<compile_context>
chip_gen: v7x
topology: tpu7x:2x2x1
jax: 0.10.0
libtpu: 0.0.40
codegen_flags: <defaults>
</compile_context>

<pallas_src>
import jax
import jax.numpy as jnp
from jax.experimental import pallas as pl
from jax.experimental.pallas import tpu as pltpu

LATENT_DIM = 512
N_CONTINUOUS = 3
LEAKY_SLOPE = 0.2


# ---------------- Pallas kernels ----------------

def _mm_bias_lrelu_kernel(a_ref, w_ref, b_ref, o_ref):
    acc = jnp.dot(a_ref[...], w_ref[...], preferred_element_type=jnp.float32)
    acc = acc + b_ref[...]                       # (1, N) bias, f32
    acc = jnp.where(acc >= 0, acc, LEAKY_SLOPE * acc)
    o_ref[...] = acc.astype(o_ref.dtype)


def _pick_tile_m(M, max_tile=512):
    """Whole-M block when small; otherwise a large multiple-of-8 tile.
    The last (ragged) block is handled by Pallas' masked stores, which is
    safe here because every output row depends only on its own input row."""
    if M <= max_tile:
        return M
    return max_tile


def matmul_bias_lrelu(a_bf16, w_bf16, bias_f32, out_dtype=jnp.bfloat16):
    """(M,K)bf16 @ (K,N)bf16 + bias (f32 acc) then LeakyReLU(0.2), M-tiled grid."""
    M, K = a_bf16.shape
    N = w_bf16.shape[1]
    tm = _pick_tile_m(M)
    grid_m = pl.cdiv(M, tm)
    return pl.pallas_call(
        _mm_bias_lrelu_kernel,
        out_shape=jax.ShapeDtypeStruct((M, N), out_dtype),
        grid=(grid_m,),
        in_specs=[pl.BlockSpec((tm, K), lambda i: (i, 0)),
                  pl.BlockSpec((K, N), lambda i: (0, 0)),
                  pl.BlockSpec((1, N), lambda i: (0, 0))],
        out_specs=pl.BlockSpec((tm, N), lambda i: (i, 0)),
        compiler_params=pltpu.CompilerParams(
            dimension_semantics=("parallel",)),
    )(a_bf16, w_bf16, bias_f32)


def _tail_kernel(h3_ref, w4_ref, b4_ref, w5_ref, b5_ref, wml_ref, bml_ref, o_ref):
    # conv4 (4x4, s2, p1 on a 3x3 map -> 1x1) as a single matmul: only the
    # 9 non-padding kernel taps survive, pre-packed into w4 (2304, 512).
    h = jnp.dot(h3_ref[...], w4_ref[...],
                preferred_element_type=jnp.float32) + b4_ref[...]
    h = jnp.where(h >= 0, h, LEAKY_SLOPE * h)
    # conv5 (1x1 conv == linear), activation kept resident in VMEM
    h = jnp.dot(h.astype(jnp.bfloat16), w5_ref[...],
                preferred_element_type=jnp.float32) + b5_ref[...]
    h = jnp.where(h >= 0, h, LEAKY_SLOPE * h)
    # fused [mean | logvar] heads -> lane-dense N = 1024 output
    o_ref[...] = jnp.dot(h.astype(jnp.bfloat16), wml_ref[...],
                         preferred_element_type=jnp.float32) + bml_ref[...]


def tail_fused(h3_bf16, packed):
    """conv4 + conv5 + mean/logvar heads in a single batch-tiled pallas_call."""
    B, K4 = h3_bf16.shape                       # (B, 2304)
    tb = _pick_tile_m(B, max_tile=256)
    grid_b = pl.cdiv(B, tb)
    N_out = 2 * LATENT_DIM
    return pl.pallas_call(
        _tail_kernel,
        out_shape=jax.ShapeDtypeStruct((B, N_out), jnp.float32),
        grid=(grid_b,),
        in_specs=[
            pl.BlockSpec((tb, K4), lambda i: (i, 0)),
            pl.BlockSpec((K4, LATENT_DIM), lambda i: (0, 0)),
            pl.BlockSpec((1, LATENT_DIM), lambda i: (0, 0)),
            pl.BlockSpec((LATENT_DIM, LATENT_DIM), lambda i: (0, 0)),
            pl.BlockSpec((1, LATENT_DIM), lambda i: (0, 0)),
            pl.BlockSpec((LATENT_DIM, N_out), lambda i: (0, 0)),
            pl.BlockSpec((1, N_out), lambda i: (0, 0)),
        ],
        out_specs=pl.BlockSpec((tb, N_out), lambda i: (i, 0)),
        compiler_params=pltpu.CompilerParams(
            dimension_semantics=("parallel",)),
    )(h3_bf16, packed['w4'], packed['b4'], packed['w5'], packed['b5'],
      packed['wml'], packed['bml'])


# ---------------- im2col glue (NHWC) ----------------

def im2col_nhwc(x, kh, kw, stride, pad):
    # TODO(synk): for large batches, move this gather into the kernel via a
    # BlockSpec index_map / manual DMA instead of materializing patches in XLA.
    B, H, W, C = x.shape
    xp = jnp.pad(x, ((0, 0), (pad, pad), (pad, pad), (0, 0)))
    Ho = (H + 2 * pad - kh) // stride + 1
    Wo = (W + 2 * pad - kw) // stride + 1
    cols = []
    for i in range(kh):
        for j in range(kw):
            cols.append(xp[:, i:i + stride * Ho:stride, j:j + stride * Wo:stride, :])
    patches = jnp.concatenate(cols, axis=-1)               # (B, Ho, Wo, kh*kw*C)
    return patches.reshape(B * Ho * Wo, kh * kw * C), Ho, Wo


# ---------------- params ----------------

def init_params(key):
    ks = jax.random.split(key, 16)
    def w(k, shape, scale=0.05):
        return scale * jax.random.normal(k, shape, jnp.float32)
    return {
        'embedding': w(ks[0], (10, 256)),
        'conv1_w': w(ks[1], (64, 1 + N_CONTINUOUS + 1, 3, 3)), 'conv1_b': w(ks[2], (64,)),
        'conv2_w': w(ks[3], (128, 64, 4, 4)),                  'conv2_b': w(ks[4], (128,)),
        'conv3_w': w(ks[5], (256, 128, 4, 4)),                 'conv3_b': w(ks[6], (256,)),
        'conv4_w': w(ks[7], (512, 256, 4, 4)),                 'conv4_b': w(ks[8], (512,)),
        'conv5_w': w(ks[9], (LATENT_DIM, 512, 1, 1)),          'conv5_b': w(ks[10], (LATENT_DIM,)),
        'mean_w': w(ks[11], (LATENT_DIM, LATENT_DIM, 1, 1)),   'mean_b': w(ks[12], (LATENT_DIM,)),
        'logvar_w': w(ks[13], (LATENT_DIM, LATENT_DIM, 1, 1)), 'logvar_b': w(ks[14], (LATENT_DIM,)),
    }


def pack_params(params):
    """One-time weight packing: (Cout,Cin,kh,kw) -> (kh*kw*Cin, Cout) bf16.
    conv1 Cout / conv2 Cin padded to 128 for lane-dense stores; conv4 reduced
    to its 9 non-padding taps (2304, 512); mean/logvar heads fused."""
    def wmat(w):
        Cout, Cin, kh, kw = w.shape
        return jnp.transpose(w, (2, 3, 1, 0)).reshape(kh * kw * Cin, Cout)

    # conv1: pad output channels 64 -> 128 (zeros) so the store is lane-dense
    w1m = jnp.pad(wmat(params['conv1_w']), ((0, 0), (0, 64)))      # (45, 128)
    b1 = jnp.pad(params['conv1_b'], (0, 64))                        # (128,)
    # conv2: pad input channels 64 -> 128 (zeros) to match conv1's padded output
    w2 = jnp.pad(params['conv2_w'], ((0, 0), (0, 64), (0, 0), (0, 0)))
    w2m = wmat(w2)                                                  # (2048, 128)
    w3m = wmat(params['conv3_w'])                                   # (2048, 256)
    # conv4: on the 3x3 conv3 output with pad=1/stride=2 only kernel taps
    # (ki,kj) in 1..3 hit real data; tap (ki,kj) multiplies input (ki-1,kj-1),
    # so conv4(x) == reshape(x,(B,2304)) @ wmat(conv4_w[:, :, 1:, 1:]).
    w4m = wmat(params['conv4_w'][:, :, 1:, 1:])                     # (2304, 512)
    w5m = wmat(params['conv5_w'])                                   # (512, 512)
    wml = jnp.concatenate([wmat(params['mean_w']),
                           wmat(params['logvar_w'])], axis=1)       # (512, 1024)
    bml = jnp.concatenate([params['mean_b'], params['logvar_b']])   # (1024,)

    bf = lambda x: x.astype(jnp.bfloat16)
    b2 = lambda b: b.reshape(1, -1).astype(jnp.float32)
    return {
        'embedding': params['embedding'].astype(jnp.float32),
        'w1': bf(w1m), 'b1': b2(b1),
        'w2': bf(w2m), 'b2': b2(params['conv2_b']),
        'w3': bf(w3m), 'b3': b2(params['conv3_b']),
        'w4': bf(w4m), 'b4': b2(params['conv4_b']),
        'w5': bf(w5m), 'b5': b2(params['conv5_b']),
        'wml': bf(wml), 'bml': b2(bml),
    }


# ---------------- model forward ----------------

def continuous_feature_map_nhwc(v, B, size=(28, 28)):
    return jnp.broadcast_to(v.reshape(B, 1, 1, 1).astype(jnp.float32),
                            (B, size[0], size[1], 1))


def vae_encoder_forward(packed, X, c):
    B = X.shape[0]
    x_nhwc = jnp.transpose(X.astype(jnp.float32), (0, 2, 3, 1))     # (B,28,28,1)

    # digit embedding: Embedding(10,256) -> (16,16) -> nearest-upsample(28,28) -> tanh
    digit_idx = jnp.argmax(c['digit'], axis=1)
    emb = packed['embedding'][digit_idx].reshape(B, 16, 16, 1)
    idx = (jnp.arange(28) * 16) // 28               # PyTorch mode='nearest' (floor)
    digit_map = jnp.tanh(emb[:, idx][:, :, idx])                    # (B,28,28,1)

    cont = {k: continuous_feature_map_nhwc(v, B)
            for k, v in c.items() if k != 'digit'}
    feats = jnp.concatenate(
        [x_nhwc, digit_map] + [cont[k] for k in sorted(cont.keys())],
        axis=-1).astype(jnp.bfloat16)                               # (B,28,28,5)

    # conv1: 3x3 s2 p1 -> (B,14,14,128) (channels 64..127 are zero padding)
    p1, ho, wo = im2col_nhwc(feats, 3, 3, 2, 1)
    h = matmul_bias_lrelu(p1, packed['w1'], packed['b1']).reshape(B, ho, wo, 128)
    # conv2: 4x4 s2 p1 -> (B,7,7,128)
    p2, ho, wo = im2col_nhwc(h, 4, 4, 2, 1)
    h = matmul_bias_lrelu(p2, packed['w2'], packed['b2']).reshape(B, ho, wo, 128)
    # conv3: 4x4 s2 p1 -> (B,3,3,256)
    p3, ho, wo = im2col_nhwc(h, 4, 4, 2, 1)
    h = matmul_bias_lrelu(p3, packed['w3'], packed['b3']).reshape(B, ho, wo, 256)

    # conv4 + conv5 + mean/logvar heads fused in one Pallas kernel.
    # conv4's im2col collapses to a contiguous reshape (see pack_params).
    h3_flat = h.reshape(B, ho * wo * 256)                           # (B, 2304) bf16
    out = tail_fused(h3_flat, packed)                               # (B, 1024) f32

    mean = out[:, :LATENT_DIM].reshape(B, LATENT_DIM, 1, 1)
    log_var = out[:, LATENT_DIM:].reshape(B, LATENT_DIM, 1, 1)
    return mean, log_var


if __name__ == "__main__":
    key = jax.random.PRNGKey(0)
    kp, kx, kd, k1, k2, k3 = jax.random.split(key, 6)
    params = init_params(kp)
    packed = pack_params(params)

    B = 2
    X = jax.random.normal(kx, (B, 1, 28, 28), jnp.float32)
    c = {
        'digit': jax.nn.one_hot(jax.random.randint(kd, (B,), 0, 10), 10, dtype=jnp.float32),
        'thickness': jax.random.normal(k1, (B,), jnp.float32),
        'intensity': jax.random.normal(k2, (B,), jnp.float32),
        'slant': jax.random.normal(k3, (B,), jnp.float32),
    }

    fwd = jax.jit(vae_encoder_forward)
    mean, log_var = fwd(packed, X, c)
    jax.block_until_ready((mean, log_var))
    assert mean.shape == (B, LATENT_DIM, 1, 1)
    assert log_var.shape == (B, LATENT_DIM, 1, 1)
    print("KERNEL_OK")
</pallas_src>

<mosaic_0001>
module attributes {stable_mosaic.version = 11 : i64} {
  func.func @_mm_bias_lrelu_kernel(%arg0: i32, %arg1: memref<392x45xbf16, #tpu.memory_space<vmem>>, %arg2: memref<45x128xbf16, #tpu.memory_space<vmem>>, %arg3: memref<1x128xf32, #tpu.memory_space<vmem>>, %arg4: memref<392x128xbf16, #tpu.memory_space<vmem>>) attributes {dimension_semantics = [#tpu.dimension_semantics<parallel>], iteration_bounds = array<i64: 1>, scalar_prefetch = 0 : i64, scratch_operands = 0 : i64, tpu.core_type = #tpu.core_type<tc>, window_params = [{transform_indices = @transform_0, window_bounds = array<i64: 392, 45>}, {pipeline_mode = #tpu.pipeline_mode<synchronous>, transform_indices = @transform_1, window_bounds = array<i64: 45, 128>}, {pipeline_mode = #tpu.pipeline_mode<synchronous>, transform_indices = @transform_2, window_bounds = array<i64: 1, 128>}, {transform_indices = @transform_3, window_bounds = array<i64: 392, 128>}]} {
    %c0 = arith.constant 0 : index
    %c0_0 = arith.constant 0 : index
    %0 = vector.load %arg1[%c0, %c0_0] : memref<392x45xbf16, #tpu.memory_space<vmem>>, vector<392x45xbf16>
    %c0_1 = arith.constant 0 : index
    %c0_2 = arith.constant 0 : index
    %1 = vector.load %arg2[%c0_1, %c0_2] : memref<45x128xbf16, #tpu.memory_space<vmem>>, vector<45x128xbf16>
    %cst = arith.constant dense<0.000000e+00> : vector<392x128xf32>
    %2 = tpu.matmul %0, %1, %cst {dimension_numbers = #tpu.dot_dimension_numbers<[1], [0], [0], [1], [0, 0, 1, 1], [], []>} : vector<392x45xbf16>, vector<45x128xbf16>, vector<392x128xf32> -> vector<392x128xf32>
    %c0_3 = arith.constant 0 : index
    %c0_4 = arith.constant 0 : index
    %3 = vector.load %arg3[%c0_3, %c0_4] : memref<1x128xf32, #tpu.memory_space<vmem>>, vector<1x128xf32>
    %4 = vector.broadcast %3 : vector<1x128xf32> to vector<392x128xf32>
    %5 = arith.addf %2, %4 : vector<392x128xf32>
    %cst_5 = arith.constant 0.000000e+00 : f32
    %6 = vector.broadcast %cst_5 : f32 to vector<392x128xf32>
    %7 = arith.cmpf oge, %5, %6 : vector<392x128xf32>
    %cst_6 = arith.constant 2.000000e-01 : f32
    %8 = vector.broadcast %cst_6 : f32 to vector<392x128xf32>
    %9 = arith.mulf %8, %5 : vector<392x128xf32>
    %10 = arith.select %7, %5, %9 : vector<392x128xi1>, vector<392x128xf32>
    %11 = arith.truncf %10 : vector<392x128xf32> to vector<392x128xbf16>
    %c0_7 = arith.constant 0 : index
    %c0_8 = arith.constant 0 : index
    %12 = vector.load %arg4[%c0_7, %c0_8] : memref<392x128xbf16, #tpu.memory_space<vmem>>, vector<392x128xbf16>
    tpu.vector_store %arg4[%c0_7, %c0_8], %11 {strides = array<i32>} : memref<392x128xbf16, #tpu.memory_space<vmem>>, vector<392x128xbf16>,
    return
  }
  func.func @transform_0(%arg0: i32) -> (i32, i32) {
    %c0_i32 = arith.constant 0 : i32
    %c0_i32_0 = arith.constant 0 : i32
    return %arg0, %c0_i32 : i32, i32
  }
  func.func @transform_1(%arg0: i32) -> (i32, i32) {
    %c0_i32 = arith.constant 0 : i32
    %c0_i32_0 = arith.constant 0 : i32
    %c0_i32_1 = arith.constant 0 : i32
    return %c0_i32, %c0_i32_0 : i32, i32
  }
  func.func @transform_2(%arg0: i32) -> (i32, i32) {
    %c0_i32 = arith.constant 0 : i32
    %c0_i32_0 = arith.constant 0 : i32
    %c0_i32_1 = arith.constant 0 : i32
    return %c0_i32, %c0_i32_0 : i32, i32
  }
  func.func @transform_3(%arg0: i32) -> (i32, i32) {
    %c0_i32 = arith.constant 0 : i32
    %c0_i32_0 = arith.constant 0 : i32
    return %arg0, %c0_i32 : i32, i32
  }
}

module attributes {stable_mosaic.version = 11 : i64} {
  func.func @_mm_bias_lrelu_kernel(%arg0: i32, %arg1: memref<98x2048xbf16, #tpu.memory_space<vmem>>, %arg2: memref<2048x128xbf16, #tpu.memory_space<vmem>>, %arg3: memref<1x128xf32, #tpu.memory_space<vmem>>, %arg4: memref<98x128xbf16, #tpu.memory_space<vmem>>) attributes {dimension_semantics = [#tpu.dimension_semantics<parallel>], iteration_bounds = array<i64: 1>, scalar_prefetch = 0 : i64, scratch_operands = 0 : i64, tpu.core_type = #tpu.core_type<tc>, window_params = [{transform_indices = @transform_0, window_bounds = array<i64: 98, 2048>}, {pipeline_mode = #tpu.pipeline_mode<synchronous>, transform_indices = @transform_1, window_bounds = array<i64: 2048, 128>}, {pipeline_mode = #tpu.pipeline_mode<synchronous>, transform_indices = @transform_2, window_bounds = array<i64: 1, 128>}, {transform_indices = @transform_3, window_bounds = array<i64: 98, 128>}]} {
    %c0 = arith.constant 0 : index
    %c0_0 = arith.constant 0 : index
    %0 = vector.load %arg1[%c0, %c0_0] : memref<98x2048xbf16, #tpu.memory_space<vmem>>, vector<98x2048xbf16>
    %c0_1 = arith.constant 0 : index
    %c0_2 = arith.constant 0 : index
    %1 = vector.load %arg2[%c0_1, %c0_2] : memref<2048x128xbf16, #tpu.memory_space<vmem>>, vector<2048x128xbf16>
    %cst = arith.constant dense<0.000000e+00> : vector<98x128xf32>
    %2 = tpu.matmul %0, %1, %cst {dimension_numbers = #tpu.dot_dimension_numbers<[1], [0], [0], [1], [0, 0, 1, 1], [], []>} : vector<98x2048xbf16>, vector<2048x128xbf16>, vector<98x128xf32> -> vector<98x128xf32>
    %c0_3 = arith.constant 0 : index
    %c0_4 = arith.constant 0 : index
    %3 = vector.load %arg3[%c0_3, %c0_4] : memref<1x128xf32, #tpu.memory_space<vmem>>, vector<1x128xf32>
    %4 = vector.broadcast %3 : vector<1x128xf32> to vector<98x128xf32>
    %5 = arith.addf %2, %4 : vector<98x128xf32>
    %cst_5 = arith.constant 0.000000e+00 : f32
    %6 = vector.broadcast %cst_5 : f32 to vector<98x128xf32>
    %7 = arith.cmpf oge, %5, %6 : vector<98x128xf32>
    %cst_6 = arith.constant 2.000000e-01 : f32
    %8 = vector.broadcast %cst_6 : f32 to vector<98x128xf32>
    %9 = arith.mulf %8, %5 : vector<98x128xf32>
    %10 = arith.select %7, %5, %9 : vector<98x128xi1>, vector<98x128xf32>
    %11 = arith.truncf %10 : vector<98x128xf32> to vector<98x128xbf16>
    %c0_7 = arith.constant 0 : index
    %c0_8 = arith.constant 0 : index
    %12 = vector.load %arg4[%c0_7, %c0_8] : memref<98x128xbf16, #tpu.memory_space<vmem>>, vector<98x128xbf16>
    tpu.vector_store %arg4[%c0_7, %c0_8], %11 {strides = array<i32>} : memref<98x128xbf16, #tpu.memory_space<vmem>>, vector<98x128xbf16>,
    return
  }
  func.func @transform_0(%arg0: i32) -> (i32, i32) {
    %c0_i32 = arith.constant 0 : i32
    %c0_i32_0 = arith.constant 0 : i32
    return %arg0, %c0_i32 : i32, i32
  }
  func.func @transform_1(%arg0: i32) -> (i32, i32) {
    %c0_i32 = arith.constant 0 : i32
    %c0_i32_0 = arith.constant 0 : i32
    %c0_i32_1 = arith.constant 0 : i32
    return %c0_i32, %c0_i32_0 : i32, i32
  }
  func.func @transform_2(%arg0: i32) -> (i32, i32) {
    %c0_i32 = arith.constant 0 : i32
    %c0_i32_0 = arith.constant 0 : i32
    %c0_i32_1 = arith.constant 0 : i32
    return %c0_i32, %c0_i32_0 : i32, i32
  }
  func.func @transform_3(%arg0: i32) -> (i32, i32) {
    %c0_i32 = arith.constant 0 : i32
    %c0_i32_0 = arith.constant 0 : i32
    return %arg0, %c0_i32 : i32, i32
  }
}

module attributes {stable_mosaic.version = 11 : i64} {
  func.func @_mm_bias_lrelu_kernel(%arg0: i32, %arg1: memref<18x2048xbf16, #tpu.memory_space<vmem>>, %arg2: memref<2048x256xbf16, #tpu.memory_space<vmem>>, %arg3: memref<1x256xf32, #tpu.memory_space<vmem>>, %arg4: memref<18x256xbf16, #tpu.memory_space<vmem>>) attributes {dimension_semantics = [#tpu.dimension_semantics<parallel>], iteration_bounds = array<i64: 1>, scalar_prefetch = 0 : i64, scratch_operands = 0 : i64, tpu.core_type = #tpu.core_type<tc>, window_params = [{transform_indices = @transform_0, window_bounds = array<i64: 18, 2048>}, {pipeline_mode = #tpu.pipeline_mode<synchronous>, transform_indices = @transform_1, window_bounds = array<i64: 2048, 256>}, {pipeline_mode = #tpu.pipeline_mode<synchronous>, transform_indices = @transform_2, window_bounds = array<i64: 1, 256>}, {transform_indices = @transform_3, window_bounds = array<i64: 18, 256>}]} {
    %c0 = arith.constant 0 : index
    %c0_0 = arith.constant 0 : index
    %0 = vector.load %arg1[%c0, %c0_0] : memref<18x2048xbf16, #tpu.memory_space<vmem>>, vector<18x2048xbf16>
    %c0_1 = arith.constant 0 : index
    %c0_2 = arith.constant 0 : index
    %1 = vector.load %arg2[%c0_1, %c0_2] : memref<2048x256xbf16, #tpu.memory_space<vmem>>, vector<2048x256xbf16>
    %cst = arith.constant dense<0.000000e+00> : vector<18x256xf32>
    %2 = tpu.matmul %0, %1, %cst {dimension_numbers = #tpu.dot_dimension_numbers<[1], [0], [0], [1], [0, 0, 1, 1], [], []>} : vector<18x2048xbf16>, vector<2048x256xbf16>, vector<18x256xf32> -> vector<18x256xf32>
    %c0_3 = arith.constant 0 : index
    %c0_4 = arith.constant 0 : index
    %3 = vector.load %arg3[%c0_3, %c0_4] : memref<1x256xf32, #tpu.memory_space<vmem>>, vector<1x256xf32>
    %4 = vector.broadcast %3 : vector<1x256xf32> to vector<18x256xf32>
    %5 = arith.addf %2, %4 : vector<18x256xf32>
    %cst_5 = arith.constant 0.000000e+00 : f32
    %6 = vector.broadcast %cst_5 : f32 to vector<18x256xf32>
    %7 = arith.cmpf oge, %5, %6 : vector<18x256xf32>
    %cst_6 = arith.constant 2.000000e-01 : f32
    %8 = vector.broadcast %cst_6 : f32 to vector<18x256xf32>
    %9 = arith.mulf %8, %5 : vector<18x256xf32>
    %10 = arith.select %7, %5, %9 : vector<18x256xi1>, vector<18x256xf32>
    %11 = arith.truncf %10 : vector<18x256xf32> to vector<18x256xbf16>
    %c0_7 = arith.constant 0 : index
    %c0_8 = arith.constant 0 : index
    %12 = vector.load %arg4[%c0_7, %c0_8] : memref<18x256xbf16, #tpu.memory_space<vmem>>, vector<18x256xbf16>
    tpu.vector_store %arg4[%c0_7, %c0_8], %11 {strides = array<i32>} : memref<18x256xbf16, #tpu.memory_space<vmem>>, vector<18x256xbf16>,
    return
  }
  func.func @transform_0(%arg0: i32) -> (i32, i32) {
    %c0_i32 = arith.constant 0 : i32
    %c0_i32_0 = arith.constant 0 : i32
    return %arg0, %c0_i32 : i32, i32
  }
  func.func @transform_1(%arg0: i32) -> (i32, i32) {
    %c0_i32 = arith.constant 0 : i32
    %c0_i32_0 = arith.constant 0 : i32
    %c0_i32_1 = arith.constant 0 : i32
    return %c0_i32, %c0_i32_0 : i32, i32
  }
  func.func @transform_2(%arg0: i32) -> (i32, i32) {
    %c0_i32 = arith.constant 0 : i32
    %c0_i32_0 = arith.constant 0 : i32
    %c0_i32_1 = arith.constant 0 : i32
    return %c0_i32, %c0_i32_0 : i32, i32
  }
  func.func @transform_3(%arg0: i32) -> (i32, i32) {
    %c0_i32 = arith.constant 0 : i32
    %c0_i32_0 = arith.constant 0 : i32
    return %arg0, %c0_i32 : i32, i32
  }
}

module attributes {stable_mosaic.version = 11 : i64} {
  func.func @_tail_kernel(%arg0: i32, %arg1: memref<2x2304xbf16, #tpu.memory_space<vmem>>, %arg2: memref<2304x512xbf16, #tpu.memory_space<vmem>>, %arg3: memref<1x512xf32, #tpu.memory_space<vmem>>, %arg4: memref<512x512xbf16, #tpu.memory_space<vmem>>, %arg5: memref<1x512xf32, #tpu.memory_space<vmem>>, %arg6: memref<512x1024xbf16, #tpu.memory_space<vmem>>, %arg7: memref<1x1024xf32, #tpu.memory_space<vmem>>, %arg8: memref<2x1024xf32, #tpu.memory_space<vmem>>) attributes {dimension_semantics = [#tpu.dimension_semantics<parallel>], iteration_bounds = array<i64: 1>, scalar_prefetch = 0 : i64, scratch_operands = 0 : i64, tpu.core_type = #tpu.core_type<tc>, window_params = [{transform_indices = @transform_0, window_bounds = array<i64: 2, 2304>}, {pipeline_mode = #tpu.pipeline_mode<synchronous>, transform_indices = @transform_1, window_bounds = array<i64: 2304, 512>}, {pipeline_mode = #tpu.pipeline_mode<synchronous>, transform_indices = @transform_2, window_bounds = array<i64: 1, 512>}, {pipeline_mode = #tpu.pipeline_mode<synchronous>, transform_indices = @transform_3, window_bounds = array<i64: 512, 512>}, {pipeline_mode = #tpu.pipeline_mode<synchronous>, transform_indices = @transform_4, window_bounds = array<i64: 1, 512>}, {pipeline_mode = #tpu.pipeline_mode<synchronous>, transform_indices = @transform_5, window_bounds = array<i64: 512, 1024>}, {pipeline_mode = #tpu.pipeline_mode<synchronous>, transform_indices = @transform_6, window_bounds = array<i64: 1, 1024>}, {transform_indices = @transform_7, window_bounds = array<i64: 2, 1024>}]} {
    %c0 = arith.constant 0 : index
    %c0_0 = arith.constant 0 : index
    %0 = vector.load %arg1[%c0, %c0_0] : memref<2x2304xbf16, #tpu.memory_space<vmem>>, vector<2x2304xbf16>
    %c0_1 = arith.constant 0 : index
    %c0_2 = arith.constant 0 : index
    %1 = vector.load %arg2[%c0_1, %c0_2] : memref<2304x512xbf16, #tpu.memory_space<vmem>>, vector<2304x512xbf16>
    %cst = arith.constant dense<0.000000e+00> : vector<2x512xf32>
    %2 = tpu.matmul %0, %1, %cst {dimension_numbers = #tpu.dot_dimension_numbers<[1], [0], [0], [1], [0, 0, 1, 1], [], []>} : vector<2x2304xbf16>, vector<2304x512xbf16>, vector<2x512xf32> -> vector<2x512xf32>
    %c0_3 = arith.constant 0 : index
    %c0_4 = arith.constant 0 : index
    %3 = vector.load %arg3[%c0_3, %c0_4] : memref<1x512xf32, #tpu.memory_space<vmem>>, vector<1x512xf32>
    %4 = vector.broadcast %3 : vector<1x512xf32> to vector<2x512xf32>
    %5 = arith.addf %2, %4 : vector<2x512xf32>
    %cst_5 = arith.constant 0.000000e+00 : f32
    %6 = vector.broadcast %cst_5 : f32 to vector<2x512xf32>
    %7 = arith.cmpf oge, %5, %6 : vector<2x512xf32>
    %cst_6 = arith.constant 2.000000e-01 : f32
    %8 = vector.broadcast %cst_6 : f32 to vector<2x512xf32>
    %9 = arith.mulf %8, %5 : vector<2x512xf32>
    %10 = arith.select %7, %5, %9 : vector<2x512xi1>, vector<2x512xf32>
    %11 = arith.truncf %10 : vector<2x512xf32> to vector<2x512xbf16>
    %c0_7 = arith.constant 0 : index
    %c0_8 = arith.constant 0 : index
    %12 = vector.load %arg4[%c0_7, %c0_8] : memref<512x512xbf16, #tpu.memory_space<vmem>>, vector<512x512xbf16>
    %cst_9 = arith.constant dense<0.000000e+00> : vector<2x512xf32>
    %13 = tpu.matmul %11, %12, %cst_9 {dimension_numbers = #tpu.dot_dimension_numbers<[1], [0], [0], [1], [0, 0, 1, 1], [], []>} : vector<2x512xbf16>, vector<512x512xbf16>, vector<2x512xf32> -> vector<2x512xf32>
    %c0_10 = arith.constant 0 : index
    %c0_11 = arith.constant 0 : index
    %14 = vector.load %arg5[%c0_10, %c0_11] : memref<1x512xf32, #tpu.memory_space<vmem>>, vector<1x512xf32>
    %15 = vector.broadcast %14 : vector<1x512xf32> to vector<2x512xf32>
    %16 = arith.addf %13, %15 : vector<2x512xf32>
    %cst_12 = arith.constant 0.000000e+00 : f32
    %17 = vector.broadcast %cst_12 : f32 to vector<2x512xf32>
    %18 = arith.cmpf oge, %16, %17 : vector<2x512xf32>
    %cst_13 = arith.constant 2.000000e-01 : f32
    %19 = vector.broadcast %cst_13 : f32 to vector<2x512xf32>
    %20 = arith.mulf %19, %16 : vector<2x512xf32>
    %21 = arith.select %18, %16, %20 : vector<2x512xi1>, vector<2x512xf32>
    %22 = arith.truncf %21 : vector<2x512xf32> to vector<2x512xbf16>
    %c0_14 = arith.constant 0 : index
    %c0_15 = arith.constant 0 : index
    %23 = vector.load %arg6[%c0_14, %c0_15] : memref<512x1024xbf16, #tpu.memory_space<vmem>>, vector<512x1024xbf16>
    %cst_16 = arith.constant dense<0.000000e+00> : vector<2x1024xf32>
    %24 = tpu.matmul %22, %23, %cst_16 {dimension_numbers = #tpu.dot_dimension_numbers<[1], [0], [0], [1], [0, 0, 1, 1], [], []>} : vector<2x512xbf16>, vector<512x1024xbf16>, vector<2x1024xf32> -> vector<2x1024xf32>
    %c0_17 = arith.constant 0 : index
    %c0_18 = arith.constant 0 : index
    %25 = vector.load %arg7[%c0_17, %c0_18] : memref<1x1024xf32, #tpu.memory_space<vmem>>, vector<1x1024xf32>
    %26 = vector.broadcast %25 : vector<1x1024xf32> to vector<2x1024xf32>
    %27 = arith.addf %24, %26 : vector<2x1024xf32>
    %c0_19 = arith.constant 0 : index
    %c0_20 = arith.constant 0 : index
    %28 = vector.load %arg8[%c0_19, %c0_20] : memref<2x1024xf32, #tpu.memory_space<vmem>>, vector<2x1024xf32>
    tpu.vector_store %arg8[%c0_19, %c0_20], %27 {strides = array<i32>} : memref<2x1024xf32, #tpu.memory_space<vmem>>, vector<2x1024xf32>,
    return
  }
  func.func @transform_0(%arg0: i32) -> (i32, i32) {
    %c0_i32 = arith.constant 0 : i32
    %c0_i32_0 = arith.constant 0 : i32
    return %arg0, %c0_i32 : i32, i32
  }
  func.func @transform_1(%arg0: i32) -> (i32, i32) {
    %c0_i32 = arith.constant 0 : i32
    %c0_i32_0 = arith.constant 0 : i32
    %c0_i32_1 = arith.constant 0 : i32
    return %c0_i32, %c0_i32_0 : i32, i32
  }
  func.func @transform_2(%arg0: i32) -> (i32, i32) {
    %c0_i32 = arith.constant 0 : i32
    %c0_i32_0 = arith.constant 0 : i32
    %c0_i32_1 = arith.constant 0 : i32
    return %c0_i32, %c0_i32_0 : i32, i32
  }
  func.func @transform_3(%arg0: i32) -> (i32, i32) {
    %c0_i32 = arith.constant 0 : i32
    %c0_i32_0 = arith.constant 0 : i32
    %c0_i32_1 = arith.constant 0 : i32
    return %c0_i32, %c0_i32_0 : i32, i32
  }
  func.func @transform_4(%arg0: i32) -> (i32, i32) {
    %c0_i32 = arith.constant 0 : i32
    %c0_i32_0 = arith.constant 0 : i32
    %c0_i32_1 = arith.constant 0 : i32
    return %c0_i32, %c0_i32_0 : i32, i32
  }
  func.func @transform_5(%arg0: i32) -> (i32, i32) {
    %c0_i32 = arith.constant 0 : i32
    %c0_i32_0 = arith.constant 0 : i32
    %c0_i32_1 = arith.constant 0 : i32
    return %c0_i32, %c0_i32_0 : i32, i32
  }
  func.func @transform_6(%arg0: i32) -> (i32, i32) {
    %c0_i32 = arith.constant 0 : i32
    %c0_i32_0 = arith.constant 0 : i32
    %c0_i32_1 = arith.constant 0 : i32
    return %c0_i32, %c0_i32_0 : i32, i32
  }
  func.func @transform_7(%arg0: i32) -> (i32, i32) {
    %c0_i32 = arith.constant 0 : i32
    %c0_i32_0 = arith.constant 0 : i32
    return %arg0, %c0_i32 : i32, i32
  }
}

</mosaic_0001>

<bundles_post_ra>
// kernel: vae_encoder_forward.4
= control target key start
LH: loop header
LB: loop body
LE: loop exit
PB: predicated region body
PF: predicated region fallthrough
CT: control target
= control target key end

     0   :  { %vm293_vm0 = vcmask 1045504   ;;  %vm294_vm1 = vcmask 1046528   ;;  %v1395_v0 = vmov 0.0   ;;  %v1396_v2 = vmov 65535   ;;  %s1712_s1 = inlined_call_operand.vmem [shape: bf16[45,128], index: 1, kind: input, shape index: {}]   ;;  %s1713_s0 = inlined_call_operand.vmem [shape: bf16[392,45], index: 0, kind: input, shape index: {}]   ;;  %s1714_s2 = inlined_call_operand.vmem [shape: f32[1,128], index: 2, kind: input, shape index: {}]   ;;  %s1715_s3 = inlined_call_operand.vmem [shape: bf16[392,128], index: 3, kind: output, shape index: {}]  }
   0x1   :  { %1252 = vmatprep.subr.bf16.mxu0 %v1395_v0  ;;  %v1367_v1 = vld [vmem:[%s1712_s1] sm:$0xff]   ;;  %1358 = vmatprep.subr.bf16.mxu1 %v1395_v0  ;;  %v295_v3 = vsel %vm293_vm0, 4294967295, %v1396_v2  ;;  %v1368_v4 = vld [vmem:[%s1712_s1 + $0x8] sm:$0xff]   ;;  %v1369_v5 = vld [vmem:[%s1712_s1 + $0x10] sm:$0x7f]   ;;  %vm1397_vm2 = vmmov 0  }
   0x2   :  { %1253 = vmatpush3.bf16.msra.mxu0 %v1367_v1  ;;  %1361 = vmatpush3.bf16.msra.mxu1 %v1367_v1  ;;  %v296_v6 = vsel %vm294_vm1, %v295_v3, 0  ;;  %v1370_v8 = vld [vmem:[%s1713_s0] sm:$0xff]   ;;  %v1371_v9 = vld [vmem:[%s1713_s0 + $0x68] sm:$0xff]   ;;  %vm217_vm3 = vcmask 367616   ;;  %v1373_v11 = vld [vmem:[%s1713_s0 + $0x70] sm:$0xff]  }
   0x3   :  { %1254 = vmatprep.subr.bf16.mxu0 %v1395_v0  ;;  %1359 = vmatprep.subr.bf16.mxu1 %v1395_v0  ;;  %v298_v7 = vand.u32 %v1369_v5, %v296_v6  ;;  %v1372_v10 = vld [vmem:[%s1713_s0 + $0x8] sm:$0xff]   ;;  %v1374_v12 = vld [vmem:[%s1713_s0 + $0x10] sm:$0xff]   ;;  %v1375_v13 = vld [vmem:[%s1713_s0 + $0x78] sm:$0xff]  }
   0x4   :  { %1258 = vmatprep.mubr.msk.bf16.mxu0 %vm1397_vm2, %v1395_v0  ;;  %1310 = vmatprep.mubr.msk.bf16.mxu1 %vm1397_vm2, %v1395_v0  ;;  %v1376_v14 = vld [vmem:[%s1713_s0 + $0x18] sm:$0xff]   ;;  %v1377_v15 = vld [vmem:[%s1713_s0 + $0x80] sm:$0xff]   ;;  %v1379_v17 = vld [vmem:[%s1713_s0 + $0x88] sm:$0xff]  }
   0x5   :  { %v1378_v16 = vld [vmem:[%s1713_s0 + $0x20] sm:$0xff]   ;;  %v1380_v18 = vld [vmem:[%s1713_s0 + $0x28] sm:$0xff]   ;;  %v1381_v19 = vld [vmem:[%s1713_s0 + $0x90] sm:$0xff]  }
   0x6   :  { %1255 = vmatpush3.bf16.msra.mxu0 %v1368_v4  ;;  %1362 = vmatpush3.bf16.msra.mxu1 %v1368_v4  ;;  %v1382_v20 = vld [vmem:[%s1713_s0 + $0x30] sm:$0xff]   ;;  %v1383_v21 = vld [vmem:[%s1713_s0 + $0x98] sm:$0xff]   ;;  %v1385_v23 = vld [vmem:[%s1713_s0 + $0xa0] sm:$0xff]  }
   0x7   :  { %1256 = vmatprep.subr.bf16.mxu0 %v1395_v0  ;;  %1360 = vmatprep.subr.bf16.mxu1 %v1395_v0  ;;  %v1384_v22 = vld [vmem:[%s1713_s0 + $0x38] sm:$0xff]   ;;  %v1386_v24 = vld [vmem:[%s1713_s0 + $0x40] sm:$0xff]   ;;  %v1387_v25 = vld [vmem:[%s1713_s0 + $0xa8] sm:$0xff]  }
   0x8   :  { %v1388_v26 = vld [vmem:[%s1713_s0 + $0x48] sm:$0xff]   ;;  %v1389_v27 = vld [vmem:[%s1713_s0 + $0xb0] sm:$0xff]   ;;  %v1391_v29 = vld [vmem:[%s1713_s0 + $0xb8] sm:$0xff]  }
   0x9   :  { %v1390_v28 = vld [vmem:[%s1713_s0 + $0x50] sm:$0xff]   ;;  %v1392_v30 = vld [vmem:[%s1713_s0 + $0x58] sm:$0xff]   ;;  %v1393_v31 = vld [vmem:[%s1713_s0 + $0xc0] ss:$0 sps:$4 sm:$0xff]  }
   0xa   :  { %1257 = vmatpush3.bf16.msra.mxu0 %v298_v7  ;;  %1363 = vmatpush3.bf16.msra.mxu1 %v298_v7  ;;  %v1394_v32 = vld [vmem:[%s1713_s0 + $0x60] sm:$0xff]  }
   0xb   :  { %v1586_v33 = vld [vmem:[%s1714_s2] ss:$0 sm:$0xff] }
   0xd   :  { %1259 = vmatmul.mubr.msk.bf16.vlgmr.msra.gmra.mrb[0].mxu0 %vm217_vm3, %v1370_v8  ;;  %1311 = vmatmul.mubr.msk.bf16.vlgmr.msra.gmra.mrb[0].mxu1 %vm217_vm3, %v1371_v9 }
   0xe   :  { %1262 = vmatprep.mubr.msk.bf16.mxu0 %vm1397_vm2, %v1395_v0  ;;  %1314 = vmatprep.mubr.msk.bf16.mxu1 %vm1397_vm2, %v1395_v0 }
  0x15   :  { %1263 = vmatmul.mubr.msk.bf16.gmra.mrb[4].mxu0 %vm217_vm3, %v1372_v10  ;;  %1315 = vmatmul.mubr.msk.bf16.gmra.mrb[4].mxu1 %vm217_vm3, %v1373_v11 }
  0x16   :  { %1266 = vmatprep.mubr.msk.bf16.mxu0 %vm1397_vm2, %v1395_v0  ;;  %1318 = vmatprep.mubr.msk.bf16.mxu1 %vm1397_vm2, %v1395_v0 }
  0x1d   :  { %1267 = vmatmul.mubr.msk.bf16.gmra.mrb[8].mxu0 %vm217_vm3, %v1374_v12  ;;  %1319 = vmatmul.mubr.msk.bf16.gmra.mrb[8].mxu1 %vm217_vm3, %v1375_v13 }
  0x1e   :  { %1270 = vmatprep.mubr.msk.bf16.mxu0 %vm1397_vm2, %v1395_v0  ;;  %1322 = vmatprep.mubr.msk.bf16.mxu1 %vm1397_vm2, %v1395_v0 }
  0x25   :  { %1271 = vmatmul.mubr.msk.bf16.gmra.mrb[12].mxu0 %vm217_vm3, %v1376_v14  ;;  %1323 = vmatmul.mubr.msk.bf16.gmra.mrb[12].mxu1 %vm217_vm3, %v1377_v15 }
  0x26   :  { %1274 = vmatprep.mubr.msk.bf16.mxu0 %vm1397_vm2, %v1395_v0  ;;  %1326 = vmatprep.mubr.msk.bf16.mxu1 %vm1397_vm2, %v1395_v0 }
  0x2d   :  { %1275 = vmatmul.mubr.msk.bf16.gmra.mrb[16].mxu0 %vm217_vm3, %v1378_v16  ;;  %1327 = vmatmul.mubr.msk.bf16.gmra.mrb[16].mxu1 %vm217_vm3, %v1379_v17 }
  0x2e   :  { %1278 = vmatprep.mubr.msk.bf16.mxu0 %vm1397_vm2, %v1395_v0  ;;  %1330 = vmatprep.mubr.msk.bf16.mxu1 %vm1397_vm2, %v1395_v0 }
  0x35   :  { %1279 = vmatmul.mubr.msk.bf16.gmra.mrb[20].mxu0 %vm217_vm3, %v1380_v18  ;;  %1331 = vmatmul.mubr.msk.bf16.gmra.mrb[20].mxu1 %vm217_vm3, %v1381_v19 }
  0x36   :  { %1282 = vmatprep.mubr.msk.bf16.mxu0 %vm1397_vm2, %v1395_v0  ;;  %1334 = vmatprep.mubr.msk.bf16.mxu1 %vm1397_vm2, %v1395_v0 }
  0x3d   :  { %1283 = vmatmul.mubr.msk.bf16.gmra.mrb[24].mxu0 %vm217_vm3, %v1382_v20  ;;  %1335 = vmatmul.mubr.msk.bf16.gmra.mrb[24].mxu1 %vm217_vm3, %v1383_v21 }
  0x3e   :  { %1286 = vmatprep.mubr.msk.bf16.mxu0 %vm1397_vm2, %v1395_v0  ;;  %1338 = vmatprep.mubr.msk.bf16.mxu1 %vm1397_vm2, %v1395_v0 }
  0x45   :  { %1287 = vmatmul.mubr.msk.bf16.gmra.mrb[28].mxu0 %vm217_vm3, %v1384_v22  ;;  %1339 = vmatmul.mubr.msk.bf16.gmra.mrb[28].mxu1 %vm217_vm3, %v1385_v23 }
  0x46   :  { %1290 = vmatprep.mubr.msk.bf16.mxu0 %vm1397_vm2, %v1395_v0  ;;  %1342 = vmatprep.mubr.msk.bf16.mxu1 %vm1397_vm2, %v1395_v0 }
  0x4d   :  { %1291 = vmatmul.mubr.msk.bf16.gmra.mrb[32].mxu0 %vm217_vm3, %v1386_v24  ;;  %1343 = vmatmul.mubr.msk.bf16.gmra.mrb[32].mxu1 %vm217_vm3, %v1387_v25 }
  0x4e   :  { %1294 = vmatprep.mubr.msk.bf16.mxu0 %vm1397_vm2, %v1395_v0  ;;  %1346 = vmatprep.mubr.msk.bf16.mxu1 %vm1397_vm2, %v1395_v0 }
  0x55   :  { %1295 = vmatmul.mubr.msk.bf16.gmra.mrb[36].mxu0 %vm217_vm3, %v1388_v26  ;;  %1347 = vmatmul.mubr.msk.bf16.gmra.mrb[36].mxu1 %vm217_vm3, %v1389_v27 }
  0x56   :  { %1298 = vmatprep.mubr.msk.bf16.mxu0 %vm1397_vm2, %v1395_v0  ;;  %1350 = vmatprep.mubr.msk.bf16.mxu1 %vm1397_vm2, %v1395_v0 }
  0x5d   :  { %1299 = vmatmul.mubr.msk.bf16.gmra.mrb[40].mxu0 %vm217_vm3, %v1390_v28  ;;  %1351 = vmatmul.mubr.msk.bf16.gmra.mrb[40].mxu1 %vm217_vm3, %v1391_v29 }
  0x5e   :  { %1302 = vmatprep.mubr.msk.bf16.mxu0 %vm1397_vm2, %v1395_v0  ;;  %1354 = vmatprep.mubr.msk.bf16.mxu1 %vm1397_vm2, %v1395_v0 }
  0x65   :  { %1303 = vmatmul.mubr.msk.bf16.gmra.mrb[44].mxu0 %vm217_vm3, %v1392_v30  ;;  %1355 = vmatmul.mubr.msk.bf16.gmra.mrb[44].mxu1 %vm217_vm3, %v1393_v31 }
  0x66   :  { %1306 = vmatprep.mubr.msk.bf16.mxu0 %vm1397_vm2, %v1395_v0 }
  0x6d   :  { %1307 = vmatmul.mubr.msk.bf16.gmra.mrb[48].mxu0 %vm217_vm3, %v1394_v32 }
  0xe0   :  { %v334_v34 = vpop.f32.mrb[0].mxu0  ;;  %v438_v35 = vpop.f32.mrb[0].mxu1 }
  0xe1   :  { %v335_v36 = vadd.f32 %v1586_v33, %v334_v34  ;;  %v1260_v37 = vpop.f32.mrb[1].mxu0  ;;  %v439_v38 = vadd.f32 %v1586_v33, %v438_v35  ;;  %v1312_v39 = vpop.f32.mrb[1].mxu1 }
  0xe2   :  { %v337_v40 = vpop.f32.mrb[2].mxu0  ;;  %v441_v41 = vpop.f32.mrb[2].mxu1 }
  0xe3   :  { %v581_v42 = vmul.f32 0.2, %v335_v36  ;;  %v338_v43 = vadd.f32 %v1586_v33, %v337_v40  ;;  %v1261_v44 = vpop.f32.mrb[3].mxu0  ;;  %vm558_vm4 = vcmp.ge.f32.partialorder %v439_v38, 0.0  ;;  %v1313_v45 = vpop.f32.mrb[3].mxu1  ;;  %vm532_vm5 = vcmp.ge.f32.partialorder %v335_v36, 0.0 }
  0xe4   :  { %v607_v46 = vmul.f32 0.2, %v439_v38  ;;  %v442_v47 = vadd.f32 %v1586_v33, %v441_v41 }
  0xe5   :  { %vm533_vm6 = vcmp.ge.f32.partialorder %v338_v43, 0.0  ;;  %v582_v48 = vmul.f32 0.2, %v338_v43  ;;  %v630_v51 = vsel %vm532_vm5, %v335_v36, %v581_v42 }
  0xe6   :  { %v656_v49 = vsel %vm558_vm4, %v439_v38, %v607_v46  ;;  %vm559_vm7 = vcmp.ge.f32.partialorder %v442_v47, 0.0  ;;  %v608_v50 = vmul.f32 0.2, %v442_v47 }
  0xe7   :  { %v631_v52 = vsel %vm533_vm6, %v338_v43, %v582_v48 }
  0xe8   :  { %v1084_v53 = vpack.c.bf16 %v631_v52, %v630_v51  ;;  %v342_v54 = vpop.f32.mrb[4].mxu0  ;;  %v657_v55 = vsel %vm559_vm7, %v442_v47, %v608_v50  ;;  %v446_v56 = vpop.f32.mrb[4].mxu1 }
  0xe9   :  { %v343_v57 = vadd.f32 %v1586_v33, %v342_v54  ;;  %v1149_v58 = vpack.c.bf16 %v657_v55, %v656_v49  ;;  %v1264_v59 = vpop.f32.mrb[5].mxu0  ;;  %v447_v60 = vadd.f32 %v1586_v33, %v446_v56  ;;  %v1316_v61 = vpop.f32.mrb[5].mxu1 }
  0xea   :  { %1085 = vst [vmem:[%s1715_s3] sm:$0xff] %v1084_v53   ;;  %v345_v62 = vpop.f32.mrb[6].mxu0  ;;  %v449_v63 = vpop.f32.mrb[6].mxu1 }
  0xeb   :  { %v583_v0 = vmul.f32 0.2, %v343_v57  ;;  %1213 = vst [vmem:[%s1715_s3 + $0x68] sm:$0xff] %v1149_v58   ;;  %v346_v1 = vadd.f32 %v1586_v33, %v345_v62  ;;  %v1265_v2 = vpop.f32.mrb[7].mxu0  ;;  %vm560_vm8 = vcmp.ge.f32.partialorder %v447_v60, 0.0  ;;  %v1317_v3 = vpop.f32.mrb[7].mxu1  ;;  %v450_v5 = vadd.f32 %v1586_v33, %v449_v63 }
  0xec   :  { %vm534_vm9 = vcmp.ge.f32.partialorder %v343_v57, 0.0  ;;  %v609_v4 = vmul.f32 0.2, %v447_v60 }
  0xed   :  { %vm535_vm10 = vcmp.ge.f32.partialorder %v346_v1, 0.0  ;;  %v584_v6 = vmul.f32 0.2, %v346_v1  ;;  %vm561_vm11 = vcmp.ge.f32.partialorder %v450_v5, 0.0  ;;  %v610_v8 = vmul.f32 0.2, %v450_v5 }
  0xee   :  { %v658_v7 = vsel %vm560_vm8, %v447_v60, %v609_v4  ;;  %v632_v9 = vsel %vm534_vm9, %v343_v57, %v583_v0 }
  0xef   :  { %v633_v10 = vsel %vm535_vm10, %v346_v1, %v584_v6  ;;  %v659_v13 = vsel %vm561_vm11, %v450_v5, %v610_v8 }
  0xf0   :  { %v1089_v11 = vpack.c.bf16 %v633_v10, %v632_v9  ;;  %v350_v12 = vpop.f32.mrb[8].mxu0  ;;  %v454_v14 = vpop.f32.mrb[8].mxu1  ;;  %v1154_v16 = vpack.c.bf16 %v659_v13, %v658_v7 }
  0xf1   :  { %v351_v15 = vadd.f32 %v1586_v33, %v350_v12  ;;  %v1268_v17 = vpop.f32.mrb[9].mxu0  ;;  %v455_v18 = vadd.f32 %v1586_v33, %v454_v14  ;;  %v1320_v19 = vpop.f32.mrb[9].mxu1 }
  0xf2   :  { %1201 = vst [vmem:[%s1715_s3 + $0x8] sm:$0xff] %v1089_v11   ;;  %v353_v20 = vpop.f32.mrb[10].mxu0  ;;  %v457_v21 = vpop.f32.mrb[10].mxu1  ;;  %1214 = vst [vmem:[%s1715_s3 + $0x70] sm:$0xff] %v1154_v16  }
  0xf3   :  { %v585_v22 = vmul.f32 0.2, %v351_v15  ;;  %v354_v23 = vadd.f32 %v1586_v33, %v353_v20  ;;  %v1269_v24 = vpop.f32.mrb[11].mxu0  ;;  %vm562_vm12 = vcmp.ge.f32.partialorder %v455_v18, 0.0  ;;  %v1321_v25 = vpop.f32.mrb[11].mxu1  ;;  %vm536_vm13 = vcmp.ge.f32.partialorder %v351_v15, 0.0 }
  0xf4   :  { %v611_v26 = vmul.f32 0.2, %v455_v18  ;;  %v458_v27 = vadd.f32 %v1586_v33, %v457_v21 }
  0xf5   :  { %vm537_vm14 = vcmp.ge.f32.partialorder %v354_v23, 0.0  ;;  %v586_v28 = vmul.f32 0.2, %v354_v23  ;;  %v634_v31 = vsel %vm536_vm13, %v351_v15, %v585_v22 }
  0xf6   :  { %v660_v29 = vsel %vm562_vm12, %v455_v18, %v611_v26  ;;  %vm563_vm15 = vcmp.ge.f32.partialorder %v458_v27, 0.0  ;;  %v612_v30 = vmul.f32 0.2, %v458_v27 }
  0xf7   :  { %v635_v32 = vsel %vm537_vm14, %v354_v23, %v586_v28 }
  0xf8   :  { %v1094_v34 = vpack.c.bf16 %v635_v32, %v634_v31  ;;  %v358_v35 = vpop.f32.mrb[12].mxu0  ;;  %v661_v36 = vsel %vm563_vm15, %v458_v27, %v612_v30  ;;  %v462_v37 = vpop.f32.mrb[12].mxu1 }
  0xf9   :  { %v359_v38 = vadd.f32 %v1586_v33, %v358_v35  ;;  %v1159_v39 = vpack.c.bf16 %v661_v36, %v660_v29  ;;  %v1272_v40 = vpop.f32.mrb[13].mxu0  ;;  %v463_v41 = vadd.f32 %v1586_v33, %v462_v37  ;;  %v1324_v42 = vpop.f32.mrb[13].mxu1 }
  0xfa   :  { %1202 = vst [vmem:[%s1715_s3 + $0x10] sm:$0xff] %v1094_v34   ;;  %v361_v43 = vpop.f32.mrb[14].mxu0  ;;  %v465_v44 = vpop.f32.mrb[14].mxu1 }
  0xfb   :  { %v587_v45 = vmul.f32 0.2, %v359_v38  ;;  %1215 = vst [vmem:[%s1715_s3 + $0x78] sm:$0xff] %v1159_v39   ;;  %v362_v46 = vadd.f32 %v1586_v33, %v361_v43  ;;  %v1273_v47 = vpop.f32.mrb[15].mxu0  ;;  %vm564_vm0 = vcmp.ge.f32.partialorder %v463_v41, 0.0  ;;  %v1325_v48 = vpop.f32.mrb[15].mxu1  ;;  %v466_v50 = vadd.f32 %v1586_v33, %v465_v44 }
  0xfc   :  { %vm538_vm1 = vcmp.ge.f32.partialorder %v359_v38, 0.0  ;;  %v613_v49 = vmul.f32 0.2, %v463_v41 }
  0xfd   :  { %vm539_vm2 = vcmp.ge.f32.partialorder %v362_v46, 0.0  ;;  %v588_v51 = vmul.f32 0.2, %v362_v46  ;;  %vm565_vm3 = vcmp.ge.f32.partialorder %v466_v50, 0.0  ;;  %v614_v53 = vmul.f32 0.2, %v466_v50 }
  0xfe   :  { %v662_v52 = vsel %vm564_vm0, %v463_v41, %v613_v49  ;;  %v636_v54 = vsel %vm538_vm1, %v359_v38, %v587_v45 }
  0xff   :  { %v637_v55 = vsel %vm539_vm2, %v362_v46, %v588_v51  ;;  %v663_v58 = vsel %vm565_vm3, %v466_v50, %v614_v53 }
 0x100   :  { %v1099_v56 = vpack.c.bf16 %v637_v55, %v636_v54  ;;  %v366_v57 = vpop.f32.mrb[16].mxu0  ;;  %v470_v59 = vpop.f32.mrb[16].mxu1  ;;  %v1164_v61 = vpack.c.bf16 %v663_v58, %v662_v52 }
 0x101   :  { %v367_v60 = vadd.f32 %v1586_v33, %v366_v57  ;;  %v1276_v62 = vpop.f32.mrb[17].mxu0  ;;  %v471_v63 = vadd.f32 %v1586_v33, %v470_v59  ;;  %v1328_v0 = vpop.f32.mrb[17].mxu1 }
 0x102   :  { %1203 = vst [vmem:[%s1715_s3 + $0x18] sm:$0xff] %v1099_v56   ;;  %v369_v1 = vpop.f32.mrb[18].mxu0  ;;  %v473_v2 = vpop.f32.mrb[18].mxu1  ;;  %1216 = vst [vmem:[%s1715_s3 + $0x80] sm:$0xff] %v1164_v61  }
 0x103   :  { %v589_v3 = vmul.f32 0.2, %v367_v60  ;;  %v370_v4 = vadd.f32 %v1586_v33, %v369_v1  ;;  %v1277_v5 = vpop.f32.mrb[19].mxu0  ;;  %vm566_vm4 = vcmp.ge.f32.partialorder %v471_v63, 0.0  ;;  %v1329_v6 = vpop.f32.mrb[19].mxu1  ;;  %vm540_vm5 = vcmp.ge.f32.partialorder %v367_v60, 0.0 }
 0x104   :  { %v615_v7 = vmul.f32 0.2, %v471_v63  ;;  %v474_v8 = vadd.f32 %v1586_v33, %v473_v2 }
 0x105   :  { %vm541_vm6 = vcmp.ge.f32.partialorder %v370_v4, 0.0  ;;  %v590_v9 = vmul.f32 0.2, %v370_v4  ;;  %v638_v12 = vsel %vm540_vm5, %v367_v60, %v589_v3 }
 0x106   :  { %v664_v10 = vsel %vm566_vm4, %v471_v63, %v615_v7  ;;  %vm567_vm7 = vcmp.ge.f32.partialorder %v474_v8, 0.0  ;;  %v616_v11 = vmul.f32 0.2, %v474_v8 }
 0x107   :  { %v639_v13 = vsel %vm541_vm6, %v370_v4, %v590_v9 }
 0x108   :  { %v1104_v14 = vpack.c.bf16 %v639_v13, %v638_v12  ;;  %v374_v15 = vpop.f32.mrb[20].mxu0  ;;  %v665_v16 = vsel %vm567_vm7, %v474_v8, %v616_v11  ;;  %v478_v17 = vpop.f32.mrb[20].mxu1 }
 0x109   :  { %v375_v18 = vadd.f32 %v1586_v33, %v374_v15  ;;  %v1169_v19 = vpack.c.bf16 %v665_v16, %v664_v10  ;;  %v1280_v20 = vpop.f32.mrb[21].mxu0  ;;  %v479_v21 = vadd.f32 %v1586_v33, %v478_v17  ;;  %v1332_v22 = vpop.f32.mrb[21].mxu1 }
 0x10a   :  { %1204 = vst [vmem:[%s1715_s3 + $0x20] sm:$0xff] %v1104_v14   ;;  %v377_v23 = vpop.f32.mrb[22].mxu0  ;;  %v481_v24 = vpop.f32.mrb[22].mxu1 }
 0x10b   :  { %v591_v25 = vmul.f32 0.2, %v375_v18  ;;  %1217 = vst [vmem:[%s1715_s3 + $0x88] sm:$0xff] %v1169_v19   ;;  %v378_v26 = vadd.f32 %v1586_v33, %v377_v23  ;;  %v1281_v27 = vpop.f32.mrb[23].mxu0  ;;  %vm568_vm8 = vcmp.ge.f32.partialorder %v479_v21, 0.0  ;;  %v1333_v28 = vpop.f32.mrb[23].mxu1  ;;  %v482_v30 = vadd.f32 %v1586_v33, %v481_v24 }
 0x10c   :  { %vm542_vm9 = vcmp.ge.f32.partialorder %v375_v18, 0.0  ;;  %v617_v29 = vmul.f32 0.2, %v479_v21 }
 0x10d   :  { %vm543_vm10 = vcmp.ge.f32.partialorder %v378_v26, 0.0  ;;  %v592_v31 = vmul.f32 0.2, %v378_v26  ;;  %vm569_vm11 = vcmp.ge.f32.partialorder %v482_v30, 0.0  ;;  %v618_v34 = vmul.f32 0.2, %v482_v30 }
 0x10e   :  { %v666_v32 = vsel %vm568_vm8, %v479_v21, %v617_v29  ;;  %v640_v35 = vsel %vm542_vm9, %v375_v18, %v591_v25 }
 0x10f   :  { %v641_v36 = vsel %vm543_vm10, %v378_v26, %v592_v31  ;;  %v667_v39 = vsel %vm569_vm11, %v482_v30, %v618_v34 }
 0x110   :  { %v1109_v37 = vpack.c.bf16 %v641_v36, %v640_v35  ;;  %v382_v38 = vpop.f32.mrb[24].mxu0  ;;  %v486_v40 = vpop.f32.mrb[24].mxu1  ;;  %v1174_v42 = vpack.c.bf16 %v667_v39, %v666_v32 }
 0x111   :  { %v383_v41 = vadd.f32 %v1586_v33, %v382_v38  ;;  %v1284_v43 = vpop.f32.mrb[25].mxu0  ;;  %v487_v44 = vadd.f32 %v1586_v33, %v486_v40  ;;  %v1336_v45 = vpop.f32.mrb[25].mxu1 }
 0x112   :  { %1205 = vst [vmem:[%s1715_s3 + $0x28] sm:$0xff] %v1109_v37   ;;  %v385_v46 = vpop.f32.mrb[26].mxu0  ;;  %v489_v47 = vpop.f32.mrb[26].mxu1  ;;  %1218 = vst [vmem:[%s1715_s3 + $0x90] sm:$0xff] %v1174_v42  }
 0x113   :  { %v593_v48 = vmul.f32 0.2, %v383_v41  ;;  %v386_v49 = vadd.f32 %v1586_v33, %v385_v46  ;;  %v1285_v50 = vpop.f32.mrb[27].mxu0  ;;  %vm570_vm12 = vcmp.ge.f32.partialorder %v487_v44, 0.0  ;;  %v1337_v51 = vpop.f32.mrb[27].mxu1  ;;  %vm544_vm13 = vcmp.ge.f32.partialorder %v383_v41, 0.0 }
 0x114   :  { %v619_v52 = vmul.f32 0.2, %v487_v44  ;;  %v490_v53 = vadd.f32 %v1586_v33, %v489_v47 }
 0x115   :  { %vm545_vm14 = vcmp.ge.f32.partialorder %v386_v49, 0.0  ;;  %v594_v54 = vmul.f32 0.2, %v386_v49  ;;  %v642_v57 = vsel %vm544_vm13, %v383_v41, %v593_v48 }
 0x116   :  { %v668_v55 = vsel %vm570_vm12, %v487_v44, %v619_v52  ;;  %vm571_vm15 = vcmp.ge.f32.partialorder %v490_v53, 0.0  ;;  %v620_v56 = vmul.f32 0.2, %v490_v53 }
 0x117   :  { %v643_v58 = vsel %vm545_vm14, %v386_v49, %v594_v54 }
 0x118   :  { %v1114_v59 = vpack.c.bf16 %v643_v58, %v642_v57  ;;  %v390_v60 = vpop.f32.mrb[28].mxu0  ;;  %v669_v61 = vsel %vm571_vm15, %v490_v53, %v620_v56  ;;  %v494_v62 = vpop.f32.mrb[28].mxu1 }
 0x119   :  { %v391_v63 = vadd.f32 %v1586_v33, %v390_v60  ;;  %v1179_v0 = vpack.c.bf16 %v669_v61, %v668_v55  ;;  %v1288_v1 = vpop.f32.mrb[29].mxu0  ;;  %v495_v2 = vadd.f32 %v1586_v33, %v494_v62  ;;  %v1340_v3 = vpop.f32.mrb[29].mxu1 }
 0x11a   :  { %1206 = vst [vmem:[%s1715_s3 + $0x30] sm:$0xff] %v1114_v59   ;;  %v393_v4 = vpop.f32.mrb[30].mxu0  ;;  %v497_v5 = vpop.f32.mrb[30].mxu1 }
 0x11b   :  { %v595_v6 = vmul.f32 0.2, %v391_v63  ;;  %1219 = vst [vmem:[%s1715_s3 + $0x98] sm:$0xff] %v1179_v0   ;;  %v394_v7 = vadd.f32 %v1586_v33, %v393_v4  ;;  %v1289_v8 = vpop.f32.mrb[31].mxu0  ;;  %vm572_vm0 = vcmp.ge.f32.partialorder %v495_v2, 0.0  ;;  %v1341_v9 = vpop.f32.mrb[31].mxu1  ;;  %v498_v11 = vadd.f32 %v1586_v33, %v497_v5 }
 0x11c   :  { %vm546_vm1 = vcmp.ge.f32.partialorder %v391_v63, 0.0  ;;  %v621_v10 = vmul.f32 0.2, %v495_v2 }
 0x11d   :  { %vm547_vm2 = vcmp.ge.f32.partialorder %v394_v7, 0.0  ;;  %v596_v12 = vmul.f32 0.2, %v394_v7  ;;  %vm573_vm3 = vcmp.ge.f32.partialorder %v498_v11, 0.0  ;;  %v622_v14 = vmul.f32 0.2, %v498_v11 }
 0x11e   :  { %v670_v13 = vsel %vm572_vm0, %v495_v2, %v621_v10  ;;  %v644_v15 = vsel %vm546_vm1, %v391_v63, %v595_v6 }
 0x11f   :  { %v645_v16 = vsel %vm547_vm2, %v394_v7, %v596_v12  ;;  %v671_v19 = vsel %vm573_vm3, %v498_v11, %v622_v14 }
 0x120   :  { %v1119_v17 = vpack.c.bf16 %v645_v16, %v644_v15  ;;  %v398_v18 = vpop.f32.mrb[32].mxu0  ;;  %v502_v20 = vpop.f32.mrb[32].mxu1  ;;  %v1184_v22 = vpack.c.bf16 %v671_v19, %v670_v13 }
 0x121   :  { %v399_v21 = vadd.f32 %v1586_v33, %v398_v18  ;;  %v1292_v23 = vpop.f32.mrb[33].mxu0  ;;  %v503_v24 = vadd.f32 %v1586_v33, %v502_v20  ;;  %v1344_v25 = vpop.f32.mrb[33].mxu1 }
 0x122   :  { %1207 = vst [vmem:[%s1715_s3 + $0x38] sm:$0xff] %v1119_v17   ;;  %v401_v26 = vpop.f32.mrb[34].mxu0  ;;  %v505_v27 = vpop.f32.mrb[34].mxu1  ;;  %1220 = vst [vmem:[%s1715_s3 + $0xa0] sm:$0xff] %v1184_v22  }
 0x123   :  { %v597_v28 = vmul.f32 0.2, %v399_v21  ;;  %v402_v29 = vadd.f32 %v1586_v33, %v401_v26  ;;  %v1293_v30 = vpop.f32.mrb[35].mxu0  ;;  %vm574_vm4 = vcmp.ge.f32.partialorder %v503_v24, 0.0  ;;  %v1345_v31 = vpop.f32.mrb[35].mxu1  ;;  %vm548_vm5 = vcmp.ge.f32.partialorder %v399_v21, 0.0 }
 0x124   :  { %v623_v32 = vmul.f32 0.2, %v503_v24  ;;  %v506_v34 = vadd.f32 %v1586_v33, %v505_v27 }
 0x125   :  { %vm549_vm6 = vcmp.ge.f32.partialorder %v402_v29, 0.0  ;;  %v598_v35 = vmul.f32 0.2, %v402_v29  ;;  %v646_v38 = vsel %vm548_vm5, %v399_v21, %v597_v28 }
 0x126   :  { %v672_v36 = vsel %vm574_vm4, %v503_v24, %v623_v32  ;;  %vm575_vm7 = vcmp.ge.f32.partialorder %v506_v34, 0.0  ;;  %v624_v37 = vmul.f32 0.2, %v506_v34 }
 0x127   :  { %v647_v39 = vsel %vm549_vm6, %v402_v29, %v598_v35 }
 0x128   :  { %v1124_v40 = vpack.c.bf16 %v647_v39, %v646_v38  ;;  %v406_v41 = vpop.f32.mrb[36].mxu0  ;;  %v673_v42 = vsel %vm575_vm7, %v506_v34, %v624_v37  ;;  %v510_v43 = vpop.f32.mrb[36].mxu1 }
 0x129   :  { %v407_v44 = vadd.f32 %v1586_v33, %v406_v41  ;;  %v1189_v45 = vpack.c.bf16 %v673_v42, %v672_v36  ;;  %v1296_v46 = vpop.f32.mrb[37].mxu0  ;;  %v511_v47 = vadd.f32 %v1586_v33, %v510_v43  ;;  %v1348_v48 = vpop.f32.mrb[37].mxu1 }
 0x12a   :  { %1208 = vst [vmem:[%s1715_s3 + $0x40] sm:$0xff] %v1124_v40   ;;  %v409_v49 = vpop.f32.mrb[38].mxu0  ;;  %v513_v50 = vpop.f32.mrb[38].mxu1 }
 0x12b   :  { %v599_v51 = vmul.f32 0.2, %v407_v44  ;;  %1221 = vst [vmem:[%s1715_s3 + $0xa8] sm:$0xff] %v1189_v45   ;;  %v410_v52 = vadd.f32 %v1586_v33, %v409_v49  ;;  %v1297_v53 = vpop.f32.mrb[39].mxu0  ;;  %vm576_vm8 = vcmp.ge.f32.partialorder %v511_v47, 0.0  ;;  %v1349_v54 = vpop.f32.mrb[39].mxu1  ;;  %v514_v56 = vadd.f32 %v1586_v33, %v513_v50 }
 0x12c   :  { %vm550_vm9 = vcmp.ge.f32.partialorder %v407_v44, 0.0  ;;  %v625_v55 = vmul.f32 0.2, %v511_v47 }
 0x12d   :  { %vm551_vm10 = vcmp.ge.f32.partialorder %v410_v52, 0.0  ;;  %v600_v57 = vmul.f32 0.2, %v410_v52  ;;  %vm577_vm11 = vcmp.ge.f32.partialorder %v514_v56, 0.0  ;;  %v626_v59 = vmul.f32 0.2, %v514_v56 }
 0x12e   :  { %v674_v58 = vsel %vm576_vm8, %v511_v47, %v625_v55  ;;  %v648_v60 = vsel %vm550_vm9, %v407_v44, %v599_v51 }
 0x12f   :  { %v649_v61 = vsel %vm551_vm10, %v410_v52, %v600_v57  ;;  %v675_v0 = vsel %vm577_vm11, %v514_v56, %v626_v59 }
 0x130   :  { %v1129_v62 = vpack.c.bf16 %v649_v61, %v648_v60  ;;  %v414_v63 = vpop.f32.mrb[40].mxu0  ;;  %v518_v1 = vpop.f32.mrb[40].mxu1  ;;  %v1194_v3 = vpack.c.bf16 %v675_v0, %v674_v58 }
 0x131   :  { %v415_v2 = vadd.f32 %v1586_v33, %v414_v63  ;;  %v1300_v4 = vpop.f32.mrb[41].mxu0  ;;  %v519_v5 = vadd.f32 %v1586_v33, %v518_v1  ;;  %v1352_v6 = vpop.f32.mrb[41].mxu1 }
 0x132   :  { %1209 = vst [vmem:[%s1715_s3 + $0x48] sm:$0xff] %v1129_v62   ;;  %v417_v7 = vpop.f32.mrb[42].mxu0  ;;  %v521_v8 = vpop.f32.mrb[42].mxu1  ;;  %1222 = vst [vmem:[%s1715_s3 + $0xb0] sm:$0xff] %v1194_v3  }
 0x133   :  { %v601_v9 = vmul.f32 0.2, %v415_v2  ;;  %v418_v10 = vadd.f32 %v1586_v33, %v417_v7  ;;  %v1301_v11 = vpop.f32.mrb[43].mxu0  ;;  %vm578_vm12 = vcmp.ge.f32.partialorder %v519_v5, 0.0  ;;  %v1353_v12 = vpop.f32.mrb[43].mxu1  ;;  %vm552_vm13 = vcmp.ge.f32.partialorder %v415_v2, 0.0 }
 0x134   :  { %v627_v13 = vmul.f32 0.2, %v519_v5  ;;  %v522_v14 = vadd.f32 %v1586_v33, %v521_v8 }
 0x135   :  { %vm553_vm14 = vcmp.ge.f32.partialorder %v418_v10, 0.0  ;;  %v602_v15 = vmul.f32 0.2, %v418_v10  ;;  %v650_v18 = vsel %vm552_vm13, %v415_v2, %v601_v9 }
 0x136   :  { %v676_v16 = vsel %vm578_vm12, %v519_v5, %v627_v13  ;;  %vm579_vm15 = vcmp.ge.f32.partialorder %v522_v14, 0.0  ;;  %v628_v17 = vmul.f32 0.2, %v522_v14 }
 0x137   :  { %v651_v19 = vsel %vm553_vm14, %v418_v10, %v602_v15 }
 0x138   :  { %v1134_v20 = vpack.c.bf16 %v651_v19, %v650_v18  ;;  %v422_v21 = vpop.f32.mrb[44].mxu0  ;;  %v677_v22 = vsel %vm579_vm15, %v522_v14, %v628_v17  ;;  %v526_v23 = vpop.f32.mrb[44].mxu1 }
 0x139   :  { %v423_v24 = vadd.f32 %v1586_v33, %v422_v21  ;;  %v1199_v25 = vpack.c.bf16 %v677_v22, %v676_v16  ;;  %v1304_v26 = vpop.f32.mrb[45].mxu0  ;;  %v527_v27 = vadd.f32 %v1586_v33, %v526_v23  ;;  %v1356_v28 = vpop.f32.mrb[45].mxu1 }
 0x13a   :  { %1210 = vst [vmem:[%s1715_s3 + $0x50] sm:$0xff] %v1134_v20   ;;  %v425_v29 = vpop.f32.mrb[46].mxu0  ;;  %v529_v30 = vpop.f32.mrb[46].mxu1 }
 0x13b   :  { %v603_v31 = vmul.f32 0.2, %v423_v24  ;;  %1223 = vst [vmem:[%s1715_s3 + $0xb8] sm:$0xff] %v1199_v25   ;;  %v426_v32 = vadd.f32 %v1586_v33, %v425_v29  ;;  %v1305_v34 = vpop.f32.mrb[47].mxu0  ;;  %vm580_vm0 = vcmp.ge.f32.partialorder %v527_v27, 0.0  ;;  %v1357_v35 = vpop.f32.mrb[47].mxu1 }
 0x13c   :  { %vm554_vm1 = vcmp.ge.f32.partialorder %v423_v24, 0.0  ;;  %v629_v36 = vmul.f32 0.2, %v527_v27 }
 0x13d   :  { %vm555_vm2 = vcmp.ge.f32.partialorder %v426_v32, 0.0  ;;  %v604_v37 = vmul.f32 0.2, %v426_v32  ;;  %v652_v39 = vsel %vm554_vm1, %v423_v24, %v603_v31 }
 0x13e   :  { %v678_v38 = vsel %vm580_vm0, %v527_v27, %v629_v36 }
 0x13f   :  { %v653_v40 = vsel %vm555_vm2, %v426_v32, %v604_v37  ;;  %v1080_v41 = vpack.c.bf16 %v678_v38, %v678_v38 }
 0x140   :  { %v1139_v42 = vpack.c.bf16 %v653_v40, %v652_v39  ;;  %v430_v43 = vpop.f32.mrb[48].mxu0 }
 0x141   :  { %924 = vst [vmem:[%s1715_s3 + $0xc0] sm:$0xf] %v1080_v41  ;;  %v431_v44 = vadd.f32 %v1586_v33, %v430_v43  ;;  %v1308_v45 = vpop.f32.mrb[49].mxu0 }
 0x142   :  { %1211 = vst [vmem:[%s1715_s3 + $0x58] sm:$0xff] %v1139_v42   ;;  %v433_v46 = vpop.f32.mrb[50].mxu0 }
 0x143   :  { %v605_v47 = vmul.f32 0.2, %v431_v44  ;;  %v434_v48 = vadd.f32 %v1586_v33, %v433_v46  ;;  %v1309_v49 = vpop.f32.mrb[51].mxu0  ;;  %vm556_vm3 = vcmp.ge.f32.partialorder %v431_v44, 0.0 }
 0x145   :  { %vm557_vm4 = vcmp.ge.f32.partialorder %v434_v48, 0.0  ;;  %v606_v50 = vmul.f32 0.2, %v434_v48  ;;  %v654_v51 = vsel %vm556_vm3, %v431_v44, %v605_v47 }
 0x147   :  { %v655_v52 = vsel %vm557_vm4, %v434_v48, %v606_v50 }
 0x148   :  { %v1144_v53 = vpack.c.bf16 %v655_v52, %v654_v51 }
 0x14a   :  { %1212 = vst [vmem:[%s1715_s3 + $0x60] sm:$0xff] %v1144_v53  }

// kernel: vae_encoder_forward.5
= control target key start
LH: loop header
LB: loop body
LE: loop exit
PB: predicated region body
PF: predicated region fallthrough
CT: control target
= control target key end

     0   :  { %s4281_s1 = inlined_call_operand.vmem [shape: bf16[2048,128], index: 1, kind: input, shape index: {}]   ;;  %s4282_s0 = inlined_call_operand.vmem [shape: bf16[98,2048], index: 0, kind: input, shape index: {}]   ;;  %s4283_s2 = inlined_call_operand.vmem [shape: f32[1,128], index: 2, kind: input, shape index: {}]   ;;  %s4284_s3 = inlined_call_operand.vmem [shape: bf16[98,128], index: 3, kind: output, shape index: {}]  }
   0x1   :  { %v3265_v0 = vld [vmem:[%s4281_s1 + $0x40] sm:$0xff]   ;;  %v3269_v4 = vld [vmem:[%s4281_s1 + $0x48] sm:$0xff]   ;;  %v3273_v8 = vld [vmem:[%s4281_s1 + $0x50] sm:$0xff]  }
   0x2   :  { %v3266_v1 = vld [vmem:[%s4281_s1 + $0xc0] sm:$0xff]   ;;  %2801 = vmatprep.subr.bf16.mxu0 %v3265_v0  ;;  %v3270_v5 = vld [vmem:[%s4281_s1 + $0xc8] sm:$0xff]   ;;  %v3274_v9 = vld [vmem:[%s4281_s1 + $0xd0] sm:$0xff]  }
   0x3   :  { %v3267_v2 = vld [vmem:[%s4281_s1] sm:$0xff]   ;;  %2859 = vmatprep.subr.bf16.mxu1 %v3266_v1  ;;  %v3271_v6 = vld [vmem:[%s4281_s1 + $0x8] sm:$0xff]   ;;  %v3275_v10 = vld [vmem:[%s4281_s1 + $0x10] sm:$0xff]  }
   0x4   :  { %v3268_v3 = vld [vmem:[%s4281_s1 + $0x80] sm:$0xff]   ;;  %2802 = vmatpush3.bf16.msra.mxu0 %v3267_v2  ;;  %v3272_v7 = vld [vmem:[%s4281_s1 + $0x88] sm:$0xff]   ;;  %v3276_v11 = vld [vmem:[%s4281_s1 + $0x90] sm:$0xff]  }
   0x5   :  { %2860 = vmatpush3.bf16.msra.mxu1 %v3268_v3  ;;  %2803 = vmatprep.subr.bf16.mxu0 %v3269_v4  ;;  %v3277_v12 = vld [vmem:[%s4281_s1 + $0x58] sm:$0xff]   ;;  %v3281_v16 = vld [vmem:[%s4281_s1 + $0x60] sm:$0xff]   ;;  %v3285_v20 = vld [vmem:[%s4281_s1 + $0x68] sm:$0xff]  }
   0x6   :  { %2861 = vmatprep.subr.bf16.mxu1 %v3270_v5  ;;  %v3278_v13 = vld [vmem:[%s4281_s1 + $0xd8] sm:$0xff]   ;;  %v3282_v17 = vld [vmem:[%s4281_s1 + $0xe0] sm:$0xff]   ;;  %v3286_v21 = vld [vmem:[%s4281_s1 + $0xe8] sm:$0xff]  }
   0x7   :  { %v3279_v14 = vld [vmem:[%s4281_s1 + $0x18] sm:$0xff]   ;;  %v3283_v18 = vld [vmem:[%s4281_s1 + $0x20] sm:$0xff]   ;;  %v3287_v22 = vld [vmem:[%s4281_s1 + $0x28] sm:$0xff]  }
   0x8   :  { %2804 = vmatpush3.bf16.msra.mxu0 %v3271_v6  ;;  %v3280_v15 = vld [vmem:[%s4281_s1 + $0x98] sm:$0xff]   ;;  %v3284_v19 = vld [vmem:[%s4281_s1 + $0xa0] sm:$0xff]   ;;  %v3288_v23 = vld [vmem:[%s4281_s1 + $0xa8] sm:$0xff]  }
   0x9   :  { %2862 = vmatpush3.bf16.msra.mxu1 %v3272_v7  ;;  %2805 = vmatprep.subr.bf16.mxu0 %v3273_v8  ;;  %v3289_v24 = vld [vmem:[%s4281_s1 + $0x70] sm:$0xff]   ;;  %v3293_v28 = vld [vmem:[%s4281_s1 + $0x78] sm:$0xff]   ;;  %v15_v32 = vld [vmem:[%s4282_s0] sm:$0xff] }
   0xa   :  { %2863 = vmatprep.subr.bf16.mxu1 %v3274_v9  ;;  %v3290_v25 = vld [vmem:[%s4281_s1 + $0xf0] sm:$0xff]   ;;  %v3294_v29 = vld [vmem:[%s4281_s1 + $0xf8] sm:$0xff]   ;;  %v23_v33 = vld [vmem:[%s4282_s0 + $0x40] sm:$0xff] }
   0xb   :  { %v3291_v26 = vld [vmem:[%s4281_s1 + $0x30] sm:$0xff]   ;;  %v3295_v30 = vld [vmem:[%s4281_s1 + $0x38] sm:$0xff]   ;;  %v16_v34 = vld [vmem:[%s4282_s0 + $0x8] sm:$0xff]  ;;  %v2500_v35 = vcombine.low %v15_v32, %v23_v33  ;;  %v2501_v36 = vcombine.high %v15_v32, %v23_v33 }
   0xc   :  { %2806 = vmatpush3.bf16.msra.mxu0 %v3275_v10  ;;  %v3292_v27 = vld [vmem:[%s4281_s1 + $0xb0] sm:$0xff]   ;;  %v3296_v31 = vld [vmem:[%s4281_s1 + $0xb8] sm:$0xff]   ;;  %v24_v37 = vld [vmem:[%s4282_s0 + $0x48] sm:$0xff] }
   0xd   :  { %2864 = vmatpush3.bf16.msra.mxu1 %v3276_v11  ;;  %2807 = vmatprep.subr.bf16.mxu0 %v3277_v12  ;;  %v2502_v38 = vcombine.low %v16_v34, %v24_v37  ;;  %v2503_v39 = vcombine.high %v16_v34, %v24_v37  ;;  %v3297_v40 = vld [vmem:[%s4281_s1 + $0x140] sm:$0xff]   ;;  %v32_v47 = vld [vmem:[%s4282_s0 + $0x88] sm:$0xff]  ;;  %v3305_v56 = vld [vmem:[%s4281_s1 + $0x150] sm:$0xff]  }
   0xe   :  { %2865 = vmatprep.subr.bf16.mxu1 %v3278_v13  ;;  %1718 = vmatprep.mubr.bf16.mxu0 %v2501_v36  ;;  %v3298_v41 = vld [vmem:[%s4281_s1 + $0x100] sm:$0xff]   ;;  %v40_v48 = vld [vmem:[%s4282_s0 + $0xc8] sm:$0xff]  ;;  %v3306_v63 = vld [vmem:[%s4281_s1 + $0x110] sm:$0xff]  }
   0xf   :  { %1806 = vmatprep.mubr.bf16.mxu1 %v2503_v39  ;;  %v3299_v42 = vld [vmem:[%s4281_s1 + $0x1c0] sm:$0xff]   ;;  %v2519_v49 = vcombine.high %v32_v47, %v40_v48  ;;  %v3301_v50 = vld [vmem:[%s4281_s1 + $0x148] sm:$0xff]   ;;  %v2518_v53 = vcombine.low %v32_v47, %v40_v48  ;;  %v3307_v0 = vld [vmem:[%s4281_s1 + $0x1d0] sm:$0xff]  }
  0x10   :  { %2808 = vmatpush3.bf16.msra.mxu0 %v3279_v14  ;;  %v3300_v43 = vld [vmem:[%s4281_s1 + $0x180] sm:$0xff]   ;;  %v3302_v52 = vld [vmem:[%s4281_s1 + $0x108] sm:$0xff]   ;;  %v3308_v1 = vld [vmem:[%s4281_s1 + $0x190] sm:$0xff]  }
  0x11   :  { %2866 = vmatpush3.bf16.msra.mxu1 %v3280_v15  ;;  %2809 = vmatprep.subr.bf16.mxu0 %v3281_v16  ;;  %v31_v44 = vld [vmem:[%s4282_s0 + $0x80] sm:$0xff]  ;;  %v3303_v54 = vld [vmem:[%s4281_s1 + $0x1c8] sm:$0xff]   ;;  %v3309_v3 = vld [vmem:[%s4281_s1 + $0x158] sm:$0xff]  }
  0x12   :  { %2867 = vmatprep.subr.bf16.mxu1 %v3282_v17  ;;  %v39_v45 = vld [vmem:[%s4282_s0 + $0xc0] sm:$0xff]  ;;  %v3304_v55 = vld [vmem:[%s4281_s1 + $0x188] sm:$0xff]   ;;  %v3310_v5 = vld [vmem:[%s4281_s1 + $0x118] sm:$0xff]  }
  0x13   :  { %v2517_v46 = vcombine.high %v31_v44, %v39_v45  ;;  %v2516_v51 = vcombine.low %v31_v44, %v39_v45  ;;  %v47_v57 = vld [vmem:[%s4282_s0 + $0x100] sm:$0xff]  ;;  %v48_v59 = vld [vmem:[%s4282_s0 + $0x108] sm:$0xff]  ;;  %v3311_v12 = vld [vmem:[%s4281_s1 + $0x1d8] sm:$0xff]  }
  0x14   :  { %2810 = vmatpush3.bf16.msra.mxu0 %v3283_v18  ;;  %v55_v58 = vld [vmem:[%s4282_s0 + $0x140] sm:$0xff]  ;;  %v56_v60 = vld [vmem:[%s4282_s0 + $0x148] sm:$0xff]  ;;  %v3312_v13 = vld [vmem:[%s4281_s1 + $0x198] sm:$0xff]  }
  0x15   :  { %2868 = vmatpush3.bf16.msra.mxu1 %v3284_v19  ;;  %2811 = vmatprep.subr.bf16.mxu0 %v3285_v20  ;;  %v2533_v61 = vcombine.high %v47_v57, %v55_v58  ;;  %v2535_v62 = vcombine.high %v48_v59, %v56_v60  ;;  %v2532_v2 = vcombine.low %v47_v57, %v55_v58  ;;  %v63_v6 = vld [vmem:[%s4282_s0 + $0x180] sm:$0xff]  ;;  %v64_v8 = vld [vmem:[%s4282_s0 + $0x188] sm:$0xff]  ;;  %v3329_v44 = vld [vmem:[%s4281_s1 + $0x178] sm:$0xff]  }
  0x16   :  { %2869 = vmatprep.subr.bf16.mxu1 %v3286_v21  ;;  %v2534_v4 = vcombine.low %v48_v59, %v56_v60  ;;  %v71_v7 = vld [vmem:[%s4282_s0 + $0x1c0] sm:$0xff]  ;;  %v72_v10 = vld [vmem:[%s4282_s0 + $0x1c8] sm:$0xff]  ;;  %v3330_v45 = vld [vmem:[%s4281_s1 + $0x138] sm:$0xff]  }
  0x17   :  { %v2549_v9 = vcombine.high %v63_v6, %v71_v7  ;;  %v2551_v11 = vcombine.high %v64_v8, %v72_v10  ;;  %v3313_v14 = vld [vmem:[%s4281_s1 + $0x160] sm:$0xff]   ;;  %v2548_v16 = vcombine.low %v63_v6, %v71_v7  ;;  %v2550_v20 = vcombine.low %v64_v8, %v72_v10  ;;  %v96_v32 = vld [vmem:[%s4282_s0 + $0x288] sm:$0xff]  ;;  %v3332_v48 = vld [vmem:[%s4281_s1 + $0x1b8] sm:$0xff]  }
  0x18   :  { %2812 = vmatpush3.bf16.msra.mxu0 %v3287_v22  ;;  %v3314_v15 = vld [vmem:[%s4281_s1 + $0x120] sm:$0xff]   ;;  %v80_v22 = vld [vmem:[%s4282_s0 + $0x208] sm:$0xff]  ;;  %v26_v57 = vld [vmem:[%s4282_s0 + $0x58] sm:$0xff] }
  0x19   :  { %2870 = vmatpush3.bf16.msra.mxu1 %v3288_v23  ;;  %2813 = vmatprep.subr.bf16.mxu0 %v3289_v24  ;;  %v3315_v17 = vld [vmem:[%s4281_s1 + $0x1e0] sm:$0xff]   ;;  %v88_v23 = vld [vmem:[%s4282_s0 + $0x248] sm:$0xff] }
  0x1a   :  { %2871 = vmatprep.subr.bf16.mxu1 %v3290_v25  ;;  %v79_v18 = vld [vmem:[%s4282_s0 + $0x200] sm:$0xff]  ;;  %v2567_v24 = vcombine.high %v80_v22, %v88_v23  ;;  %v104_v33 = vld [vmem:[%s4282_s0 + $0x2c8] sm:$0xff]  ;;  %v2566_v36 = vcombine.low %v80_v22, %v88_v23  ;;  %v3344_v23 = vld [vmem:[%s4281_s1 + $0x290] sm:$0xff]  }
  0x1b   :  { %v87_v19 = vld [vmem:[%s4282_s0 + $0x240] sm:$0xff]  ;;  %v2583_v39 = vcombine.high %v96_v32, %v104_v33  ;;  %v3337_v8 = vld [vmem:[%s4281_s1 + $0x248] sm:$0xff]  }
  0x1c   :  { %2814 = vmatpush3.bf16.msra.mxu0 %v3291_v26  ;;  %v2565_v21 = vcombine.high %v79_v18, %v87_v19  ;;  %v3316_v25 = vld [vmem:[%s4281_s1 + $0x1a0] sm:$0xff]   ;;  %v3317_v26 = vld [vmem:[%s4281_s1 + $0x168] sm:$0xff]   ;;  %v2564_v34 = vcombine.low %v79_v18, %v87_v19 }
  0x1d   :  { %2872 = vmatpush3.bf16.msra.mxu1 %v3292_v27  ;;  %2815 = vmatprep.subr.bf16.mxu0 %v3293_v28  ;;  %v3318_v27 = vld [vmem:[%s4281_s1 + $0x128] sm:$0xff]  }
  0x1e   :  { %2873 = vmatprep.subr.bf16.mxu1 %v3294_v29  ;;  %v3319_v28 = vld [vmem:[%s4281_s1 + $0x1e8] sm:$0xff]  }
  0x1f   :  { %v3320_v29 = vld [vmem:[%s4281_s1 + $0x1a8] sm:$0xff]  }
  0x20   :  { %2816 = vmatpush3.bf16.msra.mxu0 %v3295_v30  ;;  %v95_v30 = vld [vmem:[%s4282_s0 + $0x280] sm:$0xff]  ;;  %v3339_v10 = vld [vmem:[%s4281_s1 + $0x2c8] sm:$0xff]  }
  0x21   :  { %2874 = vmatpush3.bf16.msra.mxu1 %v3296_v31  ;;  %2917 = vmatprep.subr.bf16.mxu0 %v3297_v40  ;;  %v103_v31 = vld [vmem:[%s4282_s0 + $0x2c0] sm:$0xff]  ;;  %v3323_v40 = vld [vmem:[%s4281_s1 + $0x1f0] sm:$0xff]  }
  0x22   :  { %2975 = vmatprep.subr.bf16.mxu1 %v3299_v42  ;;  %v2581_v37 = vcombine.high %v95_v30, %v103_v31  ;;  %v111_v42 = vld [vmem:[%s4282_s0 + $0x300] sm:$0x11]  ;;  %v2580_v47 = vcombine.low %v95_v30, %v103_v31  ;;  %v74_v30 = vld [vmem:[%s4282_s0 + $0x1d8] sm:$0xff] }
  0x23   :  { %1719 = vmatmul.mubr.bf16.vlgmr.msra.gmra.mrb[0].mxu0 %v2500_v35  ;;  %v3321_v35 = vld [vmem:[%s4281_s1 + $0x170] sm:$0xff]   ;;  %v2596_v58 = vcombine.low %v111_v42, %v111_v42  ;;  %v3348_v31 = vld [vmem:[%s4281_s1 + $0x298] sm:$0xff]  }
  0x24   :  { %1807 = vmatmul.mubr.bf16.vlgmr.msra.gmra.mrb[0].mxu1 %v2502_v38  ;;  %2918 = vmatpush3.bf16.msra.mxu0 %v3298_v41  ;;  %v3322_v38 = vld [vmem:[%s4281_s1 + $0x130] sm:$0xff]  }
  0x25   :  { %2976 = vmatpush3.bf16.msra.mxu1 %v3300_v43  ;;  %1726 = vmatprep.mubr.bf16.mxu0 %v2517_v46  ;;  %v3324_v41 = vld [vmem:[%s4281_s1 + $0x1b0] sm:$0xff]   ;;  %v112_v43 = vld [vmem:[%s4282_s0 + $0x308] sm:$0x11]  ;;  %v3331_v46 = vld [vmem:[%s4281_s1 + $0x1f8] sm:$0xff]  }
  0x26   :  { %1814 = vmatprep.mubr.bf16.mxu1 %v2519_v49  ;;  %2919 = vmatprep.subr.bf16.mxu0 %v3301_v50  ;;  %v2582_v49 = vcombine.low %v96_v32, %v104_v33  ;;  %v2597_v50 = vcombine.high %v111_v42, %v111_v42  ;;  %v2598_v59 = vcombine.low %v112_v43, %v112_v43  ;;  %v3349_v32 = vld [vmem:[%s4281_s1 + $0x260] sm:$0xff]   ;;  %v89_v42 = vld [vmem:[%s4282_s0 + $0x250] sm:$0xff] }
  0x27   :  { %2977 = vmatprep.subr.bf16.mxu1 %v3303_v54  ;;  %v17_v54 = vld [vmem:[%s4282_s0 + $0x10] sm:$0xff] }
  0x28   :  { %2920 = vmatpush3.bf16.msra.mxu0 %v3302_v52  ;;  %v3333_v52 = vld [vmem:[%s4281_s1 + $0x240] sm:$0xff]  }
  0x29   :  { %2978 = vmatpush3.bf16.msra.mxu1 %v3304_v55  ;;  %2921 = vmatprep.subr.bf16.mxu0 %v3305_v56  ;;  %v25_v55 = vld [vmem:[%s4282_s0 + $0x50] sm:$0xff]  ;;  %v18_v56 = vld [vmem:[%s4282_s0 + $0x18] sm:$0xff] }
  0x2a   :  { %2979 = vmatprep.subr.bf16.mxu1 %v3307_v0  ;;  %v2505_v60 = vcombine.high %v17_v54, %v25_v55  ;;  %v34_v0 = vld [vmem:[%s4282_s0 + $0x98] sm:$0xff] }
  0x2b   :  { %1727 = vmatmul.mubr.bf16.gmra.mrb[4].mxu0 %v2516_v51  ;;  %v2599_v51 = vcombine.high %v112_v43, %v112_v43  ;;  %v3355_v43 = vld [vmem:[%s4281_s1 + $0x2e8] sm:$0xff]  }
  0x2c   :  { %1815 = vmatmul.mubr.bf16.gmra.mrb[4].mxu1 %v2518_v53  ;;  %1734 = vmatprep.mubr.bf16.mxu0 %v2533_v61  ;;  %v3335_v53 = vld [vmem:[%s4281_s1 + $0x2c0] sm:$0xff]   ;;  %v2507_v61 = vcombine.high %v18_v56, %v26_v57 }
  0x2d   :  { %1822 = vmatprep.mubr.bf16.mxu1 %v2535_v62  ;;  %2922 = vmatpush3.bf16.msra.mxu0 %v3306_v63  ;;  %v33_v62 = vld [vmem:[%s4282_s0 + $0x90] sm:$0xff] }
  0x2e   :  { %2980 = vmatpush3.bf16.msra.mxu1 %v3308_v1  ;;  %2923 = vmatprep.subr.bf16.mxu0 %v3309_v3  ;;  %v41_v63 = vld [vmem:[%s4282_s0 + $0xd0] sm:$0xff]  ;;  %v2504_v1 = vcombine.low %v17_v54, %v25_v55  ;;  %v2506_v3 = vcombine.low %v18_v56, %v26_v57  ;;  %v3365_v56 = vld [vmem:[%s4281_s1 + $0x278] sm:$0xff]  }
  0x2f   :  { %2981 = vmatprep.subr.bf16.mxu1 %v3311_v12  ;;  %v2521_v6 = vcombine.high %v33_v62, %v41_v63  ;;  %v3341_v12 = vld [vmem:[%s4281_s1 + $0x250] sm:$0xff]   ;;  %v2520_v18 = vcombine.low %v33_v62, %v41_v63  ;;  %v106_v62 = vld [vmem:[%s4282_s0 + $0x2d8] sm:$0xff] }
  0x30   :  { %v3358_v54 = vld [vmem:[%s4281_s1 + $0x230] sm:$0xff]   ;;  %v3368_v63 = vld [vmem:[%s4281_s1 + $0x2b8] sm:$0xff]  }
  0x31   :  { %2924 = vmatpush3.bf16.msra.mxu0 %v3310_v5  ;;  %v3336_v5 = vld [vmem:[%s4281_s1 + $0x280] sm:$0xff]   ;;  %v3360_v55 = vld [vmem:[%s4281_s1 + $0x2b0] sm:$0xff]  }
  0x32   :  { %2982 = vmatpush3.bf16.msra.mxu1 %v3312_v13  ;;  %2925 = vmatprep.subr.bf16.mxu0 %v3313_v14  ;;  %v49_v13 = vld [vmem:[%s4282_s0 + $0x110] sm:$0xff] }
  0x33   :  { %1735 = vmatmul.mubr.bf16.gmra.mrb[8].mxu0 %v2532_v2  ;;  %2983 = vmatprep.subr.bf16.mxu1 %v3315_v17  ;;  %v42_v2 = vld [vmem:[%s4282_s0 + $0xd8] sm:$0xff]  ;;  %v57_v14 = vld [vmem:[%s4282_s0 + $0x150] sm:$0xff] }
  0x34   :  { %1823 = vmatmul.mubr.bf16.gmra.mrb[8].mxu1 %v2534_v4  ;;  %1742 = vmatprep.mubr.bf16.mxu0 %v2549_v9  ;;  %v3334_v4 = vld [vmem:[%s4281_s1 + $0x200] sm:$0xff]   ;;  %v2523_v7 = vcombine.high %v34_v0, %v42_v2  ;;  %v3338_v9 = vld [vmem:[%s4281_s1 + $0x208] sm:$0xff]   ;;  %v3343_v17 = vld [vmem:[%s4281_s1 + $0x2d0] sm:$0xff]   ;;  %v2522_v19 = vcombine.low %v34_v0, %v42_v2  ;;  %v2536_v33 = vcombine.low %v49_v13, %v57_v14 }
  0x35   :  { %1830 = vmatprep.mubr.bf16.mxu1 %v2551_v11  ;;  %2926 = vmatpush3.bf16.msra.mxu0 %v3314_v15  ;;  %v3340_v11 = vld [vmem:[%s4281_s1 + $0x288] sm:$0xff]   ;;  %v50_v15 = vld [vmem:[%s4282_s0 + $0x118] sm:$0xff]  ;;  %v97_v57 = vld [vmem:[%s4282_s0 + $0x290] sm:$0xff] }
  0x36   :  { %2984 = vmatpush3.bf16.msra.mxu1 %v3316_v25  ;;  %2927 = vmatprep.subr.bf16.mxu0 %v3317_v26  ;;  %v3346_v25 = vld [vmem:[%s4281_s1 + $0x218] sm:$0xff]   ;;  %v65_v26 = vld [vmem:[%s4282_s0 + $0x190] sm:$0xff]  ;;  %v3369_v0 = vld [vmem:[%s4281_s1 + $0x340] sm:$0xff]  }
  0x37   :  { %2985 = vmatprep.subr.bf16.mxu1 %v3319_v28  ;;  %v73_v28 = vld [vmem:[%s4282_s0 + $0x1d0] sm:$0xff]  ;;  %v3371_v2 = vld [vmem:[%s4281_s1 + $0x3c0] sm:$0xff]  }
  0x39   :  { %2928 = vmatpush3.bf16.msra.mxu0 %v3318_v27  ;;  %v3347_v27 = vld [vmem:[%s4281_s1 + $0x2d8] sm:$0xff]  }
  0x3a   :  { %2986 = vmatpush3.bf16.msra.mxu1 %v3320_v29  ;;  %2929 = vmatprep.subr.bf16.mxu0 %v3321_v35  ;;  %v66_v29 = vld [vmem:[%s4282_s0 + $0x198] sm:$0xff] }
  0x3b   :  { %1743 = vmatmul.mubr.bf16.gmra.mrb[12].mxu0 %v2548_v16  ;;  %2987 = vmatprep.subr.bf16.mxu1 %v3323_v40  ;;  %v58_v16 = vld [vmem:[%s4282_s0 + $0x158] sm:$0xff]  ;;  %v3353_v40 = vld [vmem:[%s4281_s1 + $0x268] sm:$0xff]  }
  0x3c   :  { %1831 = vmatmul.mubr.bf16.gmra.mrb[12].mxu1 %v2550_v20  ;;  %1750 = vmatprep.mubr.bf16.mxu0 %v2565_v21  ;;  %v2537_v20 = vcombine.high %v49_v13, %v57_v14  ;;  %v3342_v21 = vld [vmem:[%s4281_s1 + $0x210] sm:$0xff]   ;;  %v2539_v22 = vcombine.high %v50_v15, %v58_v16  ;;  %v2538_v35 = vcombine.low %v50_v15, %v58_v16  ;;  %v27_v13 = vld [vmem:[%s4282_s0 + $0x60] sm:$0xff]  ;;  %v20_v14 = vld [vmem:[%s4282_s0 + $0x28] sm:$0xff] }
  0x3d   :  { %1838 = vmatprep.mubr.bf16.mxu1 %v2567_v24  ;;  %2930 = vmatpush3.bf16.msra.mxu0 %v3322_v38  ;;  %v3345_v24 = vld [vmem:[%s4281_s1 + $0x258] sm:$0xff]   ;;  %v2555_v38 = vcombine.high %v66_v29, %v74_v30  ;;  %v28_v15 = vld [vmem:[%s4282_s0 + $0x68] sm:$0xff] }
  0x3e   :  { %2988 = vmatpush3.bf16.msra.mxu1 %v3324_v41  ;;  %2931 = vmatprep.subr.bf16.mxu0 %v3329_v44  ;;  %v81_v41 = vld [vmem:[%s4282_s0 + $0x210] sm:$0xff]  ;;  %v82_v44 = vld [vmem:[%s4282_s0 + $0x218] sm:$0xff] }
  0x3f   :  { %2989 = vmatprep.subr.bf16.mxu1 %v3331_v46  ;;  %v3354_v46 = vld [vmem:[%s4281_s1 + $0x228] sm:$0xff]  }
  0x41   :  { %2932 = vmatpush3.bf16.msra.mxu0 %v3330_v45  ;;  %v90_v45 = vld [vmem:[%s4282_s0 + $0x258] sm:$0xff] }
  0x42   :  { %2990 = vmatpush3.bf16.msra.mxu1 %v3332_v48  ;;  %3033 = vmatprep.subr.bf16.mxu0 %v3333_v52  ;;  %v3357_v48 = vld [vmem:[%s4281_s1 + $0x270] sm:$0xff]   ;;  %v2569_v52 = vcombine.high %v81_v41, %v89_v42 }
  0x43   :  { %1751 = vmatmul.mubr.bf16.gmra.mrb[16].mxu0 %v2564_v34  ;;  %3091 = vmatprep.subr.bf16.mxu1 %v3335_v53  ;;  %v3351_v34 = vld [vmem:[%s4281_s1 + $0x2e0] sm:$0xff]   ;;  %v2571_v53 = vcombine.high %v82_v44, %v90_v45 }
  0x44   :  { %1839 = vmatmul.mubr.bf16.gmra.mrb[16].mxu1 %v2566_v36  ;;  %1758 = vmatprep.mubr.bf16.mxu0 %v2581_v37  ;;  %v2553_v36 = vcombine.high %v65_v26, %v73_v28  ;;  %v3350_v37 = vld [vmem:[%s4281_s1 + $0x220] sm:$0xff]  }
  0x45   :  { %1846 = vmatprep.mubr.bf16.mxu1 %v2583_v39  ;;  %v3352_v39 = vld [vmem:[%s4281_s1 + $0x2a0] sm:$0xff]  }
  0x4b   :  { %1759 = vmatmul.mubr.bf16.gmra.mrb[20].mxu0 %v2580_v47  ;;  %v3356_v47 = vld [vmem:[%s4281_s1 + $0x2a8] sm:$0xff]  }
  0x4c   :  { %1847 = vmatmul.mubr.bf16.gmra.mrb[20].mxu1 %v2582_v49  ;;  %1766 = vmatprep.mubr.bf16.mxu0 %v2597_v50  ;;  %v2552_v49 = vcombine.low %v65_v26, %v73_v28  ;;  %v3359_v50 = vld [vmem:[%s4281_s1 + $0x2f0] sm:$0xff]   ;;  %v2510_v26 = vcombine.low %v20_v14, %v28_v15 }
  0x4d   :  { %1854 = vmatprep.mubr.bf16.mxu1 %v2599_v51  ;;  %v2554_v51 = vcombine.low %v66_v29, %v74_v30  ;;  %v3373_v29 = vld [vmem:[%s4281_s1 + $0x348] sm:$0xff]  }
  0x53   :  { %1767 = vmatmul.mubr.bf16.gmra.mrb[24].mxu0 %v2596_v58  ;;  %v3367_v58 = vld [vmem:[%s4281_s1 + $0x2f8] sm:$0xff]  }
  0x54   :  { %1855 = vmatmul.mubr.bf16.gmra.mrb[24].mxu1 %v2598_v59  ;;  %1894 = vmatprep.mubr.bf16.mxu0 %v2505_v60  ;;  %v105_v59 = vld [vmem:[%s4282_s0 + $0x2d0] sm:$0xff]  ;;  %v98_v60 = vld [vmem:[%s4282_s0 + $0x298] sm:$0xff] }
  0x55   :  { %1982 = vmatprep.mubr.bf16.mxu1 %v2507_v61  ;;  %v3366_v61 = vld [vmem:[%s4281_s1 + $0x238] sm:$0xff]  }
  0x5b   :  { %1895 = vmatmul.mubr.bf16.vlgmr.msra.gmra.mrb[28].mxu0 %v2504_v1  ;;  %v2568_v1 = vcombine.low %v81_v41, %v89_v42 }
  0x5c   :  { %1983 = vmatmul.mubr.bf16.vlgmr.msra.gmra.mrb[28].mxu1 %v2506_v3  ;;  %3034 = vmatpush3.bf16.msra.mxu0 %v3334_v4  ;;  %v2570_v3 = vcombine.low %v82_v44, %v90_v45  ;;  %v2585_v4 = vcombine.high %v97_v57, %v105_v59  ;;  %v3378_v44 = vld [vmem:[%s4281_s1 + $0x310] sm:$0xff]  }
  0x5d   :  { %3092 = vmatpush3.bf16.msra.mxu1 %v3336_v5  ;;  %1902 = vmatprep.mubr.bf16.mxu0 %v2521_v6  ;;  %v2587_v5 = vcombine.high %v98_v60, %v106_v62  ;;  %v113_v6 = vld [vmem:[%s4282_s0 + $0x310] sm:$0x11] }
  0x5e   :  { %1990 = vmatprep.mubr.bf16.mxu1 %v2523_v7  ;;  %3035 = vmatprep.subr.bf16.mxu0 %v3337_v8  ;;  %v114_v7 = vld [vmem:[%s4282_s0 + $0x318] sm:$0x11]  ;;  %v2584_v8 = vcombine.low %v97_v57, %v105_v59  ;;  %v2600_v16 = vcombine.low %v113_v6, %v113_v6  ;;  %v3380_v45 = vld [vmem:[%s4281_s1 + $0x390] sm:$0xff]  }
  0x5f   :  { %3093 = vmatprep.subr.bf16.mxu1 %v3339_v10  ;;  %v2601_v10 = vcombine.high %v113_v6, %v113_v6  ;;  %v3393_v6 = vld [vmem:[%s4281_s1 + $0x370] sm:$0xff]  }
  0x60   :  { %3036 = vmatpush3.bf16.msra.mxu0 %v3338_v9  ;;  %v2586_v9 = vcombine.low %v98_v60, %v106_v62  ;;  %v3386_v60 = vld [vmem:[%s4281_s1 + $0x320] sm:$0xff]   ;;  %v3389_v62 = vld [vmem:[%s4281_s1 + $0x368] sm:$0xff]  }
  0x61   :  { %3094 = vmatpush3.bf16.msra.mxu1 %v3340_v11  ;;  %3037 = vmatprep.subr.bf16.mxu0 %v3341_v12  ;;  %v2603_v11 = vcombine.high %v114_v7, %v114_v7  ;;  %v19_v12 = vld [vmem:[%s4282_s0 + $0x20] sm:$0xff] }
  0x62   :  { %3095 = vmatprep.subr.bf16.mxu1 %v3343_v17  ;;  %v2602_v17 = vcombine.low %v114_v7, %v114_v7 }
  0x63   :  { %1903 = vmatmul.mubr.bf16.gmra.mrb[32].mxu0 %v2520_v18  ;;  %v2509_v18 = vcombine.high %v19_v12, %v27_v13 }
  0x64   :  { %1991 = vmatmul.mubr.bf16.gmra.mrb[32].mxu1 %v2522_v19  ;;  %1910 = vmatprep.mubr.bf16.mxu0 %v2537_v20  ;;  %v2511_v19 = vcombine.high %v20_v14, %v28_v15  ;;  %v35_v20 = vld [vmem:[%s4282_s0 + $0xa0] sm:$0xff]  ;;  %v3401_v14 = vld [vmem:[%s4281_s1 + $0x378] sm:$0xff]  }
  0x65   :  { %1998 = vmatprep.mubr.bf16.mxu1 %v2539_v22  ;;  %3038 = vmatpush3.bf16.msra.mxu0 %v3342_v21  ;;  %v43_v21 = vld [vmem:[%s4282_s0 + $0xe0] sm:$0xff]  ;;  %v2508_v22 = vcombine.low %v19_v12, %v27_v13  ;;  %v3394_v12 = vld [vmem:[%s4281_s1 + $0x330] sm:$0xff]   ;;  %v3403_v15 = vld [vmem:[%s4281_s1 + $0x3f8] sm:$0xff]  }
  0x66   :  { %3096 = vmatpush3.bf16.msra.mxu1 %v3344_v23  ;;  %3039 = vmatprep.subr.bf16.mxu0 %v3345_v24  ;;  %v3370_v23 = vld [vmem:[%s4281_s1 + $0x300] sm:$0xff]   ;;  %v36_v24 = vld [vmem:[%s4282_s0 + $0xa8] sm:$0xff]  ;;  %v2525_v28 = vcombine.high %v35_v20, %v43_v21  ;;  %v3396_v13 = vld [vmem:[%s4281_s1 + $0x3b0] sm:$0xff]  }
  0x67   :  { %3097 = vmatprep.subr.bf16.mxu1 %v3347_v27  ;;  %v3372_v27 = vld [vmem:[%s4281_s1 + $0x380] sm:$0xff]  }
  0x69   :  { %3040 = vmatpush3.bf16.msra.mxu0 %v3346_v25  ;;  %v44_v25 = vld [vmem:[%s4282_s0 + $0xe8] sm:$0xff] }
  0x6a   :  { %3098 = vmatpush3.bf16.msra.mxu1 %v3348_v31  ;;  %3041 = vmatprep.subr.bf16.mxu0 %v3349_v32  ;;  %v2527_v30 = vcombine.high %v36_v24, %v44_v25  ;;  %v3374_v31 = vld [vmem:[%s4281_s1 + $0x308] sm:$0xff]   ;;  %v2526_v41 = vcombine.low %v36_v24, %v44_v25 }
  0x6b   :  { %1911 = vmatmul.mubr.bf16.gmra.mrb[36].mxu0 %v2536_v33  ;;  %3099 = vmatprep.subr.bf16.mxu1 %v3351_v34  ;;  %v3375_v32 = vld [vmem:[%s4281_s1 + $0x3c8] sm:$0xff]   ;;  %v3377_v34 = vld [vmem:[%s4281_s1 + $0x350] sm:$0xff]  }
  0x6c   :  { %1999 = vmatmul.mubr.bf16.gmra.mrb[36].mxu1 %v2538_v35  ;;  %1918 = vmatprep.mubr.bf16.mxu0 %v2553_v36  ;;  %v3376_v33 = vld [vmem:[%s4281_s1 + $0x388] sm:$0xff]   ;;  %v51_v35 = vld [vmem:[%s4282_s0 + $0x120] sm:$0xff] }
  0x6d   :  { %2006 = vmatprep.mubr.bf16.mxu1 %v2555_v38  ;;  %3042 = vmatpush3.bf16.msra.mxu0 %v3350_v37  ;;  %v59_v36 = vld [vmem:[%s4282_s0 + $0x160] sm:$0xff]  ;;  %v52_v37 = vld [vmem:[%s4282_s0 + $0x128] sm:$0xff] }
  0x6e   :  { %3100 = vmatpush3.bf16.msra.mxu1 %v3352_v39  ;;  %3043 = vmatprep.subr.bf16.mxu0 %v3353_v40  ;;  %v60_v38 = vld [vmem:[%s4282_s0 + $0x168] sm:$0xff]  ;;  %v3379_v39 = vld [vmem:[%s4281_s1 + $0x3d0] sm:$0xff]   ;;  %v2524_v40 = vcombine.low %v35_v20, %v43_v21  ;;  %v2541_v42 = vcombine.high %v51_v35, %v59_v36  ;;  %v3404_v21 = vld [vmem:[%s4281_s1 + $0x3b8] sm:$0xff]  }
  0x6f   :  { %3101 = vmatprep.subr.bf16.mxu1 %v3355_v43  ;;  %v2543_v43 = vcombine.high %v52_v37, %v60_v38  ;;  %v2542_v57 = vcombine.low %v52_v37, %v60_v38  ;;  %v108_v20 = vld [vmem:[%s4282_s0 + $0x2e8] sm:$0xff] }
  0x71   :  { %3044 = vmatpush3.bf16.msra.mxu0 %v3354_v46  ;;  %v3381_v46 = vld [vmem:[%s4281_s1 + $0x358] sm:$0xff]  }
  0x72   :  { %3102 = vmatpush3.bf16.msra.mxu1 %v3356_v47  ;;  %3045 = vmatprep.subr.bf16.mxu0 %v3357_v48  ;;  %v3383_v47 = vld [vmem:[%s4281_s1 + $0x3d8] sm:$0xff]  }
  0x73   :  { %1919 = vmatmul.mubr.bf16.gmra.mrb[40].mxu0 %v2552_v49  ;;  %3103 = vmatprep.subr.bf16.mxu1 %v3359_v50  ;;  %v3382_v48 = vld [vmem:[%s4281_s1 + $0x318] sm:$0xff]   ;;  %v67_v49 = vld [vmem:[%s4282_s0 + $0x1a0] sm:$0xff] }
  0x74   :  { %2007 = vmatmul.mubr.bf16.gmra.mrb[40].mxu1 %v2554_v51  ;;  %1926 = vmatprep.mubr.bf16.mxu0 %v2569_v52  ;;  %v75_v50 = vld [vmem:[%s4282_s0 + $0x1e0] sm:$0xff]  ;;  %v68_v51 = vld [vmem:[%s4282_s0 + $0x1a8] sm:$0xff] }
  0x75   :  { %2014 = vmatprep.mubr.bf16.mxu1 %v2571_v53  ;;  %3046 = vmatpush3.bf16.msra.mxu0 %v3358_v54  ;;  %v76_v52 = vld [vmem:[%s4282_s0 + $0x1e8] sm:$0xff]  ;;  %v3384_v53 = vld [vmem:[%s4281_s1 + $0x398] sm:$0xff]   ;;  %v3385_v54 = vld [vmem:[%s4281_s1 + $0x360] sm:$0xff]   ;;  %v2556_v7 = vcombine.low %v67_v49, %v75_v50 }
  0x76   :  { %3104 = vmatpush3.bf16.msra.mxu1 %v3360_v55  ;;  %3047 = vmatprep.subr.bf16.mxu0 %v3365_v56  ;;  %v2540_v55 = vcombine.low %v51_v35, %v59_v36  ;;  %v3387_v56 = vld [vmem:[%s4281_s1 + $0x3e0] sm:$0xff]   ;;  %v2559_v59 = vcombine.high %v68_v51, %v76_v52  ;;  %v30_v35 = vld [vmem:[%s4282_s0 + $0x78] sm:$0xff] }
  0x77   :  { %3105 = vmatprep.subr.bf16.mxu1 %v3367_v58  ;;  %v2557_v58 = vcombine.high %v67_v49, %v75_v50  ;;  %v61_v49 = vld [vmem:[%s4282_s0 + $0x170] sm:$0xff]  ;;  %v54_v50 = vld [vmem:[%s4282_s0 + $0x138] sm:$0xff] }
  0x79   :  { %3048 = vmatpush3.bf16.msra.mxu0 %v3366_v61  ;;  %v3388_v61 = vld [vmem:[%s4281_s1 + $0x3a0] sm:$0xff]  }
  0x7a   :  { %3106 = vmatpush3.bf16.msra.mxu1 %v3368_v63  ;;  %3149 = vmatprep.subr.bf16.mxu0 %v3369_v0  ;;  %v3391_v63 = vld [vmem:[%s4281_s1 + $0x3e8] sm:$0xff]   ;;  %v83_v0 = vld [vmem:[%s4282_s0 + $0x220] sm:$0xff] }
  0x7b   :  { %1927 = vmatmul.mubr.bf16.gmra.mrb[44].mxu0 %v2568_v1  ;;  %3207 = vmatprep.subr.bf16.mxu1 %v3371_v2  ;;  %v91_v1 = vld [vmem:[%s4282_s0 + $0x260] sm:$0xff]  ;;  %v84_v2 = vld [vmem:[%s4282_s0 + $0x228] sm:$0xff] }
  0x7c   :  { %2015 = vmatmul.mubr.bf16.gmra.mrb[44].mxu1 %v2570_v3  ;;  %1934 = vmatprep.mubr.bf16.mxu0 %v2585_v4  ;;  %v3390_v3 = vld [vmem:[%s4281_s1 + $0x328] sm:$0xff]  }
  0x7d   :  { %2022 = vmatprep.mubr.bf16.mxu1 %v2587_v5  ;;  %v92_v4 = vld [vmem:[%s4282_s0 + $0x268] sm:$0xff] }
  0x7e   :  { %v3392_v5 = vld [vmem:[%s4281_s1 + $0x3a8] sm:$0xff]  }
  0x83   :  { %1935 = vmatmul.mubr.bf16.gmra.mrb[48].mxu0 %v2584_v8  ;;  %v3395_v8 = vld [vmem:[%s4281_s1 + $0x3f0] sm:$0xff]  }
  0x84   :  { %2023 = vmatmul.mubr.bf16.gmra.mrb[48].mxu1 %v2586_v9  ;;  %1942 = vmatprep.mubr.bf16.mxu0 %v2601_v10  ;;  %v2558_v9 = vcombine.low %v68_v51, %v76_v52  ;;  %v2573_v10 = vcombine.high %v83_v0, %v91_v1  ;;  %v62_v51 = vld [vmem:[%s4282_s0 + $0x178] sm:$0xff] }
  0x85   :  { %2030 = vmatprep.mubr.bf16.mxu1 %v2603_v11  ;;  %v2575_v11 = vcombine.high %v84_v2, %v92_v4 }
  0x8b   :  { %1943 = vmatmul.mubr.bf16.gmra.mrb[52].mxu0 %v2600_v16  ;;  %v99_v16 = vld [vmem:[%s4282_s0 + $0x2a0] sm:$0xff] }
  0x8c   :  { %2031 = vmatmul.mubr.bf16.gmra.mrb[52].mxu1 %v2602_v17  ;;  %2070 = vmatprep.mubr.bf16.mxu0 %v2509_v18  ;;  %v107_v17 = vld [vmem:[%s4282_s0 + $0x2e0] sm:$0xff]  ;;  %v3402_v18 = vld [vmem:[%s4281_s1 + $0x338] sm:$0xff]  }
  0x8d   :  { %2158 = vmatprep.mubr.bf16.mxu1 %v2511_v19  ;;  %v100_v19 = vld [vmem:[%s4282_s0 + $0x2a8] sm:$0xff]  ;;  %v2589_v24 = vcombine.high %v99_v16, %v107_v17 }
  0x8e   :  { %v2591_v25 = vcombine.high %v100_v19, %v108_v20 }
  0x93   :  { %2071 = vmatmul.mubr.bf16.vlgmr.msra.gmra.mrb[56].mxu0 %v2508_v22  ;;  %v2572_v22 = vcombine.low %v83_v0, %v91_v1  ;;  %v85_v0 = vld [vmem:[%s4282_s0 + $0x230] sm:$0xff] }
  0x94   :  { %2159 = vmatmul.mubr.bf16.vlgmr.msra.gmra.mrb[56].mxu1 %v2510_v26  ;;  %3150 = vmatpush3.bf16.msra.mxu0 %v3370_v23  ;;  %v2574_v23 = vcombine.low %v84_v2, %v92_v4  ;;  %v115_v26 = vld [vmem:[%s4282_s0 + $0x320] sm:$0x11]  ;;  %v93_v1 = vld [vmem:[%s4282_s0 + $0x270] sm:$0xff]  ;;  %v86_v2 = vld [vmem:[%s4282_s0 + $0x238] sm:$0xff] }
  0x95   :  { %3208 = vmatpush3.bf16.msra.mxu1 %v3372_v27  ;;  %2078 = vmatprep.mubr.bf16.mxu0 %v2525_v28  ;;  %v116_v27 = vld [vmem:[%s4282_s0 + $0x328] sm:$0x11]  ;;  %v2588_v28 = vcombine.low %v99_v16, %v107_v17  ;;  %v2604_v36 = vcombine.low %v115_v26, %v115_v26  ;;  %v117_v16 = vld [vmem:[%s4282_s0 + $0x330] sm:$0x11]  ;;  %v118_v17 = vld [vmem:[%s4282_s0 + $0x338] sm:$0x11] }
  0x96   :  { %2166 = vmatprep.mubr.bf16.mxu1 %v2527_v30  ;;  %3151 = vmatprep.subr.bf16.mxu0 %v3373_v29  ;;  %v2590_v29 = vcombine.low %v100_v19, %v108_v20  ;;  %v2605_v30 = vcombine.high %v115_v26, %v115_v26  ;;  %v2606_v37 = vcombine.low %v116_v27, %v116_v27 }
  0x97   :  { %3209 = vmatprep.subr.bf16.mxu1 %v3375_v32  ;;  %v21_v32 = vld [vmem:[%s4282_s0 + $0x30] sm:$0xff]  ;;  %v2609_v20 = vcombine.high %v117_v16, %v117_v16  ;;  %v2608_v26 = vcombine.low %v117_v16, %v117_v16 }
  0x98   :  { %3152 = vmatpush3.bf16.msra.mxu0 %v3374_v31  ;;  %v2607_v31 = vcombine.high %v116_v27, %v116_v27 }
  0x99   :  { %3210 = vmatpush3.bf16.msra.mxu1 %v3376_v33  ;;  %3153 = vmatprep.subr.bf16.mxu0 %v3377_v34  ;;  %v29_v33 = vld [vmem:[%s4282_s0 + $0x70] sm:$0xff]  ;;  %v22_v34 = vld [vmem:[%s4282_s0 + $0x38] sm:$0xff] }
  0x9a   :  { %3211 = vmatprep.subr.bf16.mxu1 %v3379_v39  ;;  %v2513_v38 = vcombine.high %v21_v32, %v29_v33  ;;  %v2515_v39 = vcombine.high %v22_v34, %v30_v35 }
  0x9b   :  { %2079 = vmatmul.mubr.bf16.gmra.mrb[60].mxu0 %v2524_v40  ;;  %v37_v40 = vld [vmem:[%s4282_s0 + $0xb0] sm:$0xff] }
  0x9c   :  { %2167 = vmatmul.mubr.bf16.gmra.mrb[60].mxu1 %v2526_v41  ;;  %2086 = vmatprep.mubr.bf16.mxu0 %v2541_v42  ;;  %v45_v41 = vld [vmem:[%s4282_s0 + $0xf0] sm:$0xff]  ;;  %v38_v42 = vld [vmem:[%s4282_s0 + $0xb8] sm:$0xff] }
  0x9d   :  { %2174 = vmatprep.mubr.bf16.mxu1 %v2543_v43  ;;  %3154 = vmatpush3.bf16.msra.mxu0 %v3378_v44  ;;  %v46_v43 = vld [vmem:[%s4282_s0 + $0xf8] sm:$0xff]  ;;  %v2512_v44 = vcombine.low %v21_v32, %v29_v33  ;;  %v2528_v52 = vcombine.low %v37_v40, %v45_v41 }
  0x9e   :  { %3212 = vmatpush3.bf16.msra.mxu1 %v3380_v45  ;;  %3155 = vmatprep.subr.bf16.mxu0 %v3381_v46  ;;  %v2514_v45 = vcombine.low %v22_v34, %v30_v35  ;;  %v2529_v46 = vcombine.high %v37_v40, %v45_v41 }
  0x9f   :  { %3213 = vmatprep.subr.bf16.mxu1 %v3383_v47  ;;  %v2531_v47 = vcombine.high %v38_v42, %v46_v43 }
  0xa1   :  { %3156 = vmatpush3.bf16.msra.mxu0 %v3382_v48  ;;  %v53_v48 = vld [vmem:[%s4282_s0 + $0x130] sm:$0xff] }
  0xa2   :  { %3214 = vmatpush3.bf16.msra.mxu1 %v3384_v53  ;;  %3157 = vmatprep.subr.bf16.mxu0 %v3385_v54  ;;  %v2530_v53 = vcombine.low %v38_v42, %v46_v43  ;;  %v2545_v54 = vcombine.high %v53_v48, %v61_v49 }
  0xa3   :  { %2087 = vmatmul.mubr.bf16.gmra.mrb[64].mxu0 %v2540_v55  ;;  %3215 = vmatprep.subr.bf16.mxu1 %v3387_v56  ;;  %v2547_v55 = vcombine.high %v54_v50, %v62_v51  ;;  %v69_v56 = vld [vmem:[%s4282_s0 + $0x1b0] sm:$0xff] }
  0xa4   :  { %2175 = vmatmul.mubr.bf16.gmra.mrb[64].mxu1 %v2542_v57  ;;  %2094 = vmatprep.mubr.bf16.mxu0 %v2557_v58  ;;  %v77_v57 = vld [vmem:[%s4282_s0 + $0x1f0] sm:$0xff]  ;;  %v70_v58 = vld [vmem:[%s4282_s0 + $0x1b8] sm:$0xff] }
  0xa5   :  { %2182 = vmatprep.mubr.bf16.mxu1 %v2559_v59  ;;  %3158 = vmatpush3.bf16.msra.mxu0 %v3386_v60  ;;  %v78_v59 = vld [vmem:[%s4282_s0 + $0x1f8] sm:$0xff]  ;;  %v2544_v60 = vcombine.low %v53_v48, %v61_v49  ;;  %v2560_v4 = vcombine.low %v69_v56, %v77_v57 }
  0xa6   :  { %3216 = vmatpush3.bf16.msra.mxu1 %v3388_v61  ;;  %3159 = vmatprep.subr.bf16.mxu0 %v3389_v62  ;;  %v2546_v61 = vcombine.low %v54_v50, %v62_v51  ;;  %v2561_v62 = vcombine.high %v69_v56, %v77_v57 }
  0xa7   :  { %3217 = vmatprep.subr.bf16.mxu1 %v3391_v63  ;;  %v2563_v63 = vcombine.high %v70_v58, %v78_v59 }
  0xa9   :  { %3160 = vmatpush3.bf16.msra.mxu0 %v3390_v3  ;;  %v94_v3 = vld [vmem:[%s4282_s0 + $0x278] sm:$0xff] }
  0xaa   :  { %3218 = vmatpush3.bf16.msra.mxu1 %v3392_v5  ;;  %3161 = vmatprep.subr.bf16.mxu0 %v3393_v6  ;;  %v2562_v5 = vcombine.low %v70_v58, %v78_v59  ;;  %v2577_v6 = vcombine.high %v85_v0, %v93_v1 }
  0xab   :  { %2095 = vmatmul.mubr.bf16.gmra.mrb[68].mxu0 %v2556_v7  ;;  %3219 = vmatprep.subr.bf16.mxu1 %v3395_v8  ;;  %v2579_v7 = vcombine.high %v86_v2, %v94_v3  ;;  %v101_v8 = vld [vmem:[%s4282_s0 + $0x2b0] sm:$0xff] }
  0xac   :  { %2183 = vmatmul.mubr.bf16.gmra.mrb[68].mxu1 %v2558_v9  ;;  %2102 = vmatprep.mubr.bf16.mxu0 %v2573_v10  ;;  %v109_v9 = vld [vmem:[%s4282_s0 + $0x2f0] sm:$0xff]  ;;  %v102_v10 = vld [vmem:[%s4282_s0 + $0x2b8] sm:$0xff] }
  0xad   :  { %2190 = vmatprep.mubr.bf16.mxu1 %v2575_v11  ;;  %3162 = vmatpush3.bf16.msra.mxu0 %v3394_v12  ;;  %v110_v11 = vld [vmem:[%s4282_s0 + $0x2f8] sm:$0xff]  ;;  %v2576_v12 = vcombine.low %v85_v0, %v93_v1 }
  0xae   :  { %3220 = vmatpush3.bf16.msra.mxu1 %v3396_v13  ;;  %3163 = vmatprep.subr.bf16.mxu0 %v3401_v14  ;;  %v2578_v13 = vcombine.low %v86_v2, %v94_v3  ;;  %v2593_v14 = vcombine.high %v101_v8, %v109_v9  ;;  %v2594_v19 = vcombine.low %v102_v10, %v110_v11 }
  0xaf   :  { %3221 = vmatprep.subr.bf16.mxu1 %v3403_v15  ;;  %v2595_v15 = vcombine.high %v102_v10, %v110_v11 }
  0xb1   :  { %3164 = vmatpush3.bf16.msra.mxu0 %v3402_v18  ;;  %v2592_v18 = vcombine.low %v101_v8, %v109_v9 }
  0xb2   :  { %3222 = vmatpush3.bf16.msra.mxu1 %v3404_v21  ;;  %v2611_v21 = vcombine.high %v118_v17, %v118_v17 }
  0xb3   :  { %2103 = vmatmul.mubr.bf16.gmra.mrb[72].mxu0 %v2572_v22 }
  0xb4   :  { %2191 = vmatmul.mubr.bf16.gmra.mrb[72].mxu1 %v2574_v23  ;;  %2110 = vmatprep.mubr.bf16.mxu0 %v2589_v24  ;;  %v4128_v24 = vld [vmem:[%s4283_s2] ss:$0 sm:$0xff] }
  0xb5   :  { %2198 = vmatprep.mubr.bf16.mxu1 %v2591_v25 }
  0xbb   :  { %2111 = vmatmul.mubr.bf16.gmra.mrb[76].mxu0 %v2588_v28 }
  0xbc   :  { %2199 = vmatmul.mubr.bf16.gmra.mrb[76].mxu1 %v2590_v29  ;;  %2118 = vmatprep.mubr.bf16.mxu0 %v2605_v30  ;;  %v2610_v30 = vcombine.low %v118_v17, %v118_v17 }
  0xbd   :  { %2206 = vmatprep.mubr.bf16.mxu1 %v2607_v31 }
  0xc3   :  { %2119 = vmatmul.mubr.bf16.gmra.mrb[80].mxu0 %v2604_v36 }
  0xc4   :  { %2207 = vmatmul.mubr.bf16.gmra.mrb[80].mxu1 %v2606_v37  ;;  %2246 = vmatprep.mubr.bf16.mxu0 %v2513_v38 }
  0xc5   :  { %2334 = vmatprep.mubr.bf16.mxu1 %v2515_v39 }
  0xcb   :  { %2247 = vmatmul.mubr.bf16.vlgmr.msra.gmra.mrb[84].mxu0 %v2512_v44 }
  0xcc   :  { %2335 = vmatmul.mubr.bf16.vlgmr.msra.gmra.mrb[84].mxu1 %v2514_v45  ;;  %2254 = vmatprep.mubr.bf16.mxu0 %v2529_v46 }
  0xcd   :  { %2342 = vmatprep.mubr.bf16.mxu1 %v2531_v47 }
  0xd3   :  { %2255 = vmatmul.mubr.bf16.gmra.mrb[88].mxu0 %v2528_v52 }
  0xd4   :  { %2343 = vmatmul.mubr.bf16.gmra.mrb[88].mxu1 %v2530_v53  ;;  %2262 = vmatprep.mubr.bf16.mxu0 %v2545_v54 }
  0xd5   :  { %2350 = vmatprep.mubr.bf16.mxu1 %v2547_v55 }
  0xdb   :  { %2263 = vmatmul.mubr.bf16.gmra.mrb[92].mxu0 %v2544_v60 }
  0xdc   :  { %2351 = vmatmul.mubr.bf16.gmra.mrb[92].mxu1 %v2546_v61  ;;  %2270 = vmatprep.mubr.bf16.mxu0 %v2561_v62 }
  0xdd   :  { %2358 = vmatprep.mubr.bf16.mxu1 %v2563_v63 }
  0xe3   :  { %2271 = vmatmul.mubr.bf16.gmra.mrb[96].mxu0 %v2560_v4 }
  0xe4   :  { %2359 = vmatmul.mubr.bf16.gmra.mrb[96].mxu1 %v2562_v5  ;;  %2278 = vmatprep.mubr.bf16.mxu0 %v2577_v6 }
  0xe5   :  { %2366 = vmatprep.mubr.bf16.mxu1 %v2579_v7 }
  0xeb   :  { %2279 = vmatmul.mubr.bf16.gmra.mrb[100].mxu0 %v2576_v12 }
  0xec   :  { %2367 = vmatmul.mubr.bf16.gmra.mrb[100].mxu1 %v2578_v13  ;;  %2286 = vmatprep.mubr.bf16.mxu0 %v2593_v14 }
  0xed   :  { %2374 = vmatprep.mubr.bf16.mxu1 %v2595_v15 }
  0xf3   :  { %2287 = vmatmul.mubr.bf16.gmra.mrb[104].mxu0 %v2592_v18 }
  0xf4   :  { %2375 = vmatmul.mubr.bf16.gmra.mrb[104].mxu1 %v2594_v19  ;;  %2294 = vmatprep.mubr.bf16.mxu0 %v2609_v20 }
  0xf5   :  { %2382 = vmatprep.mubr.bf16.mxu1 %v2611_v21 }
  0xf6   :  { %v2817_v22 = vpop.f32.mrb[0].mxu0 }
  0xf7   :  { %v2875_v23 = vpop.f32.mrb[0].mxu1  ;;  %v2818_v25 = vpop.f32.mrb[1].mxu0 }
  0xf8   :  { %v2819_v27 = vadd.f32 %v2818_v25, %v2817_v22  ;;  %v2876_v28 = vpop.f32.mrb[1].mxu1  ;;  %v2820_v29 = vpop.f32.mrb[2].mxu0 }
  0xf9   :  { %v2877_v31 = vadd.f32 %v2876_v28, %v2875_v23  ;;  %v2878_v32 = vpop.f32.mrb[2].mxu1  ;;  %v2821_v33 = vpop.f32.mrb[3].mxu0 }
  0xfa   :  { %v1721_v34 = vadd.f32 %v2819_v27, %v4128_v24  ;;  %v2822_v35 = vadd.f32 %v2821_v33, %v2820_v29  ;;  %v2879_v36 = vpop.f32.mrb[3].mxu1 }
  0xfb   :  { %v2880_v37 = vadd.f32 %v2879_v36, %v2878_v32  ;;  %2295 = vmatmul.mubr.bf16.gmra.mrb[108].mxu0 %v2608_v26 }
  0xfc   :  { %v4131_v38 = vadd.f32 %v2877_v31, %v1721_v34  ;;  %v1724_v39 = vadd.f32 %v2822_v35, %v4128_v24  ;;  %2383 = vmatmul.mubr.bf16.gmra.mrb[108].mxu1 %v2610_v30 }
  0xfe   :  { %v4134_v40 = vadd.f32 %v2880_v37, %v1724_v39  ;;  %v2823_v41 = vpop.f32.mrb[4].mxu0 }
  0xff   :  { %v2881_v42 = vpop.f32.mrb[4].mxu1  ;;  %v2824_v43 = vpop.f32.mrb[5].mxu0 }
 0x100   :  { %v2825_v44 = vadd.f32 %v2824_v43, %v2823_v41  ;;  %v2882_v45 = vpop.f32.mrb[5].mxu1  ;;  %v2826_v46 = vpop.f32.mrb[6].mxu0 }
 0x101   :  { %v2883_v47 = vadd.f32 %v2882_v45, %v2881_v42  ;;  %v2884_v48 = vpop.f32.mrb[6].mxu1  ;;  %v2827_v49 = vpop.f32.mrb[7].mxu0 }
 0x102   :  { %v1729_v50 = vadd.f32 %v2825_v44, %v4128_v24  ;;  %v2828_v51 = vadd.f32 %v2827_v49, %v2826_v46  ;;  %v2885_v52 = vpop.f32.mrb[7].mxu1 }
 0x103   :  { %v2886_v53 = vadd.f32 %v2885_v52, %v2884_v48 }
 0x104   :  { %v4137_v54 = vadd.f32 %v2883_v47, %v1729_v50  ;;  %v1732_v55 = vadd.f32 %v2828_v51, %v4128_v24 }
 0x106   :  { %v4140_v56 = vadd.f32 %v2886_v53, %v1732_v55  ;;  %v2829_v57 = vpop.f32.mrb[8].mxu0 }
 0x107   :  { %v2887_v58 = vpop.f32.mrb[8].mxu1  ;;  %v2830_v59 = vpop.f32.mrb[9].mxu0 }
 0x108   :  { %v2831_v60 = vadd.f32 %v2830_v59, %v2829_v57  ;;  %v2888_v61 = vpop.f32.mrb[9].mxu1  ;;  %v2832_v62 = vpop.f32.mrb[10].mxu0 }
 0x109   :  { %v2889_v63 = vadd.f32 %v2888_v61, %v2887_v58  ;;  %v2890_v0 = vpop.f32.mrb[10].mxu1  ;;  %v2833_v1 = vpop.f32.mrb[11].mxu0 }
 0x10a   :  { %v1737_v2 = vadd.f32 %v2831_v60, %v4128_v24  ;;  %v2834_v3 = vadd.f32 %v2833_v1, %v2832_v62  ;;  %v2891_v4 = vpop.f32.mrb[11].mxu1 }
 0x10b   :  { %v2892_v5 = vadd.f32 %v2891_v4, %v2890_v0 }
 0x10c   :  { %v4143_v6 = vadd.f32 %v2889_v63, %v1737_v2  ;;  %v1740_v7 = vadd.f32 %v2834_v3, %v4128_v24 }
 0x10e   :  { %v4146_v8 = vadd.f32 %v2892_v5, %v1740_v7  ;;  %v2835_v9 = vpop.f32.mrb[12].mxu0 }
 0x10f   :  { %v2893_v10 = vpop.f32.mrb[12].mxu1  ;;  %v2836_v11 = vpop.f32.mrb[13].mxu0 }
 0x110   :  { %v2837_v12 = vadd.f32 %v2836_v11, %v2835_v9  ;;  %v2894_v13 = vpop.f32.mrb[13].mxu1  ;;  %v2838_v14 = vpop.f32.mrb[14].mxu0 }
 0x111   :  { %v2895_v15 = vadd.f32 %v2894_v13, %v2893_v10  ;;  %v2896_v16 = vpop.f32.mrb[14].mxu1  ;;  %v2839_v17 = vpop.f32.mrb[15].mxu0 }
 0x112   :  { %v1745_v18 = vadd.f32 %v2837_v12, %v4128_v24  ;;  %v2840_v19 = vadd.f32 %v2839_v17, %v2838_v14  ;;  %v2897_v20 = vpop.f32.mrb[15].mxu1 }
 0x113   :  { %v2898_v21 = vadd.f32 %v2897_v20, %v2896_v16 }
 0x114   :  { %v4149_v22 = vadd.f32 %v2895_v15, %v1745_v18  ;;  %v1748_v23 = vadd.f32 %v2840_v19, %v4128_v24 }
 0x116   :  { %v4152_v25 = vadd.f32 %v2898_v21, %v1748_v23  ;;  %v2841_v26 = vpop.f32.mrb[16].mxu0 }
 0x117   :  { %v2899_v27 = vpop.f32.mrb[16].mxu1  ;;  %v2842_v28 = vpop.f32.mrb[17].mxu0 }
 0x118   :  { %v2843_v29 = vadd.f32 %v2842_v28, %v2841_v26  ;;  %v2900_v30 = vpop.f32.mrb[17].mxu1  ;;  %v2844_v31 = vpop.f32.mrb[18].mxu0 }
 0x119   :  { %v2901_v32 = vadd.f32 %v2900_v30, %v2899_v27  ;;  %v2902_v33 = vpop.f32.mrb[18].mxu1  ;;  %v2845_v34 = vpop.f32.mrb[19].mxu0 }
 0x11a   :  { %v1753_v35 = vadd.f32 %v2843_v29, %v4128_v24  ;;  %v2846_v36 = vadd.f32 %v2845_v34, %v2844_v31  ;;  %v2903_v37 = vpop.f32.mrb[19].mxu1 }
 0x11b   :  { %v2904_v39 = vadd.f32 %v2903_v37, %v2902_v33 }
 0x11c   :  { %v4155_v41 = vadd.f32 %v2901_v32, %v1753_v35  ;;  %v1756_v42 = vadd.f32 %v2846_v36, %v4128_v24 }
 0x11e   :  { %v4158_v43 = vadd.f32 %v2904_v39, %v1756_v42  ;;  %v2847_v44 = vpop.f32.mrb[20].mxu0 }
 0x11f   :  { %v2905_v45 = vpop.f32.mrb[20].mxu1  ;;  %v2848_v46 = vpop.f32.mrb[21].mxu0 }
 0x120   :  { %v2849_v47 = vadd.f32 %v2848_v46, %v2847_v44  ;;  %v2906_v48 = vpop.f32.mrb[21].mxu1  ;;  %v2850_v49 = vpop.f32.mrb[22].mxu0 }
 0x121   :  { %v2907_v50 = vadd.f32 %v2906_v48, %v2905_v45  ;;  %v2908_v51 = vpop.f32.mrb[22].mxu1  ;;  %v2851_v52 = vpop.f32.mrb[23].mxu0 }
 0x122   :  { %v1761_v53 = vadd.f32 %v2849_v47, %v4128_v24  ;;  %v2852_v55 = vadd.f32 %v2851_v52, %v2850_v49  ;;  %v2909_v57 = vpop.f32.mrb[23].mxu1 }
 0x123   :  { %v2910_v58 = vadd.f32 %v2909_v57, %v2908_v51 }
 0x124   :  { %v4161_v59 = vadd.f32 %v2907_v50, %v1761_v53  ;;  %v1764_v60 = vadd.f32 %v2852_v55, %v4128_v24 }
 0x126   :  { %v4164_v61 = vadd.f32 %v2910_v58, %v1764_v60  ;;  %v2853_v62 = vpop.f32.mrb[24].mxu0 }
 0x127   :  { %v2911_v63 = vpop.f32.mrb[24].mxu1  ;;  %v2854_v0 = vpop.f32.mrb[25].mxu0 }
 0x128   :  { %v2855_v1 = vadd.f32 %v2854_v0, %v2853_v62  ;;  %v2912_v2 = vpop.f32.mrb[25].mxu1  ;;  %v2856_v3 = vpop.f32.mrb[26].mxu0 }
 0x129   :  { %v2913_v4 = vadd.f32 %v2912_v2, %v2911_v63  ;;  %v2914_v5 = vpop.f32.mrb[26].mxu1  ;;  %v2857_v7 = vpop.f32.mrb[27].mxu0 }
 0x12a   :  { %v1769_v9 = vadd.f32 %v2855_v1, %v4128_v24  ;;  %v2915_v10 = vpop.f32.mrb[27].mxu1 }
 0x12c   :  { %v4167_v11 = vadd.f32 %v2913_v4, %v1769_v9 }
 0x12e   :  { %v2933_v12 = vpop.f32.mrb[28].mxu0 }
 0x12f   :  { %v2991_v13 = vpop.f32.mrb[28].mxu1  ;;  %v2934_v14 = vpop.f32.mrb[29].mxu0 }
 0x130   :  { %v2935_v15 = vadd.f32 %v2934_v14, %v2933_v12  ;;  %v2992_v16 = vpop.f32.mrb[29].mxu1  ;;  %v2936_v17 = vpop.f32.mrb[30].mxu0 }
 0x131   :  { %v2993_v18 = vadd.f32 %v2992_v16, %v2991_v13  ;;  %v2994_v19 = vpop.f32.mrb[30].mxu1  ;;  %v2937_v20 = vpop.f32.mrb[31].mxu0 }
 0x132   :  { %v1897_v21 = vadd.f32 %v2935_v15, %v4131_v38  ;;  %v2938_v23 = vadd.f32 %v2937_v20, %v2936_v17  ;;  %v2995_v26 = vpop.f32.mrb[31].mxu1 }
 0x133   :  { %v2996_v27 = vadd.f32 %v2995_v26, %v2994_v19 }
 0x134   :  { %v4170_v28 = vadd.f32 %v2993_v18, %v1897_v21  ;;  %v1900_v24 = vadd.f32 %v2938_v23, %v4134_v40 }
 0x136   :  { %v4173_v29 = vadd.f32 %v2996_v27, %v1900_v24  ;;  %v2939_v30 = vpop.f32.mrb[32].mxu0 }
 0x137   :  { %v2997_v31 = vpop.f32.mrb[32].mxu1  ;;  %v2940_v32 = vpop.f32.mrb[33].mxu0 }
 0x138   :  { %v2941_v33 = vadd.f32 %v2940_v32, %v2939_v30  ;;  %v2998_v34 = vpop.f32.mrb[33].mxu1  ;;  %v2942_v35 = vpop.f32.mrb[34].mxu0 }
 0x139   :  { %v2999_v36 = vadd.f32 %v2998_v34, %v2997_v31  ;;  %v3000_v37 = vpop.f32.mrb[34].mxu1  ;;  %v2943_v39 = vpop.f32.mrb[35].mxu0 }
 0x13a   :  { %v1905_v38 = vadd.f32 %v2941_v33, %v4137_v54  ;;  %v2944_v42 = vadd.f32 %v2943_v39, %v2942_v35  ;;  %v3001_v44 = vpop.f32.mrb[35].mxu1 }
 0x13b   :  { %v3002_v45 = vadd.f32 %v3001_v44, %v3000_v37 }
 0x13c   :  { %v4176_v46 = vadd.f32 %v2999_v36, %v1905_v38  ;;  %v1908_v40 = vadd.f32 %v2944_v42, %v4140_v56 }
 0x13e   :  { %v4179_v47 = vadd.f32 %v3002_v45, %v1908_v40  ;;  %v2945_v48 = vpop.f32.mrb[36].mxu0 }
 0x13f   :  { %v3003_v49 = vpop.f32.mrb[36].mxu1  ;;  %v2946_v50 = vpop.f32.mrb[37].mxu0 }
 0x140   :  { %v2947_v51 = vadd.f32 %v2946_v50, %v2945_v48  ;;  %v3004_v52 = vpop.f32.mrb[37].mxu1  ;;  %v2948_v53 = vpop.f32.mrb[38].mxu0 }
 0x141   :  { %v3005_v55 = vadd.f32 %v3004_v52, %v3003_v49  ;;  %v3006_v57 = vpop.f32.mrb[38].mxu1  ;;  %v2949_v58 = vpop.f32.mrb[39].mxu0 }
 0x142   :  { %v1913_v54 = vadd.f32 %v2947_v51, %v4143_v6  ;;  %v2950_v60 = vadd.f32 %v2949_v58, %v2948_v53  ;;  %v3007_v62 = vpop.f32.mrb[39].mxu1 }
 0x143   :  { %v3008_v63 = vadd.f32 %v3007_v62, %v3006_v57 }
 0x144   :  { %v4182_v0 = vadd.f32 %v3005_v55, %v1913_v54  ;;  %v1916_v56 = vadd.f32 %v2950_v60, %v4146_v8 }
 0x146   :  { %v4185_v1 = vadd.f32 %v3008_v63, %v1916_v56  ;;  %v2951_v2 = vpop.f32.mrb[40].mxu0 }
 0x147   :  { %v3009_v3 = vpop.f32.mrb[40].mxu1  ;;  %v2952_v4 = vpop.f32.mrb[41].mxu0 }
 0x148   :  { %v2953_v5 = vadd.f32 %v2952_v4, %v2951_v2  ;;  %v3010_v7 = vpop.f32.mrb[41].mxu1  ;;  %v2954_v9 = vpop.f32.mrb[42].mxu0 }
 0x149   :  { %v3011_v10 = vadd.f32 %v3010_v7, %v3009_v3  ;;  %v3012_v12 = vpop.f32.mrb[42].mxu1  ;;  %v2955_v13 = vpop.f32.mrb[43].mxu0 }
 0x14a   :  { %v1921_v6 = vadd.f32 %v2953_v5, %v4149_v22  ;;  %v2956_v14 = vadd.f32 %v2955_v13, %v2954_v9  ;;  %v3013_v15 = vpop.f32.mrb[43].mxu1 }
 0x14b   :  { %v3014_v16 = vadd.f32 %v3013_v15, %v3012_v12 }
 0x14c   :  { %v4188_v17 = vadd.f32 %v3011_v10, %v1921_v6  ;;  %v1924_v8 = vadd.f32 %v2956_v14, %v4152_v25 }
 0x14e   :  { %v4191_v18 = vadd.f32 %v3014_v16, %v1924_v8  ;;  %v2957_v19 = vpop.f32.mrb[44].mxu0 }
 0x14f   :  { %v3015_v20 = vpop.f32.mrb[44].mxu1  ;;  %v2958_v21 = vpop.f32.mrb[45].mxu0 }
 0x150   :  { %v2959_v23 = vadd.f32 %v2958_v21, %v2957_v19  ;;  %v3016_v26 = vpop.f32.mrb[45].mxu1  ;;  %v2960_v27 = vpop.f32.mrb[46].mxu0 }
 0x151   :  { %v3017_v24 = vadd.f32 %v3016_v26, %v3015_v20  ;;  %v3018_v30 = vpop.f32.mrb[46].mxu1  ;;  %v2961_v31 = vpop.f32.mrb[47].mxu0 }
 0x152   :  { %v1929_v22 = vadd.f32 %v2959_v23, %v4155_v41  ;;  %v2962_v32 = vadd.f32 %v2961_v31, %v2960_v27  ;;  %v3019_v33 = vpop.f32.mrb[47].mxu1 }
 0x153   :  { %v3020_v34 = vadd.f32 %v3019_v33, %v3018_v30 }
 0x154   :  { %v4194_v35 = vadd.f32 %v3017_v24, %v1929_v22  ;;  %v1932_v25 = vadd.f32 %v2962_v32, %v4158_v43 }
 0x156   :  { %v4197_v36 = vadd.f32 %v3020_v34, %v1932_v25  ;;  %v2963_v37 = vpop.f32.mrb[48].mxu0 }
 0x157   :  { %v3021_v39 = vpop.f32.mrb[48].mxu1  ;;  %v2964_v38 = vpop.f32.mrb[49].mxu0 }
 0x158   :  { %v2965_v42 = vadd.f32 %v2964_v38, %v2963_v37  ;;  %v3022_v44 = vpop.f32.mrb[49].mxu1  ;;  %v2966_v45 = vpop.f32.mrb[50].mxu0 }
 0x159   :  { %v3023_v40 = vadd.f32 %v3022_v44, %v3021_v39  ;;  %v3024_v48 = vpop.f32.mrb[50].mxu1  ;;  %v2967_v49 = vpop.f32.mrb[51].mxu0 }
 0x15a   :  { %v1937_v41 = vadd.f32 %v2965_v42, %v4161_v59  ;;  %v2968_v50 = vadd.f32 %v2967_v49, %v2966_v45  ;;  %v3025_v51 = vpop.f32.mrb[51].mxu1 }
 0x15b   :  { %v3026_v52 = vadd.f32 %v3025_v51, %v3024_v48 }
 0x15c   :  { %v4200_v53 = vadd.f32 %v3023_v40, %v1937_v41  ;;  %v1940_v43 = vadd.f32 %v2968_v50, %v4164_v61 }
 0x15e   :  { %v4203_v55 = vadd.f32 %v3026_v52, %v1940_v43  ;;  %v2969_v57 = vpop.f32.mrb[52].mxu0 }
 0x15f   :  { %v3027_v58 = vpop.f32.mrb[52].mxu1  ;;  %v2970_v54 = vpop.f32.mrb[53].mxu0 }
 0x160   :  { %v2971_v60 = vadd.f32 %v2970_v54, %v2969_v57  ;;  %v3028_v62 = vpop.f32.mrb[53].mxu1  ;;  %v2972_v63 = vpop.f32.mrb[54].mxu0 }
 0x161   :  { %v3029_v56 = vadd.f32 %v3028_v62, %v3027_v58  ;;  %v3030_v2 = vpop.f32.mrb[54].mxu1  ;;  %v2973_v3 = vpop.f32.mrb[55].mxu0 }
 0x162   :  { %v1945_v59 = vadd.f32 %v2971_v60, %v4167_v11  ;;  %v3031_v4 = vpop.f32.mrb[55].mxu1 }
 0x164   :  { %v4206_v5 = vadd.f32 %v3029_v56, %v1945_v59 }
 0x166   :  { %v3049_v7 = vpop.f32.mrb[56].mxu0 }
 0x167   :  { %v3107_v9 = vpop.f32.mrb[56].mxu1  ;;  %v3050_v10 = vpop.f32.mrb[57].mxu0 }
 0x168   :  { %v3051_v61 = vadd.f32 %v3050_v10, %v3049_v7  ;;  %v3108_v12 = vpop.f32.mrb[57].mxu1  ;;  %v3052_v13 = vpop.f32.mrb[58].mxu0 }
 0x169   :  { %v3109_v6 = vadd.f32 %v3108_v12, %v3107_v9  ;;  %v3110_v14 = vpop.f32.mrb[58].mxu1  ;;  %v3053_v15 = vpop.f32.mrb[59].mxu0 }
 0x16a   :  { %v2073_v16 = vadd.f32 %v3051_v61, %v4170_v28  ;;  %v3054_v8 = vadd.f32 %v3053_v15, %v3052_v13  ;;  %v3111_v19 = vpop.f32.mrb[59].mxu1 }
 0x16b   :  { %v3112_v20 = vadd.f32 %v3111_v19, %v3110_v14 }
 0x16c   :  { %v4209_v21 = vadd.f32 %v3109_v6, %v2073_v16  ;;  %v2076_v11 = vadd.f32 %v3054_v8, %v4173_v29 }
 0x16e   :  { %v4212_v23 = vadd.f32 %v3112_v20, %v2076_v11  ;;  %v3055_v26 = vpop.f32.mrb[60].mxu0 }
 0x16f   :  { %v3113_v27 = vpop.f32.mrb[60].mxu1  ;;  %v3056_v24 = vpop.f32.mrb[61].mxu0 }
 0x170   :  { %v3057_v30 = vadd.f32 %v3056_v24, %v3055_v26  ;;  %v3114_v31 = vpop.f32.mrb[61].mxu1  ;;  %v3058_v22 = vpop.f32.mrb[62].mxu0 }
 0x171   :  { %v3115_v32 = vadd.f32 %v3114_v31, %v3113_v27  ;;  %v3116_v33 = vpop.f32.mrb[62].mxu1  ;;  %v3059_v34 = vpop.f32.mrb[63].mxu0 }
 0x172   :  { %v2081_v28 = vadd.f32 %v3057_v30, %v4176_v46  ;;  %v3060_v25 = vadd.f32 %v3059_v34, %v3058_v22  ;;  %v3117_v37 = vpop.f32.mrb[63].mxu1 }
 0x173   :  { %v3118_v39 = vadd.f32 %v3117_v37, %v3116_v33 }
 0x174   :  { %v4215_v38 = vadd.f32 %v3115_v32, %v2081_v28  ;;  %v2084_v29 = vadd.f32 %v3060_v25, %v4179_v47 }
 0x176   :  { %v4218_v42 = vadd.f32 %v3118_v39, %v2084_v29  ;;  %v3061_v44 = vpop.f32.mrb[64].mxu0 }
 0x177   :  { %v3119_v45 = vpop.f32.mrb[64].mxu1  ;;  %v3062_v40 = vpop.f32.mrb[65].mxu0 }
 0x178   :  { %v3063_v48 = vadd.f32 %v3062_v40, %v3061_v44  ;;  %v3120_v49 = vpop.f32.mrb[65].mxu1  ;;  %v3064_v41 = vpop.f32.mrb[66].mxu0 }
 0x179   :  { %v3121_v50 = vadd.f32 %v3120_v49, %v3119_v45  ;;  %v3122_v51 = vpop.f32.mrb[66].mxu1  ;;  %v3065_v52 = vpop.f32.mrb[67].mxu0 }
 0x17a   :  { %v2089_v46 = vadd.f32 %v3063_v48, %v4182_v0  ;;  %v3066_v43 = vadd.f32 %v3065_v52, %v3064_v41  ;;  %v3123_v57 = vpop.f32.mrb[67].mxu1 }
 0x17b   :  { %v3124_v58 = vadd.f32 %v3123_v57, %v3122_v51 }
 0x17c   :  { %v4221_v54 = vadd.f32 %v3121_v50, %v2089_v46  ;;  %v2092_v47 = vadd.f32 %v3066_v43, %v4185_v1 }
 0x17e   :  { %v4224_v60 = vadd.f32 %v3124_v58, %v2092_v47  ;;  %v3067_v62 = vpop.f32.mrb[68].mxu0 }
 0x17f   :  { %v3125_v63 = vpop.f32.mrb[68].mxu1  ;;  %v3068_v56 = vpop.f32.mrb[69].mxu0 }
 0x180   :  { %v3069_v2 = vadd.f32 %v3068_v56, %v3067_v62  ;;  %v3126_v3 = vpop.f32.mrb[69].mxu1  ;;  %v3070_v59 = vpop.f32.mrb[70].mxu0 }
 0x181   :  { %v3127_v4 = vadd.f32 %v3126_v3, %v3125_v63  ;;  %v3128_v7 = vpop.f32.mrb[70].mxu1  ;;  %v3071_v9 = vpop.f32.mrb[71].mxu0 }
 0x182   :  { %v2097_v0 = vadd.f32 %v3069_v2, %v4188_v17  ;;  %v3072_v10 = vadd.f32 %v3071_v9, %v3070_v59  ;;  %v3129_v61 = vpop.f32.mrb[71].mxu1 }
 0x183   :  { %v3130_v12 = vadd.f32 %v3129_v61, %v3128_v7 }
 0x184   :  { %v4227_v13 = vadd.f32 %v3127_v4, %v2097_v0  ;;  %v2100_v1 = vadd.f32 %v3072_v10, %v4191_v18 }
 0x186   :  { %v4230_v6 = vadd.f32 %v3130_v12, %v2100_v1  ;;  %v3073_v14 = vpop.f32.mrb[72].mxu0 }
 0x187   :  { %v3131_v15 = vpop.f32.mrb[72].mxu1  ;;  %v3074_v16 = vpop.f32.mrb[73].mxu0 }
 0x188   :  { %v3075_v8 = vadd.f32 %v3074_v16, %v3073_v14  ;;  %v3132_v19 = vpop.f32.mrb[73].mxu1  ;;  %v3076_v20 = vpop.f32.mrb[74].mxu0 }
 0x189   :  { %v3133_v11 = vadd.f32 %v3132_v19, %v3131_v15  ;;  %v3134_v26 = vpop.f32.mrb[74].mxu1  ;;  %v3077_v27 = vpop.f32.mrb[75].mxu0 }
 0x18a   :  { %v2105_v17 = vadd.f32 %v3075_v8, %v4194_v35  ;;  %v3078_v24 = vadd.f32 %v3077_v27, %v3076_v20  ;;  %v3135_v30 = vpop.f32.mrb[75].mxu1 }
 0x18b   :  { %v3136_v31 = vadd.f32 %v3135_v30, %v3134_v26 }
 0x18c   :  { %v4233_v22 = vadd.f32 %v3133_v11, %v2105_v17  ;;  %v2108_v18 = vadd.f32 %v3078_v24, %v4197_v36 }
 0x18e   :  { %v4236_v32 = vadd.f32 %v3136_v31, %v2108_v18  ;;  %v3079_v33 = vpop.f32.mrb[76].mxu0 }
 0x18f   :  { %v3137_v34 = vpop.f32.mrb[76].mxu1  ;;  %v3080_v28 = vpop.f32.mrb[77].mxu0 }
 0x190   :  { %v3081_v25 = vadd.f32 %v3080_v28, %v3079_v33  ;;  %v3138_v37 = vpop.f32.mrb[77].mxu1  ;;  %v3082_v39 = vpop.f32.mrb[78].mxu0 }
 0x191   :  { %v3139_v29 = vadd.f32 %v3138_v37, %v3137_v34  ;;  %v3140_v44 = vpop.f32.mrb[78].mxu1  ;;  %v3083_v45 = vpop.f32.mrb[79].mxu0 }
 0x192   :  { %v2113_v35 = vadd.f32 %v3081_v25, %v4200_v53  ;;  %v3084_v40 = vadd.f32 %v3083_v45, %v3082_v39  ;;  %v3141_v48 = vpop.f32.mrb[79].mxu1 }
 0x193   :  { %v3142_v49 = vadd.f32 %v3141_v48, %v3140_v44 }
 0x194   :  { %v4239_v41 = vadd.f32 %v3139_v29, %v2113_v35  ;;  %v2116_v36 = vadd.f32 %v3084_v40, %v4203_v55 }
 0x196   :  { %v4242_v50 = vadd.f32 %v3142_v49, %v2116_v36  ;;  %v3085_v51 = vpop.f32.mrb[80].mxu0 }
 0x197   :  { %v3143_v52 = vpop.f32.mrb[80].mxu1  ;;  %v3086_v46 = vpop.f32.mrb[81].mxu0 }
 0x198   :  { %v3087_v43 = vadd.f32 %v3086_v46, %v3085_v51  ;;  %v3144_v57 = vpop.f32.mrb[81].mxu1  ;;  %v3088_v58 = vpop.f32.mrb[82].mxu0 }
 0x199   :  { %v3145_v47 = vadd.f32 %v3144_v57, %v3143_v52  ;;  %v3146_v62 = vpop.f32.mrb[82].mxu1  ;;  %v3089_v63 = vpop.f32.mrb[83].mxu0 }
 0x19a   :  { %v2121_v53 = vadd.f32 %v3087_v43, %v4206_v5  ;;  %v3147_v56 = vpop.f32.mrb[83].mxu1 }
 0x19c   :  { %v4245_v2 = vadd.f32 %v3145_v47, %v2121_v53 }
 0x19e   :  { %v3165_v3 = vpop.f32.mrb[84].mxu0 }
 0x19f   :  { %v3223_v59 = vpop.f32.mrb[84].mxu1  ;;  %v3166_v4 = vpop.f32.mrb[85].mxu0 }
 0x1a0   :  { %v3167_v55 = vadd.f32 %v3166_v4, %v3165_v3  ;;  %v3224_v7 = vpop.f32.mrb[85].mxu1  ;;  %v3168_v9 = vpop.f32.mrb[86].mxu0 }
 0x1a1   :  { %v3225_v0 = vadd.f32 %v3224_v7, %v3223_v59  ;;  %v3226_v10 = vpop.f32.mrb[86].mxu1  ;;  %v3169_v61 = vpop.f32.mrb[87].mxu0 }
 0x1a2   :  { %v2249_v12 = vadd.f32 %v3167_v55, %v4209_v21  ;;  %v3170_v1 = vadd.f32 %v3169_v61, %v3168_v9  ;;  %v3227_v14 = vpop.f32.mrb[87].mxu1 }
 0x1a3   :  { %v3228_v15 = vadd.f32 %v3227_v14, %v3226_v10 }
 0x1a4   :  { %v2337_v16 = vadd.f32 %v3225_v0, %v2249_v12  ;;  %v2252_v5 = vadd.f32 %v3170_v1, %v4212_v23 }
 0x1a6   :  { %v2403_v8 = vmul.f32 0.2, %v2337_v16  ;;  %v2340_v19 = vadd.f32 %v3228_v15, %v2252_v5  ;;  %v3171_v20 = vpop.f32.mrb[88].mxu0  ;;  %vm2390_vm0 = vcmp.ge.f32.partialorder %v2337_v16, 0.0 }
 0x1a7   :  { %v3229_v11 = vpop.f32.mrb[88].mxu1  ;;  %v3172_v26 = vpop.f32.mrb[89].mxu0 }
 0x1a8   :  { %vm2391_vm1 = vcmp.ge.f32.partialorder %v2340_v19, 0.0  ;;  %v2404_v27 = vmul.f32 0.2, %v2340_v19  ;;  %v3173_v17 = vadd.f32 %v3172_v26, %v3171_v20  ;;  %v3230_v24 = vpop.f32.mrb[89].mxu1  ;;  %v3174_v30 = vpop.f32.mrb[90].mxu0  ;;  %v2416_v33 = vsel %vm2390_vm0, %v2337_v16, %v2403_v8 }
 0x1a9   :  { %v3231_v31 = vadd.f32 %v3230_v24, %v3229_v11  ;;  %v3232_v18 = vpop.f32.mrb[90].mxu1  ;;  %v3175_v21 = vpop.f32.mrb[91].mxu0 }
 0x1aa   :  { %v2417_v34 = vsel %vm2391_vm1, %v2340_v19, %v2404_v27  ;;  %v2257_v28 = vadd.f32 %v3173_v17, %v4215_v38  ;;  %v3176_v25 = vadd.f32 %v3175_v21, %v3174_v30  ;;  %v3233_v23 = vpop.f32.mrb[91].mxu1 }
 0x1ab   :  { %v2769_v37 = vpack.c.bf16 %v2417_v34, %v2416_v33  ;;  %v3234_v39 = vadd.f32 %v3233_v23, %v3232_v18 }
 0x1ac   :  { %v2345_v29 = vadd.f32 %v3231_v31, %v2257_v28  ;;  %v2260_v44 = vadd.f32 %v3176_v25, %v4218_v42 }
 0x1ad   :  { %2770 = vst [vmem:[%s4284_s3] sm:$0xff] %v2769_v37  }
 0x1ae   :  { %v2405_v45 = vmul.f32 0.2, %v2345_v29  ;;  %v2348_v35 = vadd.f32 %v3234_v39, %v2260_v44  ;;  %v3177_v40 = vpop.f32.mrb[92].mxu0  ;;  %vm2392_vm2 = vcmp.ge.f32.partialorder %v2345_v29, 0.0 }
 0x1af   :  { %v3235_v48 = vpop.f32.mrb[92].mxu1  ;;  %v3178_v49 = vpop.f32.mrb[93].mxu0 }
 0x1b0   :  { %vm2393_vm3 = vcmp.ge.f32.partialorder %v2348_v35, 0.0  ;;  %v2406_v36 = vmul.f32 0.2, %v2348_v35  ;;  %v3179_v38 = vadd.f32 %v3178_v49, %v3177_v40  ;;  %v3236_v51 = vpop.f32.mrb[93].mxu1  ;;  %v3180_v52 = vpop.f32.mrb[94].mxu0  ;;  %v2418_v58 = vsel %vm2392_vm2, %v2345_v29, %v2405_v45 }
 0x1b1   :  { %v3237_v46 = vadd.f32 %v3236_v51, %v3235_v48  ;;  %v3238_v43 = vpop.f32.mrb[94].mxu1  ;;  %v3181_v57 = vpop.f32.mrb[95].mxu0 }
 0x1b2   :  { %v2419_v42 = vsel %vm2393_vm3, %v2348_v35, %v2406_v36  ;;  %v2265_v47 = vadd.f32 %v3179_v38, %v4221_v54  ;;  %v3182_v62 = vadd.f32 %v3181_v57, %v3180_v52  ;;  %v3239_v63 = vpop.f32.mrb[95].mxu1 }
 0x1b3   :  { %v2774_v53 = vpack.c.bf16 %v2419_v42, %v2418_v58  ;;  %v3240_v56 = vadd.f32 %v3239_v63, %v3238_v43 }
 0x1b4   :  { %v2353_v3 = vadd.f32 %v3237_v46, %v2265_v47  ;;  %v2268_v59 = vadd.f32 %v3182_v62, %v4224_v60 }
 0x1b5   :  { %2796 = vst [vmem:[%s4284_s3 + $0x8] sm:$0xff] %v2774_v53  }
 0x1b6   :  { %v2407_v4 = vmul.f32 0.2, %v2353_v3  ;;  %v2356_v55 = vadd.f32 %v3240_v56, %v2268_v59  ;;  %v3183_v7 = vpop.f32.mrb[96].mxu0  ;;  %vm2394_vm4 = vcmp.ge.f32.partialorder %v2353_v3, 0.0 }
 0x1b7   :  { %v3241_v9 = vpop.f32.mrb[96].mxu1  ;;  %v3184_v0 = vpop.f32.mrb[97].mxu0 }
 0x1b8   :  { %vm2395_vm5 = vcmp.ge.f32.partialorder %v2356_v55, 0.0  ;;  %v2408_v10 = vmul.f32 0.2, %v2356_v55  ;;  %v3185_v54 = vadd.f32 %v3184_v0, %v3183_v7  ;;  %v3242_v61 = vpop.f32.mrb[97].mxu1  ;;  %v3186_v12 = vpop.f32.mrb[98].mxu0  ;;  %v2420_v16 = vsel %vm2394_vm4, %v2353_v3, %v2407_v4 }
 0x1b9   :  { %v3243_v1 = vadd.f32 %v3242_v61, %v3241_v9  ;;  %v3244_v14 = vpop.f32.mrb[98].mxu1  ;;  %v3187_v15 = vpop.f32.mrb[99].mxu0 }
 0x1ba   :  { %v2421_v60 = vsel %vm2395_vm5, %v2356_v55, %v2408_v10  ;;  %v2273_v5 = vadd.f32 %v3185_v54, %v4227_v13  ;;  %v3188_v8 = vadd.f32 %v3187_v15, %v3186_v12  ;;  %v3245_v19 = vpop.f32.mrb[99].mxu1 }
 0x1bb   :  { %v2779_v20 = vpack.c.bf16 %v2421_v60, %v2420_v16  ;;  %v3246_v11 = vadd.f32 %v3245_v19, %v3244_v14 }
 0x1bc   :  { %v2361_v26 = vadd.f32 %v3243_v1, %v2273_v5  ;;  %v2276_v27 = vadd.f32 %v3188_v8, %v4230_v6 }
 0x1bd   :  { %2797 = vst [vmem:[%s4284_s3 + $0x10] sm:$0xff] %v2779_v20  }
 0x1be   :  { %v2409_v17 = vmul.f32 0.2, %v2361_v26  ;;  %v2364_v24 = vadd.f32 %v3246_v11, %v2276_v27  ;;  %v3189_v30 = vpop.f32.mrb[100].mxu0  ;;  %vm2396_vm6 = vcmp.ge.f32.partialorder %v2361_v26, 0.0 }
 0x1bf   :  { %v3247_v31 = vpop.f32.mrb[100].mxu1  ;;  %v3190_v18 = vpop.f32.mrb[101].mxu0 }
 0x1c0   :  { %vm2397_vm7 = vcmp.ge.f32.partialorder %v2364_v24, 0.0  ;;  %v2410_v21 = vmul.f32 0.2, %v2364_v24  ;;  %v3191_v13 = vadd.f32 %v3190_v18, %v3189_v30  ;;  %v3248_v33 = vpop.f32.mrb[101].mxu1  ;;  %v3192_v34 = vpop.f32.mrb[102].mxu0  ;;  %v2422_v37 = vsel %vm2396_vm6, %v2361_v26, %v2409_v17 }
 0x1c1   :  { %v3249_v28 = vadd.f32 %v3248_v33, %v3247_v31  ;;  %v3250_v25 = vpop.f32.mrb[102].mxu1  ;;  %v3193_v23 = vpop.f32.mrb[103].mxu0 }
 0x1c2   :  { %v2423_v6 = vsel %vm2397_vm7, %v2364_v24, %v2410_v21  ;;  %v2281_v39 = vadd.f32 %v3191_v13, %v4233_v22  ;;  %v3194_v29 = vadd.f32 %v3193_v23, %v3192_v34  ;;  %v3251_v44 = vpop.f32.mrb[103].mxu1 }
 0x1c3   :  { %v2784_v45 = vpack.c.bf16 %v2423_v6, %v2422_v37  ;;  %v3252_v35 = vadd.f32 %v3251_v44, %v3250_v25 }
 0x1c4   :  { %v2369_v40 = vadd.f32 %v3249_v28, %v2281_v39  ;;  %v2284_v48 = vadd.f32 %v3194_v29, %v4236_v32 }
 0x1c5   :  { %2798 = vst [vmem:[%s4284_s3 + $0x18] sm:$0xff] %v2784_v45  }
 0x1c6   :  { %v2411_v49 = vmul.f32 0.2, %v2369_v40  ;;  %v2372_v36 = vadd.f32 %v3252_v35, %v2284_v48  ;;  %v3195_v38 = vpop.f32.mrb[104].mxu0  ;;  %vm2398_vm8 = vcmp.ge.f32.partialorder %v2369_v40, 0.0 }
 0x1c7   :  { %v3253_v51 = vpop.f32.mrb[104].mxu1  ;;  %v3196_v52 = vpop.f32.mrb[105].mxu0 }
 0x1c8   :  { %vm2399_vm9 = vcmp.ge.f32.partialorder %v2372_v36, 0.0  ;;  %v2412_v46 = vmul.f32 0.2, %v2372_v36  ;;  %v3197_v22 = vadd.f32 %v3196_v52, %v3195_v38  ;;  %v3254_v43 = vpop.f32.mrb[105].mxu1  ;;  %v3198_v57 = vpop.f32.mrb[106].mxu0  ;;  %v2424_v62 = vsel %vm2398_vm8, %v2369_v40, %v2411_v49 }
 0x1c9   :  { %v3255_v58 = vadd.f32 %v3254_v43, %v3253_v51  ;;  %v3256_v42 = vpop.f32.mrb[106].mxu1  ;;  %v3199_v47 = vpop.f32.mrb[107].mxu0 }
 0x1ca   :  { %v2425_v32 = vsel %vm2399_vm9, %v2372_v36, %v2412_v46  ;;  %v2289_v63 = vadd.f32 %v3197_v22, %v4239_v41  ;;  %v3200_v53 = vadd.f32 %v3199_v47, %v3198_v57  ;;  %v3257_v56 = vpop.f32.mrb[107].mxu1 }
 0x1cb   :  { %v2789_v3 = vpack.c.bf16 %v2425_v32, %v2424_v62  ;;  %v3258_v59 = vadd.f32 %v3257_v56, %v3256_v42 }
 0x1cc   :  { %v2377_v4 = vadd.f32 %v3255_v58, %v2289_v63  ;;  %v2292_v55 = vadd.f32 %v3200_v53, %v4242_v50 }
 0x1cd   :  { %2799 = vst [vmem:[%s4284_s3 + $0x20] sm:$0xff] %v2789_v3  }
 0x1ce   :  { %v2413_v7 = vmul.f32 0.2, %v2377_v4  ;;  %v2380_v9 = vadd.f32 %v3258_v59, %v2292_v55  ;;  %v3201_v0 = vpop.f32.mrb[108].mxu0  ;;  %vm2400_vm10 = vcmp.ge.f32.partialorder %v2377_v4, 0.0 }
 0x1cf   :  { %v3259_v10 = vpop.f32.mrb[108].mxu1  ;;  %v3202_v54 = vpop.f32.mrb[109].mxu0 }
 0x1d0   :  { %vm2401_vm11 = vcmp.ge.f32.partialorder %v2380_v9, 0.0  ;;  %v2414_v61 = vmul.f32 0.2, %v2380_v9  ;;  %v3203_v41 = vadd.f32 %v3202_v54, %v3201_v0  ;;  %v3260_v12 = vpop.f32.mrb[109].mxu1  ;;  %v3204_v1 = vpop.f32.mrb[110].mxu0  ;;  %v2426_v60 = vsel %vm2400_vm10, %v2377_v4, %v2413_v7 }
 0x1d1   :  { %v3261_v14 = vadd.f32 %v3260_v12, %v3259_v10  ;;  %v3262_v15 = vpop.f32.mrb[110].mxu1  ;;  %v3205_v16 = vpop.f32.mrb[111].mxu0 }
 0x1d2   :  { %v2427_v50 = vsel %vm2401_vm11, %v2380_v9, %v2414_v61  ;;  %v2297_v5 = vadd.f32 %v3203_v41, %v4245_v2  ;;  %v3263_v8 = vpop.f32.mrb[111].mxu1 }
 0x1d3   :  { %v2794_v19 = vpack.c.bf16 %v2427_v50, %v2426_v60 }
 0x1d4   :  { %v2385_v20 = vadd.f32 %v3261_v14, %v2297_v5 }
 0x1d5   :  { %2800 = vst [vmem:[%s4284_s3 + $0x28] sm:$0xff] %v2794_v19  }
 0x1d6   :  { %vm2402_vm12 = vcmp.ge.f32.partialorder %v2385_v20, 0.0  ;;  %v2415_v11 = vmul.f32 0.2, %v2385_v20 }
 0x1d8   :  { %v2428_v26 = vsel %vm2402_vm12, %v2385_v20, %v2415_v11 }
 0x1d9   :  { %v2765_v27 = vpack.c.bf16 %v2428_v26, %v2428_v26 }
 0x1db   :  { %2494 = vst [vmem:[%s4284_s3 + $0x30] sm:$0x1] %v2765_v27 }

// kernel: vae_encoder_forward.6
= control target key start
LH: loop header
LB: loop body
LE: loop exit
PB: predicated region body
PF: predicated region fallthrough
CT: control target
= control target key end

     0   :  { %s3849_s1 = inlined_call_operand.vmem [shape: bf16[2048,256], index: 1, kind: input, shape index: {}]   ;;  %s3850_s0 = inlined_call_operand.vmem [shape: bf16[18,2048], index: 0, kind: input, shape index: {}]   ;;  %s3851_s2 = inlined_call_operand.vmem [shape: f32[1,256], index: 2, kind: input, shape index: {}]   ;;  %s3852_s3 = inlined_call_operand.vmem [shape: bf16[18,256], index: 3, kind: output, shape index: {}]  }
   0x1   :  { %v2529_v0 = vld [vmem:[%s3849_s1 + $0x4] ss:$8 sps:$4 sm:$0xff]   ;;  %v2533_v2 = vld [vmem:[%s3849_s1] ss:$8 sps:$4 sm:$0xff]   ;;  %v2535_v4 = vld [vmem:[%s3849_s1 + $0x14] ss:$8 sps:$4 sm:$0xff]  }
   0x2   :  { %v2531_v1 = vld [vmem:[%s3849_s1 + $0x404] ss:$8 sps:$4 sm:$0xff]   ;;  %1722 = vmatprep.subr.bf16.mxu1 %v2529_v0  ;;  %v2534_v3 = vld [vmem:[%s3849_s1 + $0x400] ss:$8 sps:$4 sm:$0xff]   ;;  %v2537_v5 = vld [vmem:[%s3849_s1 + $0x414] ss:$8 sps:$4 sm:$0xff]  }
   0x3   :  { %1926 = vmatprep.subr.bf16.mxu0 %v2531_v1  ;;  %1723 = vmatpush1.bf16.msra.mxu1 %v2533_v2  ;;  %v2539_v6 = vld [vmem:[%s3849_s1 + $0x10] ss:$8 sps:$4 sm:$0xff]   ;;  %v2541_v8 = vld [vmem:[%s3849_s1 + $0x24] ss:$8 sps:$4 sm:$0xff]   ;;  %v2545_v10 = vld [vmem:[%s3849_s1 + $0x20] ss:$8 sps:$4 sm:$0xff]  }
   0x4   :  { %1927 = vmatpush1.bf16.msra.mxu0 %v2534_v3  ;;  %1724 = vmatprep.subr.bf16.mxu1 %v2535_v4  ;;  %v2540_v7 = vld [vmem:[%s3849_s1 + $0x410] ss:$8 sps:$4 sm:$0xff]   ;;  %v2543_v9 = vld [vmem:[%s3849_s1 + $0x424] ss:$8 sps:$4 sm:$0xff]   ;;  %v2546_v11 = vld [vmem:[%s3849_s1 + $0x420] ss:$8 sps:$4 sm:$0xff]  }
   0x5   :  { %1928 = vmatprep.subr.bf16.mxu0 %v2537_v5  ;;  %v2547_v12 = vld [vmem:[%s3849_s1 + $0x34] ss:$8 sps:$4 sm:$0xff]   ;;  %v2551_v14 = vld [vmem:[%s3849_s1 + $0x30] ss:$8 sps:$4 sm:$0xff]   ;;  %v2553_v16 = vld [vmem:[%s3849_s1 + $0x44] ss:$8 sps:$4 sm:$0xff]  }
   0x6   :  { %v2549_v13 = vld [vmem:[%s3849_s1 + $0x434] ss:$8 sps:$4 sm:$0xff]   ;;  %v2552_v15 = vld [vmem:[%s3849_s1 + $0x430] ss:$8 sps:$4 sm:$0xff]   ;;  %v2555_v17 = vld [vmem:[%s3849_s1 + $0x444] ss:$8 sps:$4 sm:$0xff]  }
   0x7   :  { %1725 = vmatpush1.bf16.msra.mxu1 %v2539_v6  ;;  %v2557_v18 = vld [vmem:[%s3849_s1 + $0x40] ss:$8 sps:$4 sm:$0xff]   ;;  %v2559_v20 = vld [vmem:[%s3849_s1 + $0x54] ss:$8 sps:$4 sm:$0xff]   ;;  %v2563_v22 = vld [vmem:[%s3849_s1 + $0x50] ss:$8 sps:$4 sm:$0xff]  }
   0x8   :  { %1929 = vmatpush1.bf16.msra.mxu0 %v2540_v7  ;;  %1726 = vmatprep.subr.bf16.mxu1 %v2541_v8  ;;  %v2558_v19 = vld [vmem:[%s3849_s1 + $0x440] ss:$8 sps:$4 sm:$0xff]   ;;  %v2561_v21 = vld [vmem:[%s3849_s1 + $0x454] ss:$8 sps:$4 sm:$0xff]   ;;  %v2564_v23 = vld [vmem:[%s3849_s1 + $0x450] ss:$8 sps:$4 sm:$0xff]  }
   0x9   :  { %1930 = vmatprep.subr.bf16.mxu0 %v2543_v9  ;;  %v2565_v24 = vld [vmem:[%s3849_s1 + $0x64] ss:$8 sps:$4 sm:$0xff]   ;;  %v2569_v26 = vld [vmem:[%s3849_s1 + $0x60] ss:$8 sps:$4 sm:$0xff]   ;;  %v2571_v28 = vld [vmem:[%s3849_s1 + $0x74] ss:$8 sps:$4 sm:$0xff]  }
   0xa   :  { %v2567_v25 = vld [vmem:[%s3849_s1 + $0x464] ss:$8 sps:$4 sm:$0xff]   ;;  %v2570_v27 = vld [vmem:[%s3849_s1 + $0x460] ss:$8 sps:$4 sm:$0xff]   ;;  %v2573_v29 = vld [vmem:[%s3849_s1 + $0x474] ss:$8 sps:$4 sm:$0xff]  }
   0xb   :  { %1727 = vmatpush1.bf16.msra.mxu1 %v2545_v10  ;;  %v2575_v30 = vld [vmem:[%s3849_s1 + $0x70] ss:$8 sps:$4 sm:$0xff]   ;;  %v2577_v32 = vld [vmem:[%s3849_s1 + $0x84] ss:$8 sps:$4 sm:$0xff]   ;;  %v2581_v34 = vld [vmem:[%s3849_s1 + $0x80] ss:$8 sps:$4 sm:$0xff]  }
   0xc   :  { %1931 = vmatpush1.bf16.msra.mxu0 %v2546_v11  ;;  %1728 = vmatprep.subr.bf16.mxu1 %v2547_v12  ;;  %v2576_v31 = vld [vmem:[%s3849_s1 + $0x470] ss:$8 sps:$4 sm:$0xff]   ;;  %v2579_v33 = vld [vmem:[%s3849_s1 + $0x484] ss:$8 sps:$4 sm:$0xff]   ;;  %v2582_v35 = vld [vmem:[%s3849_s1 + $0x480] ss:$8 sps:$4 sm:$0xff]  }
   0xd   :  { %1932 = vmatprep.subr.bf16.mxu0 %v2549_v13  ;;  %v2583_v36 = vld [vmem:[%s3849_s1 + $0x94] ss:$8 sps:$4 sm:$0xff]   ;;  %v2587_v38 = vld [vmem:[%s3849_s1 + $0x90] ss:$8 sps:$4 sm:$0xff]   ;;  %v2589_v40 = vld [vmem:[%s3849_s1 + $0xa4] ss:$8 sps:$4 sm:$0xff]  }
   0xe   :  { %v2585_v37 = vld [vmem:[%s3849_s1 + $0x494] ss:$8 sps:$4 sm:$0xff]   ;;  %v2588_v39 = vld [vmem:[%s3849_s1 + $0x490] ss:$8 sps:$4 sm:$0xff]   ;;  %v2591_v41 = vld [vmem:[%s3849_s1 + $0x4a4] ss:$8 sps:$4 sm:$0xff]  }
   0xf   :  { %1729 = vmatpush1.bf16.msra.mxu1 %v2551_v14  ;;  %v2593_v42 = vld [vmem:[%s3849_s1 + $0xa0] ss:$8 sps:$4 sm:$0xff]   ;;  %v2595_v44 = vld [vmem:[%s3849_s1 + $0xb4] ss:$8 sps:$4 sm:$0xff]   ;;  %v2599_v46 = vld [vmem:[%s3849_s1 + $0xb0] ss:$8 sps:$4 sm:$0xff]  }
  0x10   :  { %1933 = vmatpush1.bf16.msra.mxu0 %v2552_v15  ;;  %1730 = vmatprep.subr.bf16.mxu1 %v2553_v16  ;;  %v2594_v43 = vld [vmem:[%s3849_s1 + $0x4a0] ss:$8 sps:$4 sm:$0xff]   ;;  %v2597_v45 = vld [vmem:[%s3849_s1 + $0x4b4] ss:$8 sps:$4 sm:$0xff]   ;;  %v2600_v47 = vld [vmem:[%s3849_s1 + $0x4b0] ss:$8 sps:$4 sm:$0xff]  }
  0x11   :  { %1934 = vmatprep.subr.bf16.mxu0 %v2555_v17  ;;  %v14_v48 = vld [vmem:[%s3850_s0] sm:$0xff]  ;;  %v2607_v58 = vld [vmem:[%s3849_s1 + $0xd4] ss:$8 sps:$4 sm:$0xff]   ;;  %v2611_v60 = vld [vmem:[%s3849_s1 + $0xd0] ss:$8 sps:$4 sm:$0xff]  }
  0x12   :  { %v22_v49 = vld [vmem:[%s3850_s0 + $0x40] sm:$0xff]  ;;  %v2609_v59 = vld [vmem:[%s3849_s1 + $0x4d4] ss:$8 sps:$4 sm:$0xff]   ;;  %v2612_v61 = vld [vmem:[%s3849_s1 + $0x4d0] ss:$8 sps:$4 sm:$0xff]  }
  0x13   :  { %1731 = vmatpush1.bf16.msra.mxu1 %v2557_v18  ;;  %v2601_v50 = vld [vmem:[%s3849_s1 + $0xc4] ss:$8 sps:$4 sm:$0xff]   ;;  %v2176_v52 = vcombine.high %v14_v48, %v22_v49  ;;  %v2605_v56 = vld [vmem:[%s3849_s1 + $0xc0] ss:$8 sps:$4 sm:$0xff]   ;;  %v2619_v2 = vld [vmem:[%s3849_s1 + $0xf4] ss:$8 sps:$4 sm:$0xff]   ;;  %v2175_v8 = vcombine.low %v14_v48, %v22_v49 }
  0x14   :  { %1935 = vmatpush1.bf16.msra.mxu0 %v2558_v19  ;;  %1732 = vmatprep.subr.bf16.mxu1 %v2559_v20  ;;  %v2603_v51 = vld [vmem:[%s3849_s1 + $0x4c4] ss:$8 sps:$4 sm:$0xff]   ;;  %v2606_v57 = vld [vmem:[%s3849_s1 + $0x4c0] ss:$8 sps:$4 sm:$0xff]   ;;  %v2621_v3 = vld [vmem:[%s3849_s1 + $0x4f4] ss:$8 sps:$4 sm:$0xff]  }
  0x15   :  { %1936 = vmatprep.subr.bf16.mxu0 %v2561_v21  ;;  %v18_v53 = vld [vmem:[%s3850_s0 + $0x20] sm:$0xff]  ;;  %1754 = vmatprep.mubr.bf16.mxu1 %v2176_v52  ;;  %v2623_v4 = vld [vmem:[%s3849_s1 + $0xf0] ss:$8 sps:$4 sm:$0xff]   ;;  %v2633_v12 = vld [vmem:[%s3849_s1 + $0x114] ss:$8 sps:$4 sm:$0xff]  }
  0x16   :  { %v26_v54 = vld [vmem:[%s3850_s0 + $0x60] sm:$0xff]  ;;  %v2624_v5 = vld [vmem:[%s3849_s1 + $0x4f0] ss:$8 sps:$4 sm:$0xff]   ;;  %v2636_v13 = vld [vmem:[%s3849_s1 + $0x514] ss:$8 sps:$4 sm:$0xff]  }
  0x17   :  { %1733 = vmatpush1.bf16.msra.mxu1 %v2563_v22  ;;  %v2184_v55 = vcombine.high %v18_v53, %v26_v54  ;;  %v2613_v62 = vld [vmem:[%s3849_s1 + $0xe4] ss:$8 sps:$4 sm:$0xff]   ;;  %v2617_v0 = vld [vmem:[%s3849_s1 + $0xe0] ss:$8 sps:$4 sm:$0xff]   ;;  %v2183_v10 = vcombine.low %v18_v53, %v26_v54  ;;  %v2631_v14 = vld [vmem:[%s3849_s1 + $0x110] ss:$8 sps:$4 sm:$0xff]  }
  0x18   :  { %1937 = vmatpush1.bf16.msra.mxu0 %v2564_v23  ;;  %1734 = vmatprep.subr.bf16.mxu1 %v2565_v24  ;;  %v2615_v63 = vld [vmem:[%s3849_s1 + $0x4e4] ss:$8 sps:$4 sm:$0xff]   ;;  %v2618_v1 = vld [vmem:[%s3849_s1 + $0x4e0] ss:$8 sps:$4 sm:$0xff]   ;;  %v2634_v15 = vld [vmem:[%s3849_s1 + $0x510] ss:$8 sps:$4 sm:$0xff]  }
  0x19   :  { %1938 = vmatprep.subr.bf16.mxu0 %v2567_v25  ;;  %1958 = vmatprep.mubr.bf16.mxu0 %v2184_v55  ;;  %v2627_v6 = vld [vmem:[%s3849_s1 + $0x104] ss:$8 sps:$4 sm:$0xff]   ;;  %v2625_v9 = vld [vmem:[%s3849_s1 + $0x100] ss:$8 sps:$4 sm:$0xff]   ;;  %v2645_v20 = vld [vmem:[%s3849_s1 + $0x134] ss:$8 sps:$4 sm:$0xff]  }
  0x1a   :  { %v2630_v7 = vld [vmem:[%s3849_s1 + $0x504] ss:$8 sps:$4 sm:$0xff]   ;;  %v2628_v11 = vld [vmem:[%s3849_s1 + $0x500] ss:$8 sps:$4 sm:$0xff]   ;;  %v2648_v21 = vld [vmem:[%s3849_s1 + $0x534] ss:$8 sps:$4 sm:$0xff]  }
  0x1b   :  { %1735 = vmatpush1.bf16.msra.mxu1 %v2569_v26  ;;  %v2639_v16 = vld [vmem:[%s3849_s1 + $0x124] ss:$8 sps:$4 sm:$0xff]   ;;  %v2637_v18 = vld [vmem:[%s3849_s1 + $0x120] ss:$8 sps:$4 sm:$0xff]   ;;  %v2643_v22 = vld [vmem:[%s3849_s1 + $0x130] ss:$8 sps:$4 sm:$0xff]  }
  0x1c   :  { %1939 = vmatpush1.bf16.msra.mxu0 %v2570_v27  ;;  %1736 = vmatprep.subr.bf16.mxu1 %v2571_v28  ;;  %v2642_v17 = vld [vmem:[%s3849_s1 + $0x524] ss:$8 sps:$4 sm:$0xff]   ;;  %v2640_v19 = vld [vmem:[%s3849_s1 + $0x520] ss:$8 sps:$4 sm:$0xff]   ;;  %v2646_v23 = vld [vmem:[%s3849_s1 + $0x530] ss:$8 sps:$4 sm:$0xff]  }
  0x1d   :  { %1940 = vmatprep.subr.bf16.mxu0 %v2573_v29  ;;  %v2651_v24 = vld [vmem:[%s3849_s1 + $0x144] ss:$8 sps:$4 sm:$0xff]   ;;  %v2649_v26 = vld [vmem:[%s3849_s1 + $0x140] ss:$8 sps:$4 sm:$0xff]   ;;  %v2657_v28 = vld [vmem:[%s3849_s1 + $0x154] ss:$8 sps:$4 sm:$0xff]  }
  0x1e   :  { %v2654_v25 = vld [vmem:[%s3849_s1 + $0x544] ss:$8 sps:$4 sm:$0xff]   ;;  %v2652_v27 = vld [vmem:[%s3849_s1 + $0x540] ss:$8 sps:$4 sm:$0xff]   ;;  %v2660_v29 = vld [vmem:[%s3849_s1 + $0x554] ss:$8 sps:$4 sm:$0xff]  }
  0x1f   :  { %1737 = vmatpush1.bf16.msra.mxu1 %v2575_v30  ;;  %v30_v30 = vld [vmem:[%s3850_s0 + $0x80] sm:$0x11]  ;;  %v3269_v48 = vld [vmem:[%s3850_s0 + $0x68] sm:$0xff] }
  0x20   :  { %1941 = vmatpush1.bf16.msra.mxu0 %v2576_v31  ;;  %1738 = vmatprep.subr.bf16.mxu1 %v2577_v32  ;;  %v2192_v31 = vcombine.high %v30_v30, %v30_v30  ;;  %v34_v32 = vld [vmem:[%s3850_s0 + $0xa0] sm:$0x11] }
  0x21   :  { %1942 = vmatprep.subr.bf16.mxu0 %v2579_v33  ;;  %v2191_v33 = vcombine.low %v30_v30, %v30_v30  ;;  %v2675_v52 = vld [vmem:[%s3849_s1 + $0x184] ss:$8 sps:$4 sm:$0xff]   ;;  %v2673_v54 = vld [vmem:[%s3849_s1 + $0x180] ss:$8 sps:$4 sm:$0xff]  }
  0x22   :  { %v2678_v53 = vld [vmem:[%s3849_s1 + $0x584] ss:$8 sps:$4 sm:$0xff]   ;;  %v2676_v55 = vld [vmem:[%s3849_s1 + $0x580] ss:$8 sps:$4 sm:$0xff]  }
  0x23   :  { %1739 = vmatpush1.bf16.msra.mxu1 %v2581_v34  ;;  %v2655_v34 = vld [vmem:[%s3849_s1 + $0x150] ss:$8 sps:$4 sm:$0xff]  }
  0x24   :  { %1943 = vmatpush1.bf16.msra.mxu0 %v2582_v35  ;;  %1740 = vmatprep.subr.bf16.mxu1 %v2583_v36  ;;  %v2658_v35 = vld [vmem:[%s3849_s1 + $0x550] ss:$8 sps:$4 sm:$0xff]   ;;  %v2200_v36 = vcombine.high %v34_v32, %v34_v32 }
  0x25   :  { %1944 = vmatprep.subr.bf16.mxu0 %v2585_v37  ;;  %v2199_v37 = vcombine.low %v34_v32, %v34_v32  ;;  %v2731_v32 = vld [vmem:[%s3849_s1 + $0x210] ss:$8 sps:$4 sm:$0xff]  }
  0x27   :  { %1741 = vmatpush1.bf16.msra.mxu1 %v2587_v38  ;;  %v2663_v38 = vld [vmem:[%s3849_s1 + $0x164] ss:$8 sps:$4 sm:$0xff]  }
  0x28   :  { %1945 = vmatpush1.bf16.msra.mxu0 %v2588_v39  ;;  %1742 = vmatprep.subr.bf16.mxu1 %v2589_v40  ;;  %v2666_v39 = vld [vmem:[%s3849_s1 + $0x564] ss:$8 sps:$4 sm:$0xff]   ;;  %v2661_v40 = vld [vmem:[%s3849_s1 + $0x160] ss:$8 sps:$4 sm:$0xff]  }
  0x29   :  { %1946 = vmatprep.subr.bf16.mxu0 %v2591_v41  ;;  %v2664_v41 = vld [vmem:[%s3849_s1 + $0x560] ss:$8 sps:$4 sm:$0xff]  }
  0x2b   :  { %1743 = vmatpush1.bf16.msra.mxu1 %v2593_v42  ;;  %v3246_v42 = vld [vmem:[%s3850_s0 + $0x8] sm:$0xff] }
  0x2c   :  { %1947 = vmatpush1.bf16.msra.mxu0 %v2594_v43  ;;  %1744 = vmatprep.subr.bf16.mxu1 %v2595_v44  ;;  %v3251_v43 = vld [vmem:[%s3850_s0 + $0x48] sm:$0xff]  ;;  %v2669_v44 = vld [vmem:[%s3849_s1 + $0x174] ss:$8 sps:$4 sm:$0xff]  }
  0x2d   :  { %1948 = vmatprep.subr.bf16.mxu0 %v2597_v45  ;;  %v2178_v45 = vcombine.high %v3246_v42, %v3251_v43 }
  0x2f   :  { %1745 = vmatpush1.bf16.msra.mxu1 %v2599_v46  ;;  %v2672_v46 = vld [vmem:[%s3849_s1 + $0x574] ss:$8 sps:$4 sm:$0xff]  }
  0x30   :  { %1949 = vmatpush1.bf16.msra.mxu0 %v2600_v47  ;;  %1746 = vmatprep.subr.bf16.mxu1 %v2601_v50  ;;  %v3264_v47 = vld [vmem:[%s3850_s0 + $0x28] sm:$0xff]  ;;  %v2667_v50 = vld [vmem:[%s3849_s1 + $0x170] ss:$8 sps:$4 sm:$0xff]  }
  0x31   :  { %1950 = vmatprep.subr.bf16.mxu0 %v2603_v51  ;;  %v2186_v49 = vcombine.high %v3264_v47, %v3269_v48  ;;  %v2670_v51 = vld [vmem:[%s3849_s1 + $0x570] ss:$8 sps:$4 sm:$0xff]  }
  0x33   :  { %1747 = vmatpush1.bf16.msra.mxu1 %v2605_v56  ;;  %v2681_v56 = vld [vmem:[%s3849_s1 + $0x194] ss:$8 sps:$4 sm:$0xff]  }
  0x34   :  { %1951 = vmatpush1.bf16.msra.mxu0 %v2606_v57  ;;  %1748 = vmatprep.subr.bf16.mxu1 %v2607_v58  ;;  %v2684_v57 = vld [vmem:[%s3849_s1 + $0x594] ss:$8 sps:$4 sm:$0xff]   ;;  %v2679_v58 = vld [vmem:[%s3849_s1 + $0x190] ss:$8 sps:$4 sm:$0xff]  }
  0x35   :  { %1952 = vmatprep.subr.bf16.mxu0 %v2609_v59  ;;  %v2682_v59 = vld [vmem:[%s3849_s1 + $0x590] ss:$8 sps:$4 sm:$0xff]  }
  0x37   :  { %1749 = vmatpush1.bf16.msra.mxu1 %v2611_v60  ;;  %v2687_v60 = vld [vmem:[%s3849_s1 + $0x1a4] ss:$8 sps:$4 sm:$0xff]  }
  0x38   :  { %1953 = vmatpush1.bf16.msra.mxu0 %v2612_v61  ;;  %1750 = vmatprep.subr.bf16.mxu1 %v2613_v62  ;;  %v2690_v61 = vld [vmem:[%s3849_s1 + $0x5a4] ss:$8 sps:$4 sm:$0xff]   ;;  %v2685_v62 = vld [vmem:[%s3849_s1 + $0x1a0] ss:$8 sps:$4 sm:$0xff]  }
  0x39   :  { %1954 = vmatprep.subr.bf16.mxu0 %v2615_v63  ;;  %v2688_v63 = vld [vmem:[%s3849_s1 + $0x5a0] ss:$8 sps:$4 sm:$0xff]  }
  0x3b   :  { %1751 = vmatpush1.bf16.msra.mxu1 %v2617_v0  ;;  %v2693_v0 = vld [vmem:[%s3849_s1 + $0x1b4] ss:$8 sps:$4 sm:$0xff]  }
  0x3c   :  { %1955 = vmatpush1.bf16.msra.mxu0 %v2618_v1  ;;  %1752 = vmatprep.subr.bf16.mxu1 %v2619_v2  ;;  %v2696_v1 = vld [vmem:[%s3849_s1 + $0x5b4] ss:$8 sps:$4 sm:$0xff]   ;;  %v2691_v2 = vld [vmem:[%s3849_s1 + $0x1b0] ss:$8 sps:$4 sm:$0xff]  }
  0x3d   :  { %1956 = vmatprep.subr.bf16.mxu0 %v2621_v3  ;;  %v2694_v3 = vld [vmem:[%s3849_s1 + $0x5b0] ss:$8 sps:$4 sm:$0xff]  }
  0x3f   :  { %1753 = vmatpush1.bf16.msra.mxu1 %v2623_v4  ;;  %v2699_v4 = vld [vmem:[%s3849_s1 + $0x1c4] ss:$8 sps:$4 sm:$0xff]  }
  0x40   :  { %1957 = vmatpush1.bf16.msra.mxu0 %v2624_v5  ;;  %1773 = vmatprep.subr.bf16.mxu1 %v2627_v6  ;;  %v2702_v5 = vld [vmem:[%s3849_s1 + $0x5c4] ss:$8 sps:$4 sm:$0xff]   ;;  %v2697_v6 = vld [vmem:[%s3849_s1 + $0x1c0] ss:$8 sps:$4 sm:$0xff]  }
  0x41   :  { %1977 = vmatprep.subr.bf16.mxu0 %v2630_v7  ;;  %v2700_v7 = vld [vmem:[%s3849_s1 + $0x5c0] ss:$8 sps:$4 sm:$0xff]  }
  0x42   :  { %1755 = vmatmul.mubr.bf16.vlgmr.msra.gmra.mrb[0].mxu1 %v2175_v8  ;;  %v2705_v8 = vld [vmem:[%s3849_s1 + $0x1d4] ss:$8 sps:$4 sm:$0xff]  }
  0x43   :  { %1959 = vmatmul.mubr.bf16.vlgmr.msra.gmra.mrb[0].mxu0 %v2183_v10  ;;  %1774 = vmatpush1.bf16.msra.mxu1 %v2625_v9  ;;  %v2708_v9 = vld [vmem:[%s3849_s1 + $0x5d4] ss:$8 sps:$4 sm:$0xff]   ;;  %v2703_v10 = vld [vmem:[%s3849_s1 + $0x1d0] ss:$8 sps:$4 sm:$0xff]  }
  0x44   :  { %1978 = vmatpush1.bf16.msra.mxu0 %v2628_v11  ;;  %1775 = vmatprep.subr.bf16.mxu1 %v2633_v12  ;;  %v2706_v11 = vld [vmem:[%s3849_s1 + $0x5d0] ss:$8 sps:$4 sm:$0xff]   ;;  %v2712_v12 = vld [vmem:[%s3849_s1 + $0x1e4] ss:$8 sps:$4 sm:$0xff]  }
  0x45   :  { %1979 = vmatprep.subr.bf16.mxu0 %v2636_v13  ;;  %1764 = vmatprep.mubr.bf16.mxu1 %v2192_v31  ;;  %v2716_v13 = vld [vmem:[%s3849_s1 + $0x5e4] ss:$8 sps:$4 sm:$0xff]  }
  0x46   :  { %1968 = vmatprep.mubr.bf16.mxu0 %v2200_v36  ;;  %v2737_v36 = vld [vmem:[%s3849_s1 + $0x220] ss:$8 sps:$4 sm:$0xff]  }
  0x47   :  { %1776 = vmatpush1.bf16.msra.mxu1 %v2631_v14  ;;  %v2710_v14 = vld [vmem:[%s3849_s1 + $0x1e0] ss:$8 sps:$4 sm:$0xff]  }
  0x48   :  { %1980 = vmatpush1.bf16.msra.mxu0 %v2634_v15  ;;  %1777 = vmatprep.subr.bf16.mxu1 %v2639_v16  ;;  %v2714_v15 = vld [vmem:[%s3849_s1 + $0x5e0] ss:$8 sps:$4 sm:$0xff]   ;;  %v2721_v16 = vld [vmem:[%s3849_s1 + $0x1f4] ss:$8 sps:$4 sm:$0xff]  }
  0x49   :  { %1981 = vmatprep.subr.bf16.mxu0 %v2642_v17  ;;  %v2724_v17 = vld [vmem:[%s3849_s1 + $0x5f4] ss:$8 sps:$4 sm:$0xff]  }
  0x4a   :  { %1765 = vmatmul.mubr.bf16.gmra.mrb[4].mxu1 %v2191_v33  ;;  %v2734_v33 = vld [vmem:[%s3849_s1 + $0x610] ss:$8 sps:$4 sm:$0xff]  }
  0x4b   :  { %1778 = vmatpush1.bf16.msra.mxu1 %v2637_v18  ;;  %1969 = vmatmul.mubr.bf16.gmra.mrb[4].mxu0 %v2199_v37  ;;  %v2719_v18 = vld [vmem:[%s3849_s1 + $0x1f0] ss:$8 sps:$4 sm:$0xff]   ;;  %v2740_v37 = vld [vmem:[%s3849_s1 + $0x620] ss:$8 sps:$4 sm:$0xff]  }
  0x4c   :  { %1982 = vmatpush1.bf16.msra.mxu0 %v2640_v19  ;;  %1779 = vmatprep.subr.bf16.mxu1 %v2645_v20  ;;  %v2722_v19 = vld [vmem:[%s3849_s1 + $0x5f0] ss:$8 sps:$4 sm:$0xff]   ;;  %v2727_v20 = vld [vmem:[%s3849_s1 + $0x204] ss:$8 sps:$4 sm:$0xff]  }
  0x4d   :  { %1983 = vmatprep.subr.bf16.mxu0 %v2648_v21  ;;  %1805 = vmatprep.mubr.bf16.mxu1 %v2178_v45  ;;  %v2730_v21 = vld [vmem:[%s3849_s1 + $0x604] ss:$8 sps:$4 sm:$0xff]   ;;  %v2748_v45 = vld [vmem:[%s3849_s1 + $0x634] ss:$8 sps:$4 sm:$0xff]  }
  0x4e   :  { %2009 = vmatprep.mubr.bf16.mxu0 %v2186_v49  ;;  %v2746_v49 = vld [vmem:[%s3849_s1 + $0x630] ss:$8 sps:$4 sm:$0xff]  }
  0x4f   :  { %1780 = vmatpush1.bf16.msra.mxu1 %v2643_v22  ;;  %v2725_v22 = vld [vmem:[%s3849_s1 + $0x200] ss:$8 sps:$4 sm:$0xff]  }
  0x50   :  { %1984 = vmatpush1.bf16.msra.mxu0 %v2646_v23  ;;  %1781 = vmatprep.subr.bf16.mxu1 %v2651_v24  ;;  %v2177_v23 = vcombine.low %v3246_v42, %v3251_v43  ;;  %v2185_v24 = vcombine.low %v3264_v47, %v3269_v48  ;;  %v3434_v42 = vld [vmem:[%s3850_s0 + $0x30] sm:$0xff] }
  0x51   :  { %1985 = vmatprep.subr.bf16.mxu0 %v2654_v25  ;;  %v2728_v25 = vld [vmem:[%s3849_s1 + $0x600] ss:$8 sps:$4 sm:$0xff]   ;;  %v3439_v43 = vld [vmem:[%s3850_s0 + $0x70] sm:$0xff] }
  0x52   :  { %v2188_v47 = vcombine.high %v3434_v42, %v3439_v43  ;;  %v2743_v48 = vld [vmem:[%s3849_s1 + $0x230] ss:$8 sps:$4 sm:$0xff]  }
  0x53   :  { %1782 = vmatpush1.bf16.msra.mxu1 %v2649_v26  ;;  %v31_v26 = vld [vmem:[%s3850_s0 + $0x88] sm:$0x11] }
  0x54   :  { %1986 = vmatpush1.bf16.msra.mxu0 %v2652_v27  ;;  %1783 = vmatprep.subr.bf16.mxu1 %v2657_v28  ;;  %v35_v27 = vld [vmem:[%s3850_s0 + $0xa8] sm:$0x11]  ;;  %v2733_v28 = vld [vmem:[%s3849_s1 + $0x214] ss:$8 sps:$4 sm:$0xff]   ;;  %v2194_v30 = vcombine.high %v31_v26, %v31_v26 }
  0x55   :  { %1987 = vmatprep.subr.bf16.mxu0 %v2660_v29  ;;  %v2736_v29 = vld [vmem:[%s3849_s1 + $0x614] ss:$8 sps:$4 sm:$0xff]   ;;  %v2202_v31 = vcombine.high %v35_v27, %v35_v27 }
  0x57   :  { %1784 = vmatpush1.bf16.msra.mxu1 %v2655_v34  ;;  %v2739_v34 = vld [vmem:[%s3849_s1 + $0x224] ss:$8 sps:$4 sm:$0xff]  }
  0x58   :  { %1988 = vmatpush1.bf16.msra.mxu0 %v2658_v35  ;;  %1785 = vmatprep.subr.bf16.mxu1 %v2663_v38  ;;  %v2742_v35 = vld [vmem:[%s3849_s1 + $0x624] ss:$8 sps:$4 sm:$0xff]   ;;  %v3424_v38 = vld [vmem:[%s3850_s0 + $0x10] sm:$0xff] }
  0x59   :  { %1989 = vmatprep.subr.bf16.mxu0 %v2666_v39  ;;  %v3429_v39 = vld [vmem:[%s3850_s0 + $0x50] sm:$0xff] }
  0x5b   :  { %1786 = vmatpush1.bf16.msra.mxu1 %v2661_v40  ;;  %v2193_v40 = vcombine.low %v31_v26, %v31_v26  ;;  %v2812_v26 = vld [vmem:[%s3849_s1 + $0x2e4] ss:$8 sps:$4 sm:$0xff]  }
  0x5c   :  { %1990 = vmatpush1.bf16.msra.mxu0 %v2664_v41  ;;  %1787 = vmatprep.subr.bf16.mxu1 %v2669_v44  ;;  %v2201_v41 = vcombine.low %v35_v27, %v35_v27  ;;  %v2745_v44 = vld [vmem:[%s3849_s1 + $0x234] ss:$8 sps:$4 sm:$0xff]   ;;  %v2816_v27 = vld [vmem:[%s3849_s1 + $0x6e4] ss:$8 sps:$4 sm:$0xff]  }
  0x5d   :  { %1991 = vmatprep.subr.bf16.mxu0 %v2672_v46  ;;  %v2180_v46 = vcombine.high %v3424_v38, %v3429_v39 }
  0x5f   :  { %1788 = vmatpush1.bf16.msra.mxu1 %v2667_v50  ;;  %v2751_v50 = vld [vmem:[%s3849_s1 + $0x244] ss:$8 sps:$4 sm:$0xff]  }
  0x60   :  { %1992 = vmatpush1.bf16.msra.mxu0 %v2670_v51  ;;  %1789 = vmatprep.subr.bf16.mxu1 %v2675_v52  ;;  %v2754_v51 = vld [vmem:[%s3849_s1 + $0x644] ss:$8 sps:$4 sm:$0xff]   ;;  %v2749_v52 = vld [vmem:[%s3849_s1 + $0x240] ss:$8 sps:$4 sm:$0xff]  }
  0x61   :  { %1993 = vmatprep.subr.bf16.mxu0 %v2678_v53  ;;  %v2752_v53 = vld [vmem:[%s3849_s1 + $0x640] ss:$8 sps:$4 sm:$0xff]  }
  0x63   :  { %1790 = vmatpush1.bf16.msra.mxu1 %v2673_v54  ;;  %v2757_v54 = vld [vmem:[%s3849_s1 + $0x254] ss:$8 sps:$4 sm:$0xff]  }
  0x64   :  { %1994 = vmatpush1.bf16.msra.mxu0 %v2676_v55  ;;  %1791 = vmatprep.subr.bf16.mxu1 %v2681_v56  ;;  %v2760_v55 = vld [vmem:[%s3849_s1 + $0x654] ss:$8 sps:$4 sm:$0xff]   ;;  %v2755_v56 = vld [vmem:[%s3849_s1 + $0x250] ss:$8 sps:$4 sm:$0xff]  }
  0x65   :  { %1995 = vmatprep.subr.bf16.mxu0 %v2684_v57  ;;  %v2758_v57 = vld [vmem:[%s3849_s1 + $0x650] ss:$8 sps:$4 sm:$0xff]  }
  0x67   :  { %1792 = vmatpush1.bf16.msra.mxu1 %v2679_v58  ;;  %v2763_v58 = vld [vmem:[%s3849_s1 + $0x264] ss:$8 sps:$4 sm:$0xff]  }
  0x68   :  { %1996 = vmatpush1.bf16.msra.mxu0 %v2682_v59  ;;  %1793 = vmatprep.subr.bf16.mxu1 %v2687_v60  ;;  %v2766_v59 = vld [vmem:[%s3849_s1 + $0x664] ss:$8 sps:$4 sm:$0xff]   ;;  %v2761_v60 = vld [vmem:[%s3849_s1 + $0x260] ss:$8 sps:$4 sm:$0xff]  }
  0x69   :  { %1997 = vmatprep.subr.bf16.mxu0 %v2690_v61  ;;  %v2764_v61 = vld [vmem:[%s3849_s1 + $0x660] ss:$8 sps:$4 sm:$0xff]  }
  0x6b   :  { %1794 = vmatpush1.bf16.msra.mxu1 %v2685_v62  ;;  %v2769_v62 = vld [vmem:[%s3849_s1 + $0x274] ss:$8 sps:$4 sm:$0xff]  }
  0x6c   :  { %1998 = vmatpush1.bf16.msra.mxu0 %v2688_v63  ;;  %1795 = vmatprep.subr.bf16.mxu1 %v2693_v0  ;;  %v2772_v63 = vld [vmem:[%s3849_s1 + $0x674] ss:$8 sps:$4 sm:$0xff]   ;;  %v2767_v0 = vld [vmem:[%s3849_s1 + $0x270] ss:$8 sps:$4 sm:$0xff]  }
  0x6d   :  { %1999 = vmatprep.subr.bf16.mxu0 %v2696_v1  ;;  %v2770_v1 = vld [vmem:[%s3849_s1 + $0x670] ss:$8 sps:$4 sm:$0xff]  }
  0x6f   :  { %1796 = vmatpush1.bf16.msra.mxu1 %v2691_v2  ;;  %v2775_v2 = vld [vmem:[%s3849_s1 + $0x284] ss:$8 sps:$4 sm:$0xff]  }
  0x70   :  { %2000 = vmatpush1.bf16.msra.mxu0 %v2694_v3  ;;  %1797 = vmatprep.subr.bf16.mxu1 %v2699_v4  ;;  %v2778_v3 = vld [vmem:[%s3849_s1 + $0x684] ss:$8 sps:$4 sm:$0xff]   ;;  %v2773_v4 = vld [vmem:[%s3849_s1 + $0x280] ss:$8 sps:$4 sm:$0xff]  }
  0x71   :  { %2001 = vmatprep.subr.bf16.mxu0 %v2702_v5  ;;  %v2776_v5 = vld [vmem:[%s3849_s1 + $0x680] ss:$8 sps:$4 sm:$0xff]  }
  0x73   :  { %1798 = vmatpush1.bf16.msra.mxu1 %v2697_v6  ;;  %v2781_v6 = vld [vmem:[%s3849_s1 + $0x294] ss:$8 sps:$4 sm:$0xff]  }
  0x74   :  { %2002 = vmatpush1.bf16.msra.mxu0 %v2700_v7  ;;  %1799 = vmatprep.subr.bf16.mxu1 %v2705_v8  ;;  %v2784_v7 = vld [vmem:[%s3849_s1 + $0x694] ss:$8 sps:$4 sm:$0xff]   ;;  %v2779_v8 = vld [vmem:[%s3849_s1 + $0x290] ss:$8 sps:$4 sm:$0xff]  }
  0x75   :  { %2003 = vmatprep.subr.bf16.mxu0 %v2708_v9  ;;  %v2782_v9 = vld [vmem:[%s3849_s1 + $0x690] ss:$8 sps:$4 sm:$0xff]  }
  0x77   :  { %1800 = vmatpush1.bf16.msra.mxu1 %v2703_v10  ;;  %v2787_v10 = vld [vmem:[%s3849_s1 + $0x2a4] ss:$8 sps:$4 sm:$0xff]  }
  0x78   :  { %2004 = vmatpush1.bf16.msra.mxu0 %v2706_v11  ;;  %1801 = vmatprep.subr.bf16.mxu1 %v2712_v12  ;;  %v2790_v11 = vld [vmem:[%s3849_s1 + $0x6a4] ss:$8 sps:$4 sm:$0xff]   ;;  %v2785_v12 = vld [vmem:[%s3849_s1 + $0x2a0] ss:$8 sps:$4 sm:$0xff]  }
  0x79   :  { %2005 = vmatprep.subr.bf16.mxu0 %v2716_v13  ;;  %v2788_v13 = vld [vmem:[%s3849_s1 + $0x6a0] ss:$8 sps:$4 sm:$0xff]  }
  0x7b   :  { %1802 = vmatpush1.bf16.msra.mxu1 %v2710_v14  ;;  %v2793_v14 = vld [vmem:[%s3849_s1 + $0x2b4] ss:$8 sps:$4 sm:$0xff]  }
  0x7c   :  { %2006 = vmatpush1.bf16.msra.mxu0 %v2714_v15  ;;  %1803 = vmatprep.subr.bf16.mxu1 %v2721_v16  ;;  %v2796_v15 = vld [vmem:[%s3849_s1 + $0x6b4] ss:$8 sps:$4 sm:$0xff]   ;;  %v2791_v16 = vld [vmem:[%s3849_s1 + $0x2b0] ss:$8 sps:$4 sm:$0xff]  }
  0x7d   :  { %2007 = vmatprep.subr.bf16.mxu0 %v2724_v17  ;;  %v2794_v17 = vld [vmem:[%s3849_s1 + $0x6b0] ss:$8 sps:$4 sm:$0xff]  }
  0x7f   :  { %1804 = vmatpush1.bf16.msra.mxu1 %v2719_v18  ;;  %v2799_v18 = vld [vmem:[%s3849_s1 + $0x2c4] ss:$8 sps:$4 sm:$0xff]  }
  0x80   :  { %2008 = vmatpush1.bf16.msra.mxu0 %v2722_v19  ;;  %1824 = vmatprep.subr.bf16.mxu1 %v2727_v20  ;;  %v2802_v19 = vld [vmem:[%s3849_s1 + $0x6c4] ss:$8 sps:$4 sm:$0xff]   ;;  %v2797_v20 = vld [vmem:[%s3849_s1 + $0x2c0] ss:$8 sps:$4 sm:$0xff]  }
  0x81   :  { %2028 = vmatprep.subr.bf16.mxu0 %v2730_v21  ;;  %v2800_v21 = vld [vmem:[%s3849_s1 + $0x6c0] ss:$8 sps:$4 sm:$0xff]  }
  0x82   :  { %1806 = vmatmul.mubr.bf16.vlgmr.msra.gmra.mrb[0].mxu1 %v2177_v23  ;;  %v2808_v23 = vld [vmem:[%s3849_s1 + $0x6d4] ss:$8 sps:$4 sm:$0xff]  }
  0x83   :  { %2010 = vmatmul.mubr.bf16.vlgmr.msra.gmra.mrb[0].mxu0 %v2185_v24  ;;  %1825 = vmatpush1.bf16.msra.mxu1 %v2725_v22  ;;  %v2805_v22 = vld [vmem:[%s3849_s1 + $0x2d4] ss:$8 sps:$4 sm:$0xff]   ;;  %v2803_v24 = vld [vmem:[%s3849_s1 + $0x2d0] ss:$8 sps:$4 sm:$0xff]  }
  0x84   :  { %2029 = vmatpush1.bf16.msra.mxu0 %v2728_v25  ;;  %1826 = vmatprep.subr.bf16.mxu1 %v2733_v28  ;;  %v2806_v25 = vld [vmem:[%s3849_s1 + $0x6d0] ss:$8 sps:$4 sm:$0xff]   ;;  %v2810_v28 = vld [vmem:[%s3849_s1 + $0x2e0] ss:$8 sps:$4 sm:$0xff]  }
  0x85   :  { %2030 = vmatprep.subr.bf16.mxu0 %v2736_v29  ;;  %1815 = vmatprep.mubr.bf16.mxu1 %v2194_v30  ;;  %v2814_v29 = vld [vmem:[%s3849_s1 + $0x6e0] ss:$8 sps:$4 sm:$0xff]   ;;  %v2821_v30 = vld [vmem:[%s3849_s1 + $0x2f4] ss:$8 sps:$4 sm:$0xff]  }
  0x86   :  { %2019 = vmatprep.mubr.bf16.mxu0 %v2202_v31  ;;  %v2824_v31 = vld [vmem:[%s3849_s1 + $0x6f4] ss:$8 sps:$4 sm:$0xff]  }
  0x87   :  { %1827 = vmatpush1.bf16.msra.mxu1 %v2731_v32  ;;  %v2819_v32 = vld [vmem:[%s3849_s1 + $0x2f0] ss:$8 sps:$4 sm:$0xff]  }
  0x88   :  { %2031 = vmatpush1.bf16.msra.mxu0 %v2734_v33  ;;  %1828 = vmatprep.subr.bf16.mxu1 %v2739_v34  ;;  %v2822_v33 = vld [vmem:[%s3849_s1 + $0x6f0] ss:$8 sps:$4 sm:$0xff]   ;;  %v2827_v34 = vld [vmem:[%s3849_s1 + $0x304] ss:$8 sps:$4 sm:$0xff]  }
  0x89   :  { %2032 = vmatprep.subr.bf16.mxu0 %v2742_v35  ;;  %v2830_v35 = vld [vmem:[%s3849_s1 + $0x704] ss:$8 sps:$4 sm:$0xff]  }
  0x8a   :  { %1816 = vmatmul.mubr.bf16.gmra.mrb[4].mxu1 %v2193_v40  ;;  %v32_v40 = vld [vmem:[%s3850_s0 + $0x90] sm:$0x11] }
  0x8b   :  { %2020 = vmatmul.mubr.bf16.gmra.mrb[4].mxu0 %v2201_v41  ;;  %1829 = vmatpush1.bf16.msra.mxu1 %v2737_v36  ;;  %v2179_v36 = vcombine.low %v3424_v38, %v3429_v39  ;;  %v36_v41 = vld [vmem:[%s3850_s0 + $0xb0] sm:$0x11]  ;;  %v2828_v38 = vld [vmem:[%s3849_s1 + $0x700] ss:$8 sps:$4 sm:$0xff]  }
  0x8c   :  { %2033 = vmatpush1.bf16.msra.mxu0 %v2740_v37  ;;  %1830 = vmatprep.subr.bf16.mxu1 %v2745_v44  ;;  %v2187_v37 = vcombine.low %v3434_v42, %v3439_v43  ;;  %v2825_v44 = vld [vmem:[%s3849_s1 + $0x300] ss:$8 sps:$4 sm:$0xff]   ;;  %v2833_v39 = vld [vmem:[%s3849_s1 + $0x314] ss:$8 sps:$4 sm:$0xff]   ;;  %v2196_v43 = vcombine.high %v32_v40, %v32_v40 }
  0x8d   :  { %2034 = vmatprep.subr.bf16.mxu0 %v2748_v45  ;;  %1856 = vmatprep.mubr.bf16.mxu1 %v2180_v46  ;;  %v2836_v42 = vld [vmem:[%s3849_s1 + $0x714] ss:$8 sps:$4 sm:$0xff]   ;;  %v2204_v45 = vcombine.high %v36_v41, %v36_v41  ;;  %v2831_v46 = vld [vmem:[%s3849_s1 + $0x310] ss:$8 sps:$4 sm:$0xff]  }
  0x8e   :  { %2060 = vmatprep.mubr.bf16.mxu0 %v2188_v47  ;;  %v2834_v47 = vld [vmem:[%s3849_s1 + $0x710] ss:$8 sps:$4 sm:$0xff]  }
  0x8f   :  { %1831 = vmatpush1.bf16.msra.mxu1 %v2743_v48  ;;  %v2839_v48 = vld [vmem:[%s3849_s1 + $0x324] ss:$8 sps:$4 sm:$0xff]  }
  0x90   :  { %2035 = vmatpush1.bf16.msra.mxu0 %v2746_v49  ;;  %1832 = vmatprep.subr.bf16.mxu1 %v2751_v50  ;;  %v2842_v49 = vld [vmem:[%s3849_s1 + $0x724] ss:$8 sps:$4 sm:$0xff]   ;;  %v3644_v50 = vld [vmem:[%s3850_s0 + $0x18] sm:$0xff] }
  0x91   :  { %2036 = vmatprep.subr.bf16.mxu0 %v2754_v51  ;;  %v2195_v51 = vcombine.low %v32_v40, %v32_v40  ;;  %v2903_v40 = vld [vmem:[%s3849_s1 + $0x3d0] ss:$8 sps:$4 sm:$0xff]  }
  0x93   :  { %1833 = vmatpush1.bf16.msra.mxu1 %v2749_v52  ;;  %v2203_v52 = vcombine.low %v36_v41, %v36_v41  ;;  %v2906_v41 = vld [vmem:[%s3849_s1 + $0x7d0] ss:$8 sps:$4 sm:$0xff]  }
  0x94   :  { %2037 = vmatpush1.bf16.msra.mxu0 %v2752_v53  ;;  %1834 = vmatprep.subr.bf16.mxu1 %v2757_v54  ;;  %v3649_v53 = vld [vmem:[%s3850_s0 + $0x58] sm:$0xff] }
  0x95   :  { %2038 = vmatprep.subr.bf16.mxu0 %v2760_v55  ;;  %v3654_v54 = vld [vmem:[%s3850_s0 + $0x38] sm:$0xff] }
  0x96   :  { %v3659_v55 = vld [vmem:[%s3850_s0 + $0x78] sm:$0xff] }
  0x97   :  { %1835 = vmatpush1.bf16.msra.mxu1 %v2755_v56  ;;  %v2837_v56 = vld [vmem:[%s3849_s1 + $0x320] ss:$8 sps:$4 sm:$0xff]  }
  0x98   :  { %2039 = vmatpush1.bf16.msra.mxu0 %v2758_v57  ;;  %1836 = vmatprep.subr.bf16.mxu1 %v2763_v58  ;;  %v2840_v57 = vld [vmem:[%s3849_s1 + $0x720] ss:$8 sps:$4 sm:$0xff]   ;;  %v2845_v58 = vld [vmem:[%s3849_s1 + $0x334] ss:$8 sps:$4 sm:$0xff]  }
  0x99   :  { %2040 = vmatprep.subr.bf16.mxu0 %v2766_v59  ;;  %v2848_v59 = vld [vmem:[%s3849_s1 + $0x734] ss:$8 sps:$4 sm:$0xff]  }
  0x9b   :  { %1837 = vmatpush1.bf16.msra.mxu1 %v2761_v60  ;;  %v2182_v60 = vcombine.high %v3644_v50, %v3649_v53 }
  0x9c   :  { %2041 = vmatpush1.bf16.msra.mxu0 %v2764_v61  ;;  %1838 = vmatprep.subr.bf16.mxu1 %v2769_v62  ;;  %v2190_v61 = vcombine.high %v3654_v54, %v3659_v55  ;;  %v2843_v62 = vld [vmem:[%s3849_s1 + $0x330] ss:$8 sps:$4 sm:$0xff]  }
  0x9d   :  { %2042 = vmatprep.subr.bf16.mxu0 %v2772_v63  ;;  %v2846_v63 = vld [vmem:[%s3849_s1 + $0x730] ss:$8 sps:$4 sm:$0xff]  }
  0x9f   :  { %1839 = vmatpush1.bf16.msra.mxu1 %v2767_v0  ;;  %v2851_v0 = vld [vmem:[%s3849_s1 + $0x344] ss:$8 sps:$4 sm:$0xff]  }
  0xa0   :  { %2043 = vmatpush1.bf16.msra.mxu0 %v2770_v1  ;;  %1840 = vmatprep.subr.bf16.mxu1 %v2775_v2  ;;  %v2854_v1 = vld [vmem:[%s3849_s1 + $0x744] ss:$8 sps:$4 sm:$0xff]   ;;  %v2849_v2 = vld [vmem:[%s3849_s1 + $0x340] ss:$8 sps:$4 sm:$0xff]  }
  0xa1   :  { %2044 = vmatprep.subr.bf16.mxu0 %v2778_v3  ;;  %v2852_v3 = vld [vmem:[%s3849_s1 + $0x740] ss:$8 sps:$4 sm:$0xff]  }
  0xa3   :  { %1841 = vmatpush1.bf16.msra.mxu1 %v2773_v4  ;;  %v2857_v4 = vld [vmem:[%s3849_s1 + $0x354] ss:$8 sps:$4 sm:$0xff]  }
  0xa4   :  { %2045 = vmatpush1.bf16.msra.mxu0 %v2776_v5  ;;  %1842 = vmatprep.subr.bf16.mxu1 %v2781_v6  ;;  %v2860_v5 = vld [vmem:[%s3849_s1 + $0x754] ss:$8 sps:$4 sm:$0xff]   ;;  %v2855_v6 = vld [vmem:[%s3849_s1 + $0x350] ss:$8 sps:$4 sm:$0xff]  }
  0xa5   :  { %2046 = vmatprep.subr.bf16.mxu0 %v2784_v7  ;;  %v2858_v7 = vld [vmem:[%s3849_s1 + $0x750] ss:$8 sps:$4 sm:$0xff]  }
  0xa7   :  { %1843 = vmatpush1.bf16.msra.mxu1 %v2779_v8  ;;  %v2863_v8 = vld [vmem:[%s3849_s1 + $0x364] ss:$8 sps:$4 sm:$0xff]  }
  0xa8   :  { %2047 = vmatpush1.bf16.msra.mxu0 %v2782_v9  ;;  %1844 = vmatprep.subr.bf16.mxu1 %v2787_v10  ;;  %v2866_v9 = vld [vmem:[%s3849_s1 + $0x764] ss:$8 sps:$4 sm:$0xff]   ;;  %v2861_v10 = vld [vmem:[%s3849_s1 + $0x360] ss:$8 sps:$4 sm:$0xff]  }
  0xa9   :  { %2048 = vmatprep.subr.bf16.mxu0 %v2790_v11  ;;  %v2864_v11 = vld [vmem:[%s3849_s1 + $0x760] ss:$8 sps:$4 sm:$0xff]  }
  0xab   :  { %1845 = vmatpush1.bf16.msra.mxu1 %v2785_v12  ;;  %v2869_v12 = vld [vmem:[%s3849_s1 + $0x374] ss:$8 sps:$4 sm:$0xff]  }
  0xac   :  { %2049 = vmatpush1.bf16.msra.mxu0 %v2788_v13  ;;  %1846 = vmatprep.subr.bf16.mxu1 %v2793_v14  ;;  %v2872_v13 = vld [vmem:[%s3849_s1 + $0x774] ss:$8 sps:$4 sm:$0xff]   ;;  %v2867_v14 = vld [vmem:[%s3849_s1 + $0x370] ss:$8 sps:$4 sm:$0xff]  }
  0xad   :  { %2050 = vmatprep.subr.bf16.mxu0 %v2796_v15  ;;  %v2870_v15 = vld [vmem:[%s3849_s1 + $0x770] ss:$8 sps:$4 sm:$0xff]  }
  0xaf   :  { %1847 = vmatpush1.bf16.msra.mxu1 %v2791_v16  ;;  %v2875_v16 = vld [vmem:[%s3849_s1 + $0x384] ss:$8 sps:$4 sm:$0xff]  }
  0xb0   :  { %2051 = vmatpush1.bf16.msra.mxu0 %v2794_v17  ;;  %1848 = vmatprep.subr.bf16.mxu1 %v2799_v18  ;;  %v2878_v17 = vld [vmem:[%s3849_s1 + $0x784] ss:$8 sps:$4 sm:$0xff]   ;;  %v2873_v18 = vld [vmem:[%s3849_s1 + $0x380] ss:$8 sps:$4 sm:$0xff]  }
  0xb1   :  { %2052 = vmatprep.subr.bf16.mxu0 %v2802_v19  ;;  %v2876_v19 = vld [vmem:[%s3849_s1 + $0x780] ss:$8 sps:$4 sm:$0xff]  }
  0xb3   :  { %1849 = vmatpush1.bf16.msra.mxu1 %v2797_v20  ;;  %v2881_v20 = vld [vmem:[%s3849_s1 + $0x394] ss:$8 sps:$4 sm:$0xff]  }
  0xb4   :  { %2053 = vmatpush1.bf16.msra.mxu0 %v2800_v21  ;;  %1850 = vmatprep.subr.bf16.mxu1 %v2805_v22  ;;  %v2884_v21 = vld [vmem:[%s3849_s1 + $0x794] ss:$8 sps:$4 sm:$0xff]   ;;  %v2879_v22 = vld [vmem:[%s3849_s1 + $0x390] ss:$8 sps:$4 sm:$0xff]  }
  0xb5   :  { %2054 = vmatprep.subr.bf16.mxu0 %v2808_v23  ;;  %v2882_v23 = vld [vmem:[%s3849_s1 + $0x790] ss:$8 sps:$4 sm:$0xff]  }
  0xb7   :  { %1851 = vmatpush1.bf16.msra.mxu1 %v2803_v24  ;;  %v2887_v24 = vld [vmem:[%s3849_s1 + $0x3a4] ss:$8 sps:$4 sm:$0xff]  }
  0xb8   :  { %2055 = vmatpush1.bf16.msra.mxu0 %v2806_v25  ;;  %1852 = vmatprep.subr.bf16.mxu1 %v2812_v26  ;;  %v2890_v25 = vld [vmem:[%s3849_s1 + $0x7a4] ss:$8 sps:$4 sm:$0xff]   ;;  %v2885_v26 = vld [vmem:[%s3849_s1 + $0x3a0] ss:$8 sps:$4 sm:$0xff]  }
  0xb9   :  { %2056 = vmatprep.subr.bf16.mxu0 %v2816_v27  ;;  %v2888_v27 = vld [vmem:[%s3849_s1 + $0x7a0] ss:$8 sps:$4 sm:$0xff]  }
  0xbb   :  { %1853 = vmatpush1.bf16.msra.mxu1 %v2810_v28  ;;  %v2893_v28 = vld [vmem:[%s3849_s1 + $0x3b4] ss:$8 sps:$4 sm:$0xff]  }
  0xbc   :  { %2057 = vmatpush1.bf16.msra.mxu0 %v2814_v29  ;;  %1854 = vmatprep.subr.bf16.mxu1 %v2821_v30  ;;  %v2896_v29 = vld [vmem:[%s3849_s1 + $0x7b4] ss:$8 sps:$4 sm:$0xff]   ;;  %v2891_v30 = vld [vmem:[%s3849_s1 + $0x3b0] ss:$8 sps:$4 sm:$0xff]  }
  0xbd   :  { %2058 = vmatprep.subr.bf16.mxu0 %v2824_v31  ;;  %v2894_v31 = vld [vmem:[%s3849_s1 + $0x7b0] ss:$8 sps:$4 sm:$0xff]  }
  0xbf   :  { %1855 = vmatpush1.bf16.msra.mxu1 %v2819_v32  ;;  %v2899_v32 = vld [vmem:[%s3849_s1 + $0x3c4] ss:$8 sps:$4 sm:$0xff]  }
  0xc0   :  { %2059 = vmatpush1.bf16.msra.mxu0 %v2822_v33  ;;  %1875 = vmatprep.subr.bf16.mxu1 %v2827_v34  ;;  %v2902_v33 = vld [vmem:[%s3849_s1 + $0x7c4] ss:$8 sps:$4 sm:$0xff]   ;;  %v2897_v34 = vld [vmem:[%s3849_s1 + $0x3c0] ss:$8 sps:$4 sm:$0xff]  }
  0xc1   :  { %2079 = vmatprep.subr.bf16.mxu0 %v2830_v35  ;;  %v2900_v35 = vld [vmem:[%s3849_s1 + $0x7c0] ss:$8 sps:$4 sm:$0xff]  }
  0xc2   :  { %1857 = vmatmul.mubr.bf16.vlgmr.msra.gmra.mrb[0].mxu1 %v2179_v36  ;;  %v2905_v36 = vld [vmem:[%s3849_s1 + $0x3d4] ss:$8 sps:$4 sm:$0xff]  }
  0xc3   :  { %2061 = vmatmul.mubr.bf16.vlgmr.msra.gmra.mrb[0].mxu0 %v2187_v37  ;;  %1876 = vmatpush1.bf16.msra.mxu1 %v2825_v44  ;;  %v2908_v37 = vld [vmem:[%s3849_s1 + $0x7d4] ss:$8 sps:$4 sm:$0xff]   ;;  %v2914_v44 = vld [vmem:[%s3849_s1 + $0x3e4] ss:$8 sps:$4 sm:$0xff]  }
  0xc4   :  { %2080 = vmatpush1.bf16.msra.mxu0 %v2828_v38  ;;  %1877 = vmatprep.subr.bf16.mxu1 %v2833_v39  ;;  %v2918_v38 = vld [vmem:[%s3849_s1 + $0x7e4] ss:$8 sps:$4 sm:$0xff]   ;;  %v2912_v39 = vld [vmem:[%s3849_s1 + $0x3e0] ss:$8 sps:$4 sm:$0xff]  }
  0xc5   :  { %2081 = vmatprep.subr.bf16.mxu0 %v2836_v42  ;;  %1866 = vmatprep.mubr.bf16.mxu1 %v2196_v43  ;;  %v2916_v42 = vld [vmem:[%s3849_s1 + $0x7e0] ss:$8 sps:$4 sm:$0xff]   ;;  %v2921_v43 = vld [vmem:[%s3849_s1 + $0x3f4] ss:$8 sps:$4 sm:$0xff]  }
  0xc6   :  { %2070 = vmatprep.mubr.bf16.mxu0 %v2204_v45  ;;  %v2924_v45 = vld [vmem:[%s3849_s1 + $0x7f4] ss:$8 sps:$4 sm:$0xff]  }
  0xc7   :  { %1878 = vmatpush1.bf16.msra.mxu1 %v2831_v46  ;;  %v2919_v46 = vld [vmem:[%s3849_s1 + $0x3f0] ss:$8 sps:$4 sm:$0xff]  }
  0xc8   :  { %2082 = vmatpush1.bf16.msra.mxu0 %v2834_v47  ;;  %1879 = vmatprep.subr.bf16.mxu1 %v2839_v48  ;;  %v2922_v47 = vld [vmem:[%s3849_s1 + $0x7f0] ss:$8 sps:$4 sm:$0xff]  }
  0xc9   :  { %2083 = vmatprep.subr.bf16.mxu0 %v2842_v49  ;;  %v33_v48 = vld [vmem:[%s3850_s0 + $0x98] sm:$0x11] }
  0xca   :  { %1867 = vmatmul.mubr.bf16.gmra.mrb[4].mxu1 %v2195_v51  ;;  %v37_v49 = vld [vmem:[%s3850_s0 + $0xb8] sm:$0x11]  ;;  %v2181_v51 = vcombine.low %v3644_v50, %v3649_v53  ;;  %v294_v50 = vld [vmem:[%s3851_s2] sm:$0x3] }
  0xcb   :  { %2071 = vmatmul.mubr.bf16.gmra.mrb[4].mxu0 %v2203_v52  ;;  %1880 = vmatpush1.bf16.msra.mxu1 %v2837_v56  ;;  %v2189_v52 = vcombine.low %v3654_v54, %v3659_v55  ;;  %v2198_v56 = vcombine.high %v33_v48, %v33_v48 }
  0xcc   :  { %2084 = vmatpush1.bf16.msra.mxu0 %v2840_v57  ;;  %1881 = vmatprep.subr.bf16.mxu1 %v2845_v58  ;;  %v2206_v57 = vcombine.high %v37_v49, %v37_v49  ;;  %v2197_v58 = vcombine.low %v33_v48, %v33_v48 }
  0xcd   :  { %2085 = vmatprep.subr.bf16.mxu0 %v2848_v59  ;;  %1907 = vmatprep.mubr.bf16.mxu1 %v2182_v60  ;;  %v2205_v59 = vcombine.low %v37_v49, %v37_v49  ;;  %v296_v60 = vlaneseq }
  0xce   :  { %2111 = vmatprep.mubr.bf16.mxu0 %v2190_v61 }
  0xcf   :  { %1882 = vmatpush1.bf16.msra.mxu1 %v2843_v62  ;;  %v297_v61 = vshrl.u32 %v296_v60, 7 }
  0xd0   :  { %2086 = vmatpush1.bf16.msra.mxu0 %v2846_v63  ;;  %1883 = vmatprep.subr.bf16.mxu1 %v2851_v0 }
  0xd1   :  { %2087 = vmatprep.subr.bf16.mxu0 %v2854_v1  ;;  %v298_v62 = vsub.s32 0, %v297_v61  ;;  %v302_v53 = vsub.s32 1, %v297_v61 }
  0xd3   :  { %1884 = vmatpush1.bf16.msra.mxu1 %v2849_v2  ;;  %v299_v54 = vrot.slane %v294_v50, %v298_v62  ;;  %v303_v55 = vrot.slane %v294_v50, %v302_v53 }
  0xd4   :  { %2088 = vmatpush1.bf16.msra.mxu0 %v2852_v3  ;;  %1885 = vmatprep.subr.bf16.mxu1 %v2857_v4 }
  0xd5   :  { %2089 = vmatprep.subr.bf16.mxu0 %v2860_v5 }
  0xd7   :  { %1886 = vmatpush1.bf16.msra.mxu1 %v2855_v6 }
  0xd8   :  { %2090 = vmatpush1.bf16.msra.mxu0 %v2858_v7  ;;  %1887 = vmatprep.subr.bf16.mxu1 %v2863_v8 }
  0xd9   :  { %2091 = vmatprep.subr.bf16.mxu0 %v2866_v9 }
  0xdb   :  { %1888 = vmatpush1.bf16.msra.mxu1 %v2861_v10 }
  0xdc   :  { %2092 = vmatpush1.bf16.msra.mxu0 %v2864_v11  ;;  %1889 = vmatprep.subr.bf16.mxu1 %v2869_v12 }
  0xdd   :  { %2093 = vmatprep.subr.bf16.mxu0 %v2872_v13 }
  0xdf   :  { %1890 = vmatpush1.bf16.msra.mxu1 %v2867_v14 }
  0xe0   :  { %2094 = vmatpush1.bf16.msra.mxu0 %v2870_v15  ;;  %1891 = vmatprep.subr.bf16.mxu1 %v2875_v16 }
  0xe1   :  { %2095 = vmatprep.subr.bf16.mxu0 %v2878_v17 }
  0xe3   :  { %1892 = vmatpush1.bf16.msra.mxu1 %v2873_v18 }
  0xe4   :  { %2096 = vmatpush1.bf16.msra.mxu0 %v2876_v19  ;;  %1893 = vmatprep.subr.bf16.mxu1 %v2881_v20 }
  0xe5   :  { %2097 = vmatprep.subr.bf16.mxu0 %v2884_v21 }
  0xe7   :  { %1894 = vmatpush1.bf16.msra.mxu1 %v2879_v22 }
  0xe8   :  { %2098 = vmatpush1.bf16.msra.mxu0 %v2882_v23  ;;  %1895 = vmatprep.subr.bf16.mxu1 %v2887_v24 }
  0xe9   :  { %2099 = vmatprep.subr.bf16.mxu0 %v2890_v25 }
  0xeb   :  { %1896 = vmatpush1.bf16.msra.mxu1 %v2885_v26 }
  0xec   :  { %2100 = vmatpush1.bf16.msra.mxu0 %v2888_v27  ;;  %1897 = vmatprep.subr.bf16.mxu1 %v2893_v28 }
  0xed   :  { %2101 = vmatprep.subr.bf16.mxu0 %v2896_v29 }
  0xef   :  { %1898 = vmatpush1.bf16.msra.mxu1 %v2891_v30 }
  0xf0   :  { %2102 = vmatpush1.bf16.msra.mxu0 %v2894_v31  ;;  %1899 = vmatprep.subr.bf16.mxu1 %v2899_v32 }
  0xf1   :  { %2103 = vmatprep.subr.bf16.mxu0 %v2902_v33 }
  0xf3   :  { %1900 = vmatpush1.bf16.msra.mxu1 %v2897_v34 }
  0xf4   :  { %2104 = vmatpush1.bf16.msra.mxu0 %v2900_v35  ;;  %1901 = vmatprep.subr.bf16.mxu1 %v2905_v36 }
  0xf5   :  { %2105 = vmatprep.subr.bf16.mxu0 %v2908_v37 }
  0xf7   :  { %1902 = vmatpush1.bf16.msra.mxu1 %v2903_v40 }
  0xf8   :  { %2106 = vmatpush1.bf16.msra.mxu0 %v2906_v41  ;;  %1903 = vmatprep.subr.bf16.mxu1 %v2914_v44 }
  0xf9   :  { %2107 = vmatprep.subr.bf16.mxu0 %v2918_v38 }
  0xfb   :  { %1904 = vmatpush1.bf16.msra.mxu1 %v2912_v39 }
  0xfc   :  { %2108 = vmatpush1.bf16.msra.mxu0 %v2916_v42  ;;  %1905 = vmatprep.subr.bf16.mxu1 %v2921_v43 }
  0xfd   :  { %2109 = vmatprep.subr.bf16.mxu0 %v2924_v45 }
  0xff   :  { %1906 = vmatpush1.bf16.msra.mxu1 %v2919_v46 }
 0x100   :  { %2110 = vmatpush1.bf16.msra.mxu0 %v2922_v47 }
 0x102   :  { %1908 = vmatmul.mubr.bf16.vlgmr.msra.gmra.mrb[0].mxu1 %v2181_v51 }
 0x103   :  { %2112 = vmatmul.mubr.bf16.vlgmr.msra.gmra.mrb[0].mxu0 %v2189_v52  ;;  %1917 = vmatprep.mubr.bf16.mxu1 %v2198_v56 }
 0x104   :  { %2121 = vmatprep.mubr.bf16.mxu0 %v2206_v57 }
 0x10a   :  { %1918 = vmatmul.mubr.bf16.gmra.mrb[4].mxu1 %v2197_v58 }
 0x10b   :  { %2122 = vmatmul.mubr.bf16.gmra.mrb[4].mxu0 %v2205_v59 }
 0x1d5   :  { %v1909_v63 = vpop.f32.mrb[0].mxu1 }
 0x1d6   :  { %v2113_v0 = vpop.f32.mrb[0].mxu0  ;;  %v2469_v1 = vadd.f32 %v1909_v63, %v299_v54  ;;  %v1911_v2 = vpop.f32.mrb[1].mxu1 }
 0x1d7   :  { %v2115_v3 = vpop.f32.mrb[1].mxu0  ;;  %v2471_v4 = vadd.f32 %v1911_v2, %v303_v55  ;;  %v1913_v5 = vpop.f32.mrb[2].mxu1 }
 0x1d8   :  { %v2117_v6 = vpop.f32.mrb[2].mxu0  ;;  %v2470_v7 = vadd.f32 %v2469_v1, %v2113_v0  ;;  %v2473_v8 = vadd.f32 %v1913_v5, %v299_v54  ;;  %v1915_v9 = vpop.f32.mrb[3].mxu1 }
 0x1d9   :  { %v2119_v10 = vpop.f32.mrb[3].mxu0  ;;  %v2472_v11 = vadd.f32 %v2471_v4, %v2115_v3  ;;  %v2475_v12 = vadd.f32 %v1915_v9, %v303_v55 }
 0x1da   :  { %vm2130_vm0 = vcmp.ge.f32.partialorder %v2470_v7, 0.0  ;;  %v2136_v13 = vmul.f32 0.2, %v2470_v7  ;;  %v2474_v14 = vadd.f32 %v2473_v8, %v2117_v6 }
 0x1db   :  { %vm2131_vm1 = vcmp.ge.f32.partialorder %v2472_v11, 0.0  ;;  %v2137_v15 = vmul.f32 0.2, %v2472_v11  ;;  %v2476_v16 = vadd.f32 %v2475_v12, %v2119_v10 }
 0x1dc   :  { %v2142_v17 = vsel %vm2130_vm0, %v2470_v7, %v2136_v13  ;;  %vm2132_vm2 = vcmp.ge.f32.partialorder %v2474_v14, 0.0  ;;  %v2138_v18 = vmul.f32 0.2, %v2474_v14 }
 0x1dd   :  { %v2143_v19 = vsel %vm2131_vm1, %v2472_v11, %v2137_v15  ;;  %vm2133_vm3 = vcmp.ge.f32.partialorder %v2476_v16, 0.0  ;;  %v2139_v20 = vmul.f32 0.2, %v2476_v16  ;;  %v1919_v21 = vpop.f32.mrb[4].mxu1 }
 0x1de   :  { %v2123_v22 = vpop.f32.mrb[4].mxu0  ;;  %v2466_v23 = vpack.c.bf16 %v2143_v19, %v2142_v17  ;;  %v2144_v24 = vsel %vm2132_vm2, %v2474_v14, %v2138_v18  ;;  %v2477_v25 = vadd.f32 %v1919_v21, %v299_v54  ;;  %v1921_v26 = vpop.f32.mrb[5].mxu1 }
 0x1df   :  { %v2125_v27 = vpop.f32.mrb[5].mxu0  ;;  %v2145_v28 = vsel %vm2133_vm3, %v2476_v16, %v2139_v20  ;;  %v2479_v29 = vadd.f32 %v1921_v26, %v303_v55  ;;  %v1923_v30 = vpop.f32.mrb[6].mxu1 }
 0x1e0   :  { %v2127_v31 = vpop.f32.mrb[6].mxu0  ;;  %2168 = vst [vmem:[%s3852_s3] sm:$0xff] %v2466_v23  ;;  %v2467_v32 = vpack.c.bf16 %v2145_v28, %v2144_v24  ;;  %v2478_v33 = vadd.f32 %v2477_v25, %v2123_v22  ;;  %v1924_v34 = vpop.f32.mrb[7].mxu1 }
 0x1e1   :  { %v2128_v35 = vpop.f32.mrb[7].mxu0  ;;  %v2480_v36 = vadd.f32 %v2479_v29, %v2125_v27 }
 0x1e2   :  { %2169 = vst [vmem:[%s3852_s3 + $0x8] sm:$0xff] %v2467_v32  ;;  %vm2134_vm4 = vcmp.ge.f32.partialorder %v2478_v33, 0.0  ;;  %v2140_v37 = vmul.f32 0.2, %v2478_v33 }
 0x1e3   :  { %vm2135_vm5 = vcmp.ge.f32.partialorder %v2480_v36, 0.0  ;;  %v2141_v40 = vmul.f32 0.2, %v2480_v36 }
 0x1e4   :  { %v2146_v41 = vsel %vm2134_vm4, %v2478_v33, %v2140_v37 }
 0x1e5   :  { %v2147_v44 = vsel %vm2135_vm5, %v2480_v36, %v2141_v40 }
 0x1e6   :  { %v2468_v38 = vpack.c.bf16 %v2147_v44, %v2146_v41 }
 0x1e8   :  { %2170 = vst [vmem:[%s3852_s3 + $0x10] sm:$0x11] %v2468_v38 }

// kernel: vae_encoder_forward.7
= control target key start
LH: loop header
LB: loop body
LE: loop exit
PB: predicated region body
PF: predicated region fallthrough
CT: control target
= control target key end

     0   :  { %v607_v36 = vlaneseq  ;;  %v9453_v37 = vmov 1966171168   ;;  %s12561_s1 = inlined_call_operand.vmem [shape: bf16[2304,512], index: 1, kind: input, shape index: {}]   ;;  %s12562_s0 = inlined_call_operand.vmem [shape: bf16[2,2304], index: 0, kind: input, shape index: {}]   ;;  %s12563_s3 = inlined_call_operand.vmem [shape: bf16[512,512], index: 3, kind: input, shape index: {}]   ;;  %s12564_s2 = inlined_call_operand.vmem [shape: f32[1,512], index: 2, kind: input, shape index: {}]   ;;  %s12565_s5 = inlined_call_operand.vmem [shape: bf16[512,1024], index: 5, kind: input, shape index: {}]   ;;  %s12566_s4 = inlined_call_operand.vmem [shape: f32[1,512], index: 4, kind: input, shape index: {}]   ;;  %s12567_s6 = inlined_call_operand.vmem [shape: f32[1,1024], index: 6, kind: input, shape index: {}]   ;;  %s12568_s7 = inlined_call_operand.vmem [shape: f32[2,1024], index: 7, kind: output, shape index: {}]  }
   0x1   :  { %v8395_v0 = vld [vmem:[%s12561_s1 + $0x4] ss:$16 sps:$4 sm:$0xff]   ;;  %v8397_v1 = vld [vmem:[%s12561_s1 + $0xc] ss:$16 sps:$4 sm:$0xff]   ;;  %v8399_v2 = vld [vmem:[%s12561_s1] ss:$16 sps:$4 sm:$0xff]   ;;  %v632_v38 = vunpack.c.l.s4 %v9453_v37 }
   0x2   :  { %3648 = vmatprep.subr.bf16.mxu0 %v8395_v0  ;;  %v8400_v3 = vld [vmem:[%s12561_s1 + $0x8] ss:$16 sps:$4 sm:$0xff]   ;;  %4017 = vmatprep.subr.bf16.mxu1 %v8397_v1  ;;  %v8401_v4 = vld [vmem:[%s12561_s1 + $0x24] ss:$16 sps:$4 sm:$0xff]   ;;  %v8403_v5 = vld [vmem:[%s12561_s1 + $0x2c] ss:$16 sps:$4 sm:$0xff]  }
   0x3   :  { %3649 = vmatpush1.bf16.msra.mxu0 %v8399_v2  ;;  %4018 = vmatpush1.bf16.msra.mxu1 %v8400_v3  ;;  %v8405_v6 = vld [vmem:[%s12561_s1 + $0x20] ss:$16 sps:$4 sm:$0xff]   ;;  %v8406_v7 = vld [vmem:[%s12561_s1 + $0x28] ss:$16 sps:$4 sm:$0xff]   ;;  %v8407_v8 = vld [vmem:[%s12561_s1 + $0x44] ss:$16 sps:$4 sm:$0xff]   ;;  %v633_v43 = vunpack.c.0.s8 %v632_v38 }
   0x4   :  { %3650 = vmatprep.subr.bf16.mxu0 %v8401_v4  ;;  %4019 = vmatprep.subr.bf16.mxu1 %v8403_v5  ;;  %v8409_v9 = vld [vmem:[%s12561_s1 + $0x4c] ss:$16 sps:$4 sm:$0xff]   ;;  %v8411_v10 = vld [vmem:[%s12561_s1 + $0x40] ss:$16 sps:$4 sm:$0xff]   ;;  %v8412_v11 = vld [vmem:[%s12561_s1 + $0x48] ss:$16 sps:$4 sm:$0xff]  }
   0x5   :  { %v8413_v12 = vld [vmem:[%s12561_s1 + $0x64] ss:$16 sps:$4 sm:$0xff]   ;;  %v8415_v13 = vld [vmem:[%s12561_s1 + $0x6c] ss:$16 sps:$4 sm:$0xff]   ;;  %v8417_v14 = vld [vmem:[%s12561_s1 + $0x60] ss:$16 sps:$4 sm:$0xff]  }
   0x6   :  { %v8418_v15 = vld [vmem:[%s12561_s1 + $0x68] ss:$16 sps:$4 sm:$0xff]   ;;  %v8419_v16 = vld [vmem:[%s12561_s1 + $0x84] ss:$16 sps:$4 sm:$0xff]   ;;  %v8421_v17 = vld [vmem:[%s12561_s1 + $0x8c] ss:$16 sps:$4 sm:$0xff]  }
   0x7   :  { %3651 = vmatpush1.bf16.msra.mxu0 %v8405_v6  ;;  %4020 = vmatpush1.bf16.msra.mxu1 %v8406_v7  ;;  %v8423_v18 = vld [vmem:[%s12561_s1 + $0x80] ss:$16 sps:$4 sm:$0xff]   ;;  %v8424_v19 = vld [vmem:[%s12561_s1 + $0x88] ss:$16 sps:$4 sm:$0xff]   ;;  %v8425_v20 = vld [vmem:[%s12561_s1 + $0xa4] ss:$16 sps:$4 sm:$0xff]  }
   0x8   :  { %3652 = vmatprep.subr.bf16.mxu0 %v8407_v8  ;;  %4021 = vmatprep.subr.bf16.mxu1 %v8409_v9  ;;  %v8427_v21 = vld [vmem:[%s12561_s1 + $0xac] ss:$16 sps:$4 sm:$0xff]   ;;  %v8429_v22 = vld [vmem:[%s12561_s1 + $0xa0] ss:$16 sps:$4 sm:$0xff]   ;;  %v8430_v23 = vld [vmem:[%s12561_s1 + $0xa8] ss:$16 sps:$4 sm:$0xff]  }
   0x9   :  { %v8431_v24 = vld [vmem:[%s12561_s1 + $0xc4] ss:$16 sps:$4 sm:$0xff]   ;;  %v8433_v25 = vld [vmem:[%s12561_s1 + $0xcc] ss:$16 sps:$4 sm:$0xff]   ;;  %v8435_v26 = vld [vmem:[%s12561_s1 + $0xc0] ss:$16 sps:$4 sm:$0xff]  }
   0xa   :  { %v8436_v27 = vld [vmem:[%s12561_s1 + $0xc8] ss:$16 sps:$4 sm:$0xff]   ;;  %v8437_v28 = vld [vmem:[%s12561_s1 + $0xe4] ss:$16 sps:$4 sm:$0xff]   ;;  %v8439_v29 = vld [vmem:[%s12561_s1 + $0xec] ss:$16 sps:$4 sm:$0xff]  }
   0xb   :  { %3653 = vmatpush1.bf16.msra.mxu0 %v8411_v10  ;;  %4022 = vmatpush1.bf16.msra.mxu1 %v8412_v11  ;;  %v8441_v30 = vld [vmem:[%s12561_s1 + $0xe0] ss:$16 sps:$4 sm:$0xff]   ;;  %v8442_v31 = vld [vmem:[%s12561_s1 + $0xe8] ss:$16 sps:$4 sm:$0xff]   ;;  %v8443_v32 = vld [vmem:[%s12561_s1 + $0x104] ss:$16 sps:$4 sm:$0xff]  }
   0xc   :  { %3654 = vmatprep.subr.bf16.mxu0 %v8413_v12  ;;  %4023 = vmatprep.subr.bf16.mxu1 %v8415_v13  ;;  %v8445_v33 = vld [vmem:[%s12561_s1 + $0x10c] ss:$16 sps:$4 sm:$0xff]   ;;  %v8447_v34 = vld [vmem:[%s12561_s1 + $0x100] ss:$16 sps:$4 sm:$0xff]   ;;  %v8448_v35 = vld [vmem:[%s12561_s1 + $0x108] ss:$16 sps:$4 sm:$0xff]  }
   0xd   :  { %v8449_v39 = vld [vmem:[%s12561_s1 + $0x124] ss:$16 sps:$4 sm:$0xff]   ;;  %v8451_v40 = vld [vmem:[%s12561_s1 + $0x12c] ss:$16 sps:$4 sm:$0xff]   ;;  %v8453_v41 = vld [vmem:[%s12561_s1 + $0x120] ss:$16 sps:$4 sm:$0xff]  }
   0xe   :  { %v9612_v42 = vshrl.u32 %v607_v36, 7  ;;  %v8454_v44 = vld [vmem:[%s12561_s1 + $0x128] ss:$16 sps:$4 sm:$0xff]   ;;  %v8455_v45 = vld [vmem:[%s12561_s1 + $0x144] ss:$16 sps:$4 sm:$0xff]  }
   0xf   :  { %3655 = vmatpush1.bf16.msra.mxu0 %v8417_v14  ;;  %4024 = vmatpush1.bf16.msra.mxu1 %v8418_v15  ;;  %v8457_v46 = vld [vmem:[%s12561_s1 + $0x14c] ss:$16 sps:$4 sm:$0xff]   ;;  %v8459_v47 = vld [vmem:[%s12561_s1 + $0x140] ss:$16 sps:$4 sm:$0xff]   ;;  %v8460_v48 = vld [vmem:[%s12561_s1 + $0x148] ss:$16 sps:$4 sm:$0xff]  }
  0x10   :  { %3656 = vmatprep.subr.bf16.mxu0 %v8419_v16  ;;  %4025 = vmatprep.subr.bf16.mxu1 %v8421_v17  ;;  %v9630_v49 = vsub.s32 %v633_v43, %v9612_v42  ;;  %v8461_v50 = vld [vmem:[%s12561_s1 + $0x164] ss:$16 sps:$4 sm:$0xff]   ;;  %v8463_v51 = vld [vmem:[%s12561_s1 + $0x16c] ss:$16 sps:$4 sm:$0xff]   ;;  %v8465_v53 = vld [vmem:[%s12561_s1 + $0x160] ss:$16 sps:$4 sm:$0xff]  }
  0x11   :  { %v9641_v52 = vld [vmem:[%s12562_s0] sm:$0xff]  ;;  %v8466_v55 = vld [vmem:[%s12561_s1 + $0x168] ss:$16 sps:$4 sm:$0xff]   ;;  %v8469_v57 = vld [vmem:[%s12561_s1 + $0x18c] ss:$16 sps:$4 sm:$0xff]  }
  0x12   :  { %v637_v54 = vrot.slane %v9641_v52, %v9630_v49  ;;  %v8467_v56 = vld [vmem:[%s12561_s1 + $0x184] ss:$16 sps:$4 sm:$0xff]   ;;  %v8471_v59 = vld [vmem:[%s12561_s1 + $0x180] ss:$16 sps:$4 sm:$0xff]   ;;  %v8472_v61 = vld [vmem:[%s12561_s1 + $0x188] ss:$16 sps:$4 sm:$0xff]  }
  0x13   :  { %3657 = vmatpush1.bf16.msra.mxu0 %v8423_v18  ;;  %4026 = vmatpush1.bf16.msra.mxu1 %v8424_v19  ;;  %v8473_v62 = vld [vmem:[%s12561_s1 + $0x1a4] ss:$16 sps:$4 sm:$0xff]   ;;  %v8475_v63 = vld [vmem:[%s12561_s1 + $0x1ac] ss:$16 sps:$4 sm:$0xff]   ;;  %v8477_v0 = vld [vmem:[%s12561_s1 + $0x1a0] ss:$16 sps:$4 sm:$0xff]  }
  0x14   :  { %3658 = vmatprep.subr.bf16.mxu0 %v8425_v20  ;;  %4027 = vmatprep.subr.bf16.mxu1 %v8427_v21  ;;  %v645_v58 = vcombine.high %v637_v54, %v637_v54  ;;  %v8478_v1 = vld [vmem:[%s12561_s1 + $0x1a8] ss:$16 sps:$4 sm:$0xff]   ;;  %v8479_v2 = vld [vmem:[%s12561_s1 + $0x1c4] ss:$16 sps:$4 sm:$0xff]   ;;  %v8481_v3 = vld [vmem:[%s12561_s1 + $0x1cc] ss:$16 sps:$4 sm:$0xff]   ;;  %v9710_v13 = vrot.slane %v637_v54, %v9630_v49 }
  0x15   :  { %v8483_v4 = vld [vmem:[%s12561_s1 + $0x1c0] ss:$16 sps:$4 sm:$0xff]   ;;  %v8484_v5 = vld [vmem:[%s12561_s1 + $0x1c8] ss:$16 sps:$4 sm:$0xff]   ;;  %v8485_v6 = vld [vmem:[%s12561_s1 + $0x1e4] ss:$16 sps:$4 sm:$0xff]  }
  0x16   :  { %v667_v60 = vrot.slane %v645_v58, %v9630_v49  ;;  %v8487_v7 = vld [vmem:[%s12561_s1 + $0x1ec] ss:$16 sps:$4 sm:$0xff]   ;;  %v8489_v8 = vld [vmem:[%s12561_s1 + $0x1e0] ss:$16 sps:$4 sm:$0xff]   ;;  %v8490_v9 = vld [vmem:[%s12561_s1 + $0x1e8] ss:$16 sps:$4 sm:$0xff]  }
  0x17   :  { %3659 = vmatpush1.bf16.msra.mxu0 %v8429_v22  ;;  %4028 = vmatpush1.bf16.msra.mxu1 %v8430_v23  ;;  %v8493_v10 = vld [vmem:[%s12561_s1 + $0x204] ss:$16 sps:$4 sm:$0xff]   ;;  %v8496_v11 = vld [vmem:[%s12561_s1 + $0x20c] ss:$16 sps:$4 sm:$0xff]   ;;  %v8491_v12 = vld [vmem:[%s12561_s1 + $0x200] ss:$16 sps:$4 sm:$0xff]  }
  0x18   :  { %3660 = vmatprep.subr.bf16.mxu0 %v8431_v24  ;;  %4029 = vmatprep.subr.bf16.mxu1 %v8433_v25  ;;  %v8494_v14 = vld [vmem:[%s12561_s1 + $0x208] ss:$16 sps:$4 sm:$0xff]   ;;  %v8499_v15 = vld [vmem:[%s12561_s1 + $0x224] ss:$16 sps:$4 sm:$0xff]   ;;  %v8502_v16 = vld [vmem:[%s12561_s1 + $0x22c] ss:$16 sps:$4 sm:$0xff]   ;;  %v677_v17 = vcombine.high %v667_v60, %v667_v60 }
  0x19   :  { %3680 = vmatprep.mubr.bf16.mxu0 %v667_v60  ;;  %4049 = vmatprep.mubr.bf16.mxu1 %v667_v60  ;;  %v8497_v18 = vld [vmem:[%s12561_s1 + $0x220] ss:$16 sps:$4 sm:$0xff]   ;;  %v8500_v19 = vld [vmem:[%s12561_s1 + $0x228] ss:$16 sps:$4 sm:$0xff]   ;;  %v8505_v20 = vld [vmem:[%s12561_s1 + $0x244] ss:$16 sps:$4 sm:$0xff]  }
  0x1a   :  { %v8508_v21 = vld [vmem:[%s12561_s1 + $0x24c] ss:$16 sps:$4 sm:$0xff]   ;;  %v8503_v22 = vld [vmem:[%s12561_s1 + $0x240] ss:$16 sps:$4 sm:$0xff]   ;;  %v8506_v23 = vld [vmem:[%s12561_s1 + $0x248] ss:$16 sps:$4 sm:$0xff]  }
  0x1b   :  { %3661 = vmatpush1.bf16.msra.mxu0 %v8435_v26  ;;  %4030 = vmatpush1.bf16.msra.mxu1 %v8436_v27  ;;  %v8511_v24 = vld [vmem:[%s12561_s1 + $0x264] ss:$16 sps:$4 sm:$0xff]   ;;  %v8514_v25 = vld [vmem:[%s12561_s1 + $0x26c] ss:$16 sps:$4 sm:$0xff]   ;;  %v8509_v26 = vld [vmem:[%s12561_s1 + $0x260] ss:$16 sps:$4 sm:$0xff]  }
  0x1c   :  { %3662 = vmatprep.subr.bf16.mxu0 %v8437_v28  ;;  %4031 = vmatprep.subr.bf16.mxu1 %v8439_v29  ;;  %v8512_v27 = vld [vmem:[%s12561_s1 + $0x268] ss:$16 sps:$4 sm:$0xff]   ;;  %v8517_v28 = vld [vmem:[%s12561_s1 + $0x284] ss:$16 sps:$4 sm:$0xff]   ;;  %v8520_v29 = vld [vmem:[%s12561_s1 + $0x28c] ss:$16 sps:$4 sm:$0xff]  }
  0x1d   :  { %v8529_v36 = vld [vmem:[%s12561_s1 + $0x2c4] ss:$16 sps:$4 sm:$0xff]   ;;  %v8532_v37 = vld [vmem:[%s12561_s1 + $0x2cc] ss:$16 sps:$4 sm:$0xff]   ;;  %v8527_v38 = vld [vmem:[%s12561_s1 + $0x2c0] ss:$16 sps:$4 sm:$0xff]  }
  0x1e   :  { %v8533_v43 = vld [vmem:[%s12561_s1 + $0x2e0] ss:$16 sps:$4 sm:$0xff]   ;;  %v8548_v54 = vld [vmem:[%s12561_s1 + $0x328] ss:$16 sps:$4 sm:$0xff]   ;;  %v8562_v60 = vld [vmem:[%s12561_s1 + $0x36c] ss:$16 sps:$4 sm:$0xff]  }
  0x1f   :  { %3663 = vmatpush1.bf16.msra.mxu0 %v8441_v30  ;;  %4032 = vmatpush1.bf16.msra.mxu1 %v8442_v31  ;;  %v8515_v30 = vld [vmem:[%s12561_s1 + $0x280] ss:$16 sps:$4 sm:$0xff]   ;;  %v8518_v31 = vld [vmem:[%s12561_s1 + $0x288] ss:$16 sps:$4 sm:$0xff]  }
  0x20   :  { %3664 = vmatprep.subr.bf16.mxu0 %v8443_v32  ;;  %4033 = vmatprep.subr.bf16.mxu1 %v8445_v33  ;;  %v8523_v32 = vld [vmem:[%s12561_s1 + $0x2a4] ss:$16 sps:$4 sm:$0xff]   ;;  %v8526_v33 = vld [vmem:[%s12561_s1 + $0x2ac] ss:$16 sps:$4 sm:$0xff]   ;;  %v8554_v58 = vld [vmem:[%s12561_s1 + $0x348] ss:$16 sps:$4 sm:$0xff]  }
  0x23   :  { %3665 = vmatpush1.bf16.msra.mxu0 %v8447_v34  ;;  %4034 = vmatpush1.bf16.msra.mxu1 %v8448_v35  ;;  %v8521_v34 = vld [vmem:[%s12561_s1 + $0x2a0] ss:$16 sps:$4 sm:$0xff]   ;;  %v8524_v35 = vld [vmem:[%s12561_s1 + $0x2a8] ss:$16 sps:$4 sm:$0xff]  }
  0x24   :  { %3666 = vmatprep.subr.bf16.mxu0 %v8449_v39  ;;  %4035 = vmatprep.subr.bf16.mxu1 %v8451_v40  ;;  %v8530_v39 = vld [vmem:[%s12561_s1 + $0x2c8] ss:$16 sps:$4 sm:$0xff]   ;;  %v8535_v40 = vld [vmem:[%s12561_s1 + $0x2e4] ss:$16 sps:$4 sm:$0xff]  }
  0x27   :  { %3667 = vmatpush1.bf16.msra.mxu0 %v8453_v41  ;;  %4036 = vmatpush1.bf16.msra.mxu1 %v8454_v44  ;;  %v8538_v41 = vld [vmem:[%s12561_s1 + $0x2ec] ss:$16 sps:$4 sm:$0xff]   ;;  %v8536_v44 = vld [vmem:[%s12561_s1 + $0x2e8] ss:$16 sps:$4 sm:$0xff]  }
  0x28   :  { %3668 = vmatprep.subr.bf16.mxu0 %v8455_v45  ;;  %4037 = vmatprep.subr.bf16.mxu1 %v8457_v46  ;;  %v8541_v45 = vld [vmem:[%s12561_s1 + $0x304] ss:$16 sps:$4 sm:$0xff]   ;;  %v8544_v46 = vld [vmem:[%s12561_s1 + $0x30c] ss:$16 sps:$4 sm:$0xff]  }
  0x2b   :  { %3669 = vmatpush1.bf16.msra.mxu0 %v8459_v47  ;;  %4038 = vmatpush1.bf16.msra.mxu1 %v8460_v48  ;;  %v8539_v47 = vld [vmem:[%s12561_s1 + $0x300] ss:$16 sps:$4 sm:$0xff]   ;;  %v8542_v48 = vld [vmem:[%s12561_s1 + $0x308] ss:$16 sps:$4 sm:$0xff]  }
  0x2c   :  { %3670 = vmatprep.subr.bf16.mxu0 %v8461_v50  ;;  %4039 = vmatprep.subr.bf16.mxu1 %v8463_v51  ;;  %v8547_v50 = vld [vmem:[%s12561_s1 + $0x324] ss:$16 sps:$4 sm:$0xff]   ;;  %v8550_v51 = vld [vmem:[%s12561_s1 + $0x32c] ss:$16 sps:$4 sm:$0xff]  }
  0x2f   :  { %3671 = vmatpush1.bf16.msra.mxu0 %v8465_v53  ;;  %4040 = vmatpush1.bf16.msra.mxu1 %v8466_v55  ;;  %v8545_v53 = vld [vmem:[%s12561_s1 + $0x320] ss:$16 sps:$4 sm:$0xff]   ;;  %v8553_v55 = vld [vmem:[%s12561_s1 + $0x344] ss:$16 sps:$4 sm:$0xff]  }
  0x30   :  { %3672 = vmatprep.subr.bf16.mxu0 %v8467_v56  ;;  %4041 = vmatprep.subr.bf16.mxu1 %v8469_v57  ;;  %v8556_v56 = vld [vmem:[%s12561_s1 + $0x34c] ss:$16 sps:$4 sm:$0xff]   ;;  %v8551_v57 = vld [vmem:[%s12561_s1 + $0x340] ss:$16 sps:$4 sm:$0xff]  }
  0x33   :  { %3673 = vmatpush1.bf16.msra.mxu0 %v8471_v59  ;;  %4042 = vmatpush1.bf16.msra.mxu1 %v8472_v61  ;;  %v8559_v59 = vld [vmem:[%s12561_s1 + $0x364] ss:$16 sps:$4 sm:$0xff]   ;;  %v8557_v61 = vld [vmem:[%s12561_s1 + $0x360] ss:$16 sps:$4 sm:$0xff]  }
  0x34   :  { %3674 = vmatprep.subr.bf16.mxu0 %v8473_v62  ;;  %4043 = vmatprep.subr.bf16.mxu1 %v8475_v63  ;;  %v8560_v62 = vld [vmem:[%s12561_s1 + $0x368] ss:$16 sps:$4 sm:$0xff]   ;;  %v8565_v63 = vld [vmem:[%s12561_s1 + $0x384] ss:$16 sps:$4 sm:$0xff]  }
  0x37   :  { %3675 = vmatpush1.bf16.msra.mxu0 %v8477_v0  ;;  %4044 = vmatpush1.bf16.msra.mxu1 %v8478_v1  ;;  %v8568_v0 = vld [vmem:[%s12561_s1 + $0x38c] ss:$16 sps:$4 sm:$0xff]   ;;  %v8563_v1 = vld [vmem:[%s12561_s1 + $0x380] ss:$16 sps:$4 sm:$0xff]  }
  0x38   :  { %3676 = vmatprep.subr.bf16.mxu0 %v8479_v2  ;;  %4045 = vmatprep.subr.bf16.mxu1 %v8481_v3  ;;  %v8566_v2 = vld [vmem:[%s12561_s1 + $0x388] ss:$16 sps:$4 sm:$0xff]   ;;  %v8571_v3 = vld [vmem:[%s12561_s1 + $0x3a4] ss:$16 sps:$4 sm:$0xff]  }
  0x3b   :  { %3677 = vmatpush1.bf16.msra.mxu0 %v8483_v4  ;;  %4046 = vmatpush1.bf16.msra.mxu1 %v8484_v5  ;;  %v8574_v4 = vld [vmem:[%s12561_s1 + $0x3ac] ss:$16 sps:$4 sm:$0xff]   ;;  %v8569_v5 = vld [vmem:[%s12561_s1 + $0x3a0] ss:$16 sps:$4 sm:$0xff]  }
  0x3c   :  { %3678 = vmatprep.subr.bf16.mxu0 %v8485_v6  ;;  %4047 = vmatprep.subr.bf16.mxu1 %v8487_v7  ;;  %v8572_v6 = vld [vmem:[%s12561_s1 + $0x3a8] ss:$16 sps:$4 sm:$0xff]   ;;  %v8577_v7 = vld [vmem:[%s12561_s1 + $0x3c4] ss:$16 sps:$4 sm:$0xff]  }
  0x3f   :  { %3679 = vmatpush1.bf16.msra.mxu0 %v8489_v8  ;;  %4048 = vmatpush1.bf16.msra.mxu1 %v8490_v9  ;;  %v8580_v8 = vld [vmem:[%s12561_s1 + $0x3cc] ss:$16 sps:$4 sm:$0xff]   ;;  %v630_v9 = vcombine.high %v9641_v52, %v9641_v52 }
  0x40   :  { %3689 = vmatprep.subr.bf16.mxu0 %v8493_v10  ;;  %4058 = vmatprep.subr.bf16.mxu1 %v8496_v11  ;;  %v8575_v10 = vld [vmem:[%s12561_s1 + $0x3c0] ss:$16 sps:$4 sm:$0xff]   ;;  %v8578_v11 = vld [vmem:[%s12561_s1 + $0x3c8] ss:$16 sps:$4 sm:$0xff]   ;;  %v8586_v52 = vld [vmem:[%s12561_s1 + $0x3ec] ss:$16 sps:$4 sm:$0xff]  }
  0x42   :  { %3681 = vmatmul.mubr.bf16.vlgmr.msra.gmra.mrb[0].mxu0 %v9710_v13  ;;  %4050 = vmatmul.mubr.bf16.vlgmr.msra.gmra.mrb[0].mxu1 %v9710_v13 }
  0x43   :  { %3690 = vmatpush1.bf16.msra.mxu0 %v8491_v12  ;;  %4059 = vmatpush1.bf16.msra.mxu1 %v8494_v14  ;;  %v8583_v12 = vld [vmem:[%s12561_s1 + $0x3e4] ss:$16 sps:$4 sm:$0xff]   ;;  %v9894_v14 = vrot.slane %v630_v9, %v9630_v49  ;;  %v8662_v9 = vld [vmem:[%s12561_s1 + $0x588] ss:$16 sps:$4 sm:$0xff]  }
  0x44   :  { %3691 = vmatprep.subr.bf16.mxu0 %v8499_v15  ;;  %4060 = vmatprep.subr.bf16.mxu1 %v8502_v16  ;;  %v8581_v15 = vld [vmem:[%s12561_s1 + $0x3e0] ss:$16 sps:$4 sm:$0xff]   ;;  %v8584_v16 = vld [vmem:[%s12561_s1 + $0x3e8] ss:$16 sps:$4 sm:$0xff]  }
  0x45   :  { %3721 = vmatprep.mubr.bf16.mxu0 %v677_v17  ;;  %4090 = vmatprep.mubr.bf16.mxu1 %v677_v17  ;;  %v8589_v17 = vld [vmem:[%s12561_s1 + $0x404] ss:$16 sps:$4 sm:$0xff]  }
  0x47   :  { %3692 = vmatpush1.bf16.msra.mxu0 %v8497_v18  ;;  %4061 = vmatpush1.bf16.msra.mxu1 %v8500_v19  ;;  %v8592_v18 = vld [vmem:[%s12561_s1 + $0x40c] ss:$16 sps:$4 sm:$0xff]   ;;  %v646_v19 = vcombine.high %v9894_v14, %v9894_v14 }
  0x48   :  { %3693 = vmatprep.subr.bf16.mxu0 %v8505_v20  ;;  %4062 = vmatprep.subr.bf16.mxu1 %v8508_v21  ;;  %v8587_v20 = vld [vmem:[%s12561_s1 + $0x400] ss:$16 sps:$4 sm:$0xff]   ;;  %v675_v21 = vcombine.high %v9710_v13, %v9710_v13 }
  0x49   :  { %v8593_v13 = vld [vmem:[%s12561_s1 + $0x420] ss:$16 sps:$4 sm:$0xff]  }
  0x4b   :  { %3694 = vmatpush1.bf16.msra.mxu0 %v8503_v22  ;;  %4063 = vmatpush1.bf16.msra.mxu1 %v8506_v23  ;;  %v8590_v22 = vld [vmem:[%s12561_s1 + $0x408] ss:$16 sps:$4 sm:$0xff]   ;;  %v8595_v23 = vld [vmem:[%s12561_s1 + $0x424] ss:$16 sps:$4 sm:$0xff]  }
  0x4c   :  { %3695 = vmatprep.subr.bf16.mxu0 %v8511_v24  ;;  %4064 = vmatprep.subr.bf16.mxu1 %v8514_v25  ;;  %v8598_v24 = vld [vmem:[%s12561_s1 + $0x42c] ss:$16 sps:$4 sm:$0xff]   ;;  %v9925_v25 = vrot.slane %v646_v19, %v9630_v49  ;;  %v8679_v19 = vld [vmem:[%s12561_s1 + $0x5e4] ss:$16 sps:$4 sm:$0xff]  }
  0x4f   :  { %3696 = vmatpush1.bf16.msra.mxu0 %v8509_v26  ;;  %4065 = vmatpush1.bf16.msra.mxu1 %v8512_v27  ;;  %v8596_v26 = vld [vmem:[%s12561_s1 + $0x428] ss:$16 sps:$4 sm:$0xff]   ;;  %v8601_v27 = vld [vmem:[%s12561_s1 + $0x444] ss:$16 sps:$4 sm:$0xff]  }
  0x50   :  { %3697 = vmatprep.subr.bf16.mxu0 %v8517_v28  ;;  %4066 = vmatprep.subr.bf16.mxu1 %v8520_v29  ;;  %v8604_v28 = vld [vmem:[%s12561_s1 + $0x44c] ss:$16 sps:$4 sm:$0xff]   ;;  %v8599_v29 = vld [vmem:[%s12561_s1 + $0x440] ss:$16 sps:$4 sm:$0xff]  }
  0x53   :  { %3698 = vmatpush1.bf16.msra.mxu0 %v8515_v30  ;;  %4067 = vmatpush1.bf16.msra.mxu1 %v8518_v31  ;;  %v8602_v30 = vld [vmem:[%s12561_s1 + $0x448] ss:$16 sps:$4 sm:$0xff]   ;;  %v8607_v31 = vld [vmem:[%s12561_s1 + $0x464] ss:$16 sps:$4 sm:$0xff]  }
  0x54   :  { %3699 = vmatprep.subr.bf16.mxu0 %v8523_v32  ;;  %4068 = vmatprep.subr.bf16.mxu1 %v8526_v33  ;;  %v8610_v32 = vld [vmem:[%s12561_s1 + $0x46c] ss:$16 sps:$4 sm:$0xff]   ;;  %v8605_v33 = vld [vmem:[%s12561_s1 + $0x460] ss:$16 sps:$4 sm:$0xff]  }
  0x57   :  { %3700 = vmatpush1.bf16.msra.mxu0 %v8521_v34  ;;  %4069 = vmatpush1.bf16.msra.mxu1 %v8524_v35  ;;  %v8608_v34 = vld [vmem:[%s12561_s1 + $0x468] ss:$16 sps:$4 sm:$0xff]   ;;  %v8613_v35 = vld [vmem:[%s12561_s1 + $0x484] ss:$16 sps:$4 sm:$0xff]  }
  0x58   :  { %3701 = vmatprep.subr.bf16.mxu0 %v8529_v36  ;;  %4070 = vmatprep.subr.bf16.mxu1 %v8532_v37  ;;  %v8616_v36 = vld [vmem:[%s12561_s1 + $0x48c] ss:$16 sps:$4 sm:$0xff]   ;;  %v8611_v37 = vld [vmem:[%s12561_s1 + $0x480] ss:$16 sps:$4 sm:$0xff]  }
  0x5b   :  { %3702 = vmatpush1.bf16.msra.mxu0 %v8527_v38  ;;  %4071 = vmatpush1.bf16.msra.mxu1 %v8530_v39  ;;  %v8614_v38 = vld [vmem:[%s12561_s1 + $0x488] ss:$16 sps:$4 sm:$0xff]   ;;  %v8619_v39 = vld [vmem:[%s12561_s1 + $0x4a4] ss:$16 sps:$4 sm:$0xff]  }
  0x5c   :  { %3703 = vmatprep.subr.bf16.mxu0 %v8535_v40  ;;  %4072 = vmatprep.subr.bf16.mxu1 %v8538_v41  ;;  %v8622_v40 = vld [vmem:[%s12561_s1 + $0x4ac] ss:$16 sps:$4 sm:$0xff]   ;;  %v8617_v41 = vld [vmem:[%s12561_s1 + $0x4a0] ss:$16 sps:$4 sm:$0xff]  }
  0x5f   :  { %3704 = vmatpush1.bf16.msra.mxu0 %v8533_v43  ;;  %4073 = vmatpush1.bf16.msra.mxu1 %v8536_v44  ;;  %v8620_v43 = vld [vmem:[%s12561_s1 + $0x4a8] ss:$16 sps:$4 sm:$0xff]   ;;  %v8625_v44 = vld [vmem:[%s12561_s1 + $0x4c4] ss:$16 sps:$4 sm:$0xff]  }
  0x60   :  { %3705 = vmatprep.subr.bf16.mxu0 %v8541_v45  ;;  %4074 = vmatprep.subr.bf16.mxu1 %v8544_v46  ;;  %v8628_v45 = vld [vmem:[%s12561_s1 + $0x4cc] ss:$16 sps:$4 sm:$0xff]   ;;  %v8623_v46 = vld [vmem:[%s12561_s1 + $0x4c0] ss:$16 sps:$4 sm:$0xff]  }
  0x63   :  { %3706 = vmatpush1.bf16.msra.mxu0 %v8539_v47  ;;  %4075 = vmatpush1.bf16.msra.mxu1 %v8542_v48  ;;  %v8626_v47 = vld [vmem:[%s12561_s1 + $0x4c8] ss:$16 sps:$4 sm:$0xff]   ;;  %v8631_v48 = vld [vmem:[%s12561_s1 + $0x4e4] ss:$16 sps:$4 sm:$0xff]  }
  0x64   :  { %3707 = vmatprep.subr.bf16.mxu0 %v8547_v50  ;;  %4076 = vmatprep.subr.bf16.mxu1 %v8550_v51  ;;  %v8634_v50 = vld [vmem:[%s12561_s1 + $0x4ec] ss:$16 sps:$4 sm:$0xff]   ;;  %v8629_v51 = vld [vmem:[%s12561_s1 + $0x4e0] ss:$16 sps:$4 sm:$0xff]  }
  0x67   :  { %3708 = vmatpush1.bf16.msra.mxu0 %v8545_v53  ;;  %4077 = vmatpush1.bf16.msra.mxu1 %v8548_v54  ;;  %v8632_v53 = vld [vmem:[%s12561_s1 + $0x4e8] ss:$16 sps:$4 sm:$0xff]   ;;  %v8637_v54 = vld [vmem:[%s12561_s1 + $0x504] ss:$16 sps:$4 sm:$0xff]  }
  0x68   :  { %3709 = vmatprep.subr.bf16.mxu0 %v8553_v55  ;;  %4078 = vmatprep.subr.bf16.mxu1 %v8556_v56  ;;  %v8640_v55 = vld [vmem:[%s12561_s1 + $0x50c] ss:$16 sps:$4 sm:$0xff]   ;;  %v8635_v56 = vld [vmem:[%s12561_s1 + $0x500] ss:$16 sps:$4 sm:$0xff]  }
  0x6b   :  { %3710 = vmatpush1.bf16.msra.mxu0 %v8551_v57  ;;  %4079 = vmatpush1.bf16.msra.mxu1 %v8554_v58  ;;  %v8638_v57 = vld [vmem:[%s12561_s1 + $0x508] ss:$16 sps:$4 sm:$0xff]   ;;  %v8643_v58 = vld [vmem:[%s12561_s1 + $0x524] ss:$16 sps:$4 sm:$0xff]  }
  0x6c   :  { %3711 = vmatprep.subr.bf16.mxu0 %v8559_v59  ;;  %4080 = vmatprep.subr.bf16.mxu1 %v8562_v60  ;;  %v8646_v59 = vld [vmem:[%s12561_s1 + $0x52c] ss:$16 sps:$4 sm:$0xff]   ;;  %v8641_v60 = vld [vmem:[%s12561_s1 + $0x520] ss:$16 sps:$4 sm:$0xff]  }
  0x6f   :  { %3712 = vmatpush1.bf16.msra.mxu0 %v8557_v61  ;;  %4081 = vmatpush1.bf16.msra.mxu1 %v8560_v62  ;;  %v8644_v61 = vld [vmem:[%s12561_s1 + $0x528] ss:$16 sps:$4 sm:$0xff]   ;;  %v8649_v62 = vld [vmem:[%s12561_s1 + $0x544] ss:$16 sps:$4 sm:$0xff]  }
  0x70   :  { %3713 = vmatprep.subr.bf16.mxu0 %v8565_v63  ;;  %4082 = vmatprep.subr.bf16.mxu1 %v8568_v0  ;;  %v8652_v63 = vld [vmem:[%s12561_s1 + $0x54c] ss:$16 sps:$4 sm:$0xff]   ;;  %v8647_v0 = vld [vmem:[%s12561_s1 + $0x540] ss:$16 sps:$4 sm:$0xff]  }
  0x73   :  { %3714 = vmatpush1.bf16.msra.mxu0 %v8563_v1  ;;  %4083 = vmatpush1.bf16.msra.mxu1 %v8566_v2  ;;  %v8650_v1 = vld [vmem:[%s12561_s1 + $0x548] ss:$16 sps:$4 sm:$0xff]   ;;  %v8655_v2 = vld [vmem:[%s12561_s1 + $0x564] ss:$16 sps:$4 sm:$0xff]  }
  0x74   :  { %3715 = vmatprep.subr.bf16.mxu0 %v8571_v3  ;;  %4084 = vmatprep.subr.bf16.mxu1 %v8574_v4  ;;  %v8658_v3 = vld [vmem:[%s12561_s1 + $0x56c] ss:$16 sps:$4 sm:$0xff]   ;;  %v8653_v4 = vld [vmem:[%s12561_s1 + $0x560] ss:$16 sps:$4 sm:$0xff]  }
  0x77   :  { %3716 = vmatpush1.bf16.msra.mxu0 %v8569_v5  ;;  %4085 = vmatpush1.bf16.msra.mxu1 %v8572_v6  ;;  %v8656_v5 = vld [vmem:[%s12561_s1 + $0x568] ss:$16 sps:$4 sm:$0xff]   ;;  %v8661_v6 = vld [vmem:[%s12561_s1 + $0x584] ss:$16 sps:$4 sm:$0xff]  }
  0x78   :  { %3717 = vmatprep.subr.bf16.mxu0 %v8577_v7  ;;  %4086 = vmatprep.subr.bf16.mxu1 %v8580_v8  ;;  %v8664_v7 = vld [vmem:[%s12561_s1 + $0x58c] ss:$16 sps:$4 sm:$0xff]   ;;  %v8659_v8 = vld [vmem:[%s12561_s1 + $0x580] ss:$16 sps:$4 sm:$0xff]  }
  0x7b   :  { %3718 = vmatpush1.bf16.msra.mxu0 %v8575_v10  ;;  %4087 = vmatpush1.bf16.msra.mxu1 %v8578_v11  ;;  %v8667_v10 = vld [vmem:[%s12561_s1 + $0x5a4] ss:$16 sps:$4 sm:$0xff]   ;;  %v8670_v11 = vld [vmem:[%s12561_s1 + $0x5ac] ss:$16 sps:$4 sm:$0xff]  }
  0x7c   :  { %3719 = vmatprep.subr.bf16.mxu0 %v8583_v12  ;;  %4088 = vmatprep.subr.bf16.mxu1 %v8586_v52  ;;  %v8665_v12 = vld [vmem:[%s12561_s1 + $0x5a0] ss:$16 sps:$4 sm:$0xff]   ;;  %v8668_v52 = vld [vmem:[%s12561_s1 + $0x5a8] ss:$16 sps:$4 sm:$0xff]  }
  0x7f   :  { %3720 = vmatpush1.bf16.msra.mxu0 %v8581_v15  ;;  %4089 = vmatpush1.bf16.msra.mxu1 %v8584_v16  ;;  %v8673_v15 = vld [vmem:[%s12561_s1 + $0x5c4] ss:$16 sps:$4 sm:$0xff]   ;;  %v8676_v16 = vld [vmem:[%s12561_s1 + $0x5cc] ss:$16 sps:$4 sm:$0xff]  }
  0x80   :  { %3730 = vmatprep.subr.bf16.mxu0 %v8589_v17  ;;  %4099 = vmatprep.subr.bf16.mxu1 %v8592_v18  ;;  %v8671_v17 = vld [vmem:[%s12561_s1 + $0x5c0] ss:$16 sps:$4 sm:$0xff]   ;;  %v8674_v18 = vld [vmem:[%s12561_s1 + $0x5c8] ss:$16 sps:$4 sm:$0xff]  }
  0x82   :  { %3722 = vmatmul.mubr.bf16.vlgmr.msra.gmra.mrb[0].mxu0 %v675_v21  ;;  %4091 = vmatmul.mubr.bf16.vlgmr.msra.gmra.mrb[0].mxu1 %v675_v21  ;;  %v8677_v21 = vld [vmem:[%s12561_s1 + $0x5e0] ss:$16 sps:$4 sm:$0xff]  }
  0x83   :  { %3731 = vmatpush1.bf16.msra.mxu0 %v8587_v20  ;;  %4100 = vmatpush1.bf16.msra.mxu1 %v8590_v22  ;;  %v8682_v20 = vld [vmem:[%s12561_s1 + $0x5ec] ss:$16 sps:$4 sm:$0xff]   ;;  %v8680_v22 = vld [vmem:[%s12561_s1 + $0x5e8] ss:$16 sps:$4 sm:$0xff]  }
  0x84   :  { %3732 = vmatprep.subr.bf16.mxu0 %v8595_v23  ;;  %4101 = vmatprep.subr.bf16.mxu1 %v8598_v24  ;;  %v8686_v23 = vld [vmem:[%s12561_s1 + $0x604] ss:$16 sps:$4 sm:$0xff]   ;;  %v8689_v24 = vld [vmem:[%s12561_s1 + $0x60c] ss:$16 sps:$4 sm:$0xff]  }
  0x85   :  { %3762 = vmatprep.mubr.bf16.mxu0 %v9925_v25  ;;  %4131 = vmatprep.mubr.bf16.mxu1 %v9925_v25 }
  0x87   :  { %3733 = vmatpush1.bf16.msra.mxu0 %v8593_v13  ;;  %4102 = vmatpush1.bf16.msra.mxu1 %v8596_v26  ;;  %v8684_v13 = vld [vmem:[%s12561_s1 + $0x600] ss:$16 sps:$4 sm:$0xff]   ;;  %v10114_v26 = vrot.slane %v9894_v14, %v9630_v49  ;;  %v678_v14 = vcombine.high %v9925_v25, %v9925_v25  ;;  %v8698_v25 = vld [vmem:[%s12561_s1 + $0x644] ss:$16 sps:$4 sm:$0xff]  }
  0x88   :  { %3734 = vmatprep.subr.bf16.mxu0 %v8601_v27  ;;  %4103 = vmatprep.subr.bf16.mxu1 %v8604_v28  ;;  %v8687_v27 = vld [vmem:[%s12561_s1 + $0x608] ss:$16 sps:$4 sm:$0xff]   ;;  %v8692_v28 = vld [vmem:[%s12561_s1 + $0x624] ss:$16 sps:$4 sm:$0xff]  }
  0x8b   :  { %3735 = vmatpush1.bf16.msra.mxu0 %v8599_v29  ;;  %4104 = vmatpush1.bf16.msra.mxu1 %v8602_v30  ;;  %v8695_v29 = vld [vmem:[%s12561_s1 + $0x62c] ss:$16 sps:$4 sm:$0xff]   ;;  %v8690_v30 = vld [vmem:[%s12561_s1 + $0x620] ss:$16 sps:$4 sm:$0xff]  }
  0x8c   :  { %3736 = vmatprep.subr.bf16.mxu0 %v8607_v31  ;;  %4105 = vmatprep.subr.bf16.mxu1 %v8610_v32  ;;  %v8693_v31 = vld [vmem:[%s12561_s1 + $0x628] ss:$16 sps:$4 sm:$0xff]   ;;  %v8701_v32 = vld [vmem:[%s12561_s1 + $0x64c] ss:$16 sps:$4 sm:$0xff]  }
  0x8f   :  { %3737 = vmatpush1.bf16.msra.mxu0 %v8605_v33  ;;  %4106 = vmatpush1.bf16.msra.mxu1 %v8608_v34  ;;  %v8696_v33 = vld [vmem:[%s12561_s1 + $0x640] ss:$16 sps:$4 sm:$0xff]   ;;  %v8699_v34 = vld [vmem:[%s12561_s1 + $0x648] ss:$16 sps:$4 sm:$0xff]  }
  0x90   :  { %3738 = vmatprep.subr.bf16.mxu0 %v8613_v35  ;;  %4107 = vmatprep.subr.bf16.mxu1 %v8616_v36  ;;  %v8704_v35 = vld [vmem:[%s12561_s1 + $0x664] ss:$16 sps:$4 sm:$0xff]   ;;  %v8707_v36 = vld [vmem:[%s12561_s1 + $0x66c] ss:$16 sps:$4 sm:$0xff]  }
  0x93   :  { %3739 = vmatpush1.bf16.msra.mxu0 %v8611_v37  ;;  %4108 = vmatpush1.bf16.msra.mxu1 %v8614_v38  ;;  %v8702_v37 = vld [vmem:[%s12561_s1 + $0x660] ss:$16 sps:$4 sm:$0xff]   ;;  %v8705_v38 = vld [vmem:[%s12561_s1 + $0x668] ss:$16 sps:$4 sm:$0xff]  }
  0x94   :  { %3740 = vmatprep.subr.bf16.mxu0 %v8619_v39  ;;  %4109 = vmatprep.subr.bf16.mxu1 %v8622_v40  ;;  %v8710_v39 = vld [vmem:[%s12561_s1 + $0x684] ss:$16 sps:$4 sm:$0xff]   ;;  %v8713_v40 = vld [vmem:[%s12561_s1 + $0x68c] ss:$16 sps:$4 sm:$0xff]  }
  0x97   :  { %3741 = vmatpush1.bf16.msra.mxu0 %v8617_v41  ;;  %4110 = vmatpush1.bf16.msra.mxu1 %v8620_v43  ;;  %v8708_v41 = vld [vmem:[%s12561_s1 + $0x680] ss:$16 sps:$4 sm:$0xff]   ;;  %v8711_v43 = vld [vmem:[%s12561_s1 + $0x688] ss:$16 sps:$4 sm:$0xff]  }
  0x98   :  { %3742 = vmatprep.subr.bf16.mxu0 %v8625_v44  ;;  %4111 = vmatprep.subr.bf16.mxu1 %v8628_v45  ;;  %v8716_v44 = vld [vmem:[%s12561_s1 + $0x6a4] ss:$16 sps:$4 sm:$0xff]   ;;  %v8719_v45 = vld [vmem:[%s12561_s1 + $0x6ac] ss:$16 sps:$4 sm:$0xff]  }
  0x9b   :  { %3743 = vmatpush1.bf16.msra.mxu0 %v8623_v46  ;;  %4112 = vmatpush1.bf16.msra.mxu1 %v8626_v47  ;;  %v8714_v46 = vld [vmem:[%s12561_s1 + $0x6a0] ss:$16 sps:$4 sm:$0xff]   ;;  %v8717_v47 = vld [vmem:[%s12561_s1 + $0x6a8] ss:$16 sps:$4 sm:$0xff]  }
  0x9c   :  { %3744 = vmatprep.subr.bf16.mxu0 %v8631_v48  ;;  %4113 = vmatprep.subr.bf16.mxu1 %v8634_v50  ;;  %v8722_v48 = vld [vmem:[%s12561_s1 + $0x6c4] ss:$16 sps:$4 sm:$0xff]   ;;  %v8725_v50 = vld [vmem:[%s12561_s1 + $0x6cc] ss:$16 sps:$4 sm:$0xff]  }
  0x9f   :  { %3745 = vmatpush1.bf16.msra.mxu0 %v8629_v51  ;;  %4114 = vmatpush1.bf16.msra.mxu1 %v8632_v53  ;;  %v8720_v51 = vld [vmem:[%s12561_s1 + $0x6c0] ss:$16 sps:$4 sm:$0xff]   ;;  %v8723_v53 = vld [vmem:[%s12561_s1 + $0x6c8] ss:$16 sps:$4 sm:$0xff]  }
  0xa0   :  { %3746 = vmatprep.subr.bf16.mxu0 %v8637_v54  ;;  %4115 = vmatprep.subr.bf16.mxu1 %v8640_v55  ;;  %v8728_v54 = vld [vmem:[%s12561_s1 + $0x6e4] ss:$16 sps:$4 sm:$0xff]   ;;  %v8731_v55 = vld [vmem:[%s12561_s1 + $0x6ec] ss:$16 sps:$4 sm:$0xff]  }
  0xa3   :  { %3747 = vmatpush1.bf16.msra.mxu0 %v8635_v56  ;;  %4116 = vmatpush1.bf16.msra.mxu1 %v8638_v57  ;;  %v8726_v56 = vld [vmem:[%s12561_s1 + $0x6e0] ss:$16 sps:$4 sm:$0xff]   ;;  %v8729_v57 = vld [vmem:[%s12561_s1 + $0x6e8] ss:$16 sps:$4 sm:$0xff]  }
  0xa4   :  { %3748 = vmatprep.subr.bf16.mxu0 %v8643_v58  ;;  %4117 = vmatprep.subr.bf16.mxu1 %v8646_v59  ;;  %v8734_v58 = vld [vmem:[%s12561_s1 + $0x704] ss:$16 sps:$4 sm:$0xff]   ;;  %v8737_v59 = vld [vmem:[%s12561_s1 + $0x70c] ss:$16 sps:$4 sm:$0xff]  }
  0xa7   :  { %3749 = vmatpush1.bf16.msra.mxu0 %v8641_v60  ;;  %4118 = vmatpush1.bf16.msra.mxu1 %v8644_v61  ;;  %v8732_v60 = vld [vmem:[%s12561_s1 + $0x700] ss:$16 sps:$4 sm:$0xff]   ;;  %v8735_v61 = vld [vmem:[%s12561_s1 + $0x708] ss:$16 sps:$4 sm:$0xff]  }
  0xa8   :  { %3750 = vmatprep.subr.bf16.mxu0 %v8649_v62  ;;  %4119 = vmatprep.subr.bf16.mxu1 %v8652_v63  ;;  %v8740_v62 = vld [vmem:[%s12561_s1 + $0x724] ss:$16 sps:$4 sm:$0xff]   ;;  %v8743_v63 = vld [vmem:[%s12561_s1 + $0x72c] ss:$16 sps:$4 sm:$0xff]  }
  0xab   :  { %3751 = vmatpush1.bf16.msra.mxu0 %v8647_v0  ;;  %4120 = vmatpush1.bf16.msra.mxu1 %v8650_v1  ;;  %v8738_v0 = vld [vmem:[%s12561_s1 + $0x720] ss:$16 sps:$4 sm:$0xff]   ;;  %v8741_v1 = vld [vmem:[%s12561_s1 + $0x728] ss:$16 sps:$4 sm:$0xff]  }
  0xac   :  { %3752 = vmatprep.subr.bf16.mxu0 %v8655_v2  ;;  %4121 = vmatprep.subr.bf16.mxu1 %v8658_v3  ;;  %v8746_v2 = vld [vmem:[%s12561_s1 + $0x744] ss:$16 sps:$4 sm:$0xff]   ;;  %v8749_v3 = vld [vmem:[%s12561_s1 + $0x74c] ss:$16 sps:$4 sm:$0xff]  }
  0xaf   :  { %3753 = vmatpush1.bf16.msra.mxu0 %v8653_v4  ;;  %4122 = vmatpush1.bf16.msra.mxu1 %v8656_v5  ;;  %v8744_v4 = vld [vmem:[%s12561_s1 + $0x740] ss:$16 sps:$4 sm:$0xff]   ;;  %v8747_v5 = vld [vmem:[%s12561_s1 + $0x748] ss:$16 sps:$4 sm:$0xff]  }
  0xb0   :  { %3754 = vmatprep.subr.bf16.mxu0 %v8661_v6  ;;  %4123 = vmatprep.subr.bf16.mxu1 %v8664_v7  ;;  %v8752_v6 = vld [vmem:[%s12561_s1 + $0x764] ss:$16 sps:$4 sm:$0xff]   ;;  %v8755_v7 = vld [vmem:[%s12561_s1 + $0x76c] ss:$16 sps:$4 sm:$0xff]  }
  0xb3   :  { %3755 = vmatpush1.bf16.msra.mxu0 %v8659_v8  ;;  %4124 = vmatpush1.bf16.msra.mxu1 %v8662_v9  ;;  %v8750_v8 = vld [vmem:[%s12561_s1 + $0x760] ss:$16 sps:$4 sm:$0xff]   ;;  %v8753_v9 = vld [vmem:[%s12561_s1 + $0x768] ss:$16 sps:$4 sm:$0xff]  }
  0xb4   :  { %3756 = vmatprep.subr.bf16.mxu0 %v8667_v10  ;;  %4125 = vmatprep.subr.bf16.mxu1 %v8670_v11  ;;  %v8758_v10 = vld [vmem:[%s12561_s1 + $0x784] ss:$16 sps:$4 sm:$0xff]   ;;  %v8761_v11 = vld [vmem:[%s12561_s1 + $0x78c] ss:$16 sps:$4 sm:$0xff]  }
  0xb7   :  { %3757 = vmatpush1.bf16.msra.mxu0 %v8665_v12  ;;  %4126 = vmatpush1.bf16.msra.mxu1 %v8668_v52  ;;  %v8756_v12 = vld [vmem:[%s12561_s1 + $0x780] ss:$16 sps:$4 sm:$0xff]   ;;  %v8759_v52 = vld [vmem:[%s12561_s1 + $0x788] ss:$16 sps:$4 sm:$0xff]  }
  0xb8   :  { %3758 = vmatprep.subr.bf16.mxu0 %v8673_v15  ;;  %4127 = vmatprep.subr.bf16.mxu1 %v8676_v16  ;;  %v8764_v15 = vld [vmem:[%s12561_s1 + $0x7a4] ss:$16 sps:$4 sm:$0xff]   ;;  %v8767_v16 = vld [vmem:[%s12561_s1 + $0x7ac] ss:$16 sps:$4 sm:$0xff]  }
  0xbb   :  { %3759 = vmatpush1.bf16.msra.mxu0 %v8671_v17  ;;  %4128 = vmatpush1.bf16.msra.mxu1 %v8674_v18  ;;  %v8762_v17 = vld [vmem:[%s12561_s1 + $0x7a0] ss:$16 sps:$4 sm:$0xff]   ;;  %v8765_v18 = vld [vmem:[%s12561_s1 + $0x7a8] ss:$16 sps:$4 sm:$0xff]  }
  0xbc   :  { %3760 = vmatprep.subr.bf16.mxu0 %v8679_v19  ;;  %4129 = vmatprep.subr.bf16.mxu1 %v8682_v20  ;;  %v8770_v19 = vld [vmem:[%s12561_s1 + $0x7c4] ss:$16 sps:$4 sm:$0xff]   ;;  %v8773_v20 = vld [vmem:[%s12561_s1 + $0x7cc] ss:$16 sps:$4 sm:$0xff]  }
  0xbf   :  { %3761 = vmatpush1.bf16.msra.mxu0 %v8677_v21  ;;  %4130 = vmatpush1.bf16.msra.mxu1 %v8680_v22  ;;  %v10288_v21 = vld [vmem:[%s12562_s0 + $0x8] sm:$0xff]  ;;  %v8768_v22 = vld [vmem:[%s12561_s1 + $0x7c0] ss:$16 sps:$4 sm:$0xff]  }
  0xc0   :  { %3771 = vmatprep.subr.bf16.mxu0 %v8686_v23  ;;  %4140 = vmatprep.subr.bf16.mxu1 %v8689_v24  ;;  %v8771_v23 = vld [vmem:[%s12561_s1 + $0x7c8] ss:$16 sps:$4 sm:$0xff]   ;;  %v8776_v24 = vld [vmem:[%s12561_s1 + $0x7e4] ss:$16 sps:$4 sm:$0xff]  }
  0xc2   :  { %3763 = vmatmul.mubr.bf16.vlgmr.msra.gmra.mrb[0].mxu0 %v10114_v26  ;;  %4132 = vmatmul.mubr.bf16.vlgmr.msra.gmra.mrb[0].mxu1 %v10114_v26 }
  0xc3   :  { %3772 = vmatpush1.bf16.msra.mxu0 %v8684_v13  ;;  %4141 = vmatpush1.bf16.msra.mxu1 %v8687_v27  ;;  %v8779_v13 = vld [vmem:[%s12561_s1 + $0x7ec] ss:$16 sps:$4 sm:$0xff]   ;;  %v10304_v27 = vrot.slane %v10288_v21, %v9630_v49 }
  0xc4   :  { %3773 = vmatprep.subr.bf16.mxu0 %v8692_v28  ;;  %4142 = vmatprep.subr.bf16.mxu1 %v8695_v29  ;;  %v8774_v28 = vld [vmem:[%s12561_s1 + $0x7e0] ss:$16 sps:$4 sm:$0xff]   ;;  %v8777_v29 = vld [vmem:[%s12561_s1 + $0x7e8] ss:$16 sps:$4 sm:$0xff]  }
  0xc5   :  { %3803 = vmatprep.mubr.bf16.mxu0 %v678_v14  ;;  %4172 = vmatprep.mubr.bf16.mxu1 %v678_v14  ;;  %v8782_v14 = vld [vmem:[%s12561_s1 + $0x804] ss:$16 sps:$4 sm:$0xff]  }
  0xc7   :  { %3774 = vmatpush1.bf16.msra.mxu0 %v8690_v30  ;;  %4143 = vmatpush1.bf16.msra.mxu1 %v8693_v31  ;;  %v8785_v30 = vld [vmem:[%s12561_s1 + $0x80c] ss:$16 sps:$4 sm:$0xff]   ;;  %v694_v31 = vcombine.high %v10304_v27, %v10304_v27 }
  0xc8   :  { %3775 = vmatprep.subr.bf16.mxu0 %v8698_v25  ;;  %4144 = vmatprep.subr.bf16.mxu1 %v8701_v32  ;;  %v676_v25 = vcombine.high %v10114_v26, %v10114_v26  ;;  %v8780_v32 = vld [vmem:[%s12561_s1 + $0x800] ss:$16 sps:$4 sm:$0xff]   ;;  %v8791_v26 = vld [vmem:[%s12561_s1 + $0x82c] ss:$16 sps:$4 sm:$0xff]  }
  0xcb   :  { %3776 = vmatpush1.bf16.msra.mxu0 %v8696_v33  ;;  %4145 = vmatpush1.bf16.msra.mxu1 %v8699_v34  ;;  %v8783_v33 = vld [vmem:[%s12561_s1 + $0x808] ss:$16 sps:$4 sm:$0xff]   ;;  %v8788_v34 = vld [vmem:[%s12561_s1 + $0x824] ss:$16 sps:$4 sm:$0xff]  }
  0xcc   :  { %3777 = vmatprep.subr.bf16.mxu0 %v8704_v35  ;;  %4146 = vmatprep.subr.bf16.mxu1 %v8707_v36  ;;  %v10335_v35 = vrot.slane %v694_v31, %v9630_v49  ;;  %v8786_v36 = vld [vmem:[%s12561_s1 + $0x820] ss:$16 sps:$4 sm:$0xff]   ;;  %v8867_v31 = vld [vmem:[%s12561_s1 + $0x9c8] ss:$16 sps:$4 sm:$0xff]  }
  0xcf   :  { %3778 = vmatpush1.bf16.msra.mxu0 %v8702_v37  ;;  %4147 = vmatpush1.bf16.msra.mxu1 %v8705_v38  ;;  %v8789_v37 = vld [vmem:[%s12561_s1 + $0x828] ss:$16 sps:$4 sm:$0xff]   ;;  %v8794_v38 = vld [vmem:[%s12561_s1 + $0x844] ss:$16 sps:$4 sm:$0xff]  }
  0xd0   :  { %3779 = vmatprep.subr.bf16.mxu0 %v8710_v39  ;;  %4148 = vmatprep.subr.bf16.mxu1 %v8713_v40  ;;  %v8797_v39 = vld [vmem:[%s12561_s1 + $0x84c] ss:$16 sps:$4 sm:$0xff]   ;;  %v8792_v40 = vld [vmem:[%s12561_s1 + $0x840] ss:$16 sps:$4 sm:$0xff]  }
  0xd3   :  { %3780 = vmatpush1.bf16.msra.mxu0 %v8708_v41  ;;  %4149 = vmatpush1.bf16.msra.mxu1 %v8711_v43  ;;  %v8795_v41 = vld [vmem:[%s12561_s1 + $0x848] ss:$16 sps:$4 sm:$0xff]   ;;  %v8800_v43 = vld [vmem:[%s12561_s1 + $0x864] ss:$16 sps:$4 sm:$0xff]  }
  0xd4   :  { %3781 = vmatprep.subr.bf16.mxu0 %v8716_v44  ;;  %4150 = vmatprep.subr.bf16.mxu1 %v8719_v45  ;;  %v8803_v44 = vld [vmem:[%s12561_s1 + $0x86c] ss:$16 sps:$4 sm:$0xff]   ;;  %v8798_v45 = vld [vmem:[%s12561_s1 + $0x860] ss:$16 sps:$4 sm:$0xff]  }
  0xd7   :  { %3782 = vmatpush1.bf16.msra.mxu0 %v8714_v46  ;;  %4151 = vmatpush1.bf16.msra.mxu1 %v8717_v47  ;;  %v8801_v46 = vld [vmem:[%s12561_s1 + $0x868] ss:$16 sps:$4 sm:$0xff]   ;;  %v8806_v47 = vld [vmem:[%s12561_s1 + $0x884] ss:$16 sps:$4 sm:$0xff]  }
  0xd8   :  { %3783 = vmatprep.subr.bf16.mxu0 %v8722_v48  ;;  %4152 = vmatprep.subr.bf16.mxu1 %v8725_v50  ;;  %v8809_v48 = vld [vmem:[%s12561_s1 + $0x88c] ss:$16 sps:$4 sm:$0xff]   ;;  %v8804_v50 = vld [vmem:[%s12561_s1 + $0x880] ss:$16 sps:$4 sm:$0xff]  }
  0xdb   :  { %3784 = vmatpush1.bf16.msra.mxu0 %v8720_v51  ;;  %4153 = vmatpush1.bf16.msra.mxu1 %v8723_v53  ;;  %v8807_v51 = vld [vmem:[%s12561_s1 + $0x888] ss:$16 sps:$4 sm:$0xff]   ;;  %v8812_v53 = vld [vmem:[%s12561_s1 + $0x8a4] ss:$16 sps:$4 sm:$0xff]  }
  0xdc   :  { %3785 = vmatprep.subr.bf16.mxu0 %v8728_v54  ;;  %4154 = vmatprep.subr.bf16.mxu1 %v8731_v55  ;;  %v8815_v54 = vld [vmem:[%s12561_s1 + $0x8ac] ss:$16 sps:$4 sm:$0xff]   ;;  %v8810_v55 = vld [vmem:[%s12561_s1 + $0x8a0] ss:$16 sps:$4 sm:$0xff]  }
  0xdf   :  { %3786 = vmatpush1.bf16.msra.mxu0 %v8726_v56  ;;  %4155 = vmatpush1.bf16.msra.mxu1 %v8729_v57  ;;  %v8813_v56 = vld [vmem:[%s12561_s1 + $0x8a8] ss:$16 sps:$4 sm:$0xff]   ;;  %v8818_v57 = vld [vmem:[%s12561_s1 + $0x8c4] ss:$16 sps:$4 sm:$0xff]  }
  0xe0   :  { %3787 = vmatprep.subr.bf16.mxu0 %v8734_v58  ;;  %4156 = vmatprep.subr.bf16.mxu1 %v8737_v59  ;;  %v8821_v58 = vld [vmem:[%s12561_s1 + $0x8cc] ss:$16 sps:$4 sm:$0xff]   ;;  %v8816_v59 = vld [vmem:[%s12561_s1 + $0x8c0] ss:$16 sps:$4 sm:$0xff]  }
  0xe3   :  { %3788 = vmatpush1.bf16.msra.mxu0 %v8732_v60  ;;  %4157 = vmatpush1.bf16.msra.mxu1 %v8735_v61  ;;  %v8819_v60 = vld [vmem:[%s12561_s1 + $0x8c8] ss:$16 sps:$4 sm:$0xff]   ;;  %v8824_v61 = vld [vmem:[%s12561_s1 + $0x8e4] ss:$16 sps:$4 sm:$0xff]  }
  0xe4   :  { %3789 = vmatprep.subr.bf16.mxu0 %v8740_v62  ;;  %4158 = vmatprep.subr.bf16.mxu1 %v8743_v63  ;;  %v8827_v62 = vld [vmem:[%s12561_s1 + $0x8ec] ss:$16 sps:$4 sm:$0xff]   ;;  %v8822_v63 = vld [vmem:[%s12561_s1 + $0x8e0] ss:$16 sps:$4 sm:$0xff]  }
  0xe7   :  { %3790 = vmatpush1.bf16.msra.mxu0 %v8738_v0  ;;  %4159 = vmatpush1.bf16.msra.mxu1 %v8741_v1  ;;  %v8825_v0 = vld [vmem:[%s12561_s1 + $0x8e8] ss:$16 sps:$4 sm:$0xff]   ;;  %v8830_v1 = vld [vmem:[%s12561_s1 + $0x904] ss:$16 sps:$4 sm:$0xff]  }
  0xe8   :  { %3791 = vmatprep.subr.bf16.mxu0 %v8746_v2  ;;  %4160 = vmatprep.subr.bf16.mxu1 %v8749_v3  ;;  %v8833_v2 = vld [vmem:[%s12561_s1 + $0x90c] ss:$16 sps:$4 sm:$0xff]   ;;  %v8828_v3 = vld [vmem:[%s12561_s1 + $0x900] ss:$16 sps:$4 sm:$0xff]  }
  0xeb   :  { %3792 = vmatpush1.bf16.msra.mxu0 %v8744_v4  ;;  %4161 = vmatpush1.bf16.msra.mxu1 %v8747_v5  ;;  %v8831_v4 = vld [vmem:[%s12561_s1 + $0x908] ss:$16 sps:$4 sm:$0xff]   ;;  %v8836_v5 = vld [vmem:[%s12561_s1 + $0x924] ss:$16 sps:$4 sm:$0xff]  }
  0xec   :  { %3793 = vmatprep.subr.bf16.mxu0 %v8752_v6  ;;  %4162 = vmatprep.subr.bf16.mxu1 %v8755_v7  ;;  %v8839_v6 = vld [vmem:[%s12561_s1 + $0x92c] ss:$16 sps:$4 sm:$0xff]   ;;  %v8834_v7 = vld [vmem:[%s12561_s1 + $0x920] ss:$16 sps:$4 sm:$0xff]  }
  0xef   :  { %3794 = vmatpush1.bf16.msra.mxu0 %v8750_v8  ;;  %4163 = vmatpush1.bf16.msra.mxu1 %v8753_v9  ;;  %v8837_v8 = vld [vmem:[%s12561_s1 + $0x928] ss:$16 sps:$4 sm:$0xff]   ;;  %v8842_v9 = vld [vmem:[%s12561_s1 + $0x944] ss:$16 sps:$4 sm:$0xff]  }
  0xf0   :  { %3795 = vmatprep.subr.bf16.mxu0 %v8758_v10  ;;  %4164 = vmatprep.subr.bf16.mxu1 %v8761_v11  ;;  %v8845_v10 = vld [vmem:[%s12561_s1 + $0x94c] ss:$16 sps:$4 sm:$0xff]   ;;  %v8840_v11 = vld [vmem:[%s12561_s1 + $0x940] ss:$16 sps:$4 sm:$0xff]  }
  0xf3   :  { %3796 = vmatpush1.bf16.msra.mxu0 %v8756_v12  ;;  %4165 = vmatpush1.bf16.msra.mxu1 %v8759_v52  ;;  %v8843_v12 = vld [vmem:[%s12561_s1 + $0x948] ss:$16 sps:$4 sm:$0xff]   ;;  %v8848_v52 = vld [vmem:[%s12561_s1 + $0x964] ss:$16 sps:$4 sm:$0xff]  }
  0xf4   :  { %3797 = vmatprep.subr.bf16.mxu0 %v8764_v15  ;;  %4166 = vmatprep.subr.bf16.mxu1 %v8767_v16  ;;  %v8851_v15 = vld [vmem:[%s12561_s1 + $0x96c] ss:$16 sps:$4 sm:$0xff]   ;;  %v8846_v16 = vld [vmem:[%s12561_s1 + $0x960] ss:$16 sps:$4 sm:$0xff]  }
  0xf7   :  { %3798 = vmatpush1.bf16.msra.mxu0 %v8762_v17  ;;  %4167 = vmatpush1.bf16.msra.mxu1 %v8765_v18  ;;  %v8849_v17 = vld [vmem:[%s12561_s1 + $0x968] ss:$16 sps:$4 sm:$0xff]   ;;  %v8854_v18 = vld [vmem:[%s12561_s1 + $0x984] ss:$16 sps:$4 sm:$0xff]  }
  0xf8   :  { %3799 = vmatprep.subr.bf16.mxu0 %v8770_v19  ;;  %4168 = vmatprep.subr.bf16.mxu1 %v8773_v20  ;;  %v8857_v19 = vld [vmem:[%s12561_s1 + $0x98c] ss:$16 sps:$4 sm:$0xff]   ;;  %v8852_v20 = vld [vmem:[%s12561_s1 + $0x980] ss:$16 sps:$4 sm:$0xff]  }
  0xfb   :  { %3800 = vmatpush1.bf16.msra.mxu0 %v8768_v22  ;;  %4169 = vmatpush1.bf16.msra.mxu1 %v8771_v23  ;;  %v8855_v22 = vld [vmem:[%s12561_s1 + $0x988] ss:$16 sps:$4 sm:$0xff]   ;;  %v8860_v23 = vld [vmem:[%s12561_s1 + $0x9a4] ss:$16 sps:$4 sm:$0xff]  }
  0xfc   :  { %3801 = vmatprep.subr.bf16.mxu0 %v8776_v24  ;;  %4170 = vmatprep.subr.bf16.mxu1 %v8779_v13  ;;  %v8863_v24 = vld [vmem:[%s12561_s1 + $0x9ac] ss:$16 sps:$4 sm:$0xff]   ;;  %v8858_v13 = vld [vmem:[%s12561_s1 + $0x9a0] ss:$16 sps:$4 sm:$0xff]  }
  0xff   :  { %3802 = vmatpush1.bf16.msra.mxu0 %v8774_v28  ;;  %4171 = vmatpush1.bf16.msra.mxu1 %v8777_v29  ;;  %v8861_v28 = vld [vmem:[%s12561_s1 + $0x9a8] ss:$16 sps:$4 sm:$0xff]   ;;  %v8866_v29 = vld [vmem:[%s12561_s1 + $0x9c4] ss:$16 sps:$4 sm:$0xff]  }
 0x100   :  { %3812 = vmatprep.subr.bf16.mxu0 %v8782_v14  ;;  %4181 = vmatprep.subr.bf16.mxu1 %v8785_v30  ;;  %v8869_v14 = vld [vmem:[%s12561_s1 + $0x9cc] ss:$16 sps:$4 sm:$0xff]   ;;  %v8864_v30 = vld [vmem:[%s12561_s1 + $0x9c0] ss:$16 sps:$4 sm:$0xff]  }
 0x102   :  { %3804 = vmatmul.mubr.bf16.vlgmr.msra.gmra.mrb[0].mxu0 %v676_v25  ;;  %4173 = vmatmul.mubr.bf16.vlgmr.msra.gmra.mrb[0].mxu1 %v676_v25  ;;  %v8872_v25 = vld [vmem:[%s12561_s1 + $0x9e4] ss:$16 sps:$4 sm:$0xff]  }
 0x103   :  { %3813 = vmatpush1.bf16.msra.mxu0 %v8780_v32  ;;  %4182 = vmatpush1.bf16.msra.mxu1 %v8783_v33  ;;  %v8875_v32 = vld [vmem:[%s12561_s1 + $0x9ec] ss:$16 sps:$4 sm:$0xff]   ;;  %v8870_v33 = vld [vmem:[%s12561_s1 + $0x9e0] ss:$16 sps:$4 sm:$0xff]  }
 0x104   :  { %3814 = vmatprep.subr.bf16.mxu0 %v8788_v34  ;;  %4183 = vmatprep.subr.bf16.mxu1 %v8791_v26  ;;  %v8873_v34 = vld [vmem:[%s12561_s1 + $0x9e8] ss:$16 sps:$4 sm:$0xff]   ;;  %v8878_v26 = vld [vmem:[%s12561_s1 + $0xa04] ss:$16 sps:$4 sm:$0xff]  }
 0x105   :  { %3844 = vmatprep.mubr.bf16.mxu0 %v10335_v35  ;;  %4213 = vmatprep.mubr.bf16.mxu1 %v10335_v35 }
 0x107   :  { %3815 = vmatpush1.bf16.msra.mxu0 %v8786_v36  ;;  %4184 = vmatpush1.bf16.msra.mxu1 %v8789_v37  ;;  %v8881_v36 = vld [vmem:[%s12561_s1 + $0xa0c] ss:$16 sps:$4 sm:$0xff]   ;;  %v10521_v37 = vrot.slane %v10304_v27, %v9630_v49 }
 0x108   :  { %3816 = vmatprep.subr.bf16.mxu0 %v8794_v38  ;;  %4185 = vmatprep.subr.bf16.mxu1 %v8797_v39  ;;  %v8876_v38 = vld [vmem:[%s12561_s1 + $0xa00] ss:$16 sps:$4 sm:$0xff]   ;;  %v8879_v39 = vld [vmem:[%s12561_s1 + $0xa08] ss:$16 sps:$4 sm:$0xff]   ;;  %v8887_v27 = vld [vmem:[%s12561_s1 + $0xa2c] ss:$16 sps:$4 sm:$0xff]  }
 0x10b   :  { %3817 = vmatpush1.bf16.msra.mxu0 %v8792_v40  ;;  %4186 = vmatpush1.bf16.msra.mxu1 %v8795_v41  ;;  %v8884_v40 = vld [vmem:[%s12561_s1 + $0xa24] ss:$16 sps:$4 sm:$0xff]   ;;  %v726_v41 = vcombine.high %v10335_v35, %v10335_v35 }
 0x10c   :  { %3818 = vmatprep.subr.bf16.mxu0 %v8800_v43  ;;  %4187 = vmatprep.subr.bf16.mxu1 %v8803_v44  ;;  %v8882_v43 = vld [vmem:[%s12561_s1 + $0xa20] ss:$16 sps:$4 sm:$0xff]   ;;  %v8885_v44 = vld [vmem:[%s12561_s1 + $0xa28] ss:$16 sps:$4 sm:$0xff]   ;;  %v8890_v35 = vld [vmem:[%s12561_s1 + $0xa44] ss:$16 sps:$4 sm:$0xff]  }
 0x10f   :  { %3819 = vmatpush1.bf16.msra.mxu0 %v8798_v45  ;;  %4188 = vmatpush1.bf16.msra.mxu1 %v8801_v46  ;;  %v8893_v45 = vld [vmem:[%s12561_s1 + $0xa4c] ss:$16 sps:$4 sm:$0xff]   ;;  %v8888_v46 = vld [vmem:[%s12561_s1 + $0xa40] ss:$16 sps:$4 sm:$0xff]  }
 0x110   :  { %3820 = vmatprep.subr.bf16.mxu0 %v8806_v47  ;;  %4189 = vmatprep.subr.bf16.mxu1 %v8809_v48  ;;  %v8891_v47 = vld [vmem:[%s12561_s1 + $0xa48] ss:$16 sps:$4 sm:$0xff]   ;;  %v8896_v48 = vld [vmem:[%s12561_s1 + $0xa64] ss:$16 sps:$4 sm:$0xff]  }
 0x113   :  { %3821 = vmatpush1.bf16.msra.mxu0 %v8804_v50  ;;  %4190 = vmatpush1.bf16.msra.mxu1 %v8807_v51  ;;  %v8899_v50 = vld [vmem:[%s12561_s1 + $0xa6c] ss:$16 sps:$4 sm:$0xff]   ;;  %v8894_v51 = vld [vmem:[%s12561_s1 + $0xa60] ss:$16 sps:$4 sm:$0xff]  }
 0x114   :  { %3822 = vmatprep.subr.bf16.mxu0 %v8812_v53  ;;  %4191 = vmatprep.subr.bf16.mxu1 %v8815_v54  ;;  %v8897_v53 = vld [vmem:[%s12561_s1 + $0xa68] ss:$16 sps:$4 sm:$0xff]   ;;  %v8902_v54 = vld [vmem:[%s12561_s1 + $0xa84] ss:$16 sps:$4 sm:$0xff]  }
 0x117   :  { %3823 = vmatpush1.bf16.msra.mxu0 %v8810_v55  ;;  %4192 = vmatpush1.bf16.msra.mxu1 %v8813_v56  ;;  %v8905_v55 = vld [vmem:[%s12561_s1 + $0xa8c] ss:$16 sps:$4 sm:$0xff]   ;;  %v8900_v56 = vld [vmem:[%s12561_s1 + $0xa80] ss:$16 sps:$4 sm:$0xff]  }
 0x118   :  { %3824 = vmatprep.subr.bf16.mxu0 %v8818_v57  ;;  %4193 = vmatprep.subr.bf16.mxu1 %v8821_v58  ;;  %v8903_v57 = vld [vmem:[%s12561_s1 + $0xa88] ss:$16 sps:$4 sm:$0xff]   ;;  %v8908_v58 = vld [vmem:[%s12561_s1 + $0xaa4] ss:$16 sps:$4 sm:$0xff]  }
 0x11b   :  { %3825 = vmatpush1.bf16.msra.mxu0 %v8816_v59  ;;  %4194 = vmatpush1.bf16.msra.mxu1 %v8819_v60  ;;  %v8911_v59 = vld [vmem:[%s12561_s1 + $0xaac] ss:$16 sps:$4 sm:$0xff]   ;;  %v8906_v60 = vld [vmem:[%s12561_s1 + $0xaa0] ss:$16 sps:$4 sm:$0xff]  }
 0x11c   :  { %3826 = vmatprep.subr.bf16.mxu0 %v8824_v61  ;;  %4195 = vmatprep.subr.bf16.mxu1 %v8827_v62  ;;  %v8909_v61 = vld [vmem:[%s12561_s1 + $0xaa8] ss:$16 sps:$4 sm:$0xff]   ;;  %v8914_v62 = vld [vmem:[%s12561_s1 + $0xac4] ss:$16 sps:$4 sm:$0xff]  }
 0x11f   :  { %3827 = vmatpush1.bf16.msra.mxu0 %v8822_v63  ;;  %4196 = vmatpush1.bf16.msra.mxu1 %v8825_v0  ;;  %v8917_v63 = vld [vmem:[%s12561_s1 + $0xacc] ss:$16 sps:$4 sm:$0xff]   ;;  %v8912_v0 = vld [vmem:[%s12561_s1 + $0xac0] ss:$16 sps:$4 sm:$0xff]  }
 0x120   :  { %3828 = vmatprep.subr.bf16.mxu0 %v8830_v1  ;;  %4197 = vmatprep.subr.bf16.mxu1 %v8833_v2  ;;  %v8915_v1 = vld [vmem:[%s12561_s1 + $0xac8] ss:$16 sps:$4 sm:$0xff]   ;;  %v8920_v2 = vld [vmem:[%s12561_s1 + $0xae4] ss:$16 sps:$4 sm:$0xff]  }
 0x123   :  { %3829 = vmatpush1.bf16.msra.mxu0 %v8828_v3  ;;  %4198 = vmatpush1.bf16.msra.mxu1 %v8831_v4  ;;  %v8923_v3 = vld [vmem:[%s12561_s1 + $0xaec] ss:$16 sps:$4 sm:$0xff]   ;;  %v8918_v4 = vld [vmem:[%s12561_s1 + $0xae0] ss:$16 sps:$4 sm:$0xff]  }
 0x124   :  { %3830 = vmatprep.subr.bf16.mxu0 %v8836_v5  ;;  %4199 = vmatprep.subr.bf16.mxu1 %v8839_v6  ;;  %v8921_v5 = vld [vmem:[%s12561_s1 + $0xae8] ss:$16 sps:$4 sm:$0xff]   ;;  %v8926_v6 = vld [vmem:[%s12561_s1 + $0xb04] ss:$16 sps:$4 sm:$0xff]  }
 0x127   :  { %3831 = vmatpush1.bf16.msra.mxu0 %v8834_v7  ;;  %4200 = vmatpush1.bf16.msra.mxu1 %v8837_v8  ;;  %v8929_v7 = vld [vmem:[%s12561_s1 + $0xb0c] ss:$16 sps:$4 sm:$0xff]   ;;  %v8924_v8 = vld [vmem:[%s12561_s1 + $0xb00] ss:$16 sps:$4 sm:$0xff]  }
 0x128   :  { %3832 = vmatprep.subr.bf16.mxu0 %v8842_v9  ;;  %4201 = vmatprep.subr.bf16.mxu1 %v8845_v10  ;;  %v8927_v9 = vld [vmem:[%s12561_s1 + $0xb08] ss:$16 sps:$4 sm:$0xff]   ;;  %v8932_v10 = vld [vmem:[%s12561_s1 + $0xb24] ss:$16 sps:$4 sm:$0xff]  }
 0x12b   :  { %3833 = vmatpush1.bf16.msra.mxu0 %v8840_v11  ;;  %4202 = vmatpush1.bf16.msra.mxu1 %v8843_v12  ;;  %v8935_v11 = vld [vmem:[%s12561_s1 + $0xb2c] ss:$16 sps:$4 sm:$0xff]   ;;  %v8930_v12 = vld [vmem:[%s12561_s1 + $0xb20] ss:$16 sps:$4 sm:$0xff]  }
 0x12c   :  { %3834 = vmatprep.subr.bf16.mxu0 %v8848_v52  ;;  %4203 = vmatprep.subr.bf16.mxu1 %v8851_v15  ;;  %v8933_v52 = vld [vmem:[%s12561_s1 + $0xb28] ss:$16 sps:$4 sm:$0xff]   ;;  %v8938_v15 = vld [vmem:[%s12561_s1 + $0xb44] ss:$16 sps:$4 sm:$0xff]  }
 0x12f   :  { %3835 = vmatpush1.bf16.msra.mxu0 %v8846_v16  ;;  %4204 = vmatpush1.bf16.msra.mxu1 %v8849_v17  ;;  %v8941_v16 = vld [vmem:[%s12561_s1 + $0xb4c] ss:$16 sps:$4 sm:$0xff]   ;;  %v8936_v17 = vld [vmem:[%s12561_s1 + $0xb40] ss:$16 sps:$4 sm:$0xff]  }
 0x130   :  { %3836 = vmatprep.subr.bf16.mxu0 %v8854_v18  ;;  %4205 = vmatprep.subr.bf16.mxu1 %v8857_v19  ;;  %v8939_v18 = vld [vmem:[%s12561_s1 + $0xb48] ss:$16 sps:$4 sm:$0xff]   ;;  %v8944_v19 = vld [vmem:[%s12561_s1 + $0xb64] ss:$16 sps:$4 sm:$0xff]  }
 0x133   :  { %3837 = vmatpush1.bf16.msra.mxu0 %v8852_v20  ;;  %4206 = vmatpush1.bf16.msra.mxu1 %v8855_v22  ;;  %v8947_v20 = vld [vmem:[%s12561_s1 + $0xb6c] ss:$16 sps:$4 sm:$0xff]   ;;  %v8942_v22 = vld [vmem:[%s12561_s1 + $0xb60] ss:$16 sps:$4 sm:$0xff]  }
 0x134   :  { %3838 = vmatprep.subr.bf16.mxu0 %v8860_v23  ;;  %4207 = vmatprep.subr.bf16.mxu1 %v8863_v24  ;;  %v8945_v23 = vld [vmem:[%s12561_s1 + $0xb68] ss:$16 sps:$4 sm:$0xff]   ;;  %v8950_v24 = vld [vmem:[%s12561_s1 + $0xb84] ss:$16 sps:$4 sm:$0xff]  }
 0x137   :  { %3839 = vmatpush1.bf16.msra.mxu0 %v8858_v13  ;;  %4208 = vmatpush1.bf16.msra.mxu1 %v8861_v28  ;;  %v8953_v13 = vld [vmem:[%s12561_s1 + $0xb8c] ss:$16 sps:$4 sm:$0xff]   ;;  %v8948_v28 = vld [vmem:[%s12561_s1 + $0xb80] ss:$16 sps:$4 sm:$0xff]  }
 0x138   :  { %3840 = vmatprep.subr.bf16.mxu0 %v8866_v29  ;;  %4209 = vmatprep.subr.bf16.mxu1 %v8869_v14  ;;  %v8951_v29 = vld [vmem:[%s12561_s1 + $0xb88] ss:$16 sps:$4 sm:$0xff]   ;;  %v8956_v14 = vld [vmem:[%s12561_s1 + $0xba4] ss:$16 sps:$4 sm:$0xff]  }
 0x13b   :  { %3841 = vmatpush1.bf16.msra.mxu0 %v8864_v30  ;;  %4210 = vmatpush1.bf16.msra.mxu1 %v8867_v31  ;;  %v8959_v30 = vld [vmem:[%s12561_s1 + $0xbac] ss:$16 sps:$4 sm:$0xff]   ;;  %v8954_v31 = vld [vmem:[%s12561_s1 + $0xba0] ss:$16 sps:$4 sm:$0xff]  }
 0x13c   :  { %3842 = vmatprep.subr.bf16.mxu0 %v8872_v25  ;;  %4211 = vmatprep.subr.bf16.mxu1 %v8875_v32  ;;  %v8957_v25 = vld [vmem:[%s12561_s1 + $0xba8] ss:$16 sps:$4 sm:$0xff]   ;;  %v8962_v32 = vld [vmem:[%s12561_s1 + $0xbc4] ss:$16 sps:$4 sm:$0xff]  }
 0x13f   :  { %3843 = vmatpush1.bf16.msra.mxu0 %v8870_v33  ;;  %4212 = vmatpush1.bf16.msra.mxu1 %v8873_v34  ;;  %v8965_v33 = vld [vmem:[%s12561_s1 + $0xbcc] ss:$16 sps:$4 sm:$0xff]   ;;  %v679_v34 = vcombine.high %v10288_v21, %v10288_v21 }
 0x140   :  { %3853 = vmatprep.subr.bf16.mxu0 %v8878_v26  ;;  %4222 = vmatprep.subr.bf16.mxu1 %v8881_v36  ;;  %v8960_v26 = vld [vmem:[%s12561_s1 + $0xbc0] ss:$16 sps:$4 sm:$0xff]   ;;  %v8963_v36 = vld [vmem:[%s12561_s1 + $0xbc8] ss:$16 sps:$4 sm:$0xff]   ;;  %v8971_v21 = vld [vmem:[%s12561_s1 + $0xbec] ss:$16 sps:$4 sm:$0xff]  }
 0x142   :  { %3845 = vmatmul.mubr.bf16.vlgmr.msra.gmra.mrb[0].mxu0 %v10521_v37  ;;  %4214 = vmatmul.mubr.bf16.vlgmr.msra.gmra.mrb[0].mxu1 %v10521_v37 }
 0x143   :  { %3854 = vmatpush1.bf16.msra.mxu0 %v8876_v38  ;;  %4223 = vmatpush1.bf16.msra.mxu1 %v8879_v39  ;;  %v8968_v38 = vld [vmem:[%s12561_s1 + $0xbe4] ss:$16 sps:$4 sm:$0xff]   ;;  %v10710_v39 = vrot.slane %v679_v34, %v9630_v49  ;;  %v9047_v34 = vld [vmem:[%s12561_s1 + $0xd88] ss:$16 sps:$4 sm:$0xff]  }
 0x144   :  { %3855 = vmatprep.subr.bf16.mxu0 %v8884_v40  ;;  %4224 = vmatprep.subr.bf16.mxu1 %v8887_v27  ;;  %v8966_v40 = vld [vmem:[%s12561_s1 + $0xbe0] ss:$16 sps:$4 sm:$0xff]   ;;  %v8969_v27 = vld [vmem:[%s12561_s1 + $0xbe8] ss:$16 sps:$4 sm:$0xff]  }
 0x145   :  { %3885 = vmatprep.mubr.bf16.mxu0 %v726_v41  ;;  %4254 = vmatprep.mubr.bf16.mxu1 %v726_v41  ;;  %v8974_v41 = vld [vmem:[%s12561_s1 + $0xc04] ss:$16 sps:$4 sm:$0xff]  }
 0x147   :  { %3856 = vmatpush1.bf16.msra.mxu0 %v8882_v43  ;;  %4225 = vmatpush1.bf16.msra.mxu1 %v8885_v44  ;;  %v8977_v43 = vld [vmem:[%s12561_s1 + $0xc0c] ss:$16 sps:$4 sm:$0xff]   ;;  %v695_v44 = vcombine.high %v10710_v39, %v10710_v39 }
 0x148   :  { %3857 = vmatprep.subr.bf16.mxu0 %v8890_v35  ;;  %4226 = vmatprep.subr.bf16.mxu1 %v8893_v45  ;;  %v724_v35 = vcombine.high %v10521_v37, %v10521_v37  ;;  %v8972_v45 = vld [vmem:[%s12561_s1 + $0xc00] ss:$16 sps:$4 sm:$0xff]   ;;  %v8983_v37 = vld [vmem:[%s12561_s1 + $0xc2c] ss:$16 sps:$4 sm:$0xff]  }
 0x14b   :  { %3858 = vmatpush1.bf16.msra.mxu0 %v8888_v46  ;;  %4227 = vmatpush1.bf16.msra.mxu1 %v8891_v47  ;;  %v8975_v46 = vld [vmem:[%s12561_s1 + $0xc08] ss:$16 sps:$4 sm:$0xff]   ;;  %v8980_v47 = vld [vmem:[%s12561_s1 + $0xc24] ss:$16 sps:$4 sm:$0xff]  }
 0x14c   :  { %3859 = vmatprep.subr.bf16.mxu0 %v8896_v48  ;;  %4228 = vmatprep.subr.bf16.mxu1 %v8899_v50  ;;  %v10741_v48 = vrot.slane %v695_v44, %v9630_v49  ;;  %v8978_v50 = vld [vmem:[%s12561_s1 + $0xc20] ss:$16 sps:$4 sm:$0xff]   ;;  %v9064_v44 = vld [vmem:[%s12561_s1 + $0xde4] ss:$16 sps:$4 sm:$0xff]  }
 0x14f   :  { %3860 = vmatpush1.bf16.msra.mxu0 %v8894_v51  ;;  %4229 = vmatpush1.bf16.msra.mxu1 %v8897_v53  ;;  %v8981_v51 = vld [vmem:[%s12561_s1 + $0xc28] ss:$16 sps:$4 sm:$0xff]   ;;  %v8986_v53 = vld [vmem:[%s12561_s1 + $0xc44] ss:$16 sps:$4 sm:$0xff]  }
 0x150   :  { %3861 = vmatprep.subr.bf16.mxu0 %v8902_v54  ;;  %4230 = vmatprep.subr.bf16.mxu1 %v8905_v55  ;;  %v8989_v54 = vld [vmem:[%s12561_s1 + $0xc4c] ss:$16 sps:$4 sm:$0xff]   ;;  %v8984_v55 = vld [vmem:[%s12561_s1 + $0xc40] ss:$16 sps:$4 sm:$0xff]  }
 0x153   :  { %3862 = vmatpush1.bf16.msra.mxu0 %v8900_v56  ;;  %4231 = vmatpush1.bf16.msra.mxu1 %v8903_v57  ;;  %v8987_v56 = vld [vmem:[%s12561_s1 + $0xc48] ss:$16 sps:$4 sm:$0xff]   ;;  %v8992_v57 = vld [vmem:[%s12561_s1 + $0xc64] ss:$16 sps:$4 sm:$0xff]  }
 0x154   :  { %3863 = vmatprep.subr.bf16.mxu0 %v8908_v58  ;;  %4232 = vmatprep.subr.bf16.mxu1 %v8911_v59  ;;  %v8995_v58 = vld [vmem:[%s12561_s1 + $0xc6c] ss:$16 sps:$4 sm:$0xff]   ;;  %v8990_v59 = vld [vmem:[%s12561_s1 + $0xc60] ss:$16 sps:$4 sm:$0xff]  }
 0x157   :  { %3864 = vmatpush1.bf16.msra.mxu0 %v8906_v60  ;;  %4233 = vmatpush1.bf16.msra.mxu1 %v8909_v61  ;;  %v8993_v60 = vld [vmem:[%s12561_s1 + $0xc68] ss:$16 sps:$4 sm:$0xff]   ;;  %v8998_v61 = vld [vmem:[%s12561_s1 + $0xc84] ss:$16 sps:$4 sm:$0xff]  }
 0x158   :  { %3865 = vmatprep.subr.bf16.mxu0 %v8914_v62  ;;  %4234 = vmatprep.subr.bf16.mxu1 %v8917_v63  ;;  %v9001_v62 = vld [vmem:[%s12561_s1 + $0xc8c] ss:$16 sps:$4 sm:$0xff]   ;;  %v8996_v63 = vld [vmem:[%s12561_s1 + $0xc80] ss:$16 sps:$4 sm:$0xff]  }
 0x15b   :  { %3866 = vmatpush1.bf16.msra.mxu0 %v8912_v0  ;;  %4235 = vmatpush1.bf16.msra.mxu1 %v8915_v1  ;;  %v8999_v0 = vld [vmem:[%s12561_s1 + $0xc88] ss:$16 sps:$4 sm:$0xff]   ;;  %v9004_v1 = vld [vmem:[%s12561_s1 + $0xca4] ss:$16 sps:$4 sm:$0xff]  }
 0x15c   :  { %3867 = vmatprep.subr.bf16.mxu0 %v8920_v2  ;;  %4236 = vmatprep.subr.bf16.mxu1 %v8923_v3  ;;  %v9007_v2 = vld [vmem:[%s12561_s1 + $0xcac] ss:$16 sps:$4 sm:$0xff]   ;;  %v9002_v3 = vld [vmem:[%s12561_s1 + $0xca0] ss:$16 sps:$4 sm:$0xff]  }
 0x15f   :  { %3868 = vmatpush1.bf16.msra.mxu0 %v8918_v4  ;;  %4237 = vmatpush1.bf16.msra.mxu1 %v8921_v5  ;;  %v9005_v4 = vld [vmem:[%s12561_s1 + $0xca8] ss:$16 sps:$4 sm:$0xff]   ;;  %v9010_v5 = vld [vmem:[%s12561_s1 + $0xcc4] ss:$16 sps:$4 sm:$0xff]  }
 0x160   :  { %3869 = vmatprep.subr.bf16.mxu0 %v8926_v6  ;;  %4238 = vmatprep.subr.bf16.mxu1 %v8929_v7  ;;  %v9013_v6 = vld [vmem:[%s12561_s1 + $0xccc] ss:$16 sps:$4 sm:$0xff]   ;;  %v9008_v7 = vld [vmem:[%s12561_s1 + $0xcc0] ss:$16 sps:$4 sm:$0xff]  }
 0x163   :  { %3870 = vmatpush1.bf16.msra.mxu0 %v8924_v8  ;;  %4239 = vmatpush1.bf16.msra.mxu1 %v8927_v9  ;;  %v9011_v8 = vld [vmem:[%s12561_s1 + $0xcc8] ss:$16 sps:$4 sm:$0xff]   ;;  %v9016_v9 = vld [vmem:[%s12561_s1 + $0xce4] ss:$16 sps:$4 sm:$0xff]  }
 0x164   :  { %3871 = vmatprep.subr.bf16.mxu0 %v8932_v10  ;;  %4240 = vmatprep.subr.bf16.mxu1 %v8935_v11  ;;  %v9019_v10 = vld [vmem:[%s12561_s1 + $0xcec] ss:$16 sps:$4 sm:$0xff]   ;;  %v9014_v11 = vld [vmem:[%s12561_s1 + $0xce0] ss:$16 sps:$4 sm:$0xff]  }
 0x167   :  { %3872 = vmatpush1.bf16.msra.mxu0 %v8930_v12  ;;  %4241 = vmatpush1.bf16.msra.mxu1 %v8933_v52  ;;  %v9017_v12 = vld [vmem:[%s12561_s1 + $0xce8] ss:$16 sps:$4 sm:$0xff]   ;;  %v9022_v52 = vld [vmem:[%s12561_s1 + $0xd04] ss:$16 sps:$4 sm:$0xff]  }
 0x168   :  { %3873 = vmatprep.subr.bf16.mxu0 %v8938_v15  ;;  %4242 = vmatprep.subr.bf16.mxu1 %v8941_v16  ;;  %v9025_v15 = vld [vmem:[%s12561_s1 + $0xd0c] ss:$16 sps:$4 sm:$0xff]   ;;  %v9020_v16 = vld [vmem:[%s12561_s1 + $0xd00] ss:$16 sps:$4 sm:$0xff]  }
 0x16b   :  { %3874 = vmatpush1.bf16.msra.mxu0 %v8936_v17  ;;  %4243 = vmatpush1.bf16.msra.mxu1 %v8939_v18  ;;  %v9023_v17 = vld [vmem:[%s12561_s1 + $0xd08] ss:$16 sps:$4 sm:$0xff]   ;;  %v9028_v18 = vld [vmem:[%s12561_s1 + $0xd24] ss:$16 sps:$4 sm:$0xff]  }
 0x16c   :  { %3875 = vmatprep.subr.bf16.mxu0 %v8944_v19  ;;  %4244 = vmatprep.subr.bf16.mxu1 %v8947_v20  ;;  %v9031_v19 = vld [vmem:[%s12561_s1 + $0xd2c] ss:$16 sps:$4 sm:$0xff]   ;;  %v9026_v20 = vld [vmem:[%s12561_s1 + $0xd20] ss:$16 sps:$4 sm:$0xff]  }
 0x16f   :  { %3876 = vmatpush1.bf16.msra.mxu0 %v8942_v22  ;;  %4245 = vmatpush1.bf16.msra.mxu1 %v8945_v23  ;;  %v9029_v22 = vld [vmem:[%s12561_s1 + $0xd28] ss:$16 sps:$4 sm:$0xff]   ;;  %v9034_v23 = vld [vmem:[%s12561_s1 + $0xd44] ss:$16 sps:$4 sm:$0xff]  }
 0x170   :  { %3877 = vmatprep.subr.bf16.mxu0 %v8950_v24  ;;  %4246 = vmatprep.subr.bf16.mxu1 %v8953_v13  ;;  %v9037_v24 = vld [vmem:[%s12561_s1 + $0xd4c] ss:$16 sps:$4 sm:$0xff]   ;;  %v9032_v13 = vld [vmem:[%s12561_s1 + $0xd40] ss:$16 sps:$4 sm:$0xff]  }
 0x173   :  { %3878 = vmatpush1.bf16.msra.mxu0 %v8948_v28  ;;  %4247 = vmatpush1.bf16.msra.mxu1 %v8951_v29  ;;  %v9035_v28 = vld [vmem:[%s12561_s1 + $0xd48] ss:$16 sps:$4 sm:$0xff]   ;;  %v9040_v29 = vld [vmem:[%s12561_s1 + $0xd64] ss:$16 sps:$4 sm:$0xff]  }
 0x174   :  { %3879 = vmatprep.subr.bf16.mxu0 %v8956_v14  ;;  %4248 = vmatprep.subr.bf16.mxu1 %v8959_v30  ;;  %v9043_v14 = vld [vmem:[%s12561_s1 + $0xd6c] ss:$16 sps:$4 sm:$0xff]   ;;  %v9038_v30 = vld [vmem:[%s12561_s1 + $0xd60] ss:$16 sps:$4 sm:$0xff]  }
 0x177   :  { %3880 = vmatpush1.bf16.msra.mxu0 %v8954_v31  ;;  %4249 = vmatpush1.bf16.msra.mxu1 %v8957_v25  ;;  %v9041_v31 = vld [vmem:[%s12561_s1 + $0xd68] ss:$16 sps:$4 sm:$0xff]   ;;  %v9046_v25 = vld [vmem:[%s12561_s1 + $0xd84] ss:$16 sps:$4 sm:$0xff]  }
 0x178   :  { %3881 = vmatprep.subr.bf16.mxu0 %v8962_v32  ;;  %4250 = vmatprep.subr.bf16.mxu1 %v8965_v33  ;;  %v9049_v32 = vld [vmem:[%s12561_s1 + $0xd8c] ss:$16 sps:$4 sm:$0xff]   ;;  %v9044_v33 = vld [vmem:[%s12561_s1 + $0xd80] ss:$16 sps:$4 sm:$0xff]  }
 0x17b   :  { %3882 = vmatpush1.bf16.msra.mxu0 %v8960_v26  ;;  %4251 = vmatpush1.bf16.msra.mxu1 %v8963_v36  ;;  %v9052_v26 = vld [vmem:[%s12561_s1 + $0xda4] ss:$16 sps:$4 sm:$0xff]   ;;  %v9055_v36 = vld [vmem:[%s12561_s1 + $0xdac] ss:$16 sps:$4 sm:$0xff]  }
 0x17c   :  { %3883 = vmatprep.subr.bf16.mxu0 %v8968_v38  ;;  %4252 = vmatprep.subr.bf16.mxu1 %v8971_v21  ;;  %v9050_v38 = vld [vmem:[%s12561_s1 + $0xda0] ss:$16 sps:$4 sm:$0xff]   ;;  %v9053_v21 = vld [vmem:[%s12561_s1 + $0xda8] ss:$16 sps:$4 sm:$0xff]  }
 0x17f   :  { %3884 = vmatpush1.bf16.msra.mxu0 %v8966_v40  ;;  %4253 = vmatpush1.bf16.msra.mxu1 %v8969_v27  ;;  %v9058_v40 = vld [vmem:[%s12561_s1 + $0xdc4] ss:$16 sps:$4 sm:$0xff]   ;;  %v9061_v27 = vld [vmem:[%s12561_s1 + $0xdcc] ss:$16 sps:$4 sm:$0xff]  }
 0x180   :  { %3894 = vmatprep.subr.bf16.mxu0 %v8974_v41  ;;  %4263 = vmatprep.subr.bf16.mxu1 %v8977_v43  ;;  %v9056_v41 = vld [vmem:[%s12561_s1 + $0xdc0] ss:$16 sps:$4 sm:$0xff]   ;;  %v9059_v43 = vld [vmem:[%s12561_s1 + $0xdc8] ss:$16 sps:$4 sm:$0xff]  }
 0x182   :  { %3886 = vmatmul.mubr.bf16.vlgmr.msra.gmra.mrb[0].mxu0 %v724_v35  ;;  %4255 = vmatmul.mubr.bf16.vlgmr.msra.gmra.mrb[0].mxu1 %v724_v35  ;;  %v9067_v35 = vld [vmem:[%s12561_s1 + $0xdec] ss:$16 sps:$4 sm:$0xff]  }
 0x183   :  { %3895 = vmatpush1.bf16.msra.mxu0 %v8972_v45  ;;  %4264 = vmatpush1.bf16.msra.mxu1 %v8975_v46  ;;  %v9062_v45 = vld [vmem:[%s12561_s1 + $0xde0] ss:$16 sps:$4 sm:$0xff]   ;;  %v9065_v46 = vld [vmem:[%s12561_s1 + $0xde8] ss:$16 sps:$4 sm:$0xff]  }
 0x184   :  { %3896 = vmatprep.subr.bf16.mxu0 %v8980_v47  ;;  %4265 = vmatprep.subr.bf16.mxu1 %v8983_v37  ;;  %v9071_v47 = vld [vmem:[%s12561_s1 + $0xe04] ss:$16 sps:$4 sm:$0xff]   ;;  %v9074_v37 = vld [vmem:[%s12561_s1 + $0xe0c] ss:$16 sps:$4 sm:$0xff]  }
 0x185   :  { %3926 = vmatprep.mubr.bf16.mxu0 %v10741_v48  ;;  %4295 = vmatprep.mubr.bf16.mxu1 %v10741_v48 }
 0x187   :  { %3897 = vmatpush1.bf16.msra.mxu0 %v8978_v50  ;;  %4266 = vmatpush1.bf16.msra.mxu1 %v8981_v51  ;;  %v10927_v50 = vrot.slane %v10710_v39, %v9630_v49  ;;  %v9069_v51 = vld [vmem:[%s12561_s1 + $0xe00] ss:$16 sps:$4 sm:$0xff]   ;;  %v9080_v39 = vld [vmem:[%s12561_s1 + $0xe2c] ss:$16 sps:$4 sm:$0xff]  }
 0x188   :  { %3898 = vmatprep.subr.bf16.mxu0 %v8986_v53  ;;  %4267 = vmatprep.subr.bf16.mxu1 %v8989_v54  ;;  %v9072_v53 = vld [vmem:[%s12561_s1 + $0xe08] ss:$16 sps:$4 sm:$0xff]   ;;  %v9077_v54 = vld [vmem:[%s12561_s1 + $0xe24] ss:$16 sps:$4 sm:$0xff]  }
 0x18b   :  { %3899 = vmatpush1.bf16.msra.mxu0 %v8984_v55  ;;  %4268 = vmatpush1.bf16.msra.mxu1 %v8987_v56  ;;  %v727_v55 = vcombine.high %v10741_v48, %v10741_v48  ;;  %v9075_v56 = vld [vmem:[%s12561_s1 + $0xe20] ss:$16 sps:$4 sm:$0xff]   ;;  %v9086_v48 = vld [vmem:[%s12561_s1 + $0xe4c] ss:$16 sps:$4 sm:$0xff]  }
 0x18c   :  { %3900 = vmatprep.subr.bf16.mxu0 %v8992_v57  ;;  %4269 = vmatprep.subr.bf16.mxu1 %v8995_v58  ;;  %v9078_v57 = vld [vmem:[%s12561_s1 + $0xe28] ss:$16 sps:$4 sm:$0xff]   ;;  %v9083_v58 = vld [vmem:[%s12561_s1 + $0xe44] ss:$16 sps:$4 sm:$0xff]  }
 0x18f   :  { %3901 = vmatpush1.bf16.msra.mxu0 %v8990_v59  ;;  %4270 = vmatpush1.bf16.msra.mxu1 %v8993_v60  ;;  %v9081_v59 = vld [vmem:[%s12561_s1 + $0xe40] ss:$16 sps:$4 sm:$0xff]   ;;  %v9084_v60 = vld [vmem:[%s12561_s1 + $0xe48] ss:$16 sps:$4 sm:$0xff]  }
 0x190   :  { %3902 = vmatprep.subr.bf16.mxu0 %v8998_v61  ;;  %4271 = vmatprep.subr.bf16.mxu1 %v9001_v62  ;;  %v9089_v61 = vld [vmem:[%s12561_s1 + $0xe64] ss:$16 sps:$4 sm:$0xff]   ;;  %v9092_v62 = vld [vmem:[%s12561_s1 + $0xe6c] ss:$16 sps:$4 sm:$0xff]  }
 0x193   :  { %3903 = vmatpush1.bf16.msra.mxu0 %v8996_v63  ;;  %4272 = vmatpush1.bf16.msra.mxu1 %v8999_v0  ;;  %v9087_v63 = vld [vmem:[%s12561_s1 + $0xe60] ss:$16 sps:$4 sm:$0xff]   ;;  %v9090_v0 = vld [vmem:[%s12561_s1 + $0xe68] ss:$16 sps:$4 sm:$0xff]  }
 0x194   :  { %3904 = vmatprep.subr.bf16.mxu0 %v9004_v1  ;;  %4273 = vmatprep.subr.bf16.mxu1 %v9007_v2  ;;  %v9095_v1 = vld [vmem:[%s12561_s1 + $0xe84] ss:$16 sps:$4 sm:$0xff]   ;;  %v9098_v2 = vld [vmem:[%s12561_s1 + $0xe8c] ss:$16 sps:$4 sm:$0xff]  }
 0x197   :  { %3905 = vmatpush1.bf16.msra.mxu0 %v9002_v3  ;;  %4274 = vmatpush1.bf16.msra.mxu1 %v9005_v4  ;;  %v9093_v3 = vld [vmem:[%s12561_s1 + $0xe80] ss:$16 sps:$4 sm:$0xff]   ;;  %v9096_v4 = vld [vmem:[%s12561_s1 + $0xe88] ss:$16 sps:$4 sm:$0xff]  }
 0x198   :  { %3906 = vmatprep.subr.bf16.mxu0 %v9010_v5  ;;  %4275 = vmatprep.subr.bf16.mxu1 %v9013_v6  ;;  %v9101_v5 = vld [vmem:[%s12561_s1 + $0xea4] ss:$16 sps:$4 sm:$0xff]   ;;  %v9104_v6 = vld [vmem:[%s12561_s1 + $0xeac] ss:$16 sps:$4 sm:$0xff]  }
 0x19b   :  { %3907 = vmatpush1.bf16.msra.mxu0 %v9008_v7  ;;  %4276 = vmatpush1.bf16.msra.mxu1 %v9011_v8  ;;  %v9099_v7 = vld [vmem:[%s12561_s1 + $0xea0] ss:$16 sps:$4 sm:$0xff]   ;;  %v9102_v8 = vld [vmem:[%s12561_s1 + $0xea8] ss:$16 sps:$4 sm:$0xff]  }
 0x19c   :  { %3908 = vmatprep.subr.bf16.mxu0 %v9016_v9  ;;  %4277 = vmatprep.subr.bf16.mxu1 %v9019_v10  ;;  %v9107_v9 = vld [vmem:[%s12561_s1 + $0xec4] ss:$16 sps:$4 sm:$0xff]   ;;  %v9110_v10 = vld [vmem:[%s12561_s1 + $0xecc] ss:$16 sps:$4 sm:$0xff]  }
 0x19f   :  { %3909 = vmatpush1.bf16.msra.mxu0 %v9014_v11  ;;  %4278 = vmatpush1.bf16.msra.mxu1 %v9017_v12  ;;  %v9105_v11 = vld [vmem:[%s12561_s1 + $0xec0] ss:$16 sps:$4 sm:$0xff]   ;;  %v9108_v12 = vld [vmem:[%s12561_s1 + $0xec8] ss:$16 sps:$4 sm:$0xff]  }
 0x1a0   :  { %3910 = vmatprep.subr.bf16.mxu0 %v9022_v52  ;;  %4279 = vmatprep.subr.bf16.mxu1 %v9025_v15  ;;  %v9113_v52 = vld [vmem:[%s12561_s1 + $0xee4] ss:$16 sps:$4 sm:$0xff]   ;;  %v9116_v15 = vld [vmem:[%s12561_s1 + $0xeec] ss:$16 sps:$4 sm:$0xff]  }
 0x1a3   :  { %3911 = vmatpush1.bf16.msra.mxu0 %v9020_v16  ;;  %4280 = vmatpush1.bf16.msra.mxu1 %v9023_v17  ;;  %v9111_v16 = vld [vmem:[%s12561_s1 + $0xee0] ss:$16 sps:$4 sm:$0xff]   ;;  %v9114_v17 = vld [vmem:[%s12561_s1 + $0xee8] ss:$16 sps:$4 sm:$0xff]  }
 0x1a4   :  { %3912 = vmatprep.subr.bf16.mxu0 %v9028_v18  ;;  %4281 = vmatprep.subr.bf16.mxu1 %v9031_v19  ;;  %v9119_v18 = vld [vmem:[%s12561_s1 + $0xf04] ss:$16 sps:$4 sm:$0xff]   ;;  %v9122_v19 = vld [vmem:[%s12561_s1 + $0xf0c] ss:$16 sps:$4 sm:$0xff]  }
 0x1a7   :  { %3913 = vmatpush1.bf16.msra.mxu0 %v9026_v20  ;;  %4282 = vmatpush1.bf16.msra.mxu1 %v9029_v22  ;;  %v9117_v20 = vld [vmem:[%s12561_s1 + $0xf00] ss:$16 sps:$4 sm:$0xff]   ;;  %v9120_v22 = vld [vmem:[%s12561_s1 + $0xf08] ss:$16 sps:$4 sm:$0xff]  }
 0x1a8   :  { %3914 = vmatprep.subr.bf16.mxu0 %v9034_v23  ;;  %4283 = vmatprep.subr.bf16.mxu1 %v9037_v24  ;;  %v9125_v23 = vld [vmem:[%s12561_s1 + $0xf24] ss:$16 sps:$4 sm:$0xff]   ;;  %v9128_v24 = vld [vmem:[%s12561_s1 + $0xf2c] ss:$16 sps:$4 sm:$0xff]  }
 0x1ab   :  { %3915 = vmatpush1.bf16.msra.mxu0 %v9032_v13  ;;  %4284 = vmatpush1.bf16.msra.mxu1 %v9035_v28  ;;  %v9123_v13 = vld [vmem:[%s12561_s1 + $0xf20] ss:$16 sps:$4 sm:$0xff]   ;;  %v9126_v28 = vld [vmem:[%s12561_s1 + $0xf28] ss:$16 sps:$4 sm:$0xff]  }
 0x1ac   :  { %3916 = vmatprep.subr.bf16.mxu0 %v9040_v29  ;;  %4285 = vmatprep.subr.bf16.mxu1 %v9043_v14  ;;  %v9131_v29 = vld [vmem:[%s12561_s1 + $0xf44] ss:$16 sps:$4 sm:$0xff]   ;;  %v9134_v14 = vld [vmem:[%s12561_s1 + $0xf4c] ss:$16 sps:$4 sm:$0xff]  }
 0x1af   :  { %3917 = vmatpush1.bf16.msra.mxu0 %v9038_v30  ;;  %4286 = vmatpush1.bf16.msra.mxu1 %v9041_v31  ;;  %v9129_v30 = vld [vmem:[%s12561_s1 + $0xf40] ss:$16 sps:$4 sm:$0xff]   ;;  %v9132_v31 = vld [vmem:[%s12561_s1 + $0xf48] ss:$16 sps:$4 sm:$0xff]  }
 0x1b0   :  { %3918 = vmatprep.subr.bf16.mxu0 %v9046_v25  ;;  %4287 = vmatprep.subr.bf16.mxu1 %v9049_v32  ;;  %v9137_v25 = vld [vmem:[%s12561_s1 + $0xf64] ss:$16 sps:$4 sm:$0xff]   ;;  %v9140_v32 = vld [vmem:[%s12561_s1 + $0xf6c] ss:$16 sps:$4 sm:$0xff]  }
 0x1b3   :  { %3919 = vmatpush1.bf16.msra.mxu0 %v9044_v33  ;;  %4288 = vmatpush1.bf16.msra.mxu1 %v9047_v34  ;;  %v9135_v33 = vld [vmem:[%s12561_s1 + $0xf60] ss:$16 sps:$4 sm:$0xff]   ;;  %v9138_v34 = vld [vmem:[%s12561_s1 + $0xf68] ss:$16 sps:$4 sm:$0xff]  }
 0x1b4   :  { %3920 = vmatprep.subr.bf16.mxu0 %v9052_v26  ;;  %4289 = vmatprep.subr.bf16.mxu1 %v9055_v36  ;;  %v9143_v26 = vld [vmem:[%s12561_s1 + $0xf84] ss:$16 sps:$4 sm:$0xff]   ;;  %v9146_v36 = vld [vmem:[%s12561_s1 + $0xf8c] ss:$16 sps:$4 sm:$0xff]  }
 0x1b7   :  { %3921 = vmatpush1.bf16.msra.mxu0 %v9050_v38  ;;  %4290 = vmatpush1.bf16.msra.mxu1 %v9053_v21  ;;  %v9141_v38 = vld [vmem:[%s12561_s1 + $0xf80] ss:$16 sps:$4 sm:$0xff]   ;;  %v9144_v21 = vld [vmem:[%s12561_s1 + $0xf88] ss:$16 sps:$4 sm:$0xff]  }
 0x1b8   :  { %3922 = vmatprep.subr.bf16.mxu0 %v9058_v40  ;;  %4291 = vmatprep.subr.bf16.mxu1 %v9061_v27  ;;  %v9149_v40 = vld [vmem:[%s12561_s1 + $0xfa4] ss:$16 sps:$4 sm:$0xff]   ;;  %v9152_v27 = vld [vmem:[%s12561_s1 + $0xfac] ss:$16 sps:$4 sm:$0xff]  }
 0x1bb   :  { %3923 = vmatpush1.bf16.msra.mxu0 %v9056_v41  ;;  %4292 = vmatpush1.bf16.msra.mxu1 %v9059_v43  ;;  %v9147_v41 = vld [vmem:[%s12561_s1 + $0xfa0] ss:$16 sps:$4 sm:$0xff]   ;;  %v9150_v43 = vld [vmem:[%s12561_s1 + $0xfa8] ss:$16 sps:$4 sm:$0xff]  }
 0x1bc   :  { %3924 = vmatprep.subr.bf16.mxu0 %v9064_v44  ;;  %4293 = vmatprep.subr.bf16.mxu1 %v9067_v35  ;;  %v9155_v44 = vld [vmem:[%s12561_s1 + $0xfc4] ss:$16 sps:$4 sm:$0xff]   ;;  %v9158_v35 = vld [vmem:[%s12561_s1 + $0xfcc] ss:$16 sps:$4 sm:$0xff]  }
 0x1bf   :  { %3925 = vmatpush1.bf16.msra.mxu0 %v9062_v45  ;;  %4294 = vmatpush1.bf16.msra.mxu1 %v9065_v46  ;;  %v9153_v45 = vld [vmem:[%s12561_s1 + $0xfc0] ss:$16 sps:$4 sm:$0xff]   ;;  %v9156_v46 = vld [vmem:[%s12561_s1 + $0xfc8] ss:$16 sps:$4 sm:$0xff]  }
 0x1c0   :  { %3935 = vmatprep.subr.bf16.mxu0 %v9071_v47  ;;  %4304 = vmatprep.subr.bf16.mxu1 %v9074_v37  ;;  %v9161_v47 = vld [vmem:[%s12561_s1 + $0xfe4] ss:$16 sps:$4 sm:$0xff]   ;;  %v9164_v37 = vld [vmem:[%s12561_s1 + $0xfec] ss:$16 sps:$4 sm:$0xff]  }
 0x1c2   :  { %3927 = vmatmul.mubr.bf16.vlgmr.msra.gmra.mrb[0].mxu0 %v10927_v50  ;;  %4296 = vmatmul.mubr.bf16.vlgmr.msra.gmra.mrb[0].mxu1 %v10927_v50 }
 0x1c3   :  { %3936 = vmatpush1.bf16.msra.mxu0 %v9069_v51  ;;  %4305 = vmatpush1.bf16.msra.mxu1 %v9072_v53  ;;  %v11116_v51 = vld.sshfl [vmem:[%s12562_s0 + $0x10] sm:$0x11 pattern:$0x75316420] }
 0x1c4   :  { %3937 = vmatprep.subr.bf16.mxu0 %v9077_v54  ;;  %4306 = vmatprep.subr.bf16.mxu1 %v9080_v39  ;;  %v9159_v53 = vld [vmem:[%s12561_s1 + $0xfe0] ss:$16 sps:$4 sm:$0xff]   ;;  %v9162_v54 = vld [vmem:[%s12561_s1 + $0xfe8] ss:$16 sps:$4 sm:$0xff]   ;;  %v9167_v39 = vld [vmem:[%s12561_s1 + $0x1004] ss:$16 sps:$4 sm:$0xff]  }
 0x1c5   :  { %3967 = vmatprep.mubr.bf16.mxu0 %v727_v55  ;;  %4336 = vmatprep.mubr.bf16.mxu1 %v727_v55  ;;  %v9170_v55 = vld [vmem:[%s12561_s1 + $0x100c] ss:$16 sps:$4 sm:$0xff]  }
 0x1c7   :  { %3938 = vmatpush1.bf16.msra.mxu0 %v9075_v56  ;;  %4307 = vmatpush1.bf16.msra.mxu1 %v9078_v57  ;;  %v9165_v56 = vld [vmem:[%s12561_s1 + $0x1000] ss:$16 sps:$4 sm:$0xff]   ;;  %v9168_v57 = vld [vmem:[%s12561_s1 + $0x1008] ss:$16 sps:$4 sm:$0xff]  }
 0x1c8   :  { %3939 = vmatprep.subr.bf16.mxu0 %v9083_v58  ;;  %4308 = vmatprep.subr.bf16.mxu1 %v9086_v48  ;;  %v735_v58 = vcombine.high %v11116_v51, %v11116_v51  ;;  %v725_v48 = vcombine.high %v10927_v50, %v10927_v50  ;;  %v9171_v50 = vld [vmem:[%s12561_s1 + $0x1020] ss:$16 sps:$4 sm:$0xff]  }
 0x1cb   :  { %3940 = vmatpush1.bf16.msra.mxu0 %v9081_v59  ;;  %4309 = vmatpush1.bf16.msra.mxu1 %v9084_v60  ;;  %v9173_v59 = vld [vmem:[%s12561_s1 + $0x1024] ss:$16 sps:$4 sm:$0xff]   ;;  %v9176_v60 = vld [vmem:[%s12561_s1 + $0x102c] ss:$16 sps:$4 sm:$0xff]  }
 0x1cc   :  { %3941 = vmatprep.subr.bf16.mxu0 %v9089_v61  ;;  %4310 = vmatprep.subr.bf16.mxu1 %v9092_v62  ;;  %v749_v61 = vrot.slane %v735_v58, %v9630_v49  ;;  %v9174_v62 = vld [vmem:[%s12561_s1 + $0x1028] ss:$16 sps:$4 sm:$0xff]   ;;  %v9255_v58 = vld [vmem:[%s12561_s1 + $0x11e0] ss:$16 sps:$4 sm:$0xff]  }
 0x1cf   :  { %3942 = vmatpush1.bf16.msra.mxu0 %v9087_v63  ;;  %4311 = vmatpush1.bf16.msra.mxu1 %v9090_v0  ;;  %v9179_v63 = vld [vmem:[%s12561_s1 + $0x1044] ss:$16 sps:$4 sm:$0xff]   ;;  %v9182_v0 = vld [vmem:[%s12561_s1 + $0x104c] ss:$16 sps:$4 sm:$0xff]  }
 0x1d0   :  { %3943 = vmatprep.subr.bf16.mxu0 %v9095_v1  ;;  %4312 = vmatprep.subr.bf16.mxu1 %v9098_v2  ;;  %v9177_v1 = vld [vmem:[%s12561_s1 + $0x1040] ss:$16 sps:$4 sm:$0xff]   ;;  %v9180_v2 = vld [vmem:[%s12561_s1 + $0x1048] ss:$16 sps:$4 sm:$0xff]  }
 0x1d3   :  { %3944 = vmatpush1.bf16.msra.mxu0 %v9093_v3  ;;  %4313 = vmatpush1.bf16.msra.mxu1 %v9096_v4  ;;  %v9185_v3 = vld [vmem:[%s12561_s1 + $0x1064] ss:$16 sps:$4 sm:$0xff]   ;;  %v9188_v4 = vld [vmem:[%s12561_s1 + $0x106c] ss:$16 sps:$4 sm:$0xff]  }
 0x1d4   :  { %3945 = vmatprep.subr.bf16.mxu0 %v9101_v5  ;;  %4314 = vmatprep.subr.bf16.mxu1 %v9104_v6  ;;  %v9183_v5 = vld [vmem:[%s12561_s1 + $0x1060] ss:$16 sps:$4 sm:$0xff]   ;;  %v9186_v6 = vld [vmem:[%s12561_s1 + $0x1068] ss:$16 sps:$4 sm:$0xff]  }
 0x1d7   :  { %3946 = vmatpush1.bf16.msra.mxu0 %v9099_v7  ;;  %4315 = vmatpush1.bf16.msra.mxu1 %v9102_v8  ;;  %v9191_v7 = vld [vmem:[%s12561_s1 + $0x1084] ss:$16 sps:$4 sm:$0xff]   ;;  %v9194_v8 = vld [vmem:[%s12561_s1 + $0x108c] ss:$16 sps:$4 sm:$0xff]  }
 0x1d8   :  { %3947 = vmatprep.subr.bf16.mxu0 %v9107_v9  ;;  %4316 = vmatprep.subr.bf16.mxu1 %v9110_v10  ;;  %v9189_v9 = vld [vmem:[%s12561_s1 + $0x1080] ss:$16 sps:$4 sm:$0xff]   ;;  %v9192_v10 = vld [vmem:[%s12561_s1 + $0x1088] ss:$16 sps:$4 sm:$0xff]  }
 0x1db   :  { %3948 = vmatpush1.bf16.msra.mxu0 %v9105_v11  ;;  %4317 = vmatpush1.bf16.msra.mxu1 %v9108_v12  ;;  %v9197_v11 = vld [vmem:[%s12561_s1 + $0x10a4] ss:$16 sps:$4 sm:$0xff]   ;;  %v9200_v12 = vld [vmem:[%s12561_s1 + $0x10ac] ss:$16 sps:$4 sm:$0xff]  }
 0x1dc   :  { %3949 = vmatprep.subr.bf16.mxu0 %v9113_v52  ;;  %4318 = vmatprep.subr.bf16.mxu1 %v9116_v15  ;;  %v9195_v52 = vld [vmem:[%s12561_s1 + $0x10a0] ss:$16 sps:$4 sm:$0xff]   ;;  %v9198_v15 = vld [vmem:[%s12561_s1 + $0x10a8] ss:$16 sps:$4 sm:$0xff]  }
 0x1df   :  { %3950 = vmatpush1.bf16.msra.mxu0 %v9111_v16  ;;  %4319 = vmatpush1.bf16.msra.mxu1 %v9114_v17  ;;  %v9203_v16 = vld [vmem:[%s12561_s1 + $0x10c4] ss:$16 sps:$4 sm:$0xff]   ;;  %v9206_v17 = vld [vmem:[%s12561_s1 + $0x10cc] ss:$16 sps:$4 sm:$0xff]  }
 0x1e0   :  { %3951 = vmatprep.subr.bf16.mxu0 %v9119_v18  ;;  %4320 = vmatprep.subr.bf16.mxu1 %v9122_v19  ;;  %v9201_v18 = vld [vmem:[%s12561_s1 + $0x10c0] ss:$16 sps:$4 sm:$0xff]   ;;  %v9204_v19 = vld [vmem:[%s12561_s1 + $0x10c8] ss:$16 sps:$4 sm:$0xff]  }
 0x1e3   :  { %3952 = vmatpush1.bf16.msra.mxu0 %v9117_v20  ;;  %4321 = vmatpush1.bf16.msra.mxu1 %v9120_v22  ;;  %v9209_v20 = vld [vmem:[%s12561_s1 + $0x10e4] ss:$16 sps:$4 sm:$0xff]   ;;  %v9212_v22 = vld [vmem:[%s12561_s1 + $0x10ec] ss:$16 sps:$4 sm:$0xff]  }
 0x1e4   :  { %3953 = vmatprep.subr.bf16.mxu0 %v9125_v23  ;;  %4322 = vmatprep.subr.bf16.mxu1 %v9128_v24  ;;  %v9207_v23 = vld [vmem:[%s12561_s1 + $0x10e0] ss:$16 sps:$4 sm:$0xff]   ;;  %v9210_v24 = vld [vmem:[%s12561_s1 + $0x10e8] ss:$16 sps:$4 sm:$0xff]  }
 0x1e7   :  { %3954 = vmatpush1.bf16.msra.mxu0 %v9123_v13  ;;  %4323 = vmatpush1.bf16.msra.mxu1 %v9126_v28  ;;  %v9215_v13 = vld [vmem:[%s12561_s1 + $0x1104] ss:$16 sps:$4 sm:$0xff]   ;;  %v9218_v28 = vld [vmem:[%s12561_s1 + $0x110c] ss:$16 sps:$4 sm:$0xff]  }
 0x1e8   :  { %3955 = vmatprep.subr.bf16.mxu0 %v9131_v29  ;;  %4324 = vmatprep.subr.bf16.mxu1 %v9134_v14  ;;  %v9213_v29 = vld [vmem:[%s12561_s1 + $0x1100] ss:$16 sps:$4 sm:$0xff]   ;;  %v9216_v14 = vld [vmem:[%s12561_s1 + $0x1108] ss:$16 sps:$4 sm:$0xff]  }
 0x1eb   :  { %3956 = vmatpush1.bf16.msra.mxu0 %v9129_v30  ;;  %4325 = vmatpush1.bf16.msra.mxu1 %v9132_v31  ;;  %v9221_v30 = vld [vmem:[%s12561_s1 + $0x1124] ss:$16 sps:$4 sm:$0xff]   ;;  %v9224_v31 = vld [vmem:[%s12561_s1 + $0x112c] ss:$16 sps:$4 sm:$0xff]  }
 0x1ec   :  { %3957 = vmatprep.subr.bf16.mxu0 %v9137_v25  ;;  %4326 = vmatprep.subr.bf16.mxu1 %v9140_v32  ;;  %v9219_v25 = vld [vmem:[%s12561_s1 + $0x1120] ss:$16 sps:$4 sm:$0xff]   ;;  %v9222_v32 = vld [vmem:[%s12561_s1 + $0x1128] ss:$16 sps:$4 sm:$0xff]  }
 0x1ef   :  { %3958 = vmatpush1.bf16.msra.mxu0 %v9135_v33  ;;  %4327 = vmatpush1.bf16.msra.mxu1 %v9138_v34  ;;  %v9227_v33 = vld [vmem:[%s12561_s1 + $0x1144] ss:$16 sps:$4 sm:$0xff]   ;;  %v9230_v34 = vld [vmem:[%s12561_s1 + $0x114c] ss:$16 sps:$4 sm:$0xff]  }
 0x1f0   :  { %3959 = vmatprep.subr.bf16.mxu0 %v9143_v26  ;;  %4328 = vmatprep.subr.bf16.mxu1 %v9146_v36  ;;  %v9225_v26 = vld [vmem:[%s12561_s1 + $0x1140] ss:$16 sps:$4 sm:$0xff]   ;;  %v9228_v36 = vld [vmem:[%s12561_s1 + $0x1148] ss:$16 sps:$4 sm:$0xff]  }
 0x1f3   :  { %3960 = vmatpush1.bf16.msra.mxu0 %v9141_v38  ;;  %4329 = vmatpush1.bf16.msra.mxu1 %v9144_v21  ;;  %v9233_v38 = vld [vmem:[%s12561_s1 + $0x1164] ss:$16 sps:$4 sm:$0xff]   ;;  %v9236_v21 = vld [vmem:[%s12561_s1 + $0x116c] ss:$16 sps:$4 sm:$0xff]  }
 0x1f4   :  { %3961 = vmatprep.subr.bf16.mxu0 %v9149_v40  ;;  %4330 = vmatprep.subr.bf16.mxu1 %v9152_v27  ;;  %v9231_v40 = vld [vmem:[%s12561_s1 + $0x1160] ss:$16 sps:$4 sm:$0xff]   ;;  %v9234_v27 = vld [vmem:[%s12561_s1 + $0x1168] ss:$16 sps:$4 sm:$0xff]  }
 0x1f7   :  { %3962 = vmatpush1.bf16.msra.mxu0 %v9147_v41  ;;  %4331 = vmatpush1.bf16.msra.mxu1 %v9150_v43  ;;  %v9239_v41 = vld [vmem:[%s12561_s1 + $0x1184] ss:$16 sps:$4 sm:$0xff]   ;;  %v9242_v43 = vld [vmem:[%s12561_s1 + $0x118c] ss:$16 sps:$4 sm:$0xff]  }
 0x1f8   :  { %3963 = vmatprep.subr.bf16.mxu0 %v9155_v44  ;;  %4332 = vmatprep.subr.bf16.mxu1 %v9158_v35  ;;  %v9237_v44 = vld [vmem:[%s12561_s1 + $0x1180] ss:$16 sps:$4 sm:$0xff]   ;;  %v9240_v35 = vld [vmem:[%s12561_s1 + $0x1188] ss:$16 sps:$4 sm:$0xff]  }
 0x1fb   :  { %3964 = vmatpush1.bf16.msra.mxu0 %v9153_v45  ;;  %4333 = vmatpush1.bf16.msra.mxu1 %v9156_v46  ;;  %v9245_v45 = vld [vmem:[%s12561_s1 + $0x11a4] ss:$16 sps:$4 sm:$0xff]   ;;  %v9248_v46 = vld [vmem:[%s12561_s1 + $0x11ac] ss:$16 sps:$4 sm:$0xff]  }
 0x1fc   :  { %3965 = vmatprep.subr.bf16.mxu0 %v9161_v47  ;;  %4334 = vmatprep.subr.bf16.mxu1 %v9164_v37  ;;  %v9243_v47 = vld [vmem:[%s12561_s1 + $0x11a0] ss:$16 sps:$4 sm:$0xff]   ;;  %v9246_v37 = vld [vmem:[%s12561_s1 + $0x11a8] ss:$16 sps:$4 sm:$0xff]  }
 0x1ff   :  { %3966 = vmatpush1.bf16.msra.mxu0 %v9159_v53  ;;  %4335 = vmatpush1.bf16.msra.mxu1 %v9162_v54  ;;  %v9251_v53 = vld [vmem:[%s12561_s1 + $0x11c4] ss:$16 sps:$4 sm:$0xff]   ;;  %v9254_v54 = vld [vmem:[%s12561_s1 + $0x11cc] ss:$16 sps:$4 sm:$0xff]  }
 0x200   :  { %3976 = vmatprep.subr.bf16.mxu0 %v9167_v39  ;;  %4345 = vmatprep.subr.bf16.mxu1 %v9170_v55  ;;  %v9249_v39 = vld [vmem:[%s12561_s1 + $0x11c0] ss:$16 sps:$4 sm:$0xff]   ;;  %v9252_v55 = vld [vmem:[%s12561_s1 + $0x11c8] ss:$16 sps:$4 sm:$0xff]  }
 0x202   :  { %3968 = vmatmul.mubr.bf16.vlgmr.msra.gmra.mrb[0].mxu0 %v725_v48  ;;  %4337 = vmatmul.mubr.bf16.vlgmr.msra.gmra.mrb[0].mxu1 %v725_v48  ;;  %v9258_v48 = vld [vmem:[%s12561_s1 + $0x11e8] ss:$16 sps:$4 sm:$0xff]  }
 0x203   :  { %3977 = vmatpush1.bf16.msra.mxu0 %v9165_v56  ;;  %4346 = vmatpush1.bf16.msra.mxu1 %v9168_v57  ;;  %v9257_v56 = vld [vmem:[%s12561_s1 + $0x11e4] ss:$16 sps:$4 sm:$0xff]   ;;  %v9260_v57 = vld [vmem:[%s12561_s1 + $0x11ec] ss:$16 sps:$4 sm:$0xff]  }
 0x204   :  { %3978 = vmatprep.subr.bf16.mxu0 %v9173_v59  ;;  %4347 = vmatprep.subr.bf16.mxu1 %v9176_v60  ;;  %v9263_v59 = vld [vmem:[%s12563_s3 + $0x4] ss:$16 sps:$4 sm:$0xff]   ;;  %v9266_v60 = vld [vmem:[%s12563_s3 + $0xc] ss:$16 sps:$4 sm:$0xff]  }
 0x205   :  { %4008 = vmatprep.mubr.bf16.mxu0 %v749_v61  ;;  %4377 = vmatprep.mubr.bf16.mxu1 %v749_v61  ;;  %v742_v61 = vrot.slane %v11116_v51, %v9630_v49  ;;  %v9272_v49 = vld [vmem:[%s12563_s3 + $0x2c] ss:$16 sps:$4 sm:$0xff]   ;;  %v9267_v51 = vld [vmem:[%s12563_s3 + $0x20] ss:$16 sps:$4 sm:$0xff]  }
 0x207   :  { %3979 = vmatpush1.bf16.msra.mxu0 %v9171_v50  ;;  %4348 = vmatpush1.bf16.msra.mxu1 %v9174_v62  ;;  %v9261_v50 = vld [vmem:[%s12563_s3] ss:$16 sps:$4 sm:$0xff]   ;;  %v9264_v62 = vld [vmem:[%s12563_s3 + $0x8] ss:$16 sps:$4 sm:$0xff]  }
 0x208   :  { %3980 = vmatprep.subr.bf16.mxu0 %v9179_v63  ;;  %4349 = vmatprep.subr.bf16.mxu1 %v9182_v0  ;;  %v9269_v63 = vld [vmem:[%s12563_s3 + $0x24] ss:$16 sps:$4 sm:$0xff]   ;;  %v9270_v0 = vld [vmem:[%s12563_s3 + $0x28] ss:$16 sps:$4 sm:$0xff]  }
 0x20b   :  { %3981 = vmatpush1.bf16.msra.mxu0 %v9177_v1  ;;  %4350 = vmatpush1.bf16.msra.mxu1 %v9180_v2  ;;  %v9275_v1 = vld [vmem:[%s12563_s3 + $0x44] ss:$16 sps:$4 sm:$0xff]   ;;  %v9278_v2 = vld [vmem:[%s12563_s3 + $0x4c] ss:$16 sps:$4 sm:$0xff]  }
 0x20c   :  { %3982 = vmatprep.subr.bf16.mxu0 %v9185_v3  ;;  %4351 = vmatprep.subr.bf16.mxu1 %v9188_v4  ;;  %v9273_v3 = vld [vmem:[%s12563_s3 + $0x40] ss:$16 sps:$4 sm:$0xff]   ;;  %v9276_v4 = vld [vmem:[%s12563_s3 + $0x48] ss:$16 sps:$4 sm:$0xff]  }
 0x20f   :  { %3983 = vmatpush1.bf16.msra.mxu0 %v9183_v5  ;;  %4352 = vmatpush1.bf16.msra.mxu1 %v9186_v6  ;;  %v9281_v5 = vld [vmem:[%s12563_s3 + $0x64] ss:$16 sps:$4 sm:$0xff]   ;;  %v9284_v6 = vld [vmem:[%s12563_s3 + $0x6c] ss:$16 sps:$4 sm:$0xff]  }
 0x210   :  { %3984 = vmatprep.subr.bf16.mxu0 %v9191_v7  ;;  %4353 = vmatprep.subr.bf16.mxu1 %v9194_v8  ;;  %v9279_v7 = vld [vmem:[%s12563_s3 + $0x60] ss:$16 sps:$4 sm:$0xff]   ;;  %v9282_v8 = vld [vmem:[%s12563_s3 + $0x68] ss:$16 sps:$4 sm:$0xff]  }
 0x213   :  { %3985 = vmatpush1.bf16.msra.mxu0 %v9189_v9  ;;  %4354 = vmatpush1.bf16.msra.mxu1 %v9192_v10  ;;  %v9287_v9 = vld [vmem:[%s12563_s3 + $0x84] ss:$16 sps:$4 sm:$0xff]   ;;  %v9290_v10 = vld [vmem:[%s12563_s3 + $0x8c] ss:$16 sps:$4 sm:$0xff]  }
 0x214   :  { %3986 = vmatprep.subr.bf16.mxu0 %v9197_v11  ;;  %4355 = vmatprep.subr.bf16.mxu1 %v9200_v12  ;;  %v9285_v11 = vld [vmem:[%s12563_s3 + $0x80] ss:$16 sps:$4 sm:$0xff]   ;;  %v9288_v12 = vld [vmem:[%s12563_s3 + $0x88] ss:$16 sps:$4 sm:$0xff]  }
 0x217   :  { %3987 = vmatpush1.bf16.msra.mxu0 %v9195_v52  ;;  %4356 = vmatpush1.bf16.msra.mxu1 %v9198_v15  ;;  %v9293_v52 = vld [vmem:[%s12563_s3 + $0xa4] ss:$16 sps:$4 sm:$0xff]   ;;  %v9296_v15 = vld [vmem:[%s12563_s3 + $0xac] ss:$16 sps:$4 sm:$0xff]  }
 0x218   :  { %3988 = vmatprep.subr.bf16.mxu0 %v9203_v16  ;;  %4357 = vmatprep.subr.bf16.mxu1 %v9206_v17  ;;  %v9291_v16 = vld [vmem:[%s12563_s3 + $0xa0] ss:$16 sps:$4 sm:$0xff]   ;;  %v9294_v17 = vld [vmem:[%s12563_s3 + $0xa8] ss:$16 sps:$4 sm:$0xff]  }
 0x21b   :  { %3989 = vmatpush1.bf16.msra.mxu0 %v9201_v18  ;;  %4358 = vmatpush1.bf16.msra.mxu1 %v9204_v19  ;;  %v9299_v18 = vld [vmem:[%s12563_s3 + $0xc4] ss:$16 sps:$4 sm:$0xff]   ;;  %v9302_v19 = vld [vmem:[%s12563_s3 + $0xcc] ss:$16 sps:$4 sm:$0xff]  }
 0x21c   :  { %3990 = vmatprep.subr.bf16.mxu0 %v9209_v20  ;;  %4359 = vmatprep.subr.bf16.mxu1 %v9212_v22  ;;  %v9297_v20 = vld [vmem:[%s12563_s3 + $0xc0] ss:$16 sps:$4 sm:$0xff]   ;;  %v9300_v22 = vld [vmem:[%s12563_s3 + $0xc8] ss:$16 sps:$4 sm:$0xff]  }
 0x21f   :  { %3991 = vmatpush1.bf16.msra.mxu0 %v9207_v23  ;;  %4360 = vmatpush1.bf16.msra.mxu1 %v9210_v24  ;;  %v9305_v23 = vld [vmem:[%s12563_s3 + $0xe4] ss:$16 sps:$4 sm:$0xff]   ;;  %v9308_v24 = vld [vmem:[%s12563_s3 + $0xec] ss:$16 sps:$4 sm:$0xff]  }
 0x220   :  { %3992 = vmatprep.subr.bf16.mxu0 %v9215_v13  ;;  %4361 = vmatprep.subr.bf16.mxu1 %v9218_v28  ;;  %v9303_v13 = vld [vmem:[%s12563_s3 + $0xe0] ss:$16 sps:$4 sm:$0xff]   ;;  %v9306_v28 = vld [vmem:[%s12563_s3 + $0xe8] ss:$16 sps:$4 sm:$0xff]  }
 0x223   :  { %3993 = vmatpush1.bf16.msra.mxu0 %v9213_v29  ;;  %4362 = vmatpush1.bf16.msra.mxu1 %v9216_v14  ;;  %v9311_v29 = vld [vmem:[%s12563_s3 + $0x104] ss:$16 sps:$4 sm:$0xff]   ;;  %v9314_v14 = vld [vmem:[%s12563_s3 + $0x10c] ss:$16 sps:$4 sm:$0xff]  }
 0x224   :  { %3994 = vmatprep.subr.bf16.mxu0 %v9221_v30  ;;  %4363 = vmatprep.subr.bf16.mxu1 %v9224_v31  ;;  %v9309_v30 = vld [vmem:[%s12563_s3 + $0x100] ss:$16 sps:$4 sm:$0xff]   ;;  %v9312_v31 = vld [vmem:[%s12563_s3 + $0x108] ss:$16 sps:$4 sm:$0xff]  }
 0x227   :  { %3995 = vmatpush1.bf16.msra.mxu0 %v9219_v25  ;;  %4364 = vmatpush1.bf16.msra.mxu1 %v9222_v32  ;;  %v9317_v25 = vld [vmem:[%s12563_s3 + $0x124] ss:$16 sps:$4 sm:$0xff]   ;;  %v9320_v32 = vld [vmem:[%s12563_s3 + $0x12c] ss:$16 sps:$4 sm:$0xff]  }
 0x228   :  { %3996 = vmatprep.subr.bf16.mxu0 %v9227_v33  ;;  %4365 = vmatprep.subr.bf16.mxu1 %v9230_v34  ;;  %v9315_v33 = vld [vmem:[%s12563_s3 + $0x120] ss:$16 sps:$4 sm:$0xff]   ;;  %v9318_v34 = vld [vmem:[%s12563_s3 + $0x128] ss:$16 sps:$4 sm:$0xff]  }
 0x22b   :  { %3997 = vmatpush1.bf16.msra.mxu0 %v9225_v26  ;;  %4366 = vmatpush1.bf16.msra.mxu1 %v9228_v36  ;;  %v9323_v26 = vld [vmem:[%s12563_s3 + $0x144] ss:$16 sps:$4 sm:$0xff]   ;;  %v9326_v36 = vld [vmem:[%s12563_s3 + $0x14c] ss:$16 sps:$4 sm:$0xff]  }
 0x22c   :  { %3998 = vmatprep.subr.bf16.mxu0 %v9233_v38  ;;  %4367 = vmatprep.subr.bf16.mxu1 %v9236_v21  ;;  %v9321_v38 = vld [vmem:[%s12563_s3 + $0x140] ss:$16 sps:$4 sm:$0xff]   ;;  %v9324_v21 = vld [vmem:[%s12563_s3 + $0x148] ss:$16 sps:$4 sm:$0xff]  }
 0x22f   :  { %3999 = vmatpush1.bf16.msra.mxu0 %v9231_v40  ;;  %4368 = vmatpush1.bf16.msra.mxu1 %v9234_v27  ;;  %v9329_v40 = vld [vmem:[%s12563_s3 + $0x164] ss:$16 sps:$4 sm:$0xff]   ;;  %v9332_v27 = vld [vmem:[%s12563_s3 + $0x16c] ss:$16 sps:$4 sm:$0xff]  }
 0x230   :  { %4000 = vmatprep.subr.bf16.mxu0 %v9239_v41  ;;  %4369 = vmatprep.subr.bf16.mxu1 %v9242_v43  ;;  %v9327_v41 = vld [vmem:[%s12563_s3 + $0x160] ss:$16 sps:$4 sm:$0xff]   ;;  %v9330_v43 = vld [vmem:[%s12563_s3 + $0x168] ss:$16 sps:$4 sm:$0xff]  }
 0x233   :  { %4001 = vmatpush1.bf16.msra.mxu0 %v9237_v44  ;;  %4370 = vmatpush1.bf16.msra.mxu1 %v9240_v35  ;;  %v9335_v44 = vld [vmem:[%s12563_s3 + $0x184] ss:$16 sps:$4 sm:$0xff]   ;;  %v9338_v35 = vld [vmem:[%s12563_s3 + $0x18c] ss:$16 sps:$4 sm:$0xff]  }
 0x234   :  { %4002 = vmatprep.subr.bf16.mxu0 %v9245_v45  ;;  %4371 = vmatprep.subr.bf16.mxu1 %v9248_v46  ;;  %v9333_v45 = vld [vmem:[%s12563_s3 + $0x180] ss:$16 sps:$4 sm:$0xff]   ;;  %v9336_v46 = vld [vmem:[%s12563_s3 + $0x188] ss:$16 sps:$4 sm:$0xff]  }
 0x237   :  { %4003 = vmatpush1.bf16.msra.mxu0 %v9243_v47  ;;  %4372 = vmatpush1.bf16.msra.mxu1 %v9246_v37  ;;  %v9341_v47 = vld [vmem:[%s12563_s3 + $0x1a4] ss:$16 sps:$4 sm:$0xff]   ;;  %v9344_v37 = vld [vmem:[%s12563_s3 + $0x1ac] ss:$16 sps:$4 sm:$0xff]  }
 0x238   :  { %4004 = vmatprep.subr.bf16.mxu0 %v9251_v53  ;;  %4373 = vmatprep.subr.bf16.mxu1 %v9254_v54  ;;  %v9339_v53 = vld [vmem:[%s12563_s3 + $0x1a0] ss:$16 sps:$4 sm:$0xff]   ;;  %v9342_v54 = vld [vmem:[%s12563_s3 + $0x1a8] ss:$16 sps:$4 sm:$0xff]  }
 0x23b   :  { %4005 = vmatpush1.bf16.msra.mxu0 %v9249_v39  ;;  %4374 = vmatpush1.bf16.msra.mxu1 %v9252_v55  ;;  %v9347_v39 = vld [vmem:[%s12563_s3 + $0x1c4] ss:$16 sps:$4 sm:$0xff]   ;;  %v9350_v55 = vld [vmem:[%s12563_s3 + $0x1cc] ss:$16 sps:$4 sm:$0xff]  }
 0x23c   :  { %4006 = vmatprep.subr.bf16.mxu0 %v9257_v56  ;;  %4375 = vmatprep.subr.bf16.mxu1 %v9260_v57  ;;  %v9345_v56 = vld [vmem:[%s12563_s3 + $0x1c0] ss:$16 sps:$4 sm:$0xff]   ;;  %v9348_v57 = vld [vmem:[%s12563_s3 + $0x1c8] ss:$16 sps:$4 sm:$0xff]  }
 0x23f   :  { %4007 = vmatpush1.bf16.msra.mxu0 %v9255_v58  ;;  %4376 = vmatpush1.bf16.msra.mxu1 %v9258_v48  ;;  %v9353_v58 = vld [vmem:[%s12563_s3 + $0x1e4] ss:$16 sps:$4 sm:$0xff]   ;;  %v9356_v48 = vld [vmem:[%s12563_s3 + $0x1ec] ss:$16 sps:$4 sm:$0xff]  }
 0x240   :  { %5192 = vmatprep.subr.bf16.mxu0 %v9263_v59  ;;  %5274 = vmatprep.subr.bf16.mxu1 %v9266_v60  ;;  %v9351_v59 = vld [vmem:[%s12563_s3 + $0x1e0] ss:$16 sps:$4 sm:$0xff]   ;;  %v9354_v60 = vld [vmem:[%s12563_s3 + $0x1e8] ss:$16 sps:$4 sm:$0xff]  }
 0x242   :  { %4009 = vmatmul.mubr.bf16.vlgmr.msra.gmra.mrb[0].mxu0 %v742_v61  ;;  %4378 = vmatmul.mubr.bf16.vlgmr.msra.gmra.mrb[0].mxu1 %v742_v61  ;;  %v9359_v61 = vld [vmem:[%s12563_s3 + $0x204] ss:$16 sps:$4 sm:$0xff]  }
 0x243   :  { %5193 = vmatpush1.bf16.msra.mxu0 %v9261_v50  ;;  %5275 = vmatpush1.bf16.msra.mxu1 %v9264_v62  ;;  %v9362_v50 = vld [vmem:[%s12563_s3 + $0x20c] ss:$16 sps:$4 sm:$0xff]   ;;  %v11522_v62 = vsub.s32 0, %v9612_v42 }
 0x244   :  { %5194 = vmatprep.subr.bf16.mxu0 %v9269_v63  ;;  %5276 = vmatprep.subr.bf16.mxu1 %v9272_v49  ;;  %v11527_v63 = vld [vmem:[%s12564_s2] sm:$0xf]  ;;  %v11530_v49 = vsub.s32 1, %v9612_v42 }
 0x247   :  { %5195 = vmatpush1.bf16.msra.mxu0 %v9267_v51  ;;  %5277 = vmatpush1.bf16.msra.mxu1 %v9270_v0  ;;  %v11533_v51 = vsub.s32 3, %v9612_v42  ;;  %v610_v0 = vrot.slane %v11527_v63, %v11522_v62 }
 0x248   :  { %5196 = vmatprep.subr.bf16.mxu0 %v9275_v1  ;;  %5278 = vmatprep.subr.bf16.mxu1 %v9278_v2  ;;  %v614_v1 = vrot.slane %v11527_v63, %v11530_v49 }
 0x249   :  { %v622_v2 = vrot.slane %v11527_v63, %v11533_v51 }
 0x24b   :  { %5197 = vmatpush1.bf16.msra.mxu0 %v9273_v3  ;;  %5279 = vmatpush1.bf16.msra.mxu1 %v9276_v4 }
 0x24c   :  { %5198 = vmatprep.subr.bf16.mxu0 %v9281_v5  ;;  %5280 = vmatprep.subr.bf16.mxu1 %v9284_v6 }
 0x24f   :  { %5199 = vmatpush1.bf16.msra.mxu0 %v9279_v7  ;;  %5281 = vmatpush1.bf16.msra.mxu1 %v9282_v8 }
 0x250   :  { %5200 = vmatprep.subr.bf16.mxu0 %v9287_v9  ;;  %5282 = vmatprep.subr.bf16.mxu1 %v9290_v10 }
 0x253   :  { %5201 = vmatpush1.bf16.msra.mxu0 %v9285_v11  ;;  %5283 = vmatpush1.bf16.msra.mxu1 %v9288_v12 }
 0x254   :  { %5202 = vmatprep.subr.bf16.mxu0 %v9293_v52  ;;  %5284 = vmatprep.subr.bf16.mxu1 %v9296_v15 }
 0x257   :  { %5203 = vmatpush1.bf16.msra.mxu0 %v9291_v16  ;;  %5285 = vmatpush1.bf16.msra.mxu1 %v9294_v17 }
 0x258   :  { %5204 = vmatprep.subr.bf16.mxu0 %v9299_v18  ;;  %5286 = vmatprep.subr.bf16.mxu1 %v9302_v19 }
 0x25b   :  { %5205 = vmatpush1.bf16.msra.mxu0 %v9297_v20  ;;  %5287 = vmatpush1.bf16.msra.mxu1 %v9300_v22  ;;  %v9357_v22 = vld [vmem:[%s12563_s3 + $0x200] ss:$16 sps:$4 sm:$0xff]  }
 0x25c   :  { %5206 = vmatprep.subr.bf16.mxu0 %v9305_v23  ;;  %5288 = vmatprep.subr.bf16.mxu1 %v9308_v24  ;;  %v9360_v23 = vld [vmem:[%s12563_s3 + $0x208] ss:$16 sps:$4 sm:$0xff]  }
 0x25f   :  { %5207 = vmatpush1.bf16.msra.mxu0 %v9303_v13  ;;  %5289 = vmatpush1.bf16.msra.mxu1 %v9306_v28  ;;  %v9365_v28 = vld [vmem:[%s12563_s3 + $0x224] ss:$16 sps:$4 sm:$0xff]  }
 0x260   :  { %5208 = vmatprep.subr.bf16.mxu0 %v9311_v29  ;;  %5290 = vmatprep.subr.bf16.mxu1 %v9314_v14  ;;  %v9368_v29 = vld [vmem:[%s12563_s3 + $0x22c] ss:$16 sps:$4 sm:$0xff]  }
 0x263   :  { %5209 = vmatpush1.bf16.msra.mxu0 %v9309_v30  ;;  %5291 = vmatpush1.bf16.msra.mxu1 %v9312_v31  ;;  %v9363_v30 = vld [vmem:[%s12563_s3 + $0x220] ss:$16 sps:$4 sm:$0xff]   ;;  %v9366_v31 = vld [vmem:[%s12563_s3 + $0x228] ss:$16 sps:$4 sm:$0xff]  }
 0x264   :  { %5210 = vmatprep.subr.bf16.mxu0 %v9317_v25  ;;  %5292 = vmatprep.subr.bf16.mxu1 %v9320_v32  ;;  %v9371_v25 = vld [vmem:[%s12563_s3 + $0x244] ss:$16 sps:$4 sm:$0xff]   ;;  %v9374_v32 = vld [vmem:[%s12563_s3 + $0x24c] ss:$16 sps:$4 sm:$0xff]  }
 0x267   :  { %5211 = vmatpush1.bf16.msra.mxu0 %v9315_v33  ;;  %5293 = vmatpush1.bf16.msra.mxu1 %v9318_v34  ;;  %v9369_v33 = vld [vmem:[%s12563_s3 + $0x240] ss:$16 sps:$4 sm:$0xff]   ;;  %v9372_v34 = vld [vmem:[%s12563_s3 + $0x248] ss:$16 sps:$4 sm:$0xff]  }
 0x268   :  { %5212 = vmatprep.subr.bf16.mxu0 %v9323_v26  ;;  %5294 = vmatprep.subr.bf16.mxu1 %v9326_v36  ;;  %v9377_v26 = vld [vmem:[%s12563_s3 + $0x264] ss:$16 sps:$4 sm:$0xff]   ;;  %v9380_v36 = vld [vmem:[%s12563_s3 + $0x26c] ss:$16 sps:$4 sm:$0xff]  }
 0x26b   :  { %5213 = vmatpush1.bf16.msra.mxu0 %v9321_v38  ;;  %5295 = vmatpush1.bf16.msra.mxu1 %v9324_v21  ;;  %v9375_v38 = vld [vmem:[%s12563_s3 + $0x260] ss:$16 sps:$4 sm:$0xff]   ;;  %v9378_v21 = vld [vmem:[%s12563_s3 + $0x268] ss:$16 sps:$4 sm:$0xff]  }
 0x26c   :  { %5214 = vmatprep.subr.bf16.mxu0 %v9329_v40  ;;  %5296 = vmatprep.subr.bf16.mxu1 %v9332_v27  ;;  %v9383_v40 = vld [vmem:[%s12563_s3 + $0x284] ss:$16 sps:$4 sm:$0xff]   ;;  %v9386_v27 = vld [vmem:[%s12563_s3 + $0x28c] ss:$16 sps:$4 sm:$0xff]  }
 0x26f   :  { %5215 = vmatpush1.bf16.msra.mxu0 %v9327_v41  ;;  %5297 = vmatpush1.bf16.msra.mxu1 %v9330_v43  ;;  %v9381_v41 = vld [vmem:[%s12563_s3 + $0x280] ss:$16 sps:$4 sm:$0xff]   ;;  %v9384_v43 = vld [vmem:[%s12563_s3 + $0x288] ss:$16 sps:$4 sm:$0xff]  }
 0x270   :  { %5216 = vmatprep.subr.bf16.mxu0 %v9335_v44  ;;  %5298 = vmatprep.subr.bf16.mxu1 %v9338_v35  ;;  %v9389_v44 = vld [vmem:[%s12563_s3 + $0x2a4] ss:$16 sps:$4 sm:$0xff]   ;;  %v9392_v35 = vld [vmem:[%s12563_s3 + $0x2ac] ss:$16 sps:$4 sm:$0xff]  }
 0x273   :  { %5217 = vmatpush1.bf16.msra.mxu0 %v9333_v45  ;;  %5299 = vmatpush1.bf16.msra.mxu1 %v9336_v46  ;;  %v9387_v45 = vld [vmem:[%s12563_s3 + $0x2a0] ss:$16 sps:$4 sm:$0xff]   ;;  %v9390_v46 = vld [vmem:[%s12563_s3 + $0x2a8] ss:$16 sps:$4 sm:$0xff]  }
 0x274   :  { %5218 = vmatprep.subr.bf16.mxu0 %v9341_v47  ;;  %5300 = vmatprep.subr.bf16.mxu1 %v9344_v37  ;;  %v9395_v47 = vld [vmem:[%s12563_s3 + $0x2c4] ss:$16 sps:$4 sm:$0xff]   ;;  %v9398_v37 = vld [vmem:[%s12563_s3 + $0x2cc] ss:$16 sps:$4 sm:$0xff]  }
 0x277   :  { %5219 = vmatpush1.bf16.msra.mxu0 %v9339_v53  ;;  %5301 = vmatpush1.bf16.msra.mxu1 %v9342_v54  ;;  %v9393_v53 = vld [vmem:[%s12563_s3 + $0x2c0] ss:$16 sps:$4 sm:$0xff]   ;;  %v9396_v54 = vld [vmem:[%s12563_s3 + $0x2c8] ss:$16 sps:$4 sm:$0xff]  }
 0x278   :  { %5220 = vmatprep.subr.bf16.mxu0 %v9347_v39  ;;  %5302 = vmatprep.subr.bf16.mxu1 %v9350_v55  ;;  %v9401_v39 = vld [vmem:[%s12563_s3 + $0x2e4] ss:$16 sps:$4 sm:$0xff]   ;;  %v9404_v55 = vld [vmem:[%s12563_s3 + $0x2ec] ss:$16 sps:$4 sm:$0xff]  }
 0x27b   :  { %5221 = vmatpush1.bf16.msra.mxu0 %v9345_v56  ;;  %5303 = vmatpush1.bf16.msra.mxu1 %v9348_v57  ;;  %v9399_v56 = vld [vmem:[%s12563_s3 + $0x2e0] ss:$16 sps:$4 sm:$0xff]   ;;  %v9402_v57 = vld [vmem:[%s12563_s3 + $0x2e8] ss:$16 sps:$4 sm:$0xff]  }
 0x27c   :  { %5222 = vmatprep.subr.bf16.mxu0 %v9353_v58  ;;  %5304 = vmatprep.subr.bf16.mxu1 %v9356_v48  ;;  %v9407_v58 = vld [vmem:[%s12563_s3 + $0x304] ss:$16 sps:$4 sm:$0xff]   ;;  %v9410_v48 = vld [vmem:[%s12563_s3 + $0x30c] ss:$16 sps:$4 sm:$0xff]  }
 0x27f   :  { %5223 = vmatpush1.bf16.msra.mxu0 %v9351_v59  ;;  %5305 = vmatpush1.bf16.msra.mxu1 %v9354_v60  ;;  %v9405_v59 = vld [vmem:[%s12563_s3 + $0x300] ss:$16 sps:$4 sm:$0xff]   ;;  %v9408_v60 = vld [vmem:[%s12563_s3 + $0x308] ss:$16 sps:$4 sm:$0xff]  }
 0x280   :  { %5233 = vmatprep.subr.bf16.mxu0 %v9359_v61  ;;  %5315 = vmatprep.subr.bf16.mxu1 %v9362_v50  ;;  %v9413_v61 = vld [vmem:[%s12563_s3 + $0x324] ss:$16 sps:$4 sm:$0xff]   ;;  %v9416_v50 = vld [vmem:[%s12563_s3 + $0x32c] ss:$16 sps:$4 sm:$0xff]  }
 0x315   :  { %v4010_v3 = vpop.f32.mrb[0].mxu0  ;;  %v11541_v4 = vpop.f32.mrb[0].mxu1 }
 0x316   :  { %v8289_v5 = vadd.f32 %v4010_v3, %v610_v0  ;;  %v4012_v6 = vpop.f32.mrb[1].mxu0  ;;  %v4381_v7 = vpop.f32.mrb[1].mxu1  ;;  %v9411_v0 = vld [vmem:[%s12563_s3 + $0x320] ss:$16 sps:$4 sm:$0xff]   ;;  %v9422_v3 = vld [vmem:[%s12563_s3 + $0x34c] ss:$16 sps:$4 sm:$0xff]  }
 0x317   :  { %v8290_v8 = vadd.f32 %v4012_v6, %v614_v1  ;;  %v8292_v9 = vadd.f32 %v4381_v7, %v622_v2  ;;  %v4014_v10 = vpop.f32.mrb[2].mxu0  ;;  %v4383_v11 = vpop.f32.mrb[2].mxu1  ;;  %v9414_v1 = vld [vmem:[%s12563_s3 + $0x328] ss:$16 sps:$4 sm:$0xff]   ;;  %v9419_v2 = vld [vmem:[%s12563_s3 + $0x344] ss:$16 sps:$4 sm:$0xff]  }
 0x318   :  { %vm4386_vm0 = vcmp.ge.f32.partialorder %v8289_v5, 0.0  ;;  %v4390_v12 = vmul.f32 0.2, %v8289_v5  ;;  %v4015_v17 = vpop.f32.mrb[3].mxu0  ;;  %v4384_v18 = vpop.f32.mrb[3].mxu1 }
 0x319   :  { %vm4387_vm1 = vcmp.ge.f32.partialorder %v8290_v8, 0.0  ;;  %v4391_v52 = vmul.f32 0.2, %v8290_v8  ;;  %vm4389_vm2 = vcmp.ge.f32.partialorder %v8292_v9, 0.0  ;;  %v4393_v15 = vmul.f32 0.2, %v8292_v9 }
 0x31a   :  { %v4394_v16 = vsel %vm4386_vm0, %v8289_v5, %v4390_v12  ;;  %v9417_v5 = vld [vmem:[%s12563_s3 + $0x340] ss:$16 sps:$4 sm:$0xff]   ;;  %v9420_v6 = vld [vmem:[%s12563_s3 + $0x348] ss:$16 sps:$4 sm:$0xff]   ;;  %v9425_v7 = vld [vmem:[%s12563_s3 + $0x364] ss:$16 sps:$4 sm:$0xff]  }
 0x31b   :  { %v4395_v19 = vsel %vm4387_vm1, %v8290_v8, %v4391_v52  ;;  %v4397_v24 = vsel %vm4389_vm2, %v8292_v9, %v4393_v15  ;;  %v4398_v13 = vpack.c.bf16 %v4394_v16, %v4394_v16  ;;  %v9428_v8 = vld [vmem:[%s12563_s3 + $0x36c] ss:$16 sps:$4 sm:$0xff]   ;;  %v9423_v9 = vld [vmem:[%s12563_s3 + $0x360] ss:$16 sps:$4 sm:$0xff]   ;;  %v9426_v10 = vld [vmem:[%s12563_s3 + $0x368] ss:$16 sps:$4 sm:$0xff]  }
 0x31c   :  { %v4399_v20 = vpack.c.bf16 %v4395_v19, %v4395_v19  ;;  %v4401_v14 = vpack.c.bf16 %v4397_v24, %v4397_v24  ;;  %v9431_v11 = vld [vmem:[%s12563_s3 + $0x384] ss:$16 sps:$4 sm:$0xff]   ;;  %v9434_v12 = vld [vmem:[%s12563_s3 + $0x38c] ss:$16 sps:$4 sm:$0xff]   ;;  %v11688_v52 = vsub.s32 2, %v9612_v42 }
 0x31d   :  { %v9429_v15 = vld [vmem:[%s12563_s3 + $0x380] ss:$16 sps:$4 sm:$0xff]   ;;  %v9432_v16 = vld [vmem:[%s12563_s3 + $0x388] ss:$16 sps:$4 sm:$0xff]   ;;  %v9437_v17 = vld [vmem:[%s12563_s3 + $0x3a4] ss:$16 sps:$4 sm:$0xff]  }
 0x31e   :  { %5224 = vmatprep.mubr.bf16.mxu0 %v4399_v20  ;;  %5306 = vmatprep.mubr.bf16.mxu1 %v4399_v20  ;;  %v9440_v18 = vld [vmem:[%s12563_s3 + $0x3ac] ss:$16 sps:$4 sm:$0xff]   ;;  %v618_v19 = vrot.slane %v11527_v63, %v11688_v52  ;;  %v9435_v20 = vld [vmem:[%s12563_s3 + $0x3a0] ss:$16 sps:$4 sm:$0xff]  }
 0x31f   :  { %5225 = vmatmul.mubr.bf16.vlgmr.msra.gmra.mrb[4].mxu0 %v4398_v13  ;;  %5307 = vmatmul.mubr.bf16.vlgmr.msra.gmra.mrb[4].mxu1 %v4398_v13  ;;  %v9446_v63 = vld [vmem:[%s12563_s3 + $0x3cc] ss:$16 sps:$4 sm:$0xff]   ;;  %v9441_v13 = vld [vmem:[%s12563_s3 + $0x3c0] ss:$16 sps:$4 sm:$0xff]  }
 0x320   :  { %5234 = vmatpush1.bf16.msra.mxu0 %v9357_v22  ;;  %5316 = vmatpush1.bf16.msra.mxu1 %v9360_v23  ;;  %v9438_v22 = vld [vmem:[%s12563_s3 + $0x3a8] ss:$16 sps:$4 sm:$0xff]   ;;  %v9443_v23 = vld [vmem:[%s12563_s3 + $0x3c4] ss:$16 sps:$4 sm:$0xff]   ;;  %v8291_v24 = vadd.f32 %v11541_v4, %v618_v19  ;;  %v9452_v4 = vld [vmem:[%s12563_s3 + $0x3ec] ss:$16 sps:$4 sm:$0xff]  }
 0x321   :  { %5265 = vmatprep.mubr.bf16.mxu0 %v4401_v14  ;;  %5347 = vmatprep.mubr.bf16.mxu1 %v4401_v14  ;;  %v5372_v14 = vld [vmem:[%s12565_s5] sm:$0xff] }
 0x322   :  { %5235 = vmatprep.subr.bf16.mxu0 %v9365_v28  ;;  %5317 = vmatprep.subr.bf16.mxu1 %v9368_v29  ;;  %v9444_v28 = vld [vmem:[%s12563_s3 + $0x3c8] ss:$16 sps:$4 sm:$0xff]   ;;  %v9449_v29 = vld [vmem:[%s12563_s3 + $0x3e4] ss:$16 sps:$4 sm:$0xff]   ;;  %vm4388_vm3 = vcmp.ge.f32.partialorder %v8291_v24, 0.0 }
 0x324   :  { %5236 = vmatpush1.bf16.msra.mxu0 %v9363_v30  ;;  %5318 = vmatpush1.bf16.msra.mxu1 %v9366_v31  ;;  %v4392_v30 = vmul.f32 0.2, %v8291_v24  ;;  %v5376_v31 = vld [vmem:[%s12565_s5 + $0x20] sm:$0xff] }
 0x325   :  { %5237 = vmatprep.subr.bf16.mxu0 %v9371_v25  ;;  %5319 = vmatprep.subr.bf16.mxu1 %v9374_v32  ;;  %v5373_v25 = vld [vmem:[%s12565_s5 + $0x8] sm:$0xff] }
 0x326   :  { %v5377_v32 = vld [vmem:[%s12565_s5 + $0x28] sm:$0xff] }
 0x328   :  { %5238 = vmatpush1.bf16.msra.mxu0 %v9369_v33  ;;  %5320 = vmatpush1.bf16.msra.mxu1 %v9372_v34  ;;  %v9447_v33 = vld [vmem:[%s12563_s3 + $0x3e0] ss:$16 sps:$4 sm:$0xff]   ;;  %v9450_v34 = vld [vmem:[%s12563_s3 + $0x3e8] ss:$16 sps:$4 sm:$0xff]  }
 0x329   :  { %5239 = vmatprep.subr.bf16.mxu0 %v9377_v26  ;;  %5321 = vmatprep.subr.bf16.mxu1 %v9380_v36  ;;  %v8034_v26 = vcombine.high %v5372_v14, %v5376_v31  ;;  %v8036_v36 = vcombine.high %v5373_v25, %v5377_v32 }
 0x32c   :  { %5240 = vmatpush1.bf16.msra.mxu0 %v9375_v38  ;;  %5322 = vmatpush1.bf16.msra.mxu1 %v9378_v21  ;;  %v5380_v38 = vld [vmem:[%s12565_s5 + $0x40] sm:$0xff]  ;;  %v4396_v21 = vsel %vm4388_vm3, %v8291_v24, %v4392_v30  ;;  %v5425_v24 = vld [vmem:[%s12565_s5 + $0x1a8] sm:$0xff] }
 0x32d   :  { %5241 = vmatprep.subr.bf16.mxu0 %v9383_v40  ;;  %5323 = vmatprep.subr.bf16.mxu1 %v9386_v27  ;;  %v5384_v40 = vld [vmem:[%s12565_s5 + $0x60] sm:$0xff]  ;;  %v5381_v27 = vld [vmem:[%s12565_s5 + $0x48] sm:$0xff] }
 0x32e   :  { %v5432_v30 = vld [vmem:[%s12565_s5 + $0x1e0] sm:$0xff] }
 0x330   :  { %5242 = vmatpush1.bf16.msra.mxu0 %v9381_v41  ;;  %5324 = vmatpush1.bf16.msra.mxu1 %v9384_v43  ;;  %v5385_v41 = vld [vmem:[%s12565_s5 + $0x68] sm:$0xff]  ;;  %v8033_v43 = vcombine.low %v5372_v14, %v5376_v31  ;;  %v5428_v14 = vld [vmem:[%s12565_s5 + $0x1c0] sm:$0xff] }
 0x331   :  { %5243 = vmatprep.subr.bf16.mxu0 %v9389_v44  ;;  %5325 = vmatprep.subr.bf16.mxu1 %v9392_v35  ;;  %v8035_v44 = vcombine.low %v5373_v25, %v5377_v32  ;;  %v4400_v35 = vpack.c.bf16 %v4396_v21, %v4396_v21  ;;  %v5429_v31 = vld [vmem:[%s12565_s5 + $0x1c8] sm:$0xff] }
 0x332   :  { %v5433_v25 = vld [vmem:[%s12565_s5 + $0x1e8] sm:$0xff] }
 0x333   :  { %v5437_v21 = vld [vmem:[%s12565_s5 + $0x208] sm:$0xff] }
 0x334   :  { %5244 = vmatpush1.bf16.msra.mxu0 %v9387_v45  ;;  %5326 = vmatpush1.bf16.msra.mxu1 %v9390_v46  ;;  %v8042_v45 = vcombine.high %v5380_v38, %v5384_v40  ;;  %v8044_v46 = vcombine.high %v5381_v27, %v5385_v41 }
 0x335   :  { %5245 = vmatprep.subr.bf16.mxu0 %v9395_v47  ;;  %5327 = vmatprep.subr.bf16.mxu1 %v9398_v37  ;;  %v5388_v47 = vld [vmem:[%s12565_s5 + $0x80] sm:$0xff] }
 0x336   :  { %v5392_v37 = vld [vmem:[%s12565_s5 + $0xa0] sm:$0xff] }
 0x338   :  { %5246 = vmatpush1.bf16.msra.mxu0 %v9393_v53  ;;  %5328 = vmatpush1.bf16.msra.mxu1 %v9396_v54  ;;  %v5389_v53 = vld [vmem:[%s12565_s5 + $0x88] sm:$0xff] }
 0x339   :  { %5247 = vmatprep.subr.bf16.mxu0 %v9401_v39  ;;  %5329 = vmatprep.subr.bf16.mxu1 %v9404_v55  ;;  %v5393_v54 = vld [vmem:[%s12565_s5 + $0xa8] sm:$0xff]  ;;  %v8041_v39 = vcombine.low %v5380_v38, %v5384_v40  ;;  %v8043_v55 = vcombine.low %v5381_v27, %v5385_v41  ;;  %v5440_v38 = vld [vmem:[%s12565_s5 + $0x220] sm:$0xff]  ;;  %v8089_v27 = vcombine.low %v5428_v14, %v5432_v30 }
 0x33a   :  { %v5441_v40 = vld [vmem:[%s12565_s5 + $0x228] sm:$0xff]  ;;  %v8091_v41 = vcombine.low %v5429_v31, %v5433_v25 }
 0x33c   :  { %5248 = vmatpush1.bf16.msra.mxu0 %v9399_v56  ;;  %5330 = vmatpush1.bf16.msra.mxu1 %v9402_v57  ;;  %v8050_v56 = vcombine.high %v5388_v47, %v5392_v37  ;;  %v8052_v57 = vcombine.high %v5389_v53, %v5393_v54 }
 0x33d   :  { %5249 = vmatprep.subr.bf16.mxu0 %v9407_v58  ;;  %5331 = vmatprep.subr.bf16.mxu1 %v9410_v48  ;;  %v5396_v58 = vld [vmem:[%s12565_s5 + $0xc0] sm:$0xff] }
 0x33e   :  { %v5400_v48 = vld [vmem:[%s12565_s5 + $0xe0] sm:$0xff] }
 0x340   :  { %5250 = vmatpush1.bf16.msra.mxu0 %v9405_v59  ;;  %5332 = vmatpush1.bf16.msra.mxu1 %v9408_v60  ;;  %v5397_v59 = vld [vmem:[%s12565_s5 + $0xc8] sm:$0xff] }
 0x341   :  { %5251 = vmatprep.subr.bf16.mxu0 %v9413_v61  ;;  %5333 = vmatprep.subr.bf16.mxu1 %v9416_v50  ;;  %v5401_v60 = vld [vmem:[%s12565_s5 + $0xe8] sm:$0xff]  ;;  %v8049_v61 = vcombine.low %v5388_v47, %v5392_v37  ;;  %v8051_v50 = vcombine.low %v5389_v53, %v5393_v54  ;;  %v8099_v53 = vcombine.low %v5437_v21, %v5441_v40 }
 0x342   :  { %v5449_v47 = vld [vmem:[%s12565_s5 + $0x268] sm:$0xff] }
 0x344   :  { %5252 = vmatpush1.bf16.msra.mxu0 %v9411_v0  ;;  %5334 = vmatpush1.bf16.msra.mxu1 %v9414_v1  ;;  %v8058_v0 = vcombine.high %v5396_v58, %v5400_v48  ;;  %v8060_v1 = vcombine.high %v5397_v59, %v5401_v60 }
 0x345   :  { %5253 = vmatprep.subr.bf16.mxu0 %v9419_v2  ;;  %5335 = vmatprep.subr.bf16.mxu1 %v9422_v3  ;;  %v5404_v2 = vld [vmem:[%s12565_s5 + $0x100] sm:$0xff] }
 0x346   :  { %v5408_v3 = vld [vmem:[%s12565_s5 + $0x120] sm:$0xff] }
 0x348   :  { %5254 = vmatpush1.bf16.msra.mxu0 %v9417_v5  ;;  %5336 = vmatpush1.bf16.msra.mxu1 %v9420_v6  ;;  %v5405_v5 = vld [vmem:[%s12565_s5 + $0x108] sm:$0xff] }
 0x349   :  { %5255 = vmatprep.subr.bf16.mxu0 %v9425_v7  ;;  %5337 = vmatprep.subr.bf16.mxu1 %v9428_v8  ;;  %v5409_v6 = vld [vmem:[%s12565_s5 + $0x128] sm:$0xff]  ;;  %v8057_v7 = vcombine.low %v5396_v58, %v5400_v48  ;;  %v8059_v8 = vcombine.low %v5397_v59, %v5401_v60 }
 0x34a   :  { %v5457_v58 = vld [vmem:[%s12565_s5 + $0x2a8] sm:$0xff] }
 0x34c   :  { %5256 = vmatpush1.bf16.msra.mxu0 %v9423_v9  ;;  %5338 = vmatpush1.bf16.msra.mxu1 %v9426_v10  ;;  %v8066_v9 = vcombine.high %v5404_v2, %v5408_v3  ;;  %v8068_v10 = vcombine.high %v5405_v5, %v5409_v6 }
 0x34d   :  { %5257 = vmatprep.subr.bf16.mxu0 %v9431_v11  ;;  %5339 = vmatprep.subr.bf16.mxu1 %v9434_v12  ;;  %v5412_v11 = vld [vmem:[%s12565_s5 + $0x140] sm:$0xff] }
 0x34e   :  { %v5416_v12 = vld [vmem:[%s12565_s5 + $0x160] sm:$0xff] }
 0x34f   :  { %v8074_v19 = vcombine.high %v5412_v11, %v5416_v12 }
 0x350   :  { %5258 = vmatpush1.bf16.msra.mxu0 %v9429_v15  ;;  %5340 = vmatpush1.bf16.msra.mxu1 %v9432_v16  ;;  %v5413_v15 = vld [vmem:[%s12565_s5 + $0x148] sm:$0xff] }
 0x351   :  { %5259 = vmatprep.subr.bf16.mxu0 %v9437_v17  ;;  %5341 = vmatprep.subr.bf16.mxu1 %v9440_v18  ;;  %v5417_v16 = vld [vmem:[%s12565_s5 + $0x168] sm:$0xff]  ;;  %v8065_v17 = vcombine.low %v5404_v2, %v5408_v3  ;;  %v8067_v18 = vcombine.low %v5405_v5, %v5409_v6 }
 0x352   :  { %v5465_v2 = vld [vmem:[%s12565_s5 + $0x2e8] sm:$0xff] }
 0x354   :  { %5260 = vmatpush1.bf16.msra.mxu0 %v9435_v20  ;;  %5342 = vmatpush1.bf16.msra.mxu1 %v9438_v22  ;;  %v8076_v20 = vcombine.high %v5413_v15, %v5417_v16  ;;  %v5420_v22 = vld [vmem:[%s12565_s5 + $0x180] sm:$0xff] }
 0x355   :  { %5261 = vmatprep.subr.bf16.mxu0 %v9443_v23  ;;  %5343 = vmatprep.subr.bf16.mxu1 %v9446_v63  ;;  %v5424_v23 = vld [vmem:[%s12565_s5 + $0x1a0] sm:$0xff]  ;;  %v5421_v63 = vld [vmem:[%s12565_s5 + $0x188] sm:$0xff] }
 0x356   :  { %v8081_v32 = vcombine.low %v5420_v22, %v5424_v23 }
 0x358   :  { %5262 = vmatpush1.bf16.msra.mxu0 %v9441_v13  ;;  %5344 = vmatpush1.bf16.msra.mxu1 %v9444_v28  ;;  %v8073_v13 = vcombine.low %v5412_v11, %v5416_v12  ;;  %v8075_v28 = vcombine.low %v5413_v15, %v5417_v16  ;;  %v5473_v11 = vld [vmem:[%s12565_s5 + $0x328] sm:$0xff] }
 0x359   :  { %5263 = vmatprep.subr.bf16.mxu0 %v9449_v29  ;;  %5345 = vmatprep.subr.bf16.mxu1 %v9452_v4  ;;  %v8082_v29 = vcombine.high %v5420_v22, %v5424_v23  ;;  %v8084_v4 = vcombine.high %v5421_v63, %v5425_v24  ;;  %v5481_v22 = vld [vmem:[%s12565_s5 + $0x368] sm:$0xff] }
 0x35c   :  { %5264 = vmatpush1.bf16.msra.mxu0 %v9447_v33  ;;  %5346 = vmatpush1.bf16.msra.mxu1 %v9450_v34  ;;  %v8083_v33 = vcombine.low %v5421_v63, %v5425_v24  ;;  %v8090_v34 = vcombine.high %v5428_v14, %v5432_v30  ;;  %v5488_v14 = vld [vmem:[%s12565_s5 + $0x3a0] sm:$0xff]  ;;  %v5485_v30 = vld [vmem:[%s12565_s5 + $0x388] sm:$0xff] }
 0x35d   :  { %6950 = vmatprep.subr.bf16.mxu0 %v8034_v26  ;;  %7032 = vmatprep.subr.bf16.mxu1 %v8036_v36  ;;  %v8092_v26 = vcombine.high %v5429_v31, %v5433_v25  ;;  %v5436_v36 = vld [vmem:[%s12565_s5 + $0x200] sm:$0xff]  ;;  %v5489_v25 = vld [vmem:[%s12565_s5 + $0x3a8] sm:$0xff] }
 0x35e   :  { %v8097_v37 = vcombine.low %v5436_v36, %v5440_v38 }
 0x35f   :  { %5266 = vmatmul.mubr.bf16.vlgmr.msra.gmra.mrb[4].mxu0 %v4400_v35  ;;  %5348 = vmatmul.mubr.bf16.vlgmr.msra.gmra.mrb[4].mxu1 %v4400_v35  ;;  %v5444_v35 = vld [vmem:[%s12565_s5 + $0x240] sm:$0xff] }
 0x360   :  { %6951 = vmatpush1.bf16.msra.mxu0 %v8033_v43  ;;  %7033 = vmatpush1.bf16.msra.mxu1 %v8035_v44  ;;  %v8098_v43 = vcombine.high %v5436_v36, %v5440_v38  ;;  %v8100_v44 = vcombine.high %v5437_v21, %v5441_v40  ;;  %v5496_v36 = vld [vmem:[%s12565_s5 + $0x3e0] sm:$0xff]  ;;  %v5493_v38 = vld [vmem:[%s12565_s5 + $0x3c8] sm:$0xff] }
 0x361   :  { %6952 = vmatprep.subr.bf16.mxu0 %v8042_v45  ;;  %7034 = vmatprep.subr.bf16.mxu1 %v8044_v46  ;;  %v5448_v45 = vld [vmem:[%s12565_s5 + $0x260] sm:$0xff]  ;;  %v5445_v46 = vld [vmem:[%s12565_s5 + $0x248] sm:$0xff] }
 0x362   :  { %v8106_v54 = vcombine.high %v5444_v35, %v5448_v45  ;;  %v8105_v48 = vcombine.low %v5444_v35, %v5448_v45  ;;  %v8107_v59 = vcombine.low %v5445_v46, %v5449_v47  ;;  %v5497_v40 = vld [vmem:[%s12565_s5 + $0x3e8] sm:$0xff]  ;;  %v5504_v35 = vld [vmem:[%s12565_s5 + $0x420] sm:$0xff] }
 0x363   :  { %v5501_v45 = vld [vmem:[%s12565_s5 + $0x408] sm:$0xff] }
 0x364   :  { %6953 = vmatpush1.bf16.msra.mxu0 %v8041_v39  ;;  %7035 = vmatpush1.bf16.msra.mxu1 %v8043_v55  ;;  %v8108_v39 = vcombine.high %v5445_v46, %v5449_v47  ;;  %v5452_v55 = vld [vmem:[%s12565_s5 + $0x280] sm:$0xff] }
 0x365   :  { %6954 = vmatprep.subr.bf16.mxu0 %v8050_v56  ;;  %7036 = vmatprep.subr.bf16.mxu1 %v8052_v57  ;;  %v5456_v56 = vld [vmem:[%s12565_s5 + $0x2a0] sm:$0xff]  ;;  %v5453_v57 = vld [vmem:[%s12565_s5 + $0x288] sm:$0xff] }
 0x366   :  { %v8114_v60 = vcombine.high %v5452_v55, %v5456_v56  ;;  %v8113_v3 = vcombine.low %v5452_v55, %v5456_v56  ;;  %v8115_v5 = vcombine.low %v5453_v57, %v5457_v58 }
 0x368   :  { %6955 = vmatpush1.bf16.msra.mxu0 %v8049_v61  ;;  %7037 = vmatpush1.bf16.msra.mxu1 %v8051_v50  ;;  %v8116_v61 = vcombine.high %v5453_v57, %v5457_v58  ;;  %v5460_v50 = vld [vmem:[%s12565_s5 + $0x2c0] sm:$0xff] }
 0x369   :  { %6956 = vmatprep.subr.bf16.mxu0 %v8058_v0  ;;  %7038 = vmatprep.subr.bf16.mxu1 %v8060_v1  ;;  %v5464_v0 = vld [vmem:[%s12565_s5 + $0x2e0] sm:$0xff]  ;;  %v5461_v1 = vld [vmem:[%s12565_s5 + $0x2c8] sm:$0xff] }
 0x36a   :  { %v8122_v6 = vcombine.high %v5460_v50, %v5464_v0  ;;  %v8121_v12 = vcombine.low %v5460_v50, %v5464_v0  ;;  %v8123_v15 = vcombine.low %v5461_v1, %v5465_v2 }
 0x36c   :  { %6957 = vmatpush1.bf16.msra.mxu0 %v8057_v7  ;;  %7039 = vmatpush1.bf16.msra.mxu1 %v8059_v8  ;;  %v8124_v7 = vcombine.high %v5461_v1, %v5465_v2  ;;  %v5468_v8 = vld [vmem:[%s12565_s5 + $0x300] sm:$0xff] }
 0x36d   :  { %6958 = vmatprep.subr.bf16.mxu0 %v8066_v9  ;;  %7040 = vmatprep.subr.bf16.mxu1 %v8068_v10  ;;  %v5472_v9 = vld [vmem:[%s12565_s5 + $0x320] sm:$0xff]  ;;  %v5469_v10 = vld [vmem:[%s12565_s5 + $0x308] sm:$0xff] }
 0x36e   :  { %v8130_v16 = vcombine.high %v5468_v8, %v5472_v9  ;;  %v8129_v23 = vcombine.low %v5468_v8, %v5472_v9  ;;  %v8131_v63 = vcombine.low %v5469_v10, %v5473_v11 }
 0x370   :  { %6959 = vmatpush1.bf16.msra.mxu0 %v8065_v17  ;;  %7041 = vmatpush1.bf16.msra.mxu1 %v8067_v18  ;;  %v8132_v17 = vcombine.high %v5469_v10, %v5473_v11  ;;  %v5476_v18 = vld [vmem:[%s12565_s5 + $0x340] sm:$0xff] }
 0x371   :  { %6960 = vmatprep.subr.bf16.mxu0 %v8074_v19  ;;  %7042 = vmatprep.subr.bf16.mxu1 %v8076_v20  ;;  %v5480_v19 = vld [vmem:[%s12565_s5 + $0x360] sm:$0xff]  ;;  %v5477_v20 = vld [vmem:[%s12565_s5 + $0x348] sm:$0xff] }
 0x372   :  { %v8138_v24 = vcombine.high %v5476_v18, %v5480_v19  ;;  %v5508_v10 = vld [vmem:[%s12565_s5 + $0x440] sm:$0xff] }
 0x374   :  { %6961 = vmatpush1.bf16.msra.mxu0 %v8073_v13  ;;  %7043 = vmatpush1.bf16.msra.mxu1 %v8075_v28  ;;  %v8140_v13 = vcombine.high %v5477_v20, %v5481_v22  ;;  %v8137_v28 = vcombine.low %v5476_v18, %v5480_v19 }
 0x375   :  { %6962 = vmatprep.subr.bf16.mxu0 %v8082_v29  ;;  %7044 = vmatprep.subr.bf16.mxu1 %v8084_v4  ;;  %v8139_v29 = vcombine.low %v5477_v20, %v5481_v22  ;;  %v5484_v4 = vld [vmem:[%s12565_s5 + $0x380] sm:$0xff] }
 0x376   :  { %v8146_v31 = vcombine.high %v5484_v4, %v5488_v14  ;;  %v5516_v20 = vld [vmem:[%s12565_s5 + $0x480] sm:$0xff] }
 0x378   :  { %6963 = vmatpush1.bf16.msra.mxu0 %v8081_v32  ;;  %7045 = vmatpush1.bf16.msra.mxu1 %v8083_v33  ;;  %v8145_v32 = vcombine.low %v5484_v4, %v5488_v14  ;;  %v8147_v33 = vcombine.low %v5485_v30, %v5489_v25 }
 0x379   :  { %6964 = vmatprep.subr.bf16.mxu0 %v8090_v34  ;;  %7046 = vmatprep.subr.bf16.mxu1 %v8092_v26  ;;  %v8148_v34 = vcombine.high %v5485_v30, %v5489_v25  ;;  %v5492_v26 = vld [vmem:[%s12565_s5 + $0x3c0] sm:$0xff] }
 0x37a   :  { %v8154_v21 = vcombine.high %v5492_v26, %v5496_v36  ;;  %v5528_v25 = vld [vmem:[%s12565_s5 + $0x4e0] sm:$0xff] }
 0x37c   :  { %6965 = vmatpush1.bf16.msra.mxu0 %v8089_v27  ;;  %7047 = vmatpush1.bf16.msra.mxu1 %v8091_v41  ;;  %v8153_v27 = vcombine.low %v5492_v26, %v5496_v36  ;;  %v8155_v41 = vcombine.low %v5493_v38, %v5497_v40 }
 0x37d   :  { %6966 = vmatprep.subr.bf16.mxu0 %v8098_v43  ;;  %7048 = vmatprep.subr.bf16.mxu1 %v8100_v44  ;;  %v8156_v43 = vcombine.high %v5493_v38, %v5497_v40  ;;  %v5500_v44 = vld [vmem:[%s12565_s5 + $0x400] sm:$0xff] }
 0x37e   :  { %v8161_v46 = vcombine.low %v5500_v44, %v5504_v35  ;;  %v8162_v47 = vcombine.high %v5500_v44, %v5504_v35  ;;  %v5536_v40 = vld [vmem:[%s12565_s5 + $0x520] sm:$0xff] }
 0x380   :  { %6967 = vmatpush1.bf16.msra.mxu0 %v8097_v37  ;;  %7049 = vmatpush1.bf16.msra.mxu1 %v8099_v53  ;;  %v5505_v37 = vld [vmem:[%s12565_s5 + $0x428] sm:$0xff] }
 0x381   :  { %6968 = vmatprep.subr.bf16.mxu0 %v8106_v54  ;;  %7050 = vmatprep.subr.bf16.mxu1 %v8108_v39  ;;  %v8163_v53 = vcombine.low %v5501_v45, %v5505_v37  ;;  %v8164_v54 = vcombine.high %v5501_v45, %v5505_v37  ;;  %v11942_v39 = vld [vmem:[%s12566_s4] sm:$0xf]  ;;  %v5541_v37 = vld [vmem:[%s12565_s5 + $0x548] sm:$0xff] }
 0x382   :  { %v4535_v55 = vrot.slane %v11942_v39, %v11522_v62  ;;  %v4539_v56 = vrot.slane %v11942_v39, %v11530_v49  ;;  %v4547_v57 = vrot.slane %v11942_v39, %v11533_v51 }
 0x384   :  { %6969 = vmatpush1.bf16.msra.mxu0 %v8105_v48  ;;  %7051 = vmatpush1.bf16.msra.mxu1 %v8107_v59 }
 0x385   :  { %6970 = vmatprep.subr.bf16.mxu0 %v8114_v60  ;;  %7052 = vmatprep.subr.bf16.mxu1 %v8116_v61 }
 0x388   :  { %6971 = vmatpush1.bf16.msra.mxu0 %v8113_v3  ;;  %7053 = vmatpush1.bf16.msra.mxu1 %v8115_v5 }
 0x389   :  { %6972 = vmatprep.subr.bf16.mxu0 %v8122_v6  ;;  %7054 = vmatprep.subr.bf16.mxu1 %v8124_v7 }
 0x38c   :  { %6973 = vmatpush1.bf16.msra.mxu0 %v8121_v12  ;;  %7055 = vmatpush1.bf16.msra.mxu1 %v8123_v15  ;;  %v5512_v12 = vld [vmem:[%s12565_s5 + $0x460] sm:$0xff]  ;;  %v5509_v15 = vld [vmem:[%s12565_s5 + $0x448] sm:$0xff] }
 0x38d   :  { %6974 = vmatprep.subr.bf16.mxu0 %v8130_v16  ;;  %7056 = vmatprep.subr.bf16.mxu1 %v8132_v17  ;;  %v5513_v16 = vld [vmem:[%s12565_s5 + $0x468] sm:$0xff]  ;;  %v8170_v22 = vcombine.high %v5508_v10, %v5512_v12 }
 0x38e   :  { %v8171_v4 = vcombine.low %v5509_v15, %v5513_v16 }
 0x390   :  { %6975 = vmatpush1.bf16.msra.mxu0 %v8129_v23  ;;  %7057 = vmatpush1.bf16.msra.mxu1 %v8131_v63  ;;  %v8172_v23 = vcombine.high %v5509_v15, %v5513_v16  ;;  %v5520_v63 = vld [vmem:[%s12565_s5 + $0x4a0] sm:$0xff]  ;;  %v5565_v16 = vld [vmem:[%s12565_s5 + $0x608] sm:$0xff] }
 0x391   :  { %6976 = vmatprep.subr.bf16.mxu0 %v8138_v24  ;;  %7058 = vmatprep.subr.bf16.mxu1 %v8140_v13  ;;  %v5517_v24 = vld [vmem:[%s12565_s5 + $0x488] sm:$0xff]  ;;  %v8178_v14 = vcombine.high %v5516_v20, %v5520_v63  ;;  %v5568_v15 = vld [vmem:[%s12565_s5 + $0x620] sm:$0xff] }
 0x392   :  { %v5521_v13 = vld [vmem:[%s12565_s5 + $0x4a8] sm:$0xff] }
 0x393   :  { %v8180_v30 = vcombine.high %v5517_v24, %v5521_v13  ;;  %v8179_v26 = vcombine.low %v5517_v24, %v5521_v13  ;;  %v5572_v24 = vld [vmem:[%s12565_s5 + $0x640] sm:$0xff] }
 0x394   :  { %6977 = vmatpush1.bf16.msra.mxu0 %v8137_v28  ;;  %7059 = vmatpush1.bf16.msra.mxu1 %v8139_v29  ;;  %v8169_v29 = vcombine.low %v5508_v10, %v5512_v12  ;;  %v5564_v12 = vld [vmem:[%s12565_s5 + $0x600] sm:$0xff] }
 0x395   :  { %6978 = vmatprep.subr.bf16.mxu0 %v8146_v31  ;;  %7060 = vmatprep.subr.bf16.mxu1 %v8148_v34  ;;  %v5524_v31 = vld [vmem:[%s12565_s5 + $0x4c0] sm:$0xff]  ;;  %v8177_v34 = vcombine.low %v5516_v20, %v5520_v63 }
 0x396   :  { %v8186_v36 = vcombine.high %v5524_v31, %v5528_v25  ;;  %v5576_v13 = vld [vmem:[%s12565_s5 + $0x660] sm:$0xff] }
 0x398   :  { %6979 = vmatpush1.bf16.msra.mxu0 %v8145_v32  ;;  %7061 = vmatpush1.bf16.msra.mxu1 %v8147_v33  ;;  %v5525_v32 = vld [vmem:[%s12565_s5 + $0x4c8] sm:$0xff] }
 0x399   :  { %6980 = vmatprep.subr.bf16.mxu0 %v8154_v21  ;;  %7062 = vmatprep.subr.bf16.mxu1 %v8156_v43  ;;  %v5529_v33 = vld [vmem:[%s12565_s5 + $0x4e8] sm:$0xff]  ;;  %v5532_v21 = vld [vmem:[%s12565_s5 + $0x500] sm:$0xff]  ;;  %v8185_v43 = vcombine.low %v5524_v31, %v5528_v25  ;;  %v8234_v31 = vcombine.high %v5572_v24, %v5576_v13 }
 0x39a   :  { %v8188_v38 = vcombine.high %v5525_v32, %v5529_v33  ;;  %v8187_v44 = vcombine.low %v5525_v32, %v5529_v33  ;;  %v8194_v35 = vcombine.high %v5532_v21, %v5536_v40  ;;  %v5580_v32 = vld [vmem:[%s12565_s5 + $0x680] sm:$0xff] }
 0x39b   :  { %v5584_v33 = vld [vmem:[%s12565_s5 + $0x6a0] sm:$0xff] }
 0x39c   :  { %6981 = vmatpush1.bf16.msra.mxu0 %v8153_v27  ;;  %7063 = vmatpush1.bf16.msra.mxu1 %v8155_v41  ;;  %v5533_v27 = vld [vmem:[%s12565_s5 + $0x508] sm:$0xff] }
 0x39d   :  { %6991 = vmatprep.subr.bf16.mxu0 %v8162_v47  ;;  %7073 = vmatprep.subr.bf16.mxu1 %v8164_v54  ;;  %v5537_v41 = vld [vmem:[%s12565_s5 + $0x528] sm:$0xff]  ;;  %v5544_v47 = vld [vmem:[%s12565_s5 + $0x560] sm:$0xff]  ;;  %v8193_v54 = vcombine.low %v5532_v21, %v5536_v40  ;;  %v8242_v21 = vcombine.high %v5580_v32, %v5584_v33 }
 0x39e   :  { %v8196_v45 = vcombine.high %v5533_v27, %v5537_v41 }
 0x432   :  { %v5267_v58 = vpop.f32.mrb[4].mxu0  ;;  %v11950_v48 = vpop.f32.mrb[4].mxu1 }
 0x433   :  { %v8293_v59 = vadd.f32 %v5267_v58, %v4535_v55  ;;  %v5269_v60 = vpop.f32.mrb[5].mxu0  ;;  %v5351_v61 = vpop.f32.mrb[5].mxu1  ;;  %v8195_v55 = vcombine.low %v5533_v27, %v5537_v41  ;;  %v5548_v58 = vld [vmem:[%s12565_s5 + $0x580] sm:$0xff] }
 0x434   :  { %v8294_v50 = vadd.f32 %v5269_v60, %v4539_v56  ;;  %v8296_v0 = vadd.f32 %v5351_v61, %v4547_v57  ;;  %v5271_v1 = vpop.f32.mrb[6].mxu0  ;;  %v5353_v2 = vpop.f32.mrb[6].mxu1  ;;  %v5549_v60 = vld [vmem:[%s12565_s5 + $0x588] sm:$0xff]  ;;  %v5588_v27 = vld [vmem:[%s12565_s5 + $0x6c0] sm:$0xff] }
 0x435   :  { %vm5356_vm4 = vcmp.ge.f32.partialorder %v8293_v59, 0.0  ;;  %v5360_v3 = vmul.f32 0.2, %v8293_v59  ;;  %v5272_v8 = vpop.f32.mrb[7].mxu0  ;;  %v5354_v9 = vpop.f32.mrb[7].mxu1  ;;  %v5553_v61 = vld [vmem:[%s12565_s5 + $0x5a8] sm:$0xff] }
 0x436   :  { %vm5357_vm5 = vcmp.ge.f32.partialorder %v8294_v50, 0.0  ;;  %v5361_v5 = vmul.f32 0.2, %v8294_v50  ;;  %vm5359_vm6 = vcmp.ge.f32.partialorder %v8296_v0, 0.0  ;;  %v5363_v6 = vmul.f32 0.2, %v8296_v0 }
 0x437   :  { %v5364_v7 = vsel %vm5356_vm4, %v8293_v59, %v5360_v3  ;;  %v5552_v59 = vld [vmem:[%s12565_s5 + $0x5a0] sm:$0xff]  ;;  %v8212_v2 = vcombine.high %v5549_v60, %v5553_v61  ;;  %v8211_v9 = vcombine.low %v5549_v60, %v5553_v61 }
 0x438   :  { %v5365_v11 = vsel %vm5357_vm5, %v8294_v50, %v5361_v5  ;;  %v5367_v18 = vsel %vm5359_vm6, %v8296_v0, %v5363_v6  ;;  %v11966_v19 = vpack.c.bf16 %v5364_v7, %v5364_v7  ;;  %v8210_v1 = vcombine.high %v5548_v58, %v5552_v59  ;;  %v5556_v3 = vld [vmem:[%s12565_s5 + $0x5c0] sm:$0xff]  ;;  %v5557_v6 = vld [vmem:[%s12565_s5 + $0x5c8] sm:$0xff] }
 0x439   :  { %v11964_v17 = vpack.c.bf16 %v5365_v11, %v5365_v11  ;;  %v11982_v28 = vpack.c.bf16 %v5367_v18, %v5367_v18  ;;  %v5560_v5 = vld [vmem:[%s12565_s5 + $0x5e0] sm:$0xff]  ;;  %v5561_v7 = vld [vmem:[%s12565_s5 + $0x5e8] sm:$0xff]  ;;  %v8209_v8 = vcombine.low %v5548_v58, %v5552_v59 }
 0x43a   :  { %v8218_v10 = vcombine.high %v5556_v3, %v5560_v5  ;;  %v8220_v11 = vcombine.high %v5557_v6, %v5561_v7  ;;  %v5569_v18 = vld [vmem:[%s12565_s5 + $0x628] sm:$0xff]  ;;  %v8217_v20 = vcombine.low %v5556_v3, %v5560_v5  ;;  %v5592_v41 = vld [vmem:[%s12565_s5 + $0x6e0] sm:$0xff] }
 0x43b   :  { %6982 = vmatprep.mubr.bf16.mxu0 %v11964_v17  ;;  %7064 = vmatprep.mubr.bf16.mxu1 %v11964_v17  ;;  %v8228_v63 = vcombine.high %v5565_v16, %v5569_v18  ;;  %v5604_v60 = vld [vmem:[%s12565_s5 + $0x740] sm:$0xff] }
 0x43c   :  { %6983 = vmatmul.mubr.bf16.vlgmr.msra.gmra.mrb[8].mxu0 %v11966_v19  ;;  %7065 = vmatmul.mubr.bf16.vlgmr.msra.gmra.mrb[8].mxu1 %v11966_v19  ;;  %v5608_v61 = vld [vmem:[%s12565_s5 + $0x760] sm:$0xff] }
 0x43d   :  { %6992 = vmatpush1.bf16.msra.mxu0 %v8161_v46  ;;  %7074 = vmatpush1.bf16.msra.mxu1 %v8163_v53  ;;  %v5540_v46 = vld [vmem:[%s12565_s5 + $0x540] sm:$0xff]  ;;  %v5545_v53 = vld [vmem:[%s12565_s5 + $0x568] sm:$0xff]  ;;  %v8266_v3 = vcombine.high %v5604_v60, %v5608_v61 }
 0x43e   :  { %7023 = vmatprep.mubr.bf16.mxu0 %v11982_v28  ;;  %7105 = vmatprep.mubr.bf16.mxu1 %v11982_v28  ;;  %v8202_v56 = vcombine.high %v5540_v46, %v5544_v47  ;;  %v8204_v57 = vcombine.high %v5541_v37, %v5545_v53  ;;  %v8201_v50 = vcombine.low %v5540_v46, %v5544_v47 }
 0x43f   :  { %6993 = vmatprep.subr.bf16.mxu0 %v8170_v22  ;;  %7075 = vmatprep.subr.bf16.mxu1 %v8172_v23  ;;  %v8203_v0 = vcombine.low %v5541_v37, %v5545_v53  ;;  %v8219_v22 = vcombine.low %v5557_v6, %v5561_v7  ;;  %v8226_v23 = vcombine.high %v5564_v12, %v5568_v15  ;;  %v5596_v37 = vld [vmem:[%s12565_s5 + $0x700] sm:$0xff] }
 0x440   :  { %v8250_v46 = vcombine.high %v5588_v27, %v5592_v41  ;;  %v5600_v53 = vld [vmem:[%s12565_s5 + $0x720] sm:$0xff]  ;;  %v4543_v7 = vrot.slane %v11942_v39, %v11688_v52 }
 0x441   :  { %6994 = vmatpush1.bf16.msra.mxu0 %v8169_v29  ;;  %7076 = vmatpush1.bf16.msra.mxu1 %v8171_v4  ;;  %v5573_v29 = vld [vmem:[%s12565_s5 + $0x648] sm:$0xff]  ;;  %v8258_v58 = vcombine.high %v5596_v37, %v5600_v53  ;;  %v5612_v6 = vld [vmem:[%s12565_s5 + $0x780] sm:$0xff] }
 0x442   :  { %6995 = vmatprep.subr.bf16.mxu0 %v8178_v14  ;;  %7077 = vmatprep.subr.bf16.mxu1 %v8180_v30  ;;  %v5577_v4 = vld [vmem:[%s12565_s5 + $0x668] sm:$0xff]  ;;  %v8225_v14 = vcombine.low %v5564_v12, %v5568_v15  ;;  %v8227_v30 = vcombine.low %v5565_v16, %v5569_v18  ;;  %v5620_v16 = vld [vmem:[%s12565_s5 + $0x7c0] sm:$0xff]  ;;  %v8295_v18 = vadd.f32 %v11950_v48, %v4543_v7 }
 0x443   :  { %v8236_v25 = vcombine.high %v5573_v29, %v5577_v4 }
 0x444   :  { %vm5358_vm7 = vcmp.ge.f32.partialorder %v8295_v18, 0.0 }
 0x445   :  { %6996 = vmatpush1.bf16.msra.mxu0 %v8177_v34  ;;  %7078 = vmatpush1.bf16.msra.mxu1 %v8179_v26  ;;  %v5581_v34 = vld [vmem:[%s12565_s5 + $0x688] sm:$0xff] }
 0x446   :  { %6997 = vmatprep.subr.bf16.mxu0 %v8186_v36  ;;  %7079 = vmatprep.subr.bf16.mxu1 %v8188_v38  ;;  %v5585_v26 = vld [vmem:[%s12565_s5 + $0x6a8] sm:$0xff]  ;;  %v8233_v36 = vcombine.low %v5572_v24, %v5576_v13  ;;  %v8235_v38 = vcombine.low %v5573_v29, %v5577_v4  ;;  %v5374_v29 = vld [vmem:[%s12565_s5 + $0x10] sm:$0xff]  ;;  %v5362_v4 = vmul.f32 0.2, %v8295_v18 }
 0x447   :  { %v8244_v40 = vcombine.high %v5581_v34, %v5585_v26 }
 0x449   :  { %6998 = vmatpush1.bf16.msra.mxu0 %v8185_v43  ;;  %7080 = vmatpush1.bf16.msra.mxu1 %v8187_v44  ;;  %v5589_v43 = vld [vmem:[%s12565_s5 + $0x6c8] sm:$0xff] }
 0x44a   :  { %6999 = vmatprep.subr.bf16.mxu0 %v8194_v35  ;;  %7081 = vmatprep.subr.bf16.mxu1 %v8196_v45  ;;  %v5593_v44 = vld [vmem:[%s12565_s5 + $0x6e8] sm:$0xff]  ;;  %v8241_v35 = vcombine.low %v5580_v32, %v5584_v33  ;;  %v8243_v45 = vcombine.low %v5581_v34, %v5585_v26  ;;  %v5366_v26 = vsel %vm5358_vm7, %v8295_v18, %v5362_v4 }
 0x44b   :  { %v8252_v47 = vcombine.high %v5589_v43, %v5593_v44 }
 0x44d   :  { %7000 = vmatpush1.bf16.msra.mxu0 %v8193_v54  ;;  %7082 = vmatpush1.bf16.msra.mxu1 %v8195_v55  ;;  %v5597_v54 = vld [vmem:[%s12565_s5 + $0x708] sm:$0xff] }
 0x44e   :  { %7001 = vmatprep.subr.bf16.mxu0 %v8202_v56  ;;  %7083 = vmatprep.subr.bf16.mxu1 %v8204_v57  ;;  %v5601_v55 = vld [vmem:[%s12565_s5 + $0x728] sm:$0xff]  ;;  %v8249_v56 = vcombine.low %v5588_v27, %v5592_v41  ;;  %v8251_v57 = vcombine.low %v5589_v43, %v5593_v44  ;;  %v12171_v41 = vpack.c.bf16 %v5366_v26, %v5366_v26 }
 0x44f   :  { %v8260_v59 = vcombine.high %v5597_v54, %v5601_v55 }
 0x451   :  { %7002 = vmatpush1.bf16.msra.mxu0 %v8201_v50  ;;  %7084 = vmatpush1.bf16.msra.mxu1 %v8203_v0  ;;  %v5605_v50 = vld [vmem:[%s12565_s5 + $0x748] sm:$0xff] }
 0x452   :  { %7003 = vmatprep.subr.bf16.mxu0 %v8210_v1  ;;  %7085 = vmatprep.subr.bf16.mxu1 %v8212_v2  ;;  %v5609_v0 = vld [vmem:[%s12565_s5 + $0x768] sm:$0xff]  ;;  %v8257_v1 = vcombine.low %v5596_v37, %v5600_v53  ;;  %v8259_v2 = vcombine.low %v5597_v54, %v5601_v55  ;;  %v5395_v37 = vld [vmem:[%s12565_s5 + $0xb8] sm:$0xff] }
 0x453   :  { %v8268_v5 = vcombine.high %v5605_v50, %v5609_v0  ;;  %v8267_v12 = vcombine.low %v5605_v50, %v5609_v0 }
 0x455   :  { %7004 = vmatpush1.bf16.msra.mxu0 %v8209_v8  ;;  %7086 = vmatpush1.bf16.msra.mxu1 %v8211_v9  ;;  %v5616_v8 = vld [vmem:[%s12565_s5 + $0x7a0] sm:$0xff]  ;;  %v5613_v9 = vld [vmem:[%s12565_s5 + $0x788] sm:$0xff] }
 0x456   :  { %7005 = vmatprep.subr.bf16.mxu0 %v8218_v10  ;;  %7087 = vmatprep.subr.bf16.mxu1 %v8220_v11  ;;  %v5617_v10 = vld [vmem:[%s12565_s5 + $0x7a8] sm:$0xff]  ;;  %v8265_v11 = vcombine.low %v5604_v60, %v5608_v61  ;;  %v8274_v15 = vcombine.high %v5612_v6, %v5616_v8 }
 0x457   :  { %v8276_v39 = vcombine.high %v5613_v9, %v5617_v10  ;;  %v8275_v24 = vcombine.low %v5613_v9, %v5617_v10  ;;  %v5414_v10 = vld [vmem:[%s12565_s5 + $0x150] sm:$0xff] }
 0x459   :  { %7006 = vmatpush1.bf16.msra.mxu0 %v8217_v20  ;;  %7088 = vmatpush1.bf16.msra.mxu1 %v8219_v22  ;;  %v5624_v20 = vld [vmem:[%s12565_s5 + $0x7e0] sm:$0xff]  ;;  %v5621_v22 = vld [vmem:[%s12565_s5 + $0x7c8] sm:$0xff] }
 0x45a   :  { %7007 = vmatprep.subr.bf16.mxu0 %v8226_v23  ;;  %7089 = vmatprep.subr.bf16.mxu1 %v8228_v63  ;;  %v5625_v23 = vld [vmem:[%s12565_s5 + $0x7e8] sm:$0xff]  ;;  %v8273_v63 = vcombine.low %v5612_v6, %v5616_v8  ;;  %v8282_v13 = vcombine.high %v5620_v16, %v5624_v20 }
 0x45b   :  { %v8284_v48 = vcombine.high %v5621_v22, %v5625_v23  ;;  %v8283_v32 = vcombine.low %v5621_v22, %v5625_v23  ;;  %v5422_v22 = vld [vmem:[%s12565_s5 + $0x190] sm:$0xff] }
 0x45c   :  { %v5426_v23 = vld [vmem:[%s12565_s5 + $0x1b0] sm:$0xff] }
 0x45d   :  { %7008 = vmatpush1.bf16.msra.mxu0 %v8225_v14  ;;  %7090 = vmatpush1.bf16.msra.mxu1 %v8227_v30  ;;  %v5378_v14 = vld [vmem:[%s12565_s5 + $0x30] sm:$0xff]  ;;  %v5375_v30 = vld [vmem:[%s12565_s5 + $0x18] sm:$0xff] }
 0x45e   :  { %7009 = vmatprep.subr.bf16.mxu0 %v8234_v31  ;;  %7091 = vmatprep.subr.bf16.mxu1 %v8236_v25  ;;  %v5379_v31 = vld [vmem:[%s12565_s5 + $0x38] sm:$0xff]  ;;  %v8281_v25 = vcombine.low %v5620_v16, %v5624_v20  ;;  %v8038_v33 = vcombine.high %v5374_v29, %v5378_v14  ;;  %v8037_v27 = vcombine.low %v5374_v29, %v5378_v14  ;;  %v5430_v14 = vld [vmem:[%s12565_s5 + $0x1d0] sm:$0xff] }
 0x45f   :  { %v8040_v34 = vcombine.high %v5375_v30, %v5379_v31  ;;  %v8039_v43 = vcombine.low %v5375_v30, %v5379_v31  ;;  %v8086_v29 = vcombine.high %v5422_v22, %v5426_v23  ;;  %v5434_v30 = vld [vmem:[%s12565_s5 + $0x1f0] sm:$0xff]  ;;  %v5431_v31 = vld [vmem:[%s12565_s5 + $0x1d8] sm:$0xff] }
 0x461   :  { %7010 = vmatpush1.bf16.msra.mxu0 %v8233_v36  ;;  %7092 = vmatpush1.bf16.msra.mxu1 %v8235_v38  ;;  %v5382_v36 = vld [vmem:[%s12565_s5 + $0x50] sm:$0xff] }
 0x462   :  { %7011 = vmatprep.subr.bf16.mxu0 %v8242_v21  ;;  %7093 = vmatprep.subr.bf16.mxu1 %v8244_v40  ;;  %v5386_v38 = vld [vmem:[%s12565_s5 + $0x70] sm:$0xff]  ;;  %v5383_v21 = vld [vmem:[%s12565_s5 + $0x58] sm:$0xff] }
 0x463   :  { %v5387_v40 = vld [vmem:[%s12565_s5 + $0x78] sm:$0xff]  ;;  %v8046_v44 = vcombine.high %v5382_v36, %v5386_v38  ;;  %v8045_v53 = vcombine.low %v5382_v36, %v5386_v38  ;;  %v5438_v36 = vld [vmem:[%s12565_s5 + $0x210] sm:$0xff] }
 0x464   :  { %v8047_v54 = vcombine.low %v5383_v21, %v5387_v40  ;;  %v5442_v38 = vld [vmem:[%s12565_s5 + $0x230] sm:$0xff] }
 0x465   :  { %7012 = vmatpush1.bf16.msra.mxu0 %v8241_v35  ;;  %7094 = vmatpush1.bf16.msra.mxu1 %v8243_v45  ;;  %v8048_v35 = vcombine.high %v5383_v21, %v5387_v40  ;;  %v5390_v45 = vld [vmem:[%s12565_s5 + $0x90] sm:$0xff]  ;;  %v5439_v21 = vld [vmem:[%s12565_s5 + $0x218] sm:$0xff] }
 0x466   :  { %7013 = vmatprep.subr.bf16.mxu0 %v8250_v46  ;;  %7095 = vmatprep.subr.bf16.mxu1 %v8252_v47  ;;  %v5394_v46 = vld [vmem:[%s12565_s5 + $0xb0] sm:$0xff]  ;;  %v5391_v47 = vld [vmem:[%s12565_s5 + $0x98] sm:$0xff] }
 0x467   :  { %v8054_v55 = vcombine.high %v5390_v45, %v5394_v46  ;;  %v8053_v60 = vcombine.low %v5390_v45, %v5394_v46  ;;  %v8055_v61 = vcombine.low %v5391_v47, %v5395_v37  ;;  %v5443_v40 = vld [vmem:[%s12565_s5 + $0x238] sm:$0xff]  ;;  %v5446_v45 = vld [vmem:[%s12565_s5 + $0x250] sm:$0xff] }
 0x468   :  { %v5450_v46 = vld [vmem:[%s12565_s5 + $0x270] sm:$0xff] }
 0x469   :  { %7014 = vmatpush1.bf16.msra.mxu0 %v8249_v56  ;;  %7096 = vmatpush1.bf16.msra.mxu1 %v8251_v57  ;;  %v8056_v56 = vcombine.high %v5391_v47, %v5395_v37  ;;  %v5398_v57 = vld [vmem:[%s12565_s5 + $0xd0] sm:$0xff]  ;;  %v5447_v47 = vld [vmem:[%s12565_s5 + $0x258] sm:$0xff] }
 0x46a   :  { %7015 = vmatprep.subr.bf16.mxu0 %v8258_v58  ;;  %7097 = vmatprep.subr.bf16.mxu1 %v8260_v59  ;;  %v5402_v58 = vld [vmem:[%s12565_s5 + $0xf0] sm:$0xff]  ;;  %v5399_v59 = vld [vmem:[%s12565_s5 + $0xd8] sm:$0xff] }
 0x46b   :  { %v8062_v50 = vcombine.high %v5398_v57, %v5402_v58  ;;  %v8061_v6 = vcombine.low %v5398_v57, %v5402_v58  ;;  %v5451_v37 = vld [vmem:[%s12565_s5 + $0x278] sm:$0xff]  ;;  %v5454_v57 = vld [vmem:[%s12565_s5 + $0x290] sm:$0xff] }
 0x46c   :  { %v5458_v58 = vld [vmem:[%s12565_s5 + $0x2b0] sm:$0xff] }
 0x46d   :  { %7016 = vmatpush1.bf16.msra.mxu0 %v8257_v1  ;;  %7098 = vmatpush1.bf16.msra.mxu1 %v8259_v2  ;;  %v5406_v1 = vld [vmem:[%s12565_s5 + $0x110] sm:$0xff] }
 0x46e   :  { %7017 = vmatprep.subr.bf16.mxu0 %v8266_v3  ;;  %7099 = vmatprep.subr.bf16.mxu1 %v8268_v5  ;;  %v5410_v2 = vld [vmem:[%s12565_s5 + $0x130] sm:$0xff]  ;;  %v5407_v3 = vld [vmem:[%s12565_s5 + $0x118] sm:$0xff] }
 0x46f   :  { %v5411_v5 = vld [vmem:[%s12565_s5 + $0x138] sm:$0xff]  ;;  %v8070_v8 = vcombine.high %v5406_v1, %v5410_v2 }
 0x470   :  { %v8072_v9 = vcombine.high %v5407_v3, %v5411_v5  ;;  %v8071_v16 = vcombine.low %v5407_v3, %v5411_v5  ;;  %v5463_v3 = vld [vmem:[%s12565_s5 + $0x2d8] sm:$0xff] }
 0x471   :  { %7018 = vmatpush1.bf16.msra.mxu0 %v8265_v11  ;;  %7100 = vmatpush1.bf16.msra.mxu1 %v8267_v12  ;;  %v5418_v11 = vld [vmem:[%s12565_s5 + $0x170] sm:$0xff]  ;;  %v5415_v12 = vld [vmem:[%s12565_s5 + $0x158] sm:$0xff] }
 0x472   :  { %7019 = vmatprep.subr.bf16.mxu0 %v8274_v15  ;;  %7101 = vmatprep.subr.bf16.mxu1 %v8276_v39  ;;  %v5419_v15 = vld [vmem:[%s12565_s5 + $0x178] sm:$0xff]  ;;  %v8069_v39 = vcombine.low %v5406_v1, %v5410_v2  ;;  %v8078_v18 = vcombine.high %v5414_v10, %v5418_v11  ;;  %v5462_v1 = vld [vmem:[%s12565_s5 + $0x2d0] sm:$0xff] }
 0x473   :  { %v8080_v20 = vcombine.high %v5415_v12, %v5419_v15  ;;  %v5466_v2 = vld [vmem:[%s12565_s5 + $0x2f0] sm:$0xff]  ;;  %v5467_v5 = vld [vmem:[%s12565_s5 + $0x2f8] sm:$0xff] }
 0x475   :  { %7020 = vmatpush1.bf16.msra.mxu0 %v8273_v63  ;;  %7102 = vmatpush1.bf16.msra.mxu1 %v8275_v24  ;;  %v5423_v63 = vld [vmem:[%s12565_s5 + $0x198] sm:$0xff] }
 0x476   :  { %7021 = vmatprep.subr.bf16.mxu0 %v8282_v13  ;;  %7103 = vmatprep.subr.bf16.mxu1 %v8284_v48  ;;  %v5427_v24 = vld [vmem:[%s12565_s5 + $0x1b8] sm:$0xff]  ;;  %v8077_v13 = vcombine.low %v5414_v10, %v5418_v11  ;;  %v8079_v48 = vcombine.low %v5415_v12, %v5419_v15  ;;  %v5470_v10 = vld [vmem:[%s12565_s5 + $0x310] sm:$0xff] }
 0x477   :  { %v8088_v4 = vcombine.high %v5423_v63, %v5427_v24  ;;  %v5474_v11 = vld [vmem:[%s12565_s5 + $0x330] sm:$0xff]  ;;  %v5471_v12 = vld [vmem:[%s12565_s5 + $0x318] sm:$0xff] }
 0x478   :  { %v5475_v15 = vld [vmem:[%s12565_s5 + $0x338] sm:$0xff] }
 0x479   :  { %7022 = vmatpush1.bf16.msra.mxu0 %v8281_v25  ;;  %7104 = vmatpush1.bf16.msra.mxu1 %v8283_v32  ;;  %v5435_v25 = vld [vmem:[%s12565_s5 + $0x1f8] sm:$0xff]  ;;  %v8085_v32 = vcombine.low %v5422_v22, %v5426_v23  ;;  %v5478_v22 = vld [vmem:[%s12565_s5 + $0x350] sm:$0xff] }
 0x47a   :  { %7114 = vmatprep.subr.bf16.mxu0 %v8038_v33  ;;  %7196 = vmatprep.subr.bf16.mxu1 %v8040_v34  ;;  %v8087_v33 = vcombine.low %v5423_v63, %v5427_v24  ;;  %v8094_v34 = vcombine.high %v5430_v14, %v5434_v30  ;;  %v8096_v26 = vcombine.high %v5431_v31, %v5435_v25  ;;  %v5482_v23 = vld [vmem:[%s12565_s5 + $0x370] sm:$0xff]  ;;  %v5479_v63 = vld [vmem:[%s12565_s5 + $0x358] sm:$0xff] }
 0x47b   :  { %v5483_v24 = vld [vmem:[%s12565_s5 + $0x378] sm:$0xff] }
 0x47c   :  { %7024 = vmatmul.mubr.bf16.vlgmr.msra.gmra.mrb[8].mxu0 %v12171_v41  ;;  %7106 = vmatmul.mubr.bf16.vlgmr.msra.gmra.mrb[8].mxu1 %v12171_v41 }
 0x47d   :  { %7115 = vmatpush1.bf16.msra.mxu0 %v8037_v27  ;;  %7146 = vmatprep.mubr.bf16.mxu0 %v11964_v17  ;;  %v8093_v27 = vcombine.low %v5430_v14, %v5434_v30  ;;  %v5486_v14 = vld [vmem:[%s12565_s5 + $0x390] sm:$0xff] }
 0x47e   :  { %7197 = vmatpush1.bf16.msra.mxu1 %v8039_v43  ;;  %7228 = vmatprep.mubr.bf16.mxu1 %v11964_v17  ;;  %v5403_v17 = vld [vmem:[%s12565_s5 + $0xf8] sm:$0xff]  ;;  %v8095_v43 = vcombine.low %v5431_v31, %v5435_v25  ;;  %v5490_v30 = vld [vmem:[%s12565_s5 + $0x3b0] sm:$0xff] }
 0x47f   :  { %7116 = vmatprep.subr.bf16.mxu0 %v8046_v44  ;;  %7198 = vmatprep.subr.bf16.mxu1 %v8048_v35  ;;  %v8064_v0 = vcombine.high %v5399_v59, %v5403_v17  ;;  %v8063_v7 = vcombine.low %v5399_v59, %v5403_v17  ;;  %v8102_v44 = vcombine.high %v5438_v36, %v5442_v38  ;;  %v5455_v59 = vld [vmem:[%s12565_s5 + $0x298] sm:$0xff] }
 0x480   :  { %v8104_v35 = vcombine.high %v5439_v21, %v5443_v40  ;;  %v5459_v17 = vld [vmem:[%s12565_s5 + $0x2b8] sm:$0xff] }
 0x481   :  { %7117 = vmatpush1.bf16.msra.mxu0 %v8045_v53  ;;  %v8101_v53 = vcombine.low %v5438_v36, %v5442_v38  ;;  %v5487_v31 = vld [vmem:[%s12565_s5 + $0x398] sm:$0xff]  ;;  %v5494_v36 = vld [vmem:[%s12565_s5 + $0x3d0] sm:$0xff] }
 0x482   :  { %7199 = vmatpush1.bf16.msra.mxu1 %v8047_v54  ;;  %7118 = vmatprep.subr.bf16.mxu0 %v8054_v55  ;;  %v8103_v54 = vcombine.low %v5439_v21, %v5443_v40  ;;  %v8110_v55 = vcombine.high %v5446_v45, %v5450_v46  ;;  %v5491_v25 = vld [vmem:[%s12565_s5 + $0x3b8] sm:$0xff]  ;;  %v5498_v38 = vld [vmem:[%s12565_s5 + $0x3f0] sm:$0xff] }
 0x483   :  { %7200 = vmatprep.subr.bf16.mxu1 %v8056_v56  ;;  %v8112_v56 = vcombine.high %v5447_v47, %v5451_v37  ;;  %v5495_v21 = vld [vmem:[%s12565_s5 + $0x3d8] sm:$0xff] }
 0x484   :  { %v5499_v40 = vld [vmem:[%s12565_s5 + $0x3f8] sm:$0xff] }
 0x485   :  { %7119 = vmatpush1.bf16.msra.mxu0 %v8053_v60  ;;  %v8109_v60 = vcombine.low %v5446_v45, %v5450_v46  ;;  %v5502_v45 = vld [vmem:[%s12565_s5 + $0x410] sm:$0xff] }
 0x486   :  { %7201 = vmatpush1.bf16.msra.mxu1 %v8055_v61  ;;  %7120 = vmatprep.subr.bf16.mxu0 %v8062_v50  ;;  %v8111_v61 = vcombine.low %v5447_v47, %v5451_v37  ;;  %v8118_v50 = vcombine.high %v5454_v57, %v5458_v58  ;;  %v5506_v46 = vld [vmem:[%s12565_s5 + $0x430] sm:$0xff]  ;;  %v5503_v47 = vld [vmem:[%s12565_s5 + $0x418] sm:$0xff] }
 0x487   :  { %7202 = vmatprep.subr.bf16.mxu1 %v8064_v0  ;;  %v8120_v0 = vcombine.high %v5455_v59, %v5459_v17  ;;  %v5507_v37 = vld [vmem:[%s12565_s5 + $0x438] sm:$0xff] }
 0x489   :  { %7121 = vmatpush1.bf16.msra.mxu0 %v8061_v6  ;;  %v8117_v6 = vcombine.low %v5454_v57, %v5458_v58  ;;  %v5510_v57 = vld [vmem:[%s12565_s5 + $0x450] sm:$0xff] }
 0x48a   :  { %7203 = vmatpush1.bf16.msra.mxu1 %v8063_v7  ;;  %7122 = vmatprep.subr.bf16.mxu0 %v8070_v8  ;;  %v8119_v7 = vcombine.low %v5455_v59, %v5459_v17  ;;  %v8126_v8 = vcombine.high %v5462_v1, %v5466_v2  ;;  %v5514_v58 = vld [vmem:[%s12565_s5 + $0x470] sm:$0xff]  ;;  %v8165_v59 = vcombine.low %v5502_v45, %v5506_v46  ;;  %v5511_v17 = vld [vmem:[%s12565_s5 + $0x458] sm:$0xff] }
 0x48b   :  { %7204 = vmatprep.subr.bf16.mxu1 %v8072_v9  ;;  %v8128_v9 = vcombine.high %v5463_v3, %v5467_v5 }
 0x48d   :  { %7123 = vmatpush1.bf16.msra.mxu0 %v8069_v39  ;;  %v8125_v39 = vcombine.low %v5462_v1, %v5466_v2  ;;  %v5522_v1 = vld [vmem:[%s12565_s5 + $0x4b0] sm:$0xff] }
 0x48e   :  { %7205 = vmatpush1.bf16.msra.mxu1 %v8071_v16  ;;  %7124 = vmatprep.subr.bf16.mxu0 %v8078_v18  ;;  %v8127_v16 = vcombine.low %v5463_v3, %v5467_v5  ;;  %v8134_v18 = vcombine.high %v5470_v10, %v5474_v11  ;;  %v5519_v3 = vld [vmem:[%s12565_s5 + $0x498] sm:$0xff] }
 0x48f   :  { %7206 = vmatprep.subr.bf16.mxu1 %v8080_v20  ;;  %v8136_v20 = vcombine.high %v5471_v12, %v5475_v15  ;;  %v5523_v5 = vld [vmem:[%s12565_s5 + $0x4b8] sm:$0xff] }
 0x491   :  { %7125 = vmatpush1.bf16.msra.mxu0 %v8077_v13  ;;  %v8133_v13 = vcombine.low %v5470_v10, %v5474_v11  ;;  %v5526_v10 = vld [vmem:[%s12565_s5 + $0x4d0] sm:$0xff] }
 0x492   :  { %7207 = vmatpush1.bf16.msra.mxu1 %v8079_v48  ;;  %7126 = vmatprep.subr.bf16.mxu0 %v8086_v29  ;;  %v8135_v48 = vcombine.low %v5471_v12, %v5475_v15  ;;  %v8142_v29 = vcombine.high %v5478_v22, %v5482_v23  ;;  %v5530_v11 = vld [vmem:[%s12565_s5 + $0x4f0] sm:$0xff]  ;;  %v5531_v12 = vld [vmem:[%s12565_s5 + $0x4f8] sm:$0xff]  ;;  %v8183_v15 = vcombine.low %v5519_v3, %v5523_v5 }
 0x493   :  { %7208 = vmatprep.subr.bf16.mxu1 %v8088_v4  ;;  %v8144_v4 = vcombine.high %v5479_v63, %v5483_v24 }
 0x495   :  { %7127 = vmatpush1.bf16.msra.mxu0 %v8085_v32  ;;  %v8141_v32 = vcombine.low %v5478_v22, %v5482_v23  ;;  %v5535_v22 = vld [vmem:[%s12565_s5 + $0x518] sm:$0xff] }
 0x496   :  { %7209 = vmatpush1.bf16.msra.mxu1 %v8087_v33  ;;  %7128 = vmatprep.subr.bf16.mxu0 %v8094_v34  ;;  %v8143_v33 = vcombine.low %v5479_v63, %v5483_v24  ;;  %v8150_v34 = vcombine.high %v5486_v14, %v5490_v30  ;;  %v5539_v23 = vld [vmem:[%s12565_s5 + $0x538] sm:$0xff]  ;;  %v8189_v63 = vcombine.low %v5526_v10, %v5530_v11 }
 0x497   :  { %7210 = vmatprep.subr.bf16.mxu1 %v8096_v26  ;;  %v8152_v26 = vcombine.high %v5487_v31, %v5491_v25 }
 0x499   :  { %7129 = vmatpush1.bf16.msra.mxu0 %v8093_v27  ;;  %v8149_v27 = vcombine.low %v5486_v14, %v5490_v30  ;;  %v5543_v14 = vld [vmem:[%s12565_s5 + $0x558] sm:$0xff] }
 0x49a   :  { %7211 = vmatpush1.bf16.msra.mxu1 %v8095_v43  ;;  %7130 = vmatprep.subr.bf16.mxu0 %v8102_v44  ;;  %v8151_v43 = vcombine.low %v5487_v31, %v5491_v25  ;;  %v8158_v44 = vcombine.high %v5494_v36, %v5498_v38  ;;  %v5547_v30 = vld [vmem:[%s12565_s5 + $0x578] sm:$0xff]  ;;  %v8199_v25 = vcombine.low %v5535_v22, %v5539_v23 }
 0x49b   :  { %7212 = vmatprep.subr.bf16.mxu1 %v8104_v35  ;;  %v8160_v35 = vcombine.high %v5495_v21, %v5499_v40 }
 0x49d   :  { %7131 = vmatpush1.bf16.msra.mxu0 %v8101_v53  ;;  %v8157_v53 = vcombine.low %v5494_v36, %v5498_v38  ;;  %v5551_v36 = vld [vmem:[%s12565_s5 + $0x598] sm:$0xff] }
 0x49e   :  { %7213 = vmatpush1.bf16.msra.mxu1 %v8103_v54  ;;  %7132 = vmatprep.subr.bf16.mxu0 %v8110_v55  ;;  %v8159_v54 = vcombine.low %v5495_v21, %v5499_v40  ;;  %v8166_v55 = vcombine.high %v5502_v45, %v5506_v46  ;;  %v5555_v38 = vld [vmem:[%s12565_s5 + $0x5b8] sm:$0xff]  ;;  %v8207_v40 = vcombine.low %v5543_v14, %v5547_v30 }
 0x49f   :  { %7214 = vmatprep.subr.bf16.mxu1 %v8112_v56  ;;  %v8168_v56 = vcombine.high %v5503_v47, %v5507_v37  ;;  %v5559_v45 = vld [vmem:[%s12565_s5 + $0x5d8] sm:$0xff] }
 0x4a0   :  { %v5563_v46 = vld [vmem:[%s12565_s5 + $0x5f8] sm:$0xff] }
 0x4a1   :  { %7133 = vmatpush1.bf16.msra.mxu0 %v8109_v60  ;;  %v5515_v60 = vld [vmem:[%s12565_s5 + $0x478] sm:$0xff] }
 0x4a2   :  { %7215 = vmatpush1.bf16.msra.mxu1 %v8111_v61  ;;  %7134 = vmatprep.subr.bf16.mxu0 %v8118_v50  ;;  %v8167_v61 = vcombine.low %v5503_v47, %v5507_v37  ;;  %v8174_v50 = vcombine.high %v5510_v57, %v5514_v58  ;;  %v8176_v2 = vcombine.high %v5511_v17, %v5515_v60 }
 0x4a3   :  { %7216 = vmatprep.subr.bf16.mxu1 %v8120_v0  ;;  %v5518_v0 = vld [vmem:[%s12565_s5 + $0x490] sm:$0xff]  ;;  %v8215_v37 = vcombine.low %v5551_v36, %v5555_v38 }
 0x4a5   :  { %7135 = vmatpush1.bf16.msra.mxu0 %v8117_v6  ;;  %v8173_v6 = vcombine.low %v5510_v57, %v5514_v58  ;;  %v5567_v57 = vld [vmem:[%s12565_s5 + $0x618] sm:$0xff] }
 0x4a6   :  { %7217 = vmatpush1.bf16.msra.mxu1 %v8119_v7  ;;  %7136 = vmatprep.subr.bf16.mxu0 %v8126_v8  ;;  %v8175_v7 = vcombine.low %v5511_v17, %v5515_v60  ;;  %v8182_v8 = vcombine.high %v5518_v0, %v5522_v1  ;;  %v5571_v58 = vld [vmem:[%s12565_s5 + $0x638] sm:$0xff]  ;;  %v8223_v17 = vcombine.low %v5559_v45, %v5563_v46 }
 0x4a7   :  { %7218 = vmatprep.subr.bf16.mxu1 %v8128_v9  ;;  %v8184_v9 = vcombine.high %v5519_v3, %v5523_v5  ;;  %v8231_v5 = vcombine.low %v5567_v57, %v5571_v58 }
 0x4a9   :  { %7137 = vmatpush1.bf16.msra.mxu0 %v8125_v39  ;;  %v8190_v39 = vcombine.high %v5526_v10, %v5530_v11  ;;  %v5583_v10 = vld [vmem:[%s12565_s5 + $0x698] sm:$0xff] }
 0x4aa   :  { %7219 = vmatpush1.bf16.msra.mxu1 %v8127_v16  ;;  %7138 = vmatprep.subr.bf16.mxu0 %v8134_v18  ;;  %v5534_v18 = vld [vmem:[%s12565_s5 + $0x510] sm:$0xff]  ;;  %v5587_v11 = vld [vmem:[%s12565_s5 + $0x6b8] sm:$0xff] }
 0x4ab   :  { %7220 = vmatprep.subr.bf16.mxu1 %v8136_v20  ;;  %v5538_v20 = vld [vmem:[%s12565_s5 + $0x530] sm:$0xff] }
 0x4ac   :  { %v8197_v31 = vcombine.low %v5534_v18, %v5538_v20 }
 0x4ad   :  { %7139 = vmatpush1.bf16.msra.mxu0 %v8133_v13  ;;  %v8198_v13 = vcombine.high %v5534_v18, %v5538_v20  ;;  %v5591_v18 = vld [vmem:[%s12565_s5 + $0x6d8] sm:$0xff] }
 0x4ae   :  { %7221 = vmatpush1.bf16.msra.mxu1 %v8135_v48  ;;  %7140 = vmatprep.subr.bf16.mxu0 %v8142_v29  ;;  %v8200_v48 = vcombine.high %v5535_v22, %v5539_v23  ;;  %v5542_v29 = vld [vmem:[%s12565_s5 + $0x550] sm:$0xff]  ;;  %v5595_v20 = vld [vmem:[%s12565_s5 + $0x6f8] sm:$0xff]  ;;  %v8247_v23 = vcombine.low %v5583_v10, %v5587_v11 }
 0x4af   :  { %7222 = vmatprep.subr.bf16.mxu1 %v8144_v4  ;;  %v5546_v4 = vld [vmem:[%s12565_s5 + $0x570] sm:$0xff] }
 0x4b0   :  { %v8205_v21 = vcombine.low %v5542_v29, %v5546_v4 }
 0x4b1   :  { %7141 = vmatpush1.bf16.msra.mxu0 %v8141_v32  ;;  %v8206_v32 = vcombine.high %v5542_v29, %v5546_v4  ;;  %v5599_v29 = vld [vmem:[%s12565_s5 + $0x718] sm:$0xff] }
 0x4b2   :  { %7223 = vmatpush1.bf16.msra.mxu1 %v8143_v33  ;;  %7142 = vmatprep.subr.bf16.mxu0 %v8150_v34  ;;  %v8208_v33 = vcombine.high %v5543_v14, %v5547_v30  ;;  %v5550_v34 = vld [vmem:[%s12565_s5 + $0x590] sm:$0xff]  ;;  %v5603_v4 = vld [vmem:[%s12565_s5 + $0x738] sm:$0xff]  ;;  %v8255_v30 = vcombine.low %v5591_v18, %v5595_v20 }
 0x4b3   :  { %7224 = vmatprep.subr.bf16.mxu1 %v8152_v26  ;;  %v5554_v26 = vld [vmem:[%s12565_s5 + $0x5b0] sm:$0xff] }
 0x4b4   :  { %v8213_v47 = vcombine.low %v5550_v34, %v5554_v26 }
 0x4b5   :  { %7143 = vmatpush1.bf16.msra.mxu0 %v8149_v27  ;;  %v8214_v27 = vcombine.high %v5550_v34, %v5554_v26  ;;  %v5607_v34 = vld [vmem:[%s12565_s5 + $0x758] sm:$0xff] }
 0x4b6   :  { %7225 = vmatpush1.bf16.msra.mxu1 %v8151_v43  ;;  %7144 = vmatprep.subr.bf16.mxu0 %v8158_v44  ;;  %v8216_v43 = vcombine.high %v5551_v36, %v5555_v38  ;;  %v5558_v44 = vld [vmem:[%s12565_s5 + $0x5d0] sm:$0xff]  ;;  %v5611_v26 = vld [vmem:[%s12565_s5 + $0x778] sm:$0xff]  ;;  %v8263_v38 = vcombine.low %v5599_v29, %v5603_v4 }
 0x4b7   :  { %7226 = vmatprep.subr.bf16.mxu1 %v8160_v35  ;;  %v5562_v35 = vld [vmem:[%s12565_s5 + $0x5f0] sm:$0xff] }
 0x4b9   :  { %7145 = vmatpush1.bf16.msra.mxu0 %v8157_v53  ;;  %v8222_v53 = vcombine.high %v5558_v44, %v5562_v35 }
 0x4ba   :  { %7227 = vmatpush1.bf16.msra.mxu1 %v8159_v54  ;;  %7155 = vmatprep.subr.bf16.mxu0 %v8166_v55  ;;  %v8224_v54 = vcombine.high %v5559_v45, %v5563_v46  ;;  %v5566_v55 = vld [vmem:[%s12565_s5 + $0x610] sm:$0xff]  ;;  %v8271_v46 = vcombine.low %v5607_v34, %v5611_v26 }
 0x4bb   :  { %7237 = vmatprep.subr.bf16.mxu1 %v8168_v56  ;;  %v5570_v56 = vld [vmem:[%s12565_s5 + $0x630] sm:$0xff] }
 0x4bc   :  { %7147 = vmatmul.mubr.bf16.vlgmr.msra.gmra.mrb[12].mxu0 %v11966_v19  ;;  %v8230_v60 = vcombine.high %v5566_v55, %v5570_v56  ;;  %v8229_v3 = vcombine.low %v5566_v55, %v5570_v56  ;;  %v5623_v55 = vld [vmem:[%s12565_s5 + $0x7d8] sm:$0xff] }
 0x4bd   :  { %7229 = vmatmul.mubr.bf16.vlgmr.msra.gmra.mrb[12].mxu1 %v11966_v19  ;;  %7156 = vmatpush1.bf16.msra.mxu0 %v8165_v59  ;;  %v5527_v19 = vld [vmem:[%s12565_s5 + $0x4d8] sm:$0xff]  ;;  %v8221_v59 = vcombine.low %v5558_v44, %v5562_v35 }
 0x4be   :  { %7187 = vmatprep.mubr.bf16.mxu0 %v11982_v28  ;;  %7238 = vmatpush1.bf16.msra.mxu1 %v8167_v61  ;;  %v8192_v16 = vcombine.high %v5527_v19, %v5531_v12  ;;  %v8191_v24 = vcombine.low %v5527_v19, %v5531_v12  ;;  %v8232_v61 = vcombine.high %v5567_v57, %v5571_v58  ;;  %v5615_v44 = vld [vmem:[%s12565_s5 + $0x798] sm:$0xff] }
 0x4bf   :  { %7269 = vmatprep.mubr.bf16.mxu1 %v11982_v28  ;;  %7157 = vmatprep.subr.bf16.mxu0 %v8174_v50  ;;  %v8181_v28 = vcombine.low %v5518_v0, %v5522_v1  ;;  %v5574_v50 = vld [vmem:[%s12565_s5 + $0x650] sm:$0xff]  ;;  %v5575_v1 = vld [vmem:[%s12565_s5 + $0x658] sm:$0xff] }
 0x4c0   :  { %7239 = vmatprep.subr.bf16.mxu1 %v8176_v2  ;;  %v5578_v0 = vld [vmem:[%s12565_s5 + $0x670] sm:$0xff]  ;;  %v5579_v2 = vld [vmem:[%s12565_s5 + $0x678] sm:$0xff] }
 0x4c1   :  { %7158 = vmatpush1.bf16.msra.mxu0 %v8173_v6  ;;  %v8238_v6 = vcombine.high %v5574_v50, %v5578_v0  ;;  %v8237_v19 = vcombine.low %v5574_v50, %v5578_v0  ;;  %v8239_v12 = vcombine.low %v5575_v1, %v5579_v2  ;;  %v5619_v35 = vld [vmem:[%s12565_s5 + $0x7b8] sm:$0xff]  ;;  %v5628_v50 = vld [vmem:[%s12567_s6] sm:$0xff]  ;;  %v9454_v0 = vmov 1983009808  }
 0x4c2   :  { %7240 = vmatpush1.bf16.msra.mxu1 %v8175_v7  ;;  %7159 = vmatprep.subr.bf16.mxu0 %v8182_v8  ;;  %v8240_v7 = vcombine.high %v5575_v1, %v5579_v2  ;;  %v5582_v8 = vld [vmem:[%s12565_s5 + $0x690] sm:$0xff]  ;;  %v5627_v56 = vld [vmem:[%s12565_s5 + $0x7f8] sm:$0xff]  ;;  %v8279_v58 = vcombine.low %v5615_v44, %v5619_v35  ;;  %v7289_v1 = vunpack.c.l.s4 %v9454_v0  ;;  %v5633_v2 = vrot.slane %v5628_v50, %v11522_v62 }
 0x4c3   :  { %7241 = vmatprep.subr.bf16.mxu1 %v8184_v9  ;;  %v5586_v9 = vld [vmem:[%s12565_s5 + $0x6b0] sm:$0xff] }
 0x4c4   :  { %v8245_v22 = vcombine.low %v5582_v8, %v5586_v9 }
 0x4c5   :  { %7160 = vmatpush1.bf16.msra.mxu0 %v8181_v28  ;;  %v8246_v28 = vcombine.high %v5582_v8, %v5586_v9 }
 0x4c6   :  { %7242 = vmatpush1.bf16.msra.mxu1 %v8183_v15  ;;  %7161 = vmatprep.subr.bf16.mxu0 %v8190_v39  ;;  %v8248_v15 = vcombine.high %v5583_v10, %v5587_v11  ;;  %v5590_v39 = vld [vmem:[%s12565_s5 + $0x6d0] sm:$0xff] }
 0x4c7   :  { %7243 = vmatprep.subr.bf16.mxu1 %v8192_v16  ;;  %v5594_v16 = vld [vmem:[%s12565_s5 + $0x6f0] sm:$0xff] }
 0x4c8   :  { %v8253_v14 = vcombine.low %v5590_v39, %v5594_v16 }
 0x4c9   :  { %7162 = vmatpush1.bf16.msra.mxu0 %v8189_v63  ;;  %v8254_v63 = vcombine.high %v5590_v39, %v5594_v16 }
 0x4ca   :  { %7244 = vmatpush1.bf16.msra.mxu1 %v8191_v24  ;;  %7163 = vmatprep.subr.bf16.mxu0 %v8198_v13  ;;  %v8256_v24 = vcombine.high %v5591_v18, %v5595_v20  ;;  %v5598_v13 = vld [vmem:[%s12565_s5 + $0x710] sm:$0xff] }
 0x4cb   :  { %7245 = vmatprep.subr.bf16.mxu1 %v8200_v48  ;;  %v5602_v48 = vld [vmem:[%s12565_s5 + $0x730] sm:$0xff] }
 0x4cc   :  { %v8261_v36 = vcombine.low %v5598_v13, %v5602_v48 }
 0x4cd   :  { %7164 = vmatpush1.bf16.msra.mxu0 %v8197_v31  ;;  %v8262_v31 = vcombine.high %v5598_v13, %v5602_v48  ;;  %v5660_v13 = vsub.s32 7, %v9612_v42 }
 0x4ce   :  { %7246 = vmatpush1.bf16.msra.mxu1 %v8199_v25  ;;  %7165 = vmatprep.subr.bf16.mxu0 %v8206_v32  ;;  %v8264_v25 = vcombine.high %v5599_v29, %v5603_v4  ;;  %v5606_v32 = vld [vmem:[%s12565_s5 + $0x750] sm:$0xff] }
 0x4cf   :  { %7247 = vmatprep.subr.bf16.mxu1 %v8208_v33  ;;  %v5610_v33 = vld [vmem:[%s12565_s5 + $0x770] sm:$0xff] }
 0x4d0   :  { %v8269_v45 = vcombine.low %v5606_v32, %v5610_v33 }
 0x4d1   :  { %7166 = vmatpush1.bf16.msra.mxu0 %v8205_v21  ;;  %v8270_v21 = vcombine.high %v5606_v32, %v5610_v33 }
 0x4d2   :  { %7248 = vmatpush1.bf16.msra.mxu1 %v8207_v40  ;;  %7167 = vmatprep.subr.bf16.mxu0 %v8214_v27  ;;  %v8272_v40 = vcombine.high %v5607_v34, %v5611_v26  ;;  %v5614_v27 = vld [vmem:[%s12565_s5 + $0x790] sm:$0xff] }
 0x4d3   :  { %7249 = vmatprep.subr.bf16.mxu1 %v8216_v43  ;;  %v5618_v43 = vld [vmem:[%s12565_s5 + $0x7b0] sm:$0xff] }
 0x4d4   :  { %v8277_v57 = vcombine.low %v5614_v27, %v5618_v43 }
 0x4d5   :  { %7168 = vmatpush1.bf16.msra.mxu0 %v8213_v47  ;;  %v8278_v47 = vcombine.high %v5614_v27, %v5618_v43 }
 0x4d6   :  { %7250 = vmatpush1.bf16.msra.mxu1 %v8215_v37  ;;  %7169 = vmatprep.subr.bf16.mxu0 %v8222_v53  ;;  %v8280_v37 = vcombine.high %v5615_v44, %v5619_v35  ;;  %v5622_v53 = vld [vmem:[%s12565_s5 + $0x7d0] sm:$0xff] }
 0x4d7   :  { %7251 = vmatprep.subr.bf16.mxu1 %v8224_v54  ;;  %v5626_v54 = vld [vmem:[%s12565_s5 + $0x7f0] sm:$0xff] }
 0x4d9   :  { %7170 = vmatpush1.bf16.msra.mxu0 %v8221_v59  ;;  %v8286_v59 = vcombine.high %v5622_v53, %v5626_v54 }
 0x4da   :  { %7252 = vmatpush1.bf16.msra.mxu1 %v8223_v17  ;;  %7171 = vmatprep.subr.bf16.mxu0 %v8230_v60  ;;  %v8288_v17 = vcombine.high %v5623_v55, %v5627_v56  ;;  %v8285_v60 = vcombine.low %v5622_v53, %v5626_v54 }
 0x4db   :  { %7253 = vmatprep.subr.bf16.mxu1 %v8232_v61  ;;  %v8287_v61 = vcombine.low %v5623_v55, %v5627_v56 }
 0x4dd   :  { %7172 = vmatpush1.bf16.msra.mxu0 %v8229_v3  ;;  %v5641_v3 = vrot.slane %v5628_v50, %v11688_v52 }
 0x4de   :  { %7254 = vmatpush1.bf16.msra.mxu1 %v8231_v5  ;;  %7173 = vmatprep.subr.bf16.mxu0 %v8238_v6  ;;  %v5637_v5 = vrot.slane %v5628_v50, %v11530_v49  ;;  %v7290_v6 = vunpack.c.0.s8 %v7289_v1 }
 0x4df   :  { %7255 = vmatprep.subr.bf16.mxu1 %v8240_v7  ;;  %v5645_v7 = vrot.slane %v5628_v50, %v11533_v51  ;;  %v5648_v51 = vsub.s32 4, %v9612_v42 }
 0x4e1   :  { %7174 = vmatpush1.bf16.msra.mxu0 %v8237_v19  ;;  %v5649_v48 = vrot.slane %v5628_v50, %v5648_v51 }
 0x4e2   :  { %7256 = vmatpush1.bf16.msra.mxu1 %v8239_v12  ;;  %7175 = vmatprep.subr.bf16.mxu0 %v8246_v28  ;;  %v7293_v28 = vsub.s32 %v7290_v6, %v9612_v42 }
 0x4e3   :  { %7257 = vmatprep.subr.bf16.mxu1 %v8248_v15 }
 0x4e5   :  { %7176 = vmatpush1.bf16.msra.mxu0 %v8245_v22 }
 0x4e6   :  { %7258 = vmatpush1.bf16.msra.mxu1 %v8247_v23  ;;  %7177 = vmatprep.subr.bf16.mxu0 %v8254_v63  ;;  %v5656_v63 = vsub.s32 6, %v9612_v42 }
 0x4e7   :  { %7259 = vmatprep.subr.bf16.mxu1 %v8256_v24  ;;  %v5652_v24 = vsub.s32 5, %v9612_v42 }
 0x4e8   :  { %v5657_v29 = vrot.slane %v5628_v50, %v5656_v63 }
 0x4e9   :  { %7178 = vmatpush1.bf16.msra.mxu0 %v8253_v14  ;;  %v5653_v4 = vrot.slane %v5628_v50, %v5652_v24  ;;  %v5661_v14 = vrot.slane %v5628_v50, %v5660_v13 }
 0x4ea   :  { %7260 = vmatpush1.bf16.msra.mxu1 %v8255_v30  ;;  %7179 = vmatprep.subr.bf16.mxu0 %v8262_v31 }
 0x4eb   :  { %7261 = vmatprep.subr.bf16.mxu1 %v8264_v25 }
 0x4ed   :  { %7180 = vmatpush1.bf16.msra.mxu0 %v8261_v36 }
 0x4ee   :  { %7262 = vmatpush1.bf16.msra.mxu1 %v8263_v38  ;;  %7181 = vmatprep.subr.bf16.mxu0 %v8270_v21 }
 0x4ef   :  { %7263 = vmatprep.subr.bf16.mxu1 %v8272_v40 }
 0x4f1   :  { %7182 = vmatpush1.bf16.msra.mxu0 %v8269_v45 }
 0x4f2   :  { %7264 = vmatpush1.bf16.msra.mxu1 %v8271_v46  ;;  %7183 = vmatprep.subr.bf16.mxu0 %v8278_v47 }
 0x4f3   :  { %7265 = vmatprep.subr.bf16.mxu1 %v8280_v37 }
 0x4f5   :  { %7184 = vmatpush1.bf16.msra.mxu0 %v8277_v57 }
 0x4f6   :  { %7266 = vmatpush1.bf16.msra.mxu1 %v8279_v58  ;;  %7185 = vmatprep.subr.bf16.mxu0 %v8286_v59 }
 0x4f7   :  { %7267 = vmatprep.subr.bf16.mxu1 %v8288_v17 }
 0x4f9   :  { %7186 = vmatpush1.bf16.msra.mxu0 %v8285_v60 }
 0x4fa   :  { %7268 = vmatpush1.bf16.msra.mxu1 %v8287_v61 }
 0x4fc   :  { %7188 = vmatmul.mubr.bf16.vlgmr.msra.gmra.mrb[12].mxu0 %v12171_v41 }
 0x4fd   :  { %7270 = vmatmul.mubr.bf16.vlgmr.msra.gmra.mrb[12].mxu1 %v12171_v41 }
 0x54f   :  { %v7025_v8 = vpop.f32.mrb[8].mxu0  ;;  %v7107_v9 = vpop.f32.mrb[8].mxu1 }
 0x550   :  { %v8297_v10 = vadd.f32 %v7025_v8, %v5633_v2  ;;  %v8299_v11 = vadd.f32 %v7107_v9, %v5641_v3  ;;  %v7027_v41 = vpop.f32.mrb[9].mxu0  ;;  %v7109_v19 = vpop.f32.mrb[9].mxu1 }
 0x551   :  { %v8298_v12 = vadd.f32 %v7027_v41, %v5637_v5  ;;  %v8300_v15 = vadd.f32 %v7109_v19, %v5645_v7  ;;  %v7029_v39 = vpop.f32.mrb[10].mxu0  ;;  %v7111_v16 = vpop.f32.mrb[10].mxu1 }
 0x552   :  { %v7030_v62 = vpop.f32.mrb[11].mxu0  ;;  %v7112_v18 = vpop.f32.mrb[11].mxu1 }
 0x553   :  { %v7286_v52 = vcombine.low %v8297_v10, %v8298_v12  ;;  %v7287_v20 = vcombine.low %v8299_v11, %v8300_v15 }
 0x555   :  { %v7294_v49 = vrot.slane %v7286_v52, %v7293_v28  ;;  %v7301_v22 = vrot.slane %v7287_v20, %v7293_v28 }
 0x557   :  { %v7302_v23 = vcombine.low %v7294_v49, %v7301_v22 }
 0x559   :  { %7322 = vst [vmem:[%s12568_s7] sm:$0xff] %v7302_v23 }
 0x5cf   :  { %v7189_v30 = vpop.f32.mrb[12].mxu0 }
 0x5d0   :  { %v8301_v31 = vadd.f32 %v7189_v30, %v5649_v48  ;;  %v7271_v25 = vpop.f32.mrb[12].mxu1  ;;  %v7191_v32 = vpop.f32.mrb[13].mxu0 }
 0x5d1   :  { %v8303_v33 = vadd.f32 %v7271_v25, %v5657_v29  ;;  %v8302_v34 = vadd.f32 %v7191_v32, %v5653_v4  ;;  %v7273_v26 = vpop.f32.mrb[13].mxu1  ;;  %v7193_v36 = vpop.f32.mrb[14].mxu0 }
 0x5d2   :  { %v8304_v38 = vadd.f32 %v7273_v26, %v5661_v14  ;;  %v7275_v21 = vpop.f32.mrb[14].mxu1  ;;  %v7194_v40 = vpop.f32.mrb[15].mxu0 }
 0x5d3   :  { %v7303_v27 = vcombine.low %v8301_v31, %v8302_v34  ;;  %v7276_v43 = vpop.f32.mrb[15].mxu1 }
 0x5d4   :  { %v7304_v44 = vcombine.low %v8303_v33, %v8304_v38 }
 0x5d5   :  { %v7311_v35 = vrot.slane %v7303_v27, %v7293_v28 }
 0x5d6   :  { %v7318_v42 = vrot.slane %v7304_v44, %v7293_v28 }
 0x5d8   :  { %v7319_v45 = vcombine.low %v7311_v35, %v7318_v42 }
 0x5da   :  { %7323 = vst [vmem:[%s12568_s7 + $0x8] sm:$0xff] %v7319_v45 }

</bundles_post_ra>
